<compile_context>
chip_gen: v7x
topology: tpu7x:2x2x1
jax: 0.10.0
libtpu: 0.0.40
codegen_flags: <defaults>
</compile_context>

<pallas_src>
import functools

import jax
import jax.numpy as jnp
import numpy as np
from jax.experimental import pallas as pl
from jax.experimental.pallas import tpu as pltpu


def _round_up(n, mult):
    return (n + mult - 1) // mult * mult


def _pad_to(arr, shape):
    pads = [(0, t - s) for s, t in zip(arr.shape, shape)]
    if all(p == (0, 0) for p in pads):
        return arr
    return jnp.pad(arr, pads)


def _const_index_map(ndim):
    zeros = (0,) * ndim
    return lambda b: zeros


def cpi_kernel(adj_ref, x_ref, prot_ref,
               wg1_ref, bg1_ref, wg2_ref, bg2_ref,
               wc_ref, bc_ref,
               w1c_ref, w1p_ref, b1_ref, w2_ref, b2_ref,
               w3_ref, b3_ref, w4_ref, b4_ref,
               out_ref, *, compute_dtype):
    cdt = compute_dtype
    f32 = jnp.float32
    relu = lambda t: jnp.maximum(t, 0.0)

    B, V, _ = adj_ref.shape
    S = prot_ref.shape[1]
    K = wc_ref.shape[0]
    Dp = x_ref.shape[2]
    Hp = wc_ref.shape[2]

    # ---------------- GNN compound encoder (batched over B samples) ----------
    adj = adj_ref[...].astype(cdt)                       # (B, V, V)
    x = x_ref[...].astype(cdt)                           # (B, V, Dp)
    msg = jnp.einsum("bvw,bwd->bvd", adj, x,
                     preferred_element_type=f32)         # (B, V, Dp) f32
    msg2 = msg.reshape(B * V, Dp).astype(cdt)
    h = relu(jnp.dot(msg2, wg1_ref[...],
                     preferred_element_type=f32) + bg1_ref[...])     # (B*V, Dp)
    g = jnp.dot(h.astype(cdt), wg2_ref[...],
                preferred_element_type=f32) + bg2_ref[...]           # (B*V, Hp)
    # Mean over the true node count V (nodes are not padded).
    cx = jnp.mean(g.reshape(B, V, Hp), axis=1)                       # (B, Hp)

    # ---------------- CNN protein encoder (valid Conv1d + ReLU + max) --------
    # Full-slab matmul per tap, aligned with small sublane rolls; positions
    # 0..K-2 of each sample are invalid (wrapped across the roll) and are
    # masked to -inf before the max-pool.
    prot2 = prot_ref[...].reshape(B * S, -1)             # (B*S, Pp), already cdt
    acc = None
    for k in range(K):
        proj = jnp.dot(prot2, wc_ref[k],
                       preferred_element_type=f32)       # (B*S, Hp)
        shift = (K - 1) - k
        if shift:
            proj = pltpu.roll(proj, shift=shift, axis=0)
        acc = proj if acc is None else acc + proj
    conv = relu(acc + bc_ref[...]).reshape(B, S, Hp)
    pos = jax.lax.broadcasted_iota(jnp.int32, (B, S, Hp), 1)
    conv = jnp.where(pos >= K - 1, conv, -jnp.inf)
    px = jnp.max(conv, axis=1)                                       # (B, Hp)

    # ---------------- joint MLP head (cat + Linear as split matmul) ----------
    z = relu(jnp.dot(cx.astype(cdt), w1c_ref[...], preferred_element_type=f32)
             + jnp.dot(px.astype(cdt), w1p_ref[...], preferred_element_type=f32)
             + b1_ref[...])                                          # (B, 512)
    z = relu(jnp.dot(z.astype(cdt), w2_ref[...],
                     preferred_element_type=f32) + b2_ref[...])      # (B, 512)
    z = relu(jnp.dot(z.astype(cdt), w3_ref[...],
                     preferred_element_type=f32) + b3_ref[...])      # (B, 128)
    out = jnp.dot(z.astype(cdt), w4_ref[...],
                  preferred_element_type=f32) + b4_ref[...]          # (B, Op)

    out_ref[...] = out.astype(out_ref.dtype)             # lane-dense store


def cpi_forward(adj, x, prot, params, *, compute_dtype=jnp.bfloat16,
                batch_tile=128):
    m, V, D = x.shape
    _, S, P = prot.shape
    K, _, H = params["wc"].shape
    F1 = params["w1"].shape[1]           # 512
    F2 = params["w2"].shape[1]           # 512
    H3 = params["w3"].shape[1]           # 64
    out_dim = params["w4"].shape[1]

    Dp = _round_up(D, 128)
    Hp = _round_up(H, 128)
    Pp = _round_up(P, 128)
    H3p = _round_up(H3, 128)
    Op = _round_up(out_dim, 128)

    # Batch tile: 128 for production batches (MXU-row friendly on all chips),
    # capped by the (sublane-rounded) batch for tiny demos.
    B = min(batch_tile, _round_up(m, 8))
    m_pad = _round_up(m, B)

    cdt = compute_dtype
    f32 = jnp.float32

    # ---- pad + cast inputs (zero padding is inert; see kernel) -------------
    adj_p = _pad_to(adj, (m_pad, V, V)).astype(cdt)
    x_p = _pad_to(x, (m_pad, V, Dp)).astype(cdt)
    prot_p = _pad_to(prot, (m_pad, S, Pp)).astype(cdt)

    wg1 = _pad_to(params["wg1"], (Dp, Dp)).astype(cdt)
    bg1 = _pad_to(params["bg1"], (1, Dp)).astype(f32)
    wg2 = _pad_to(params["wg2"], (Dp, Hp)).astype(cdt)
    bg2 = _pad_to(params["bg2"], (1, Hp)).astype(f32)
    wc = _pad_to(params["wc"], (K, Pp, Hp)).astype(cdt)
    bc = _pad_to(params["bc"], (1, Hp)).astype(f32)
    w1c = _pad_to(params["w1"][:H], (Hp, F1)).astype(cdt)   # compound half
    w1p = _pad_to(params["w1"][H:], (Hp, F1)).astype(cdt)   # protein half
    b1 = params["b1"].astype(f32)
    w2 = params["w2"].astype(cdt)
    b2 = params["b2"].astype(f32)
    w3 = _pad_to(params["w3"], (F2, H3p)).astype(cdt)
    b3 = _pad_to(params["b3"], (1, H3p)).astype(f32)
    w4 = _pad_to(params["w4"], (H3p, Op)).astype(cdt)
    b4 = _pad_to(params["b4"], (1, Op)).astype(f32)

    weights = (wg1, bg1, wg2, bg2, wc, bc,
               w1c, w1p, b1, w2, b2, w3, b3, w4, b4)

    batch_specs = [
        pl.BlockSpec((B, V, V), lambda b: (b, 0, 0)),
        pl.BlockSpec((B, V, Dp), lambda b: (b, 0, 0)),
        pl.BlockSpec((B, S, Pp), lambda b: (b, 0, 0)),
    ]

    # VMEM budget: double-buffered batch tiles + single-buffered weights +
    # output, with headroom, clamped to v7x's 64 MiB physical VMEM.
    tile_bytes = sum(int(np.prod(a.shape[1:])) * a.dtype.itemsize
                     for a in (adj_p, x_p, prot_p)) * B
    w_bytes = sum(a.size * a.dtype.itemsize for a in weights)
    out_bytes = B * Op * 4
    vmem_limit = int(min(64 * 2**20,
                         max(32 * 2**20,
                             4 * (2 * tile_bytes + w_bytes + 2 * out_bytes))))

    def run(single_buffer_weights):
        def wspec(a):
            idx = _const_index_map(a.ndim)
            if single_buffer_weights:
                # Constant block index -> one buffer is enough; halves weight
                # VMEM residency (w2 alone saves ~0.5 MiB in bf16).
                return pl.BlockSpec(a.shape, idx,
                                    pipeline_mode=pl.Buffered(buffer_count=1))
            return pl.BlockSpec(a.shape, idx)

        grid_spec = pltpu.PrefetchScalarGridSpec(
            num_scalar_prefetch=0,
            grid=(m_pad // B,),
            in_specs=batch_specs + [wspec(a) for a in weights],
            out_specs=pl.BlockSpec((B, Op), lambda b: (b, 0)),
        )
        fn = pl.pallas_call(
            functools.partial(cpi_kernel, compute_dtype=cdt),
            out_shape=jax.ShapeDtypeStruct((m_pad, Op), f32),
            grid_spec=grid_spec,
            compiler_params=pltpu.CompilerParams(
                dimension_semantics=("parallel",),   # batch steps independent
                vmem_limit_bytes=vmem_limit,
            ),
        )
        return fn(adj_p, x_p, prot_p, *weights)

    try:
        out = jax.block_until_ready(run(True))
    except Exception:
        # Fallback if single-buffered weight specs (pl.Buffered(1)) are not
        # supported by this JAX/Mosaic version.
        out = jax.block_until_ready(run(False))

    return out[:m, :out_dim]


def reference_forward(adj, x, prot, params, compute_dtype=jnp.float32):
    """Pure-JAX reference (mirrors the kernel's matmul-input dtype)."""
    f32 = jnp.float32
    c = lambda a: a.astype(compute_dtype)
    dot = lambda a, b: jnp.matmul(c(a), c(b), preferred_element_type=f32)

    msg = jnp.einsum("bvw,bwd->bvd", c(adj), c(x), preferred_element_type=f32)
    h = jax.nn.relu(dot(msg, params["wg1"]) + params["bg1"])
    g = dot(h, params["wg2"]) + params["bg2"]
    cx = jnp.mean(g, axis=1)                                   # (m, H)

    K = params["wc"].shape[0]
    L = prot.shape[1] - K + 1
    conv = sum(jnp.einsum("bsp,ph->bsh", c(prot[:, k:k + L, :]),
                          c(params["wc"][k]), preferred_element_type=f32)
               for k in range(K))
    conv = jax.nn.relu(conv + params["bc"])
    px = jnp.max(conv, axis=1)                                 # (m, H)

    joint = jnp.concatenate([cx, px], axis=-1)                 # dropout = id
    z = jax.nn.relu(dot(joint, params["w1"]) + params["b1"])
    z = jax.nn.relu(dot(z, params["w2"]) + params["b2"])
    z = jax.nn.relu(dot(z, params["w3"]) + params["b3"])
    return dot(z, params["w4"]) + params["b4"]


def init_params(key, D, H, P, K, out_dim):
    ks = jax.random.split(key, 12)
    scale = 0.1
    return {
        "wg1": jax.random.normal(ks[0], (D, D), jnp.float32) * scale,
        "bg1": jnp.zeros((1, D), jnp.float32),
        "wg2": jax.random.normal(ks[1], (D, H), jnp.float32) * scale,
        "bg2": jnp.zeros((1, H), jnp.float32),
        "wc": jax.random.normal(ks[2], (K, P, H), jnp.float32) * scale,
        "bc": jnp.zeros((1, H), jnp.float32),
        "w1": jax.random.normal(ks[3], (2 * H, 512), jnp.float32) * scale,
        "b1": jnp.zeros((1, 512), jnp.float32),
        "w2": jax.random.normal(ks[4], (512, 512), jnp.float32) * scale,
        "b2": jnp.zeros((1, 512), jnp.float32),
        "w3": jax.random.normal(ks[5], (512, 64), jnp.float32) * scale,
        "b3": jnp.zeros((1, 64), jnp.float32),
        "w4": jax.random.normal(ks[6], (64, out_dim), jnp.float32) * scale,
        "b4": jnp.zeros((1, out_dim), jnp.float32),
    }


if __name__ == "__main__":
    V, D = 8, 16                # graph nodes, node feature dim
    H = 32                      # compound_config.hidden_dim
    S, P, K = 16, 16, 3         # protein seq len, embed dim, conv kernel
    out_dim = 2                 # compound_config.output_dim

    key = jax.random.PRNGKey(0)
    k_adj, k_x, k_prot, k_par = jax.random.split(key, 4)
    params = init_params(k_par, D, H, P, K, out_dim)

    def make_inputs(m):
        adj = (jax.random.uniform(k_adj, (m, V, V)) > 0.5).astype(jnp.float32)
        adj = adj + jnp.eye(V, dtype=jnp.float32)[None]        # self loops
        x = jax.random.normal(k_x, (m, V, D), jnp.float32)
        prot = jax.random.normal(k_prot, (m, S, P), jnp.float32)
        return adj, x, prot

    # 1) small batch, exact f32 path (tight check of the kernel logic)
    adj, x, prot = make_inputs(2)
    out = jax.block_until_ready(
        cpi_forward(adj, x, prot, params, compute_dtype=jnp.float32))
    ref = reference_forward(adj, x, prot, params, compute_dtype=jnp.float32)
    assert out.shape == (2, out_dim)
    np.testing.assert_allclose(np.asarray(out), np.asarray(ref),
                               rtol=1e-3, atol=1e-3)

    # 2) larger batch exercising the 128-wide batch tile + bf16 MXU path
    adj, x, prot = make_inputs(256)
    out = jax.block_until_ready(
        cpi_forward(adj, x, prot, params, compute_dtype=jnp.bfloat16))
    ref = reference_forward(adj, x, prot, params, compute_dtype=jnp.bfloat16)
    assert out.shape == (256, out_dim)
    np.testing.assert_allclose(np.asarray(out), np.asarray(ref),
                               rtol=2e-2, atol=2e-2)

    print("KERNEL_OK")
</pallas_src>

<mosaic_0001>
module attributes {stable_mosaic.version = 11 : i64} {
  func.func @cpi_kernel(%arg0: i32, %arg1: memref<8x8x8xf32, #tpu.memory_space<vmem>>, %arg2: memref<8x8x128xf32, #tpu.memory_space<vmem>>, %arg3: memref<8x16x128xf32, #tpu.memory_space<vmem>>, %arg4: memref<128x128xf32, #tpu.memory_space<vmem>>, %arg5: memref<1x128xf32, #tpu.memory_space<vmem>>, %arg6: memref<128x128xf32, #tpu.memory_space<vmem>>, %arg7: memref<1x128xf32, #tpu.memory_space<vmem>>, %arg8: memref<3x128x128xf32, #tpu.memory_space<vmem>>, %arg9: memref<1x128xf32, #tpu.memory_space<vmem>>, %arg10: memref<128x512xf32, #tpu.memory_space<vmem>>, %arg11: memref<128x512xf32, #tpu.memory_space<vmem>>, %arg12: memref<1x512xf32, #tpu.memory_space<vmem>>, %arg13: memref<512x512xf32, #tpu.memory_space<vmem>>, %arg14: memref<1x512xf32, #tpu.memory_space<vmem>>, %arg15: memref<512x128xf32, #tpu.memory_space<vmem>>, %arg16: memref<1x128xf32, #tpu.memory_space<vmem>>, %arg17: memref<128x128xf32, #tpu.memory_space<vmem>>, %arg18: memref<1x128xf32, #tpu.memory_space<vmem>>, %arg19: memref<8x128xf32, #tpu.memory_space<vmem>>) attributes {dimension_semantics = [#tpu.dimension_semantics<parallel>], iteration_bounds = array<i64: 1>, scalar_prefetch = 0 : i64, scratch_operands = 0 : i64, tpu.core_type = #tpu.core_type<tc>, window_params = [{transform_indices = @transform_0, window_bounds = array<i64: 8, 8, 8>}, {transform_indices = @transform_1, window_bounds = array<i64: 8, 8, 128>}, {transform_indices = @transform_2, window_bounds = array<i64: 8, 16, 128>}, {pipeline_mode = #tpu.pipeline_mode<synchronous>, transform_indices = @transform_3, window_bounds = array<i64: 128, 128>}, {pipeline_mode = #tpu.pipeline_mode<synchronous>, transform_indices = @transform_4, window_bounds = array<i64: 1, 128>}, {pipeline_mode = #tpu.pipeline_mode<synchronous>, transform_indices = @transform_5, window_bounds = array<i64: 128, 128>}, {pipeline_mode = #tpu.pipeline_mode<synchronous>, transform_indices = @transform_6, window_bounds = array<i64: 1, 128>}, {pipeline_mode = #tpu.pipeline_mode<synchronous>, transform_indices = @transform_7, window_bounds = array<i64: 3, 128, 128>}, {pipeline_mode = #tpu.pipeline_mode<synchronous>, transform_indices = @transform_8, window_bounds = array<i64: 1, 128>}, {pipeline_mode = #tpu.pipeline_mode<synchronous>, transform_indices = @transform_9, window_bounds = array<i64: 128, 512>}, {pipeline_mode = #tpu.pipeline_mode<synchronous>, transform_indices = @transform_10, window_bounds = array<i64: 128, 512>}, {pipeline_mode = #tpu.pipeline_mode<synchronous>, transform_indices = @transform_11, window_bounds = array<i64: 1, 512>}, {pipeline_mode = #tpu.pipeline_mode<synchronous>, transform_indices = @transform_12, window_bounds = array<i64: 512, 512>}, {pipeline_mode = #tpu.pipeline_mode<synchronous>, transform_indices = @transform_13, window_bounds = array<i64: 1, 512>}, {pipeline_mode = #tpu.pipeline_mode<synchronous>, transform_indices = @transform_14, window_bounds = array<i64: 512, 128>}, {pipeline_mode = #tpu.pipeline_mode<synchronous>, transform_indices = @transform_15, window_bounds = array<i64: 1, 128>}, {pipeline_mode = #tpu.pipeline_mode<synchronous>, transform_indices = @transform_16, window_bounds = array<i64: 128, 128>}, {pipeline_mode = #tpu.pipeline_mode<synchronous>, transform_indices = @transform_17, window_bounds = array<i64: 1, 128>}, {transform_indices = @transform_18, window_bounds = array<i64: 8, 128>}]} {
    %c0 = arith.constant 0 : index
    %c0_0 = arith.constant 0 : index
    %c0_1 = arith.constant 0 : index
    %0 = vector.load %arg1[%c0, %c0_0, %c0_1] : memref<8x8x8xf32, #tpu.memory_space<vmem>>, vector<8x8x8xf32>
    %c0_2 = arith.constant 0 : index
    %c0_3 = arith.constant 0 : index
    %c0_4 = arith.constant 0 : index
    %1 = vector.load %arg2[%c0_2, %c0_3, %c0_4] : memref<8x8x128xf32, #tpu.memory_space<vmem>>, vector<8x8x128xf32>
    "tpu.trace_start"() <{level = 10 : i32, message = "bvw,bwd->bvd"}> : () -> ()
    %cst = arith.constant dense<0.000000e+00> : vector<8x8x128xf32>
    %2 = tpu.matmul %0, %1, %cst {dimension_numbers = #tpu.dot_dimension_numbers<[2], [1], [1], [2], [0, 0, 0, 1, 1, 2], [0], [0]>} : vector<8x8x8xf32>, vector<8x8x128xf32>, vector<8x8x128xf32> -> vector<8x8x128xf32>
    "tpu.trace_stop"() : () -> ()
    %3 = vector.shape_cast %2 : vector<8x8x128xf32> to vector<64x128xf32>
    %c0_5 = arith.constant 0 : index
    %c0_6 = arith.constant 0 : index
    %4 = vector.load %arg4[%c0_5, %c0_6] : memref<128x128xf32, #tpu.memory_space<vmem>>, vector<128x128xf32>
    %cst_7 = arith.constant dense<0.000000e+00> : vector<64x128xf32>
    %5 = tpu.matmul %3, %4, %cst_7 {dimension_numbers = #tpu.dot_dimension_numbers<[1], [0], [0], [1], [0, 0, 1, 1], [], []>} : vector<64x128xf32>, vector<128x128xf32>, vector<64x128xf32> -> vector<64x128xf32>
    %c0_8 = arith.constant 0 : index
    %c0_9 = arith.constant 0 : index
    %6 = vector.load %arg5[%c0_8, %c0_9] : memref<1x128xf32, #tpu.memory_space<vmem>>, vector<1x128xf32>
    %7 = vector.broadcast %6 : vector<1x128xf32> to vector<64x128xf32>
    %8 = arith.addf %5, %7 : vector<64x128xf32>
    %cst_10 = arith.constant 0.000000e+00 : f32
    %9 = vector.broadcast %cst_10 : f32 to vector<64x128xf32>
    %10 = arith.maximumf %8, %9 : vector<64x128xf32>
    %c0_11 = arith.constant 0 : index
    %c0_12 = arith.constant 0 : index
    %11 = vector.load %arg6[%c0_11, %c0_12] : memref<128x128xf32, #tpu.memory_space<vmem>>, vector<128x128xf32>
    %cst_13 = arith.constant dense<0.000000e+00> : vector<64x128xf32>
    %12 = tpu.matmul %10, %11, %cst_13 {dimension_numbers = #tpu.dot_dimension_numbers<[1], [0], [0], [1], [0, 0, 1, 1], [], []>} : vector<64x128xf32>, vector<128x128xf32>, vector<64x128xf32> -> vector<64x128xf32>
    %c0_14 = arith.constant 0 : index
    %c0_15 = arith.constant 0 : index
    %13 = vector.load %arg7[%c0_14, %c0_15] : memref<1x128xf32, #tpu.memory_space<vmem>>, vector<1x128xf32>
    %14 = vector.broadcast %13 : vector<1x128xf32> to vector<64x128xf32>
    %15 = arith.addf %12, %14 : vector<64x128xf32>
    %16 = vector.shape_cast %15 : vector<64x128xf32> to vector<8x8x128xf32>
    %cst_16 = arith.constant dense<0.000000e+00> : vector<8x128xf32>
    %17 = vector.multi_reduction <add>, %16, %cst_16 [1] : vector<8x8x128xf32> to vector<8x128xf32>
    %cst_17 = arith.constant 8.000000e+00 : f32
    %18 = vector.broadcast %cst_17 : f32 to vector<8x128xf32>
    %19 = arith.divf %17, %18 : vector<8x128xf32>
    %c0_18 = arith.constant 0 : index
    %c0_19 = arith.constant 0 : index
    %c0_20 = arith.constant 0 : index
    %20 = vector.load %arg3[%c0_18, %c0_19, %c0_20] : memref<8x16x128xf32, #tpu.memory_space<vmem>>, vector<8x16x128xf32>
    %21 = vector.shape_cast %20 : vector<8x16x128xf32> to vector<128x128xf32>
    %c0_21 = arith.constant 0 : index
    %c0_22 = arith.constant 0 : index
    %c0_23 = arith.constant 0 : index
    %22 = vector.load %arg8[%c0_21, %c0_22, %c0_23] : memref<3x128x128xf32, #tpu.memory_space<vmem>>, vector<1x128x128xf32>
    %23 = vector.shape_cast %22 : vector<1x128x128xf32> to vector<128x128xf32>
    %cst_24 = arith.constant dense<0.000000e+00> : vector<128x128xf32>
    %24 = tpu.matmul %21, %23, %cst_24 {dimension_numbers = #tpu.dot_dimension_numbers<[1], [0], [0], [1], [0, 0, 1, 1], [], []>} : vector<128x128xf32>, vector<128x128xf32>, vector<128x128xf32> -> vector<128x128xf32>
    %c2_i32 = arith.constant 2 : i32
    %25 = tpu.dynamic_rotate %24 by %c2_i32 dim 0 : vector<128x128xf32>, i32 -> vector<128x128xf32>
    %c1 = arith.constant 1 : index
    %c0_25 = arith.constant 0 : index
    %c0_26 = arith.constant 0 : index
    %26 = vector.load %arg8[%c1, %c0_25, %c0_26] : memref<3x128x128xf32, #tpu.memory_space<vmem>>, vector<1x128x128xf32>
    %27 = vector.shape_cast %26 : vector<1x128x128xf32> to vector<128x128xf32>
    %cst_27 = arith.constant dense<0.000000e+00> : vector<128x128xf32>
    %28 = tpu.matmul %21, %27, %cst_27 {dimension_numbers = #tpu.dot_dimension_numbers<[1], [0], [0], [1], [0, 0, 1, 1], [], []>} : vector<128x128xf32>, vector<128x128xf32>, vector<128x128xf32> -> vector<128x128xf32>
    %c1_i32 = arith.constant 1 : i32
    %29 = tpu.dynamic_rotate %28 by %c1_i32 dim 0 : vector<128x128xf32>, i32 -> vector<128x128xf32>
    %30 = arith.addf %25, %29 : vector<128x128xf32>
    %c2 = arith.constant 2 : index
    %c0_28 = arith.constant 0 : index
    %c0_29 = arith.constant 0 : index
    %31 = vector.load %arg8[%c2, %c0_28, %c0_29] : memref<3x128x128xf32, #tpu.memory_space<vmem>>, vector<1x128x128xf32>
    %32 = vector.shape_cast %31 : vector<1x128x128xf32> to vector<128x128xf32>
    %cst_30 = arith.constant dense<0.000000e+00> : vector<128x128xf32>
    %33 = tpu.matmul %21, %32, %cst_30 {dimension_numbers = #tpu.dot_dimension_numbers<[1], [0], [0], [1], [0, 0, 1, 1], [], []>} : vector<128x128xf32>, vector<128x128xf32>, vector<128x128xf32> -> vector<128x128xf32>
    %34 = arith.addf %30, %33 : vector<128x128xf32>
    %c0_31 = arith.constant 0 : index
    %c0_32 = arith.constant 0 : index
    %35 = vector.load %arg9[%c0_31, %c0_32] : memref<1x128xf32, #tpu.memory_space<vmem>>, vector<1x128xf32>
    %36 = vector.broadcast %35 : vector<1x128xf32> to vector<128x128xf32>
    %37 = arith.addf %34, %36 : vector<128x128xf32>
    %cst_33 = arith.constant 0.000000e+00 : f32
    %38 = vector.broadcast %cst_33 : f32 to vector<128x128xf32>
    %39 = arith.maximumf %37, %38 : vector<128x128xf32>
    %40 = vector.shape_cast %39 : vector<128x128xf32> to vector<8x16x128xf32>
    %41 = tpu.iota {dimensions = array<i32: 1>} : vector<8x16x128xi32>
    %c2_i32_34 = arith.constant 2 : i32
    %42 = vector.broadcast %c2_i32_34 : i32 to vector<8x16x128xi32>
    %43 = arith.cmpi sge, %41, %42 : vector<8x16x128xi32>
    %cst_35 = arith.constant 0xFF800000 : f32
    %44 = vector.broadcast %cst_35 : f32 to vector<8x16x128xf32>
    %45 = arith.select %43, %40, %44 : vector<8x16x128xi1>, vector<8x16x128xf32>
    %cst_36 = arith.constant dense<0xFF800000> : vector<8x128xf32>
    %46 = vector.multi_reduction <maximumf>, %45, %cst_36 [1] : vector<8x16x128xf32> to vector<8x128xf32>
    %c0_37 = arith.constant 0 : index
    %c0_38 = arith.constant 0 : index
    %47 = vector.load %arg10[%c0_37, %c0_38] : memref<128x512xf32, #tpu.memory_space<vmem>>, vector<128x512xf32>
    %cst_39 = arith.constant dense<0.000000e+00> : vector<8x512xf32>
    %48 = tpu.matmul %19, %47, %cst_39 {dimension_numbers = #tpu.dot_dimension_numbers<[1], [0], [0], [1], [0, 0, 1, 1], [], []>} : vector<8x128xf32>, vector<128x512xf32>, vector<8x512xf32> -> vector<8x512xf32>
    %c0_40 = arith.constant 0 : index
    %c0_41 = arith.constant 0 : index
    %49 = vector.load %arg11[%c0_40, %c0_41] : memref<128x512xf32, #tpu.memory_space<vmem>>, vector<128x512xf32>
    %cst_42 = arith.constant dense<0.000000e+00> : vector<8x512xf32>
    %50 = tpu.matmul %46, %49, %cst_42 {dimension_numbers = #tpu.dot_dimension_numbers<[1], [0], [0], [1], [0, 0, 1, 1], [], []>} : vector<8x128xf32>, vector<128x512xf32>, vector<8x512xf32> -> vector<8x512xf32>
    %51 = arith.addf %48, %50 : vector<8x512xf32>
    %c0_43 = arith.constant 0 : index
    %c0_44 = arith.constant 0 : index
    %52 = vector.load %arg12[%c0_43, %c0_44] : memref<1x512xf32, #tpu.memory_space<vmem>>, vector<1x512xf32>
    %53 = vector.broadcast %52 : vector<1x512xf32> to vector<8x512xf32>
    %54 = arith.addf %51, %53 : vector<8x512xf32>
    %cst_45 = arith.constant 0.000000e+00 : f32
    %55 = vector.broadcast %cst_45 : f32 to vector<8x512xf32>
    %56 = arith.maximumf %54, %55 : vector<8x512xf32>
    %c0_46 = arith.constant 0 : index
    %c0_47 = arith.constant 0 : index
    %57 = vector.load %arg13[%c0_46, %c0_47] : memref<512x512xf32, #tpu.memory_space<vmem>>, vector<512x512xf32>
    %cst_48 = arith.constant dense<0.000000e+00> : vector<8x512xf32>
    %58 = tpu.matmul %56, %57, %cst_48 {dimension_numbers = #tpu.dot_dimension_numbers<[1], [0], [0], [1], [0, 0, 1, 1], [], []>} : vector<8x512xf32>, vector<512x512xf32>, vector<8x512xf32> -> vector<8x512xf32>
    %c0_49 = arith.constant 0 : index
    %c0_50 = arith.constant 0 : index
    %59 = vector.load %arg14[%c0_49, %c0_50] : memref<1x512xf32, #tpu.memory_space<vmem>>, vector<1x512xf32>
    %60 = vector.broadcast %59 : vector<1x512xf32> to vector<8x512xf32>
    %61 = arith.addf %58, %60 : vector<8x512xf32>
    %cst_51 = arith.constant 0.000000e+00 : f32
    %62 = vector.broadcast %cst_51 : f32 to vector<8x512xf32>
    %63 = arith.maximumf %61, %62 : vector<8x512xf32>
    %c0_52 = arith.constant 0 : index
    %c0_53 = arith.constant 0 : index
    %64 = vector.load %arg15[%c0_52, %c0_53] : memref<512x128xf32, #tpu.memory_space<vmem>>, vector<512x128xf32>
    %cst_54 = arith.constant dense<0.000000e+00> : vector<8x128xf32>
    %65 = tpu.matmul %63, %64, %cst_54 {dimension_numbers = #tpu.dot_dimension_numbers<[1], [0], [0], [1], [0, 0, 1, 1], [], []>} : vector<8x512xf32>, vector<512x128xf32>, vector<8x128xf32> -> vector<8x128xf32>
    %c0_55 = arith.constant 0 : index
    %c0_56 = arith.constant 0 : index
    %66 = vector.load %arg16[%c0_55, %c0_56] : memref<1x128xf32, #tpu.memory_space<vmem>>, vector<1x128xf32>
    %67 = vector.broadcast %66 : vector<1x128xf32> to vector<8x128xf32>
    %68 = arith.addf %65, %67 : vector<8x128xf32>
    %cst_57 = arith.constant 0.000000e+00 : f32
    %69 = vector.broadcast %cst_57 : f32 to vector<8x128xf32>
    %70 = arith.maximumf %68, %69 : vector<8x128xf32>
    %c0_58 = arith.constant 0 : index
    %c0_59 = arith.constant 0 : index
    %71 = vector.load %arg17[%c0_58, %c0_59] : memref<128x128xf32, #tpu.memory_space<vmem>>, vector<128x128xf32>
    %cst_60 = arith.constant dense<0.000000e+00> : vector<8x128xf32>
    %72 = tpu.matmul %70, %71, %cst_60 {dimension_numbers = #tpu.dot_dimension_numbers<[1], [0], [0], [1], [0, 0, 1, 1], [], []>} : vector<8x128xf32>, vector<128x128xf32>, vector<8x128xf32> -> vector<8x128xf32>
    %c0_61 = arith.constant 0 : index
    %c0_62 = arith.constant 0 : index
    %73 = vector.load %arg18[%c0_61, %c0_62] : memref<1x128xf32, #tpu.memory_space<vmem>>, vector<1x128xf32>
    %74 = vector.broadcast %73 : vector<1x128xf32> to vector<8x128xf32>
    %75 = arith.addf %72, %74 : vector<8x128xf32>
    %c0_63 = arith.constant 0 : index
    %c0_64 = arith.constant 0 : index
    %76 = vector.load %arg19[%c0_63, %c0_64] : memref<8x128xf32, #tpu.memory_space<vmem>>, vector<8x128xf32>
    tpu.vector_store %arg19[%c0_63, %c0_64], %75 {strides = array<i32>} : memref<8x128xf32, #tpu.memory_space<vmem>>, vector<8x128xf32>,
    return
  }
  func.func @transform_0(%arg0: i32) -> (i32, i32, i32) {
    %c0_i32 = arith.constant 0 : i32
    %c0_i32_0 = arith.constant 0 : i32
    %c0_i32_1 = arith.constant 0 : i32
    return %arg0, %c0_i32, %c0_i32_0 : i32, i32, i32
  }
  func.func @transform_1(%arg0: i32) -> (i32, i32, i32) {
    %c0_i32 = arith.constant 0 : i32
    %c0_i32_0 = arith.constant 0 : i32
    %c0_i32_1 = arith.constant 0 : i32
    return %arg0, %c0_i32, %c0_i32_0 : i32, i32, i32
  }
  func.func @transform_2(%arg0: i32) -> (i32, i32, i32) {
    %c0_i32 = arith.constant 0 : i32
    %c0_i32_0 = arith.constant 0 : i32
    %c0_i32_1 = arith.constant 0 : i32
    return %arg0, %c0_i32, %c0_i32_0 : i32, i32, i32
  }
  func.func @transform_3(%arg0: i32) -> (i32, i32) {
    %c0_i32 = arith.constant 0 : i32
    %c0_i32_0 = arith.constant 0 : i32
    %c0_i32_1 = arith.constant 0 : i32
    return %c0_i32, %c0_i32_0 : i32, i32
  }
  func.func @transform_4(%arg0: i32) -> (i32, i32) {
    %c0_i32 = arith.constant 0 : i32
    %c0_i32_0 = arith.constant 0 : i32
    %c0_i32_1 = arith.constant 0 : i32
    return %c0_i32, %c0_i32_0 : i32, i32
  }
  func.func @transform_5(%arg0: i32) -> (i32, i32) {
    %c0_i32 = arith.constant 0 : i32
    %c0_i32_0 = arith.constant 0 : i32
    %c0_i32_1 = arith.constant 0 : i32
    return %c0_i32, %c0_i32_0 : i32, i32
  }
  func.func @transform_6(%arg0: i32) -> (i32, i32) {
    %c0_i32 = arith.constant 0 : i32
    %c0_i32_0 = arith.constant 0 : i32
    %c0_i32_1 = arith.constant 0 : i32
    return %c0_i32, %c0_i32_0 : i32, i32
  }
  func.func @transform_7(%arg0: i32) -> (i32, i32, i32) {
    %c0_i32 = arith.constant 0 : i32
    %c0_i32_0 = arith.constant 0 : i32
    %c0_i32_1 = arith.constant 0 : i32
    %c0_i32_2 = arith.constant 0 : i32
    return %c0_i32, %c0_i32_0, %c0_i32_1 : i32, i32, i32
  }
  func.func @transform_8(%arg0: i32) -> (i32, i32) {
    %c0_i32 = arith.constant 0 : i32
    %c0_i32_0 = arith.constant 0 : i32
    %c0_i32_1 = arith.constant 0 : i32
    return %c0_i32, %c0_i32_0 : i32, i32
  }
  func.func @transform_9(%arg0: i32) -> (i32, i32) {
    %c0_i32 = arith.constant 0 : i32
    %c0_i32_0 = arith.constant 0 : i32
    %c0_i32_1 = arith.constant 0 : i32
    return %c0_i32, %c0_i32_0 : i32, i32
  }
  func.func @transform_10(%arg0: i32) -> (i32, i32) {
    %c0_i32 = arith.constant 0 : i32
    %c0_i32_0 = arith.constant 0 : i32
    %c0_i32_1 = arith.constant 0 : i32
    return %c0_i32, %c0_i32_0 : i32, i32
  }
  func.func @transform_11(%arg0: i32) -> (i32, i32) {
    %c0_i32 = arith.constant 0 : i32
    %c0_i32_0 = arith.constant 0 : i32
    %c0_i32_1 = arith.constant 0 : i32
    return %c0_i32, %c0_i32_0 : i32, i32
  }
  func.func @transform_12(%arg0: i32) -> (i32, i32) {
    %c0_i32 = arith.constant 0 : i32
    %c0_i32_0 = arith.constant 0 : i32
    %c0_i32_1 = arith.constant 0 : i32
    return %c0_i32, %c0_i32_0 : i32, i32
  }
  func.func @transform_13(%arg0: i32) -> (i32, i32) {
    %c0_i32 = arith.constant 0 : i32
    %c0_i32_0 = arith.constant 0 : i32
    %c0_i32_1 = arith.constant 0 : i32
    return %c0_i32, %c0_i32_0 : i32, i32
  }
  func.func @transform_14(%arg0: i32) -> (i32, i32) {
    %c0_i32 = arith.constant 0 : i32
    %c0_i32_0 = arith.constant 0 : i32
    %c0_i32_1 = arith.constant 0 : i32
    return %c0_i32, %c0_i32_0 : i32, i32
  }
  func.func @transform_15(%arg0: i32) -> (i32, i32) {
    %c0_i32 = arith.constant 0 : i32
    %c0_i32_0 = arith.constant 0 : i32
    %c0_i32_1 = arith.constant 0 : i32
    return %c0_i32, %c0_i32_0 : i32, i32
  }
  func.func @transform_16(%arg0: i32) -> (i32, i32) {
    %c0_i32 = arith.constant 0 : i32
    %c0_i32_0 = arith.constant 0 : i32
    %c0_i32_1 = arith.constant 0 : i32
    return %c0_i32, %c0_i32_0 : i32, i32
  }
  func.func @transform_17(%arg0: i32) -> (i32, i32) {
    %c0_i32 = arith.constant 0 : i32
    %c0_i32_0 = arith.constant 0 : i32
    %c0_i32_1 = arith.constant 0 : i32
    return %c0_i32, %c0_i32_0 : i32, i32
  }
  func.func @transform_18(%arg0: i32) -> (i32, i32) {
    %c0_i32 = arith.constant 0 : i32
    %c0_i32_0 = arith.constant 0 : i32
    return %arg0, %c0_i32 : i32, i32
  }
}

module attributes {stable_mosaic.version = 11 : i64} {
  func.func @cpi_kernel(%arg0: i32, %arg1: memref<8x8x8xf32, #tpu.memory_space<vmem>>, %arg2: memref<8x8x128xf32, #tpu.memory_space<vmem>>, %arg3: memref<8x16x128xf32, #tpu.memory_space<vmem>>, %arg4: memref<128x128xf32, #tpu.memory_space<vmem>>, %arg5: memref<1x128xf32, #tpu.memory_space<vmem>>, %arg6: memref<128x128xf32, #tpu.memory_space<vmem>>, %arg7: memref<1x128xf32, #tpu.memory_space<vmem>>, %arg8: memref<3x128x128xf32, #tpu.memory_space<vmem>>, %arg9: memref<1x128xf32, #tpu.memory_space<vmem>>, %arg10: memref<128x512xf32, #tpu.memory_space<vmem>>, %arg11: memref<128x512xf32, #tpu.memory_space<vmem>>, %arg12: memref<1x512xf32, #tpu.memory_space<vmem>>, %arg13: memref<512x512xf32, #tpu.memory_space<vmem>>, %arg14: memref<1x512xf32, #tpu.memory_space<vmem>>, %arg15: memref<512x128xf32, #tpu.memory_space<vmem>>, %arg16: memref<1x128xf32, #tpu.memory_space<vmem>>, %arg17: memref<128x128xf32, #tpu.memory_space<vmem>>, %arg18: memref<1x128xf32, #tpu.memory_space<vmem>>, %arg19: memref<8x128xf32, #tpu.memory_space<vmem>>) attributes {dimension_semantics = [#tpu.dimension_semantics<parallel>], iteration_bounds = array<i64: 1>, scalar_prefetch = 0 : i64, scratch_operands = 0 : i64, tpu.core_type = #tpu.core_type<tc>, window_params = [{transform_indices = @transform_0, window_bounds = array<i64: 8, 8, 8>}, {transform_indices = @transform_1, window_bounds = array<i64: 8, 8, 128>}, {transform_indices = @transform_2, window_bounds = array<i64: 8, 16, 128>}, {pipeline_mode = #tpu.pipeline_mode<synchronous>, transform_indices = @transform_3, window_bounds = array<i64: 128, 128>}, {pipeline_mode = #tpu.pipeline_mode<synchronous>, transform_indices = @transform_4, window_bounds = array<i64: 1, 128>}, {pipeline_mode = #tpu.pipeline_mode<synchronous>, transform_indices = @transform_5, window_bounds = array<i64: 128, 128>}, {pipeline_mode = #tpu.pipeline_mode<synchronous>, transform_indices = @transform_6, window_bounds = array<i64: 1, 128>}, {pipeline_mode = #tpu.pipeline_mode<synchronous>, transform_indices = @transform_7, window_bounds = array<i64: 3, 128, 128>}, {pipeline_mode = #tpu.pipeline_mode<synchronous>, transform_indices = @transform_8, window_bounds = array<i64: 1, 128>}, {pipeline_mode = #tpu.pipeline_mode<synchronous>, transform_indices = @transform_9, window_bounds = array<i64: 128, 512>}, {pipeline_mode = #tpu.pipeline_mode<synchronous>, transform_indices = @transform_10, window_bounds = array<i64: 128, 512>}, {pipeline_mode = #tpu.pipeline_mode<synchronous>, transform_indices = @transform_11, window_bounds = array<i64: 1, 512>}, {pipeline_mode = #tpu.pipeline_mode<synchronous>, transform_indices = @transform_12, window_bounds = array<i64: 512, 512>}, {pipeline_mode = #tpu.pipeline_mode<synchronous>, transform_indices = @transform_13, window_bounds = array<i64: 1, 512>}, {pipeline_mode = #tpu.pipeline_mode<synchronous>, transform_indices = @transform_14, window_bounds = array<i64: 512, 128>}, {pipeline_mode = #tpu.pipeline_mode<synchronous>, transform_indices = @transform_15, window_bounds = array<i64: 1, 128>}, {pipeline_mode = #tpu.pipeline_mode<synchronous>, transform_indices = @transform_16, window_bounds = array<i64: 128, 128>}, {pipeline_mode = #tpu.pipeline_mode<synchronous>, transform_indices = @transform_17, window_bounds = array<i64: 1, 128>}, {transform_indices = @transform_18, window_bounds = array<i64: 8, 128>}]} {
    %c0 = arith.constant 0 : index
    %c0_0 = arith.constant 0 : index
    %c0_1 = arith.constant 0 : index
    %0 = vector.load %arg1[%c0, %c0_0, %c0_1] : memref<8x8x8xf32, #tpu.memory_space<vmem>>, vector<8x8x8xf32>
    %c0_2 = arith.constant 0 : index
    %c0_3 = arith.constant 0 : index
    %c0_4 = arith.constant 0 : index
    %1 = vector.load %arg2[%c0_2, %c0_3, %c0_4] : memref<8x8x128xf32, #tpu.memory_space<vmem>>, vector<8x8x128xf32>
    "tpu.trace_start"() <{level = 10 : i32, message = "bvw,bwd->bvd"}> : () -> ()
    %cst = arith.constant dense<0.000000e+00> : vector<8x8x128xf32>
    %2 = tpu.matmul %0, %1, %cst {dimension_numbers = #tpu.dot_dimension_numbers<[2], [1], [1], [2], [0, 0, 0, 1, 1, 2], [0], [0]>} : vector<8x8x8xf32>, vector<8x8x128xf32>, vector<8x8x128xf32> -> vector<8x8x128xf32>
    "tpu.trace_stop"() : () -> ()
    %3 = vector.shape_cast %2 : vector<8x8x128xf32> to vector<64x128xf32>
    %c0_5 = arith.constant 0 : index
    %c0_6 = arith.constant 0 : index
    %4 = vector.load %arg4[%c0_5, %c0_6] : memref<128x128xf32, #tpu.memory_space<vmem>>, vector<128x128xf32>
    %cst_7 = arith.constant dense<0.000000e+00> : vector<64x128xf32>
    %5 = tpu.matmul %3, %4, %cst_7 {dimension_numbers = #tpu.dot_dimension_numbers<[1], [0], [0], [1], [0, 0, 1, 1], [], []>} : vector<64x128xf32>, vector<128x128xf32>, vector<64x128xf32> -> vector<64x128xf32>
    %c0_8 = arith.constant 0 : index
    %c0_9 = arith.constant 0 : index
    %6 = vector.load %arg5[%c0_8, %c0_9] : memref<1x128xf32, #tpu.memory_space<vmem>>, vector<1x128xf32>
    %7 = vector.broadcast %6 : vector<1x128xf32> to vector<64x128xf32>
    %8 = arith.addf %5, %7 : vector<64x128xf32>
    %cst_10 = arith.constant 0.000000e+00 : f32
    %9 = vector.broadcast %cst_10 : f32 to vector<64x128xf32>
    %10 = arith.maximumf %8, %9 : vector<64x128xf32>
    %c0_11 = arith.constant 0 : index
    %c0_12 = arith.constant 0 : index
    %11 = vector.load %arg6[%c0_11, %c0_12] : memref<128x128xf32, #tpu.memory_space<vmem>>, vector<128x128xf32>
    %cst_13 = arith.constant dense<0.000000e+00> : vector<64x128xf32>
    %12 = tpu.matmul %10, %11, %cst_13 {dimension_numbers = #tpu.dot_dimension_numbers<[1], [0], [0], [1], [0, 0, 1, 1], [], []>} : vector<64x128xf32>, vector<128x128xf32>, vector<64x128xf32> -> vector<64x128xf32>
    %c0_14 = arith.constant 0 : index
    %c0_15 = arith.constant 0 : index
    %13 = vector.load %arg7[%c0_14, %c0_15] : memref<1x128xf32, #tpu.memory_space<vmem>>, vector<1x128xf32>
    %14 = vector.broadcast %13 : vector<1x128xf32> to vector<64x128xf32>
    %15 = arith.addf %12, %14 : vector<64x128xf32>
    %16 = vector.shape_cast %15 : vector<64x128xf32> to vector<8x8x128xf32>
    %cst_16 = arith.constant dense<0.000000e+00> : vector<8x128xf32>
    %17 = vector.multi_reduction <add>, %16, %cst_16 [1] : vector<8x8x128xf32> to vector<8x128xf32>
    %cst_17 = arith.constant 8.000000e+00 : f32
    %18 = vector.broadcast %cst_17 : f32 to vector<8x128xf32>
    %19 = arith.divf %17, %18 : vector<8x128xf32>
    %c0_18 = arith.constant 0 : index
    %c0_19 = arith.constant 0 : index
    %c0_20 = arith.constant 0 : index
    %20 = vector.load %arg3[%c0_18, %c0_19, %c0_20] : memref<8x16x128xf32, #tpu.memory_space<vmem>>, vector<8x16x128xf32>
    %21 = vector.shape_cast %20 : vector<8x16x128xf32> to vector<128x128xf32>
    %c0_21 = arith.constant 0 : index
    %c0_22 = arith.constant 0 : index
    %c0_23 = arith.constant 0 : index
    %22 = vector.load %arg8[%c0_21, %c0_22, %c0_23] : memref<3x128x128xf32, #tpu.memory_space<vmem>>, vector<1x128x128xf32>
    %23 = vector.shape_cast %22 : vector<1x128x128xf32> to vector<128x128xf32>
    %cst_24 = arith.constant dense<0.000000e+00> : vector<128x128xf32>
    %24 = tpu.matmul %21, %23, %cst_24 {dimension_numbers = #tpu.dot_dimension_numbers<[1], [0], [0], [1], [0, 0, 1, 1], [], []>} : vector<128x128xf32>, vector<128x128xf32>, vector<128x128xf32> -> vector<128x128xf32>
    %c2_i32 = arith.constant 2 : i32
    %25 = tpu.dynamic_rotate %24 by %c2_i32 dim 0 : vector<128x128xf32>, i32 -> vector<128x128xf32>
    %c1 = arith.constant 1 : index
    %c0_25 = arith.constant 0 : index
    %c0_26 = arith.constant 0 : index
    %26 = vector.load %arg8[%c1, %c0_25, %c0_26] : memref<3x128x128xf32, #tpu.memory_space<vmem>>, vector<1x128x128xf32>
    %27 = vector.shape_cast %26 : vector<1x128x128xf32> to vector<128x128xf32>
    %cst_27 = arith.constant dense<0.000000e+00> : vector<128x128xf32>
    %28 = tpu.matmul %21, %27, %cst_27 {dimension_numbers = #tpu.dot_dimension_numbers<[1], [0], [0], [1], [0, 0, 1, 1], [], []>} : vector<128x128xf32>, vector<128x128xf32>, vector<128x128xf32> -> vector<128x128xf32>
    %c1_i32 = arith.constant 1 : i32
    %29 = tpu.dynamic_rotate %28 by %c1_i32 dim 0 : vector<128x128xf32>, i32 -> vector<128x128xf32>
    %30 = arith.addf %25, %29 : vector<128x128xf32>
    %c2 = arith.constant 2 : index
    %c0_28 = arith.constant 0 : index
    %c0_29 = arith.constant 0 : index
    %31 = vector.load %arg8[%c2, %c0_28, %c0_29] : memref<3x128x128xf32, #tpu.memory_space<vmem>>, vector<1x128x128xf32>
    %32 = vector.shape_cast %31 : vector<1x128x128xf32> to vector<128x128xf32>
    %cst_30 = arith.constant dense<0.000000e+00> : vector<128x128xf32>
    %33 = tpu.matmul %21, %32, %cst_30 {dimension_numbers = #tpu.dot_dimension_numbers<[1], [0], [0], [1], [0, 0, 1, 1], [], []>} : vector<128x128xf32>, vector<128x128xf32>, vector<128x128xf32> -> vector<128x128xf32>
    %34 = arith.addf %30, %33 : vector<128x128xf32>
    %c0_31 = arith.constant 0 : index
    %c0_32 = arith.constant 0 : index
    %35 = vector.load %arg9[%c0_31, %c0_32] : memref<1x128xf32, #tpu.memory_space<vmem>>, vector<1x128xf32>
    %36 = vector.broadcast %35 : vector<1x128xf32> to vector<128x128xf32>
    %37 = arith.addf %34, %36 : vector<128x128xf32>
    %cst_33 = arith.constant 0.000000e+00 : f32
    %38 = vector.broadcast %cst_33 : f32 to vector<128x128xf32>
    %39 = arith.maximumf %37, %38 : vector<128x128xf32>
    %40 = vector.shape_cast %39 : vector<128x128xf32> to vector<8x16x128xf32>
    %41 = tpu.iota {dimensions = array<i32: 1>} : vector<8x16x128xi32>
    %c2_i32_34 = arith.constant 2 : i32
    %42 = vector.broadcast %c2_i32_34 : i32 to vector<8x16x128xi32>
    %43 = arith.cmpi sge, %41, %42 : vector<8x16x128xi32>
    %cst_35 = arith.constant 0xFF800000 : f32
    %44 = vector.broadcast %cst_35 : f32 to vector<8x16x128xf32>
    %45 = arith.select %43, %40, %44 : vector<8x16x128xi1>, vector<8x16x128xf32>
    %cst_36 = arith.constant dense<0xFF800000> : vector<8x128xf32>
    %46 = vector.multi_reduction <maximumf>, %45, %cst_36 [1] : vector<8x16x128xf32> to vector<8x128xf32>
    %c0_37 = arith.constant 0 : index
    %c0_38 = arith.constant 0 : index
    %47 = vector.load %arg10[%c0_37, %c0_38] : memref<128x512xf32, #tpu.memory_space<vmem>>, vector<128x512xf32>
    %cst_39 = arith.constant dense<0.000000e+00> : vector<8x512xf32>
    %48 = tpu.matmul %19, %47, %cst_39 {dimension_numbers = #tpu.dot_dimension_numbers<[1], [0], [0], [1], [0, 0, 1, 1], [], []>} : vector<8x128xf32>, vector<128x512xf32>, vector<8x512xf32> -> vector<8x512xf32>
    %c0_40 = arith.constant 0 : index
    %c0_41 = arith.constant 0 : index
    %49 = vector.load %arg11[%c0_40, %c0_41] : memref<128x512xf32, #tpu.memory_space<vmem>>, vector<128x512xf32>
    %cst_42 = arith.constant dense<0.000000e+00> : vector<8x512xf32>
    %50 = tpu.matmul %46, %49, %cst_42 {dimension_numbers = #tpu.dot_dimension_numbers<[1], [0], [0], [1], [0, 0, 1, 1], [], []>} : vector<8x128xf32>, vector<128x512xf32>, vector<8x512xf32> -> vector<8x512xf32>
    %51 = arith.addf %48, %50 : vector<8x512xf32>
    %c0_43 = arith.constant 0 : index
    %c0_44 = arith.constant 0 : index
    %52 = vector.load %arg12[%c0_43, %c0_44] : memref<1x512xf32, #tpu.memory_space<vmem>>, vector<1x512xf32>
    %53 = vector.broadcast %52 : vector<1x512xf32> to vector<8x512xf32>
    %54 = arith.addf %51, %53 : vector<8x512xf32>
    %cst_45 = arith.constant 0.000000e+00 : f32
    %55 = vector.broadcast %cst_45 : f32 to vector<8x512xf32>
    %56 = arith.maximumf %54, %55 : vector<8x512xf32>
    %c0_46 = arith.constant 0 : index
    %c0_47 = arith.constant 0 : index
    %57 = vector.load %arg13[%c0_46, %c0_47] : memref<512x512xf32, #tpu.memory_space<vmem>>, vector<512x512xf32>
    %cst_48 = arith.constant dense<0.000000e+00> : vector<8x512xf32>
    %58 = tpu.matmul %56, %57, %cst_48 {dimension_numbers = #tpu.dot_dimension_numbers<[1], [0], [0], [1], [0, 0, 1, 1], [], []>} : vector<8x512xf32>, vector<512x512xf32>, vector<8x512xf32> -> vector<8x512xf32>
    %c0_49 = arith.constant 0 : index
    %c0_50 = arith.constant 0 : index
    %59 = vector.load %arg14[%c0_49, %c0_50] : memref<1x512xf32, #tpu.memory_space<vmem>>, vector<1x512xf32>
    %60 = vector.broadcast %59 : vector<1x512xf32> to vector<8x512xf32>
    %61 = arith.addf %58, %60 : vector<8x512xf32>
    %cst_51 = arith.constant 0.000000e+00 : f32
    %62 = vector.broadcast %cst_51 : f32 to vector<8x512xf32>
    %63 = arith.maximumf %61, %62 : vector<8x512xf32>
    %c0_52 = arith.constant 0 : index
    %c0_53 = arith.constant 0 : index
    %64 = vector.load %arg15[%c0_52, %c0_53] : memref<512x128xf32, #tpu.memory_space<vmem>>, vector<512x128xf32>
    %cst_54 = arith.constant dense<0.000000e+00> : vector<8x128xf32>
    %65 = tpu.matmul %63, %64, %cst_54 {dimension_numbers = #tpu.dot_dimension_numbers<[1], [0], [0], [1], [0, 0, 1, 1], [], []>} : vector<8x512xf32>, vector<512x128xf32>, vector<8x128xf32> -> vector<8x128xf32>
    %c0_55 = arith.constant 0 : index
    %c0_56 = arith.constant 0 : index
    %66 = vector.load %arg16[%c0_55, %c0_56] : memref<1x128xf32, #tpu.memory_space<vmem>>, vector<1x128xf32>
    %67 = vector.broadcast %66 : vector<1x128xf32> to vector<8x128xf32>
    %68 = arith.addf %65, %67 : vector<8x128xf32>
    %cst_57 = arith.constant 0.000000e+00 : f32
    %69 = vector.broadcast %cst_57 : f32 to vector<8x128xf32>
    %70 = arith.maximumf %68, %69 : vector<8x128xf32>
    %c0_58 = arith.constant 0 : index
    %c0_59 = arith.constant 0 : index
    %71 = vector.load %arg17[%c0_58, %c0_59] : memref<128x128xf32, #tpu.memory_space<vmem>>, vector<128x128xf32>
    %cst_60 = arith.constant dense<0.000000e+00> : vector<8x128xf32>
    %72 = tpu.matmul %70, %71, %cst_60 {dimension_numbers = #tpu.dot_dimension_numbers<[1], [0], [0], [1], [0, 0, 1, 1], [], []>} : vector<8x128xf32>, vector<128x128xf32>, vector<8x128xf32> -> vector<8x128xf32>
    %c0_61 = arith.constant 0 : index
    %c0_62 = arith.constant 0 : index
    %73 = vector.load %arg18[%c0_61, %c0_62] : memref<1x128xf32, #tpu.memory_space<vmem>>, vector<1x128xf32>
    %74 = vector.broadcast %73 : vector<1x128xf32> to vector<8x128xf32>
    %75 = arith.addf %72, %74 : vector<8x128xf32>
    %c0_63 = arith.constant 0 : index
    %c0_64 = arith.constant 0 : index
    %76 = vector.load %arg19[%c0_63, %c0_64] : memref<8x128xf32, #tpu.memory_space<vmem>>, vector<8x128xf32>
    tpu.vector_store %arg19[%c0_63, %c0_64], %75 {strides = array<i32>} : memref<8x128xf32, #tpu.memory_space<vmem>>, vector<8x128xf32>,
    return
  }
  func.func @transform_0(%arg0: i32) -> (i32, i32, i32) {
    %c0_i32 = arith.constant 0 : i32
    %c0_i32_0 = arith.constant 0 : i32
    %c0_i32_1 = arith.constant 0 : i32
    return %arg0, %c0_i32, %c0_i32_0 : i32, i32, i32
  }
  func.func @transform_1(%arg0: i32) -> (i32, i32, i32) {
    %c0_i32 = arith.constant 0 : i32
    %c0_i32_0 = arith.constant 0 : i32
    %c0_i32_1 = arith.constant 0 : i32
    return %arg0, %c0_i32, %c0_i32_0 : i32, i32, i32
  }
  func.func @transform_2(%arg0: i32) -> (i32, i32, i32) {
    %c0_i32 = arith.constant 0 : i32
    %c0_i32_0 = arith.constant 0 : i32
    %c0_i32_1 = arith.constant 0 : i32
    return %arg0, %c0_i32, %c0_i32_0 : i32, i32, i32
  }
  func.func @transform_3(%arg0: i32) -> (i32, i32) {
    %c0_i32 = arith.constant 0 : i32
    %c0_i32_0 = arith.constant 0 : i32
    %c0_i32_1 = arith.constant 0 : i32
    return %c0_i32, %c0_i32_0 : i32, i32
  }
  func.func @transform_4(%arg0: i32) -> (i32, i32) {
    %c0_i32 = arith.constant 0 : i32
    %c0_i32_0 = arith.constant 0 : i32
    %c0_i32_1 = arith.constant 0 : i32
    return %c0_i32, %c0_i32_0 : i32, i32
  }
  func.func @transform_5(%arg0: i32) -> (i32, i32) {
    %c0_i32 = arith.constant 0 : i32
    %c0_i32_0 = arith.constant 0 : i32
    %c0_i32_1 = arith.constant 0 : i32
    return %c0_i32, %c0_i32_0 : i32, i32
  }
  func.func @transform_6(%arg0: i32) -> (i32, i32) {
    %c0_i32 = arith.constant 0 : i32
    %c0_i32_0 = arith.constant 0 : i32
    %c0_i32_1 = arith.constant 0 : i32
    return %c0_i32, %c0_i32_0 : i32, i32
  }
  func.func @transform_7(%arg0: i32) -> (i32, i32, i32) {
    %c0_i32 = arith.constant 0 : i32
    %c0_i32_0 = arith.constant 0 : i32
    %c0_i32_1 = arith.constant 0 : i32
    %c0_i32_2 = arith.constant 0 : i32
    return %c0_i32, %c0_i32_0, %c0_i32_1 : i32, i32, i32
  }
  func.func @transform_8(%arg0: i32) -> (i32, i32) {
    %c0_i32 = arith.constant 0 : i32
    %c0_i32_0 = arith.constant 0 : i32
    %c0_i32_1 = arith.constant 0 : i32
    return %c0_i32, %c0_i32_0 : i32, i32
  }
  func.func @transform_9(%arg0: i32) -> (i32, i32) {
    %c0_i32 = arith.constant 0 : i32
    %c0_i32_0 = arith.constant 0 : i32
    %c0_i32_1 = arith.constant 0 : i32
    return %c0_i32, %c0_i32_0 : i32, i32
  }
  func.func @transform_10(%arg0: i32) -> (i32, i32) {
    %c0_i32 = arith.constant 0 : i32
    %c0_i32_0 = arith.constant 0 : i32
    %c0_i32_1 = arith.constant 0 : i32
    return %c0_i32, %c0_i32_0 : i32, i32
  }
  func.func @transform_11(%arg0: i32) -> (i32, i32) {
    %c0_i32 = arith.constant 0 : i32
    %c0_i32_0 = arith.constant 0 : i32
    %c0_i32_1 = arith.constant 0 : i32
    return %c0_i32, %c0_i32_0 : i32, i32
  }
  func.func @transform_12(%arg0: i32) -> (i32, i32) {
    %c0_i32 = arith.constant 0 : i32
    %c0_i32_0 = arith.constant 0 : i32
    %c0_i32_1 = arith.constant 0 : i32
    return %c0_i32, %c0_i32_0 : i32, i32
  }
  func.func @transform_13(%arg0: i32) -> (i32, i32) {
    %c0_i32 = arith.constant 0 : i32
    %c0_i32_0 = arith.constant 0 : i32
    %c0_i32_1 = arith.constant 0 : i32
    return %c0_i32, %c0_i32_0 : i32, i32
  }
  func.func @transform_14(%arg0: i32) -> (i32, i32) {
    %c0_i32 = arith.constant 0 : i32
    %c0_i32_0 = arith.constant 0 : i32
    %c0_i32_1 = arith.constant 0 : i32
    return %c0_i32, %c0_i32_0 : i32, i32
  }
  func.func @transform_15(%arg0: i32) -> (i32, i32) {
    %c0_i32 = arith.constant 0 : i32
    %c0_i32_0 = arith.constant 0 : i32
    %c0_i32_1 = arith.constant 0 : i32
    return %c0_i32, %c0_i32_0 : i32, i32
  }
  func.func @transform_16(%arg0: i32) -> (i32, i32) {
    %c0_i32 = arith.constant 0 : i32
    %c0_i32_0 = arith.constant 0 : i32
    %c0_i32_1 = arith.constant 0 : i32
    return %c0_i32, %c0_i32_0 : i32, i32
  }
  func.func @transform_17(%arg0: i32) -> (i32, i32) {
    %c0_i32 = arith.constant 0 : i32
    %c0_i32_0 = arith.constant 0 : i32
    %c0_i32_1 = arith.constant 0 : i32
    return %c0_i32, %c0_i32_0 : i32, i32
  }
  func.func @transform_18(%arg0: i32) -> (i32, i32) {
    %c0_i32 = arith.constant 0 : i32
    %c0_i32_0 = arith.constant 0 : i32
    return %arg0, %c0_i32 : i32, i32
  }
}

</mosaic_0001>

<bundles_post_ra>
// kernel: tpu_custom_call.1
= control target key start
LH: loop header
LB: loop body
LE: loop exit
PB: predicated region body
PF: predicated region fallthrough
CT: control target
= control target key end

     0   :  { %s5442_s0 = inlined_call_operand.hbm [shape: f32[8,8,8], index: 0, kind: input, shape index: {}]   ;;  %s5443_s1 = inlined_call_operand.hbm [shape: f32[8,8,128], index: 1, kind: input, shape index: {}]   ;;  %s5444_s2 = inlined_call_operand.hbm [shape: f32[8,16,128], index: 2, kind: input, shape index: {}]   ;;  %s5445_s3 = inlined_call_operand.hbm [shape: f32[128,128], index: 3, kind: input, shape index: {}]   ;;  %s5446_s4 = inlined_call_operand.vmem [shape: f32[1,128], index: 4, kind: input, shape index: {}]   ;;  %s5447_s5 = inlined_call_operand.hbm [shape: f32[128,128], index: 5, kind: input, shape index: {}]   ;;  %s5448_s6 = inlined_call_operand.vmem [shape: f32[1,128], index: 6, kind: input, shape index: {}]   ;;  %s5449_s7 = inlined_call_operand.hbm [shape: f32[3,128,128], index: 7, kind: input, shape index: {}]   ;;  %s5450_s8 = inlined_call_operand.vmem [shape: f32[1,128], index: 8, kind: input, shape index: {}]   ;;  %s5451_s9 = inlined_call_operand.hbm [shape: f32[128,512], index: 9, kind: input, shape index: {}]   ;;  %s5452_s10 = inlined_call_operand.hbm [shape: f32[128,512], index: 10, kind: input, shape index: {}]   ;;  %s5453_s11 = inlined_call_operand.vmem [shape: f32[1,512], index: 11, kind: input, shape index: {}]   ;;  %s5454_s12 = inlined_call_operand.hbm [shape: f32[512,512], index: 12, kind: input, shape index: {}]   ;;  %s5455_s13 = inlined_call_operand.vmem [shape: f32[1,512], index: 13, kind: input, shape index: {}]   ;;  %s5456_s14 = inlined_call_operand.hbm [shape: f32[512,128], index: 14, kind: input, shape index: {}]   ;;  %s5457_s15 = inlined_call_operand.vmem [shape: f32[1,128], index: 15, kind: input, shape index: {}]   ;;  %s5458_s16 = inlined_call_operand.hbm [shape: f32[128,128], index: 16, kind: input, shape index: {}]   ;;  %s5459_s17 = inlined_call_operand.vmem [shape: f32[1,128], index: 17, kind: input, shape index: {}]   ;;  %s5460_s18 = inlined_call_operand.hbm [shape: f32[8,128], index: 18, kind: output, shape index: {}]  }
   0x1   :  { %5468 = sst [smem:[#allocation31_spill]] %s5442_s0 }
   0x2   :  { %5469 = sst [smem:[#allocation32_spill]] %s5443_s1 }
   0x3   :  { %5470 = sst [smem:[#allocation33_spill]] %s5444_s2 }
   0x4   :  { %23 = vsyncpa [#allocation3], 0 }
   0x5   :  { %24 = vsyncpa [#allocation6], 0 }
   0x6   :  { %25 = vsyncpa [#allocation9], 0 }
   0x7   :  { %26 = vsyncpa [#allocation12], 0 }
   0x8   :  { %27 = vsyncpa [#allocation15], 0 }
   0x9   :  { %28 = vsyncpa [#allocation18], 0 }
   0xa   :  { %29 = vsyncpa [#allocation4], 0  ;;  %s4751_s27 = smov [#allocation5]   ;;  %s4752_s29 = smov [#allocation8]  }
   0xb   :  { %s47_s28 = sshll.u32 %s4751_s27, 4  ;;  %s71_s30 = sshll.u32 %s4752_s29, 4  ;;  %s48_s28 = int_to_ptr.vmem [resolvable:$true] %s47_s28  ;;  %s4865_s30 = int_to_ptr.vmem [resolvable:$true] %s71_s30 }
   0xc   :  { %s5471_s1 = sld [smem:[#allocation32_spill]] }
  0x12   :  { %s4473_s20 = scalar_lea.hbm %s5471_s1, 1024 }
  0x13   :  { %p4474_p0 = scmp.ne.s32.totalorder %s5471_s1, %s4473_s20  ;;  %p4477_p1 = scmp.lt.u32.totalorder %s4473_s20, %s5471_s1 }
  0x15   :  { %p4479_p2 = pnand %p4477_p1, %p4474_p0 }
  0x17   :  { %4482 = shalt.err (!%p4479_p2)
}
  0x18   :  { %s4483_s24 = scalar_lea.vmem %s48_s28, 1024  ;;  %p4488_p4 = scmp.lt.s32.totalorder %s48_s28, %s48_s28 }
  0x19   :  { %p4484_p3 = scmp.ne.s32.totalorder %s48_s28, %s4483_s24  ;;  %p4489_p5 = scmp.lt.s32.totalorder %s4483_s24, %s4483_s24 }
  0x1b   :  { %p4490_p6 = por %p4489_p5, %p4488_p4 }
  0x1d   :  { %p4491_p7 = pnand %p4490_p6, %p4484_p3 }
  0x1f   :  { %4494 = shalt.err (!%p4491_p7)
}
  0x20   :  { %s4753_s25 = smov 128   ;;  %s4754_s26 = smov 8  }
  0x21   :  { %53 = dma.hbm_to_vmem [thread:$0]  %s5471_s1, 1024, %s48_s28, [#allocation6], %s4753_s25, %s4753_s25, %s4754_s26  }
  0x22   :  { %s4495_s20 = scalar_lea.hbm %s5445_s3, 2048 }
  0x23   :  { %p4496_p8 = scmp.ne.s32.totalorder %s5445_s3, %s4495_s20  ;;  %p4499_p9 = scmp.lt.u32.totalorder %s4495_s20, %s5445_s3 }
  0x25   :  { %p4501_p10 = pnand %p4499_p9, %p4496_p8 }
  0x27   :  { %4504 = shalt.err (!%p4501_p10)
}
  0x28   :  { %s4505_s24 = scalar_lea.vmem %s4865_s30, 2048  ;;  %p4510_p12 = scmp.lt.s32.totalorder %s4865_s30, %s4865_s30 }
  0x29   :  { %p4506_p11 = scmp.ne.s32.totalorder %s4865_s30, %s4505_s24  ;;  %p4511_p13 = scmp.lt.s32.totalorder %s4505_s24, %s4505_s24 }
  0x2b   :  { %p4512_p0 = por %p4511_p13, %p4510_p12 }
  0x2d   :  { %p4513_p1 = pnand %p4512_p0, %p4506_p11 }
  0x2f   :  { %4516 = shalt.err (!%p4513_p1)
}
  0x30   :  { %77 = dma.hbm_to_vmem [thread:$0]  %s5445_s3, 2048, %s4865_s30, [#allocation9], %s4753_s25, %s4753_s25, %s4754_s26  }
  0x31   :  { %s4755_s27 = smov [#allocation11]   ;;  %s4517_s20 = scalar_lea.hbm %s5449_s7, 6144 }
  0x32   :  { %s99_s29 = sshll.u32 %s4755_s27, 4  ;;  %p4518_p2 = scmp.ne.s32.totalorder %s5449_s7, %s4517_s20  ;;  %s100_s29 = int_to_ptr.vmem [resolvable:$true] %s99_s29 }
  0x33   :  { %p4521_p3 = scmp.lt.u32.totalorder %s4517_s20, %s5449_s7 }
  0x35   :  { %p4523_p4 = pnand %p4521_p3, %p4518_p2 }
  0x37   :  { %4526 = shalt.err (!%p4523_p4)
}
  0x38   :  { %s4527_s24 = scalar_lea.vmem %s100_s29, 6144  ;;  %p4532_p6 = scmp.lt.s32.totalorder %s100_s29, %s100_s29 }
  0x39   :  { %p4528_p5 = scmp.ne.s32.totalorder %s100_s29, %s4527_s24  ;;  %p4533_p7 = scmp.lt.s32.totalorder %s4527_s24, %s4527_s24 }
  0x3b   :  { %p4534_p8 = por %p4533_p7, %p4532_p6 }
  0x3d   :  { %p4535_p9 = pnand %p4534_p8, %p4528_p5 }
  0x3f   :  { %4538 = shalt.err (!%p4535_p9)
}
  0x40   :  { %105 = dma.hbm_to_vmem [thread:$0]  %s5449_s7, 6144, %s100_s29, [#allocation12], %s4753_s25, %s4753_s25, %s4754_s26  }
  0x41   :  { %s4756_s28 = smov [#allocation14]   ;;  %s4757_s27 = smov [#allocation17]  }
  0x42   :  { %s125_s1 = sshll.u32 %s4756_s28, 4  ;;  %s153_s0 = sshll.u32 %s4757_s27, 4  ;;  %s126_s1 = int_to_ptr.vmem [resolvable:$true] %s125_s1  ;;  %s154_s0 = int_to_ptr.vmem [resolvable:$true] %s153_s0 }
  0x43   :  { %s4539_s21 = scalar_lea.hbm %s5452_s10, 8192 }
  0x44   :  { %p4540_p10 = scmp.ne.s32.totalorder %s5452_s10, %s4539_s21  ;;  %p4543_p11 = scmp.lt.u32.totalorder %s4539_s21, %s5452_s10 }
  0x46   :  { %p4545_p12 = pnand %p4543_p11, %p4540_p10 }
  0x48   :  { %4548 = shalt.err (!%p4545_p12)
}
  0x49   :  { %s4549_s7 = scalar_lea.vmem %s126_s1, 8192  ;;  %p4554_p0 = scmp.lt.s32.totalorder %s126_s1, %s126_s1 }
  0x4a   :  { %p4550_p13 = scmp.ne.s32.totalorder %s126_s1, %s4549_s7  ;;  %p4555_p1 = scmp.lt.s32.totalorder %s4549_s7, %s4549_s7 }
  0x4c   :  { %p4556_p2 = por %p4555_p1, %p4554_p0 }
  0x4e   :  { %p4557_p3 = pnand %p4556_p2, %p4550_p13 }
  0x50   :  { %4560 = shalt.err (!%p4557_p3)
}
  0x51   :  { %s5464_s29 = smov 512   ;;  %s4759_s3 = smov 32  }
  0x52   :  { %131 = dma.hbm_to_vmem [thread:$0]  %s5452_s10, 8192, %s126_s1, [#allocation15], %s5464_s29, %s5464_s29, %s4759_s3  }
  0x53   :  { %s4561_s20 = scalar_lea.hbm %s5456_s14, 8192 }
  0x54   :  { %p4562_p4 = scmp.ne.s32.totalorder %s5456_s14, %s4561_s20  ;;  %p4565_p5 = scmp.lt.u32.totalorder %s4561_s20, %s5456_s14 }
  0x56   :  { %p4567_p6 = pnand %p4565_p5, %p4562_p4 }
  0x58   :  { %4570 = shalt.err (!%p4567_p6)
}
  0x59   :  { %s4571_s24 = scalar_lea.vmem %s154_s0, 8192  ;;  %p4576_p8 = scmp.lt.s32.totalorder %s154_s0, %s154_s0 }
  0x5a   :  { %p4572_p7 = scmp.ne.s32.totalorder %s154_s0, %s4571_s24  ;;  %p4577_p9 = scmp.lt.s32.totalorder %s4571_s24, %s4571_s24 }
  0x5c   :  { %p4578_p10 = por %p4577_p9, %p4576_p8 }
  0x5e   :  { %p4579_p11 = pnand %p4578_p10, %p4572_p7 }
  0x60   :  { %4582 = shalt.err (!%p4579_p11)
}
  0x61   :  { %159 = dma.hbm_to_vmem [thread:$0]  %s5456_s14, 8192, %s154_s0, [#allocation18], %s4753_s25, %s4753_s25, %s4754_s26  }
  0x62   :  { %s4760_s7 = smov [#allocation2]   ;;  %s4761_s28 = smov [#allocation7]  }
  0x63   :  { %s35_s30 = sshll.u32 %s4760_s7, 4  ;;  %s59_s27 = sshll.u32 %s4761_s28, 4  ;;  %s36_s30 = int_to_ptr.vmem [resolvable:$true] %s35_s30  ;;  %s60_s27 = int_to_ptr.vmem [resolvable:$true] %s59_s27 }
  0x64   :  { %s5472_s21 = sld [smem:[#allocation31_spill]] }
  0x6a   :  { %s4583_s22 = scalar_lea.hbm %s5472_s21, 1024 }
  0x6b   :  { %p4584_p12 = scmp.ne.s32.totalorder %s5472_s21, %s4583_s22  ;;  %p4587_p13 = scmp.lt.u32.totalorder %s4583_s22, %s5472_s21 }
  0x6d   :  { %p4589_p0 = pnand %p4587_p13, %p4584_p12 }
  0x6f   :  { %4592 = shalt.err (!%p4589_p0)
}
  0x70   :  { %s4593_s14 = scalar_lea.vmem %s36_s30, 1024  ;;  %p4598_p2 = scmp.lt.s32.totalorder %s36_s30, %s36_s30 }
  0x71   :  { %p4594_p1 = scmp.ne.s32.totalorder %s36_s30, %s4593_s14  ;;  %p4599_p3 = scmp.lt.s32.totalorder %s4593_s14, %s4593_s14 }
  0x73   :  { %p4600_p4 = por %p4599_p3, %p4598_p2 }
  0x75   :  { %p4601_p5 = pnand %p4600_p4, %p4594_p1 }
  0x77   :  { %4604 = shalt.err (!%p4601_p5)
}
  0x78   :  { %41 = dma.hbm_to_vmem [thread:$0]  %s5472_s21, 1024, %s36_s30, [#allocation3], %s4753_s25, %s4753_s25, %s4754_s26  }
  0x79   :  { %s5473_s7 = sld [smem:[#allocation33_spill]] }
  0x7f   :  { %s4605_s28 = scalar_lea.hbm %s5473_s7, 2048 }
  0x80   :  { %p4606_p6 = scmp.ne.s32.totalorder %s5473_s7, %s4605_s28  ;;  %p4609_p7 = scmp.lt.u32.totalorder %s4605_s28, %s5473_s7 }
  0x82   :  { %p4611_p8 = pnand %p4609_p7, %p4606_p6 }
  0x84   :  { %4614 = shalt.err (!%p4611_p8)
}
  0x85   :  { %s4615_s23 = scalar_lea.vmem %s60_s27, 2048  ;;  %p4620_p10 = scmp.lt.s32.totalorder %s60_s27, %s60_s27 }
  0x86   :  { %p4616_p9 = scmp.ne.s32.totalorder %s60_s27, %s4615_s23  ;;  %p4621_p11 = scmp.lt.s32.totalorder %s4615_s23, %s4615_s23 }
  0x88   :  { %p4622_p12 = por %p4621_p11, %p4620_p10 }
  0x8a   :  { %p4623_p13 = pnand %p4622_p12, %p4616_p9 }
  0x8c   :  { %4626 = shalt.err (!%p4623_p13)
}
  0x8d   :  { %65 = dma.hbm_to_vmem [thread:$0]  %s5473_s7, 2048, %s60_s27, [#allocation6], %s4753_s25, %s4753_s25, %s4754_s26  }
  0x8e   :  { %s4762_s24 = smov [#allocation10]   ;;  %s4763_s0 = smov [#allocation13]  }
  0x8f   :  { %s85_s14 = sshll.u32 %s4762_s24, 4  ;;  %s113_s10 = sshll.u32 %s4763_s0, 4  ;;  %s86_s14 = int_to_ptr.vmem [resolvable:$true] %s85_s14  ;;  %s114_s10 = int_to_ptr.vmem [resolvable:$true] %s113_s10 }
  0x90   :  { %s4627_s28 = scalar_lea.hbm %s5447_s5, 2048 }
  0x91   :  { %p4628_p0 = scmp.ne.s32.totalorder %s5447_s5, %s4627_s28  ;;  %p4631_p1 = scmp.lt.u32.totalorder %s4627_s28, %s5447_s5 }
  0x93   :  { %p4633_p2 = pnand %p4631_p1, %p4628_p0 }
  0x95   :  { %4636 = shalt.err (!%p4633_p2)
}
  0x96   :  { %s4637_s27 = scalar_lea.vmem %s86_s14, 2048  ;;  %p4642_p4 = scmp.lt.s32.totalorder %s86_s14, %s86_s14 }
  0x97   :  { %p4638_p3 = scmp.ne.s32.totalorder %s86_s14, %s4637_s27  ;;  %p4643_p5 = scmp.lt.s32.totalorder %s4637_s27, %s4637_s27 }
  0x99   :  { %p4644_p6 = por %p4643_p5, %p4642_p4 }
  0x9b   :  { %p4645_p7 = pnand %p4644_p6, %p4638_p3 }
  0x9d   :  { %4648 = shalt.err (!%p4645_p7)
}
  0x9e   :  { %91 = dma.hbm_to_vmem [thread:$0]  %s5447_s5, 2048, %s86_s14, [#allocation9], %s4753_s25, %s4753_s25, %s4754_s26  }
  0x9f   :  { %s4649_s24 = scalar_lea.hbm %s5451_s9, 8192 }
  0xa0   :  { %p4650_p8 = scmp.ne.s32.totalorder %s5451_s9, %s4649_s24  ;;  %p4653_p9 = scmp.lt.u32.totalorder %s4649_s24, %s5451_s9 }
  0xa2   :  { %p4655_p10 = pnand %p4653_p9, %p4650_p8 }
  0xa4   :  { %4658 = shalt.err (!%p4655_p10)
}
  0xa5   :  { %s4659_s19 = scalar_lea.vmem %s114_s10, 8192  ;;  %p4664_p12 = scmp.lt.s32.totalorder %s114_s10, %s114_s10 }
  0xa6   :  { %p4660_p11 = scmp.ne.s32.totalorder %s114_s10, %s4659_s19  ;;  %p4665_p13 = scmp.lt.s32.totalorder %s4659_s19, %s4659_s19 }
  0xa8   :  { %p4666_p0 = por %p4665_p13, %p4664_p12 }
  0xaa   :  { %p4667_p1 = pnand %p4666_p0, %p4660_p11 }
  0xac   :  { %4670 = shalt.err (!%p4667_p1)
}
  0xad   :  { %s5474_s5 = smov 512   ;;  %s4764_s22 = smov [#allocation16]  }
  0xae   :  { %119 = dma.hbm_to_vmem [thread:$0]  %s5451_s9, 8192, %s114_s10, [#allocation12], %s5474_s5, %s5474_s5, %s4759_s3  }
  0xaf   :  { %s139_s2 = sshll.u32 %s4764_s22, 4  ;;  %s4765_s27 = smov [#allocation19]   ;;  %s140_s2 = int_to_ptr.vmem [resolvable:$true] %s139_s2 }
  0xb0   :  { %s167_s7 = sshll.u32 %s4765_s27, 4  ;;  %s4671_s21 = scalar_lea.hbm %s5454_s12, 32768  ;;  %s168_s7 = int_to_ptr.vmem [resolvable:$true] %s167_s7 }
  0xb1   :  { %p4672_p2 = scmp.ne.s32.totalorder %s5454_s12, %s4671_s21  ;;  %p4675_p3 = scmp.lt.u32.totalorder %s4671_s21, %s5454_s12 }
  0xb3   :  { %p4677_p4 = pnand %p4675_p3, %p4672_p2 }
  0xb5   :  { %4680 = shalt.err (!%p4677_p4)
}
  0xb6   :  { %s4681_s9 = scalar_lea.vmem %s140_s2, 32768  ;;  %p4686_p6 = scmp.lt.s32.totalorder %s140_s2, %s140_s2 }
  0xb7   :  { %p4682_p5 = scmp.ne.s32.totalorder %s140_s2, %s4681_s9  ;;  %p4687_p7 = scmp.lt.s32.totalorder %s4681_s9, %s4681_s9 }
  0xb9   :  { %p4688_p8 = por %p4687_p7, %p4686_p6 }
  0xbb   :  { %p4689_p9 = pnand %p4688_p8, %p4682_p5 }
  0xbd   :  { %4692 = shalt.err (!%p4689_p9)
}
  0xbe   :  { %145 = dma.hbm_to_vmem [thread:$0]  %s5454_s12, 32768, %s140_s2, [#allocation15], %s5474_s5, %s5474_s5, %s4759_s3  }
  0xbf   :  { %s4693_s20 = scalar_lea.hbm %s5458_s16, 2048 }
  0xc0   :  { %p4694_p10 = scmp.ne.s32.totalorder %s5458_s16, %s4693_s20  ;;  %p4697_p11 = scmp.lt.u32.totalorder %s4693_s20, %s5458_s16 }
  0xc2   :  { %p4699_p12 = pnand %p4697_p11, %p4694_p10 }
  0xc4   :  { %4702 = shalt.err (!%p4699_p12)
}
  0xc5   :  { %s4703_s21 = scalar_lea.vmem %s168_s7, 2048  ;;  %p4708_p0 = scmp.lt.s32.totalorder %s168_s7, %s168_s7 }
  0xc6   :  { %p4704_p13 = scmp.ne.s32.totalorder %s168_s7, %s4703_s21  ;;  %p4709_p1 = scmp.lt.s32.totalorder %s4703_s21, %s4703_s21 }
  0xc8   :  { %p4710_p2 = por %p4709_p1, %p4708_p0 }
  0xca   :  { %p4711_p3 = pnand %p4710_p2, %p4704_p13 }
  0xcc   :  { %4714 = shalt.err (!%p4711_p3)
}
  0xcd   :  { %173 = dma.hbm_to_vmem [thread:$0]  %s5458_s16, 2048, %s168_s7, [#allocation18], %s4753_s25, %s4753_s25, %s4754_s26  }
  0xce   :  { %4737 = dma.done.wait [#allocation3], 1024  }
  0xcf   :  { %4738 = vsyncadd [#allocation3], 4294966272 }
  0xd0   :  { %4739 = dma.done.wait [#allocation6], 3072  }
  0xd1   :  { %4740 = vsyncadd [#allocation6], 4294964224 }
  0xd2   :  { %4741 = dma.done.wait [#allocation9], 4096  }
  0xd3   :  { %4742 = vsyncadd [#allocation9], 4294963200 }
  0xd4   :  { %4743 = dma.done.wait [#allocation12], 14336  }
  0xd5   :  { %4744 = vsyncadd [#allocation12], 4294952960 }
  0xd6   :  { %4745 = dma.done.wait [#allocation15], 40960  }
  0xd7   :  { %4746 = vsyncadd [#allocation15], 4294926336 }
  0xd8   :  { %4747 = dma.done.wait [#allocation18], 10240  }
  0xd9   :  { %4748 = vsyncadd [#allocation18], 4294957056  ;;  %v5466_v0 = vmov 0.0   ;;  %vm4767_vm0 = vmmov 0   ;;  %vm225_vm1 = vcmask 64512   ;;  %v217_v1 = vld [vmem:[#allocation5] sm:$0xff] }
  0xda   :  { %3479 = vmatprep.subr.mxu0 %v5466_v0  ;;  %3484 = vmatprep.subr.mxu1 %v5466_v0  ;;  %v218_v2 = vld [vmem:[#allocation5 + $0x8] sm:$0xff]  ;;  %v209_v3 = vld [vmem:[#allocation2] sm:$0xff]  ;;  %v219_v5 = vld [vmem:[#allocation5 + $0x10] sm:$0xff]  ;;  %vm1982_vm3 = vcmask 1041409   ;;  %vm1984_vm4 = vcmask 1042434   ;;  %vm1986_vm5 = vcmask 1043459  }
  0xdb   :  { %3481 = vmatprep.mubr.msk.f32.mxu0 %vm4767_vm0, %v5466_v0  ;;  %3486 = vmatprep.mubr.msk.f32.mxu1 %vm4767_vm0, %v5466_v0  ;;  %v210_v4 = vld [vmem:[#allocation2 + $0x8] sm:$0xff]  ;;  %v220_v6 = vld [vmem:[#allocation5 + $0x18] sm:$0xff]  ;;  %v211_v7 = vld [vmem:[#allocation2 + $0x10] sm:$0xff]  ;;  %vm1988_vm6 = vcmask 1044484   ;;  %vm1990_vm7 = vcmask 1045509   ;;  %vm1992_vm8 = vcmask 1046534  }
  0xdc   :  { %3480 = vmatpush3.msra.mxu0 %v217_v1  ;;  %3485 = vmatpush3.msra.mxu1 %v218_v2  ;;  %v212_v8 = vld [vmem:[#allocation2 + $0x18] sm:$0xff]  ;;  %v221_v9 = vld [vmem:[#allocation5 + $0x20] sm:$0xff]  ;;  %v222_v10 = vld [vmem:[#allocation5 + $0x28] sm:$0xff]  ;;  %vm1994_vm9 = vcmask 1047559   ;;  %s4769_s29 = smov [#allocation20]  }
  0xdd   :  { %3482 = vmatmul.mubr.msk.f32.vlgmr.msra.gmra.mrb[0].mxu0 %vm225_vm1, %v209_v3  ;;  %3487 = vmatmul.mubr.msk.f32.vlgmr.msra.gmra.mrb[0].mxu1 %vm225_vm1, %v210_v4  ;;  %v213_v11 = vld [vmem:[#allocation2 + $0x20] sm:$0xff]  ;;  %v214_v12 = vld [vmem:[#allocation2 + $0x28] sm:$0xff]  ;;  %v223_v15 = vld [vmem:[#allocation5 + $0x30] sm:$0xff]  ;;  %s3205_s9 = sshll.u32 %s4769_s29, 4  ;;  %s3206_s9 = int_to_ptr.vmem [resolvable:$true] %s3205_s9 }
  0xde   :  { %3489 = vmatprep.subr.mxu0 %v5466_v0  ;;  %3491 = vmatprep.mubr.msk.f32.mxu0 %vm4767_vm0, %v5466_v0  ;;  %v810_v13 = vld [vmem:[#allocation8] sm:$0xff]  ;;  %v811_v14 = vld [vmem:[#allocation8 + $0x8] sm:$0xff]  ;;  %v224_v16 = vld [vmem:[#allocation5 + $0x38] sm:$0xff]  ;;  %p4720_p5 = scmp.lt.s32.totalorder %s3206_s9, %s3206_s9 }
  0xdf   :  { %3490 = vmatpush3.msra.mxu0 %v219_v5  ;;  %3494 = vmatprep.subr.mxu1 %v5466_v0  ;;  %v812_v17 = vld [vmem:[#allocation8 + $0x10] sm:$0xff]  ;;  %v813_v18 = vld [vmem:[#allocation8 + $0x18] sm:$0xff]  ;;  %v3810_v21 = vpack.c.bf16 %v811_v14, %v810_v13  ;;  %v814_v23 = vld [vmem:[#allocation8 + $0x20] sm:$0xff] }
  0xe0   :  { %3495 = vmatpush3.msra.mxu1 %v220_v6  ;;  %3496 = vmatprep.mubr.msk.f32.mxu1 %vm4767_vm0, %v5466_v0  ;;  %v215_v19 = vld [vmem:[#allocation2 + $0x30] sm:$0xff]  ;;  %v216_v20 = vld [vmem:[#allocation2 + $0x38] sm:$0xff]  ;;  %v3814_v22 = vpack.c.bf16 %v813_v18, %v812_v17  ;;  %v815_v24 = vld [vmem:[#allocation8 + $0x28] sm:$0xff] }
  0xe1   :  { %3492 = vmatmul.mubr.msk.f32.vlgmr.msra.gmra.mrb[2].mxu0 %vm225_vm1, %v211_v7  ;;  %3497 = vmatmul.mubr.msk.f32.vlgmr.msra.gmra.mrb[2].mxu1 %vm225_vm1, %v212_v8  ;;  %v3818_v25 = vpack.c.bf16 %v815_v24, %v814_v23  ;;  %v816_v26 = vld [vmem:[#allocation8 + $0x30] sm:$0xff]  ;;  %v817_v27 = vld [vmem:[#allocation8 + $0x38] sm:$0xff]  ;;  %v818_v29 = vld [vmem:[#allocation8 + $0x40] sm:$0xff] }
  0xe2   :  { %3499 = vmatprep.subr.mxu0 %v5466_v0  ;;  %3501 = vmatprep.mubr.msk.f32.mxu0 %vm4767_vm0, %v5466_v0  ;;  %v3822_v28 = vpack.c.bf16 %v817_v27, %v816_v26  ;;  %v819_v30 = vld [vmem:[#allocation8 + $0x48] sm:$0xff]  ;;  %v820_v32 = vld [vmem:[#allocation8 + $0x50] sm:$0xff]  ;;  %v821_v33 = vld [vmem:[#allocation8 + $0x58] sm:$0xff] }
  0xe3   :  { %3500 = vmatpush3.msra.mxu0 %v221_v9  ;;  %3504 = vmatprep.subr.mxu1 %v5466_v0  ;;  %v3826_v31 = vpack.c.bf16 %v819_v30, %v818_v29  ;;  %v3830_v34 = vpack.c.bf16 %v821_v33, %v820_v32  ;;  %v822_v35 = vld [vmem:[#allocation8 + $0x60] sm:$0xff]  ;;  %v823_v36 = vld [vmem:[#allocation8 + $0x68] sm:$0xff]  ;;  %v824_v38 = vld [vmem:[#allocation8 + $0x70] sm:$0xff] }
  0xe4   :  { %3505 = vmatpush3.msra.mxu1 %v222_v10  ;;  %3506 = vmatprep.mubr.msk.f32.mxu1 %vm4767_vm0, %v5466_v0  ;;  %v3834_v37 = vpack.c.bf16 %v823_v36, %v822_v35  ;;  %v825_v39 = vld [vmem:[#allocation8 + $0x78] sm:$0xff]  ;;  %v1147_v41 = vld [vmem:[#allocation11] sm:$0xff]  ;;  %v1148_v42 = vld [vmem:[#allocation11 + $0x8] sm:$0xff] }
  0xe5   :  { %3502 = vmatmul.mubr.msk.f32.vlgmr.msra.gmra.mrb[4].mxu0 %vm225_vm1, %v213_v11  ;;  %3507 = vmatmul.mubr.msk.f32.vlgmr.msra.gmra.mrb[4].mxu1 %vm225_vm1, %v214_v12  ;;  %v3838_v40 = vpack.c.bf16 %v825_v39, %v824_v38  ;;  %v3874_v43 = vpack.c.bf16 %v1148_v42, %v1147_v41  ;;  %v946_v44 = vld [vmem:[#allocation10] sm:$0xff]  ;;  %v947_v45 = vld [vmem:[#allocation10 + $0x8] sm:$0xff]  ;;  %v948_v47 = vld [vmem:[#allocation10 + $0x10] sm:$0xff] }
  0xe6   :  { %3509 = vmatprep.subr.mxu0 %v5466_v0  ;;  %3511 = vmatprep.mubr.msk.f32.mxu0 %vm4767_vm0, %v5466_v0  ;;  %v3842_v46 = vpack.c.bf16 %v947_v45, %v946_v44  ;;  %v949_v48 = vld [vmem:[#allocation10 + $0x18] sm:$0xff]  ;;  %v950_v50 = vld [vmem:[#allocation10 + $0x20] sm:$0xff]  ;;  %v951_v51 = vld [vmem:[#allocation10 + $0x28] sm:$0xff] }
  0xe7   :  { %3510 = vmatpush3.msra.mxu0 %v223_v15  ;;  %3514 = vmatprep.subr.mxu1 %v5466_v0  ;;  %v3846_v49 = vpack.c.bf16 %v949_v48, %v948_v47  ;;  %v3850_v52 = vpack.c.bf16 %v951_v51, %v950_v50  ;;  %v952_v53 = vld [vmem:[#allocation10 + $0x30] sm:$0xff]  ;;  %v953_v54 = vld [vmem:[#allocation10 + $0x38] sm:$0xff]  ;;  %v954_v56 = vld [vmem:[#allocation10 + $0x40] sm:$0xff] }
  0xe8   :  { %3515 = vmatpush3.msra.mxu1 %v224_v16  ;;  %3516 = vmatprep.mubr.msk.f32.mxu1 %vm4767_vm0, %v5466_v0  ;;  %v3854_v55 = vpack.c.bf16 %v953_v54, %v952_v53  ;;  %v955_v57 = vld [vmem:[#allocation10 + $0x48] sm:$0xff]  ;;  %v956_v59 = vld [vmem:[#allocation10 + $0x50] sm:$0xff]  ;;  %v957_v60 = vld [vmem:[#allocation10 + $0x58] sm:$0xff] }
  0xe9   :  { %3512 = vmatmul.mubr.msk.f32.vlgmr.msra.gmra.mrb[6].mxu0 %vm225_vm1, %v215_v19  ;;  %3517 = vmatmul.mubr.msk.f32.vlgmr.msra.gmra.mrb[6].mxu1 %vm225_vm1, %v216_v20  ;;  %v3858_v58 = vpack.c.bf16 %v955_v57, %v954_v56  ;;  %v3862_v61 = vpack.c.bf16 %v957_v60, %v956_v59  ;;  %v958_v62 = vld [vmem:[#allocation10 + $0x60] sm:$0xff]  ;;  %v959_v63 = vld [vmem:[#allocation10 + $0x68] sm:$0xff]  ;;  %v1149_v2 = vld [vmem:[#allocation11 + $0x10] sm:$0xff] }
  0xea   :  { %3811 = vmatprep.subr.bf16.mxu0 %v3810_v21  ;;  %3843 = vmatprep.subr.bf16.mxu1 %v3842_v46  ;;  %v3866_v1 = vpack.c.bf16 %v959_v63, %v958_v62  ;;  %v1150_v3 = vld [vmem:[#allocation11 + $0x18] sm:$0xff]  ;;  %v1151_v9 = vld [vmem:[#allocation11 + $0x20] sm:$0xff]  ;;  %v1152_v10 = vld [vmem:[#allocation11 + $0x28] sm:$0xff] }
  0xeb   :  { %3813 = vmatpush3.bf16.msra.mxu0 %v3810_v21  ;;  %3845 = vmatpush3.bf16.msra.mxu1 %v3842_v46  ;;  %v3878_v6 = vpack.c.bf16 %v1150_v3, %v1149_v2  ;;  %v3882_v13 = vpack.c.bf16 %v1152_v10, %v1151_v9  ;;  %v1153_v16 = vld [vmem:[#allocation11 + $0x30] sm:$0xff]  ;;  %v1154_v17 = vld [vmem:[#allocation11 + $0x38] sm:$0xff]  ;;  %v1155_v23 = vld [vmem:[#allocation11 + $0x40] sm:$0xff] }
  0xec   :  { %3815 = vmatprep.subr.bf16.mxu0 %v3814_v22  ;;  %3847 = vmatprep.subr.bf16.mxu1 %v3846_v49  ;;  %v3886_v20 = vpack.c.bf16 %v1154_v17, %v1153_v16  ;;  %v1156_v24 = vld [vmem:[#allocation11 + $0x48] sm:$0xff]  ;;  %v1158_v32 = vld [vmem:[#allocation11 + $0x58] sm:$0xff]  ;;  %v5074_v41 = vld [vmem:[#allocation7 + $0x10] sm:$0xff] }
  0xed   :  { %v3890_v27 = vpack.c.bf16 %v1156_v24, %v1155_v23  ;;  %v1160_v35 = vld [vmem:[#allocation11 + $0x68] sm:$0xff]  ;;  %v1162_v38 = vld [vmem:[#allocation11 + $0x78] sm:$0xff]  ;;  %v5086_v45 = vld [vmem:[#allocation7 + $0x30] sm:$0xff] }
  0xee   :  { %v5078_v42 = vld [vmem:[#allocation7 + $0x18] sm:$0xff]  ;;  %v5084_v44 = vld [vmem:[#allocation7 + $0x28] sm:$0xff]  ;;  %v960_v47 = vld [vmem:[#allocation10 + $0x70] sm:$0xff] }
  0xef   :  { %3817 = vmatpush3.bf16.msra.mxu0 %v3814_v22  ;;  %3849 = vmatpush3.bf16.msra.mxu1 %v3846_v49  ;;  %v5090_v46 = vld [vmem:[#allocation7 + $0x38] sm:$0xff]  ;;  %v5093_v50 = vld [vmem:[#allocation7 + $0x40] sm:$0xff]  ;;  %v5096_v51 = vld [vmem:[#allocation7 + $0x48] sm:$0xff] }
  0xf0   :  { %3819 = vmatprep.subr.bf16.mxu0 %v3818_v25  ;;  %3851 = vmatprep.subr.bf16.mxu1 %v3850_v52  ;;  %v961_v48 = vld [vmem:[#allocation10 + $0x78] sm:$0xff]  ;;  %v1345_v53 = vld [vmem:[#allocation11 + $0x88] sm:$0xff]  ;;  %v1555_v57 = vld [vmem:[#allocation11 + $0x100] sm:$0xff] }
  0xf1   :  { %v3870_v49 = vpack.c.bf16 %v961_v48, %v960_v47  ;;  %v5105_v56 = vld [vmem:[#allocation7 + $0x58] sm:$0xff]  ;;  %v5108_v60 = vld [vmem:[#allocation7 + $0x60] sm:$0xff]  ;;  %v1557_v62 = vld [vmem:[#allocation11 + $0x110] sm:$0xff] }
  0xf2   :  { %v1558_v63 = vld [vmem:[#allocation11 + $0x118] sm:$0xff]  ;;  %v5114_v2 = vld [vmem:[#allocation7 + $0x70] sm:$0xff]  ;;  %v1563_v10 = vld [vmem:[#allocation11 + $0x140] sm:$0xff] }
  0xf3   :  { %3821 = vmatpush3.bf16.msra.mxu0 %v3818_v25  ;;  %3853 = vmatpush3.bf16.msra.mxu1 %v3850_v52  ;;  %v1344_v52 = vld [vmem:[#allocation11 + $0x80] sm:$0xff]  ;;  %v5117_v3 = vld [vmem:[#allocation7 + $0x78] sm:$0xff]  ;;  %v1568_v17 = vld [vmem:[#allocation11 + $0x168] sm:$0xff] }
  0xf4   :  { %3823 = vmatprep.subr.bf16.mxu0 %v3822_v28  ;;  %3855 = vmatprep.subr.bf16.mxu1 %v3854_v55  ;;  %v5099_v54 = vpack.c.bf16 %v1345_v53, %v1344_v52  ;;  %v1567_v16 = vld [vmem:[#allocation11 + $0x160] sm:$0xff] }
  0xf7   :  { %3825 = vmatpush3.bf16.msra.mxu0 %v3822_v28  ;;  %3857 = vmatpush3.bf16.msra.mxu1 %v3854_v55  ;;  %v5069_v28 = vld [vmem:[#allocation7] sm:$0xff]  ;;  %v5102_v55 = vld [vmem:[#allocation7 + $0x50] sm:$0xff] }
  0xf8   :  { %3827 = vmatprep.subr.bf16.mxu0 %v3826_v31  ;;  %3859 = vmatprep.subr.bf16.mxu1 %v3858_v58 }
  0xfb   :  { %3829 = vmatpush3.bf16.msra.mxu0 %v3826_v31  ;;  %3861 = vmatpush3.bf16.msra.mxu1 %v3858_v58  ;;  %v1157_v31 = vld [vmem:[#allocation11 + $0x50] sm:$0xff]  ;;  %v1556_v58 = vld [vmem:[#allocation11 + $0x108] sm:$0xff] }
  0xfc   :  { %3831 = vmatprep.subr.bf16.mxu0 %v3830_v34  ;;  %3863 = vmatprep.subr.bf16.mxu1 %v3862_v61  ;;  %v3894_v33 = vpack.c.bf16 %v1158_v32, %v1157_v31  ;;  %v3938_v59 = vpack.c.bf16 %v1556_v58, %v1555_v57  ;;  %v1350_v58 = vld [vmem:[#allocation11 + $0xb0] sm:$0xff] }
  0xff   :  { %3833 = vmatpush3.bf16.msra.mxu0 %v3830_v34  ;;  %3865 = vmatpush3.bf16.msra.mxu1 %v3862_v61  ;;  %v1159_v34 = vld [vmem:[#allocation11 + $0x60] sm:$0xff]  ;;  %v5111_v61 = vld [vmem:[#allocation7 + $0x68] sm:$0xff] }
 0x100   :  { %3835 = vmatprep.subr.bf16.mxu0 %v3834_v37  ;;  %3867 = vmatprep.subr.bf16.mxu1 %v3866_v1  ;;  %v3898_v36 = vpack.c.bf16 %v1160_v35, %v1159_v34 }
 0x103   :  { %3837 = vmatpush3.bf16.msra.mxu0 %v3834_v37  ;;  %3869 = vmatpush3.bf16.msra.mxu1 %v3866_v1  ;;  %v1161_v37 = vld [vmem:[#allocation11 + $0x70] sm:$0xff]  ;;  %v3942_v1 = vpack.c.bf16 %v1558_v63, %v1557_v62 }
 0x104   :  { %3839 = vmatprep.subr.bf16.mxu0 %v3838_v40  ;;  %v3902_v39 = vpack.c.bf16 %v1162_v38, %v1161_v37  ;;  %3871 = vmatprep.subr.bf16.mxu1 %v3870_v49  ;;  %v1348_v37 = vld [vmem:[#allocation11 + $0xa0] sm:$0xff]  ;;  %v1349_v38 = vld [vmem:[#allocation11 + $0xa8] sm:$0xff] }
 0x105   :  { %v3914_v53 = vpack.c.bf16 %v1349_v38, %v1348_v37 }
 0x107   :  { %3841 = vmatpush3.bf16.msra.mxu0 %v3838_v40  ;;  %v5072_v40 = vld [vmem:[#allocation7 + $0x8] sm:$0xff]  ;;  %3873 = vmatpush3.bf16.msra.mxu1 %v3870_v49 }
 0x108   :  { %3875 = vmatprep.subr.bf16.mxu0 %v3874_v43  ;;  %3907 = vmatprep.subr.bf16.mxu1 %v5099_v54 }
 0x1b0   :  { %v295_v4 = vpop.f32.mrb[0].mxu0  ;;  %v368_v5 = vpop.f32.mrb[0].mxu1 }
 0x1b1   :  { %v3483_v7 = vpop.f32.mrb[1].mxu0  ;;  %v3488_v8 = vpop.f32.mrb[1].mxu1  ;;  %3551 = vmatprep.mubr.f32.mxu0 %v295_v4  ;;  %v1559_v4 = vld [vmem:[#allocation11 + $0x120] sm:$0xff] }
 0x1b2   :  { %3552 = vmatmul.mubr.f32.vlgmr.msra.gmra.mrb[8].mxu0 %v368_v5  ;;  %v1560_v5 = vld [vmem:[#allocation11 + $0x128] sm:$0xff]  ;;  %v1561_v7 = vld [vmem:[#allocation11 + $0x130] sm:$0xff]  ;;  %v1562_v8 = vld [vmem:[#allocation11 + $0x138] sm:$0xff] }
 0x1b3   :  { %3877 = vmatpush3.bf16.msra.mxu0 %v3874_v43  ;;  %v5080_v43 = vld [vmem:[#allocation7 + $0x20] sm:$0xff]  ;;  %v3950_v9 = vpack.c.bf16 %v1562_v8, %v1561_v7  ;;  %v1353_v8 = vld [vmem:[#allocation11 + $0xc8] sm:$0xff] }
 0x1b4   :  { %v441_v11 = vpop.f32.mrb[2].mxu0  ;;  %v514_v12 = vpop.f32.mrb[2].mxu1  ;;  %3879 = vmatprep.subr.bf16.mxu0 %v3878_v6 }
 0x1b5   :  { %3554 = vmatprep.mubr.f32.mxu0 %v441_v11  ;;  %v3493_v14 = vpop.f32.mrb[3].mxu0  ;;  %v3498_v15 = vpop.f32.mrb[3].mxu1  ;;  %v1564_v11 = vld [vmem:[#allocation11 + $0x148] sm:$0xff] }
 0x1b6   :  { %3555 = vmatmul.mubr.f32.gmra.mrb[10].mxu0 %v514_v12  ;;  %v3954_v12 = vpack.c.bf16 %v1564_v11, %v1563_v10  ;;  %v1566_v14 = vld [vmem:[#allocation11 + $0x158] sm:$0xff] }
 0x1b7   :  { %3881 = vmatpush3.bf16.msra.mxu0 %v3878_v6  ;;  %v3946_v6 = vpack.c.bf16 %v1560_v5, %v1559_v4 }
 0x1b8   :  { %v587_v18 = vpop.f32.mrb[4].mxu0  ;;  %v660_v19 = vpop.f32.mrb[4].mxu1  ;;  %3883 = vmatprep.subr.bf16.mxu0 %v3882_v13 }
 0x1b9   :  { %3557 = vmatprep.mubr.f32.mxu0 %v587_v18  ;;  %v3503_v21 = vpop.f32.mrb[5].mxu0  ;;  %v3508_v22 = vpop.f32.mrb[5].mxu1  ;;  %v3962_v18 = vpack.c.bf16 %v1568_v17, %v1567_v16  ;;  %v1357_v16 = vld [vmem:[#allocation11 + $0xe8] sm:$0xff] }
 0x1ba   :  { %3558 = vmatmul.mubr.f32.gmra.mrb[12].mxu0 %v660_v19  ;;  %v1569_v19 = vld [vmem:[#allocation11 + $0x170] sm:$0xff]  ;;  %v3227_v22 = vld [vmem:[%s5446_s4] ss:$0 sm:$0xff] }
 0x1bb   :  { %3885 = vmatpush3.bf16.msra.mxu0 %v3882_v13  ;;  %v1565_v13 = vld [vmem:[#allocation11 + $0x150] sm:$0xff] }
 0x1bc   :  { %v733_v25 = vpop.f32.mrb[6].mxu0  ;;  %v806_v26 = vpop.f32.mrb[6].mxu1  ;;  %3887 = vmatprep.subr.bf16.mxu0 %v3886_v20  ;;  %v3958_v15 = vpack.c.bf16 %v1566_v14, %v1565_v13  ;;  %v1355_v13 = vld [vmem:[#allocation11 + $0xd8] sm:$0xff] }
 0x1bd   :  { %3560 = vmatprep.mubr.f32.mxu0 %v733_v25  ;;  %v3513_v29 = vpop.f32.mrb[7].mxu0  ;;  %v3518_v30 = vpop.f32.mrb[7].mxu1 }
 0x1be   :  { %3561 = vmatmul.mubr.f32.gmra.mrb[14].mxu0 %v806_v26  ;;  %v1347_v29 = vld [vmem:[#allocation11 + $0x98] sm:$0xff] }
 0x1bf   :  { %3889 = vmatpush3.bf16.msra.mxu0 %v3886_v20  ;;  %3639 = vmatprep.mubr.f32.mxu0 %v5069_v28  ;;  %v1570_v20 = vld [vmem:[#allocation11 + $0x178] sm:$0xff] }
 0x1c0   :  { %3891 = vmatprep.subr.bf16.mxu0 %v3890_v27  ;;  %v3966_v21 = vpack.c.bf16 %v1570_v20, %v1569_v19  ;;  %v1359_v19 = vld [vmem:[#allocation11 + $0xf8] sm:$0xff] }
 0x1c3   :  { %3893 = vmatpush3.bf16.msra.mxu0 %v3890_v27  ;;  %v1346_v27 = vld [vmem:[#allocation11 + $0x90] sm:$0xff] }
 0x1c4   :  { %3895 = vmatprep.subr.bf16.mxu0 %v3894_v33  ;;  %v3910_v35 = vpack.c.bf16 %v1347_v29, %v1346_v27 }
 0x1c7   :  { %3897 = vmatpush3.bf16.msra.mxu0 %v3894_v33 }
 0x1c8   :  { %3899 = vmatprep.subr.bf16.mxu0 %v3898_v36 }
 0x1cb   :  { %3901 = vmatpush3.bf16.msra.mxu0 %v3898_v36 }
 0x1cc   :  { %3903 = vmatprep.subr.bf16.mxu0 %v3902_v39 }
 0x1cf   :  { %3905 = vmatpush3.bf16.msra.mxu0 %v3902_v39 }
 0x1d0   :  { %3939 = vmatprep.subr.bf16.mxu0 %v3938_v59 }
 0x1d2   :  { %3640 = vmatmul.mubr.f32.vlgmr.msra.gmra.mrb[16].mxu0 %v5072_v40 }
 0x1d3   :  { %3642 = vmatprep.mubr.f32.mxu0 %v5074_v41  ;;  %3941 = vmatpush3.bf16.msra.mxu0 %v3938_v59  ;;  %v1351_v59 = vld [vmem:[#allocation11 + $0xb8] sm:$0xff] }
 0x1d4   :  { %3943 = vmatprep.subr.bf16.mxu0 %v3942_v1 }
 0x1d6   :  { %3643 = vmatmul.mubr.f32.gmra.mrb[18].mxu0 %v5078_v42 }
 0x1d7   :  { %3645 = vmatprep.mubr.f32.mxu0 %v5080_v43  ;;  %3945 = vmatpush3.bf16.msra.mxu0 %v3942_v1 }
 0x1d8   :  { %3947 = vmatprep.subr.bf16.mxu0 %v3946_v6 }
 0x1da   :  { %3646 = vmatmul.mubr.f32.gmra.mrb[20].mxu0 %v5084_v44 }
 0x1db   :  { %3648 = vmatprep.mubr.f32.mxu0 %v5086_v45  ;;  %3949 = vmatpush3.bf16.msra.mxu0 %v3946_v6  ;;  %v3918_v6 = vpack.c.bf16 %v1351_v59, %v1350_v58 }
 0x1dc   :  { %3951 = vmatprep.subr.bf16.mxu0 %v3950_v9 }
 0x1de   :  { %3649 = vmatmul.mubr.f32.gmra.mrb[22].mxu0 %v5090_v46 }
 0x1df   :  { %3651 = vmatprep.mubr.f32.mxu0 %v5093_v50  ;;  %3953 = vmatpush3.bf16.msra.mxu0 %v3950_v9 }
 0x1e0   :  { %3955 = vmatprep.subr.bf16.mxu0 %v3954_v12 }
 0x1e2   :  { %3652 = vmatmul.mubr.f32.gmra.mrb[24].mxu0 %v5096_v51 }
 0x1e3   :  { %3654 = vmatprep.mubr.f32.mxu0 %v5102_v55  ;;  %3957 = vmatpush3.bf16.msra.mxu0 %v3954_v12  ;;  %v1354_v12 = vld [vmem:[#allocation11 + $0xd0] sm:$0xff] }
 0x1e4   :  { %3959 = vmatprep.subr.bf16.mxu0 %v3958_v15  ;;  %v3926_v14 = vpack.c.bf16 %v1355_v13, %v1354_v12 }
 0x1e6   :  { %3655 = vmatmul.mubr.f32.gmra.mrb[26].mxu0 %v5105_v56 }
 0x1e7   :  { %3657 = vmatprep.mubr.f32.mxu0 %v5108_v60  ;;  %3961 = vmatpush3.bf16.msra.mxu0 %v3958_v15  ;;  %v1356_v15 = vld [vmem:[#allocation11 + $0xe0] sm:$0xff] }
 0x1e8   :  { %3963 = vmatprep.subr.bf16.mxu0 %v3962_v18  ;;  %v3930_v17 = vpack.c.bf16 %v1357_v16, %v1356_v15 }
 0x1ea   :  { %3658 = vmatmul.mubr.f32.gmra.mrb[28].mxu0 %v5111_v61 }
 0x1eb   :  { %3660 = vmatprep.mubr.f32.mxu0 %v5114_v2  ;;  %3965 = vmatpush3.bf16.msra.mxu0 %v3962_v18  ;;  %v1358_v18 = vld [vmem:[#allocation11 + $0xf0] sm:$0xff] }
 0x1ec   :  { %3967 = vmatprep.subr.bf16.mxu0 %v3966_v21  ;;  %v3934_v20 = vpack.c.bf16 %v1359_v19, %v1358_v18 }
 0x1ee   :  { %3661 = vmatmul.mubr.f32.gmra.mrb[30].mxu0 %v5117_v3 }
 0x1ef   :  { %3751 = vmatprep.mubr.f32.mxu0 %v5069_v28  ;;  %3969 = vmatpush3.bf16.msra.mxu0 %v3966_v21 }
 0x1f2   :  { %3752 = vmatmul.mubr.f32.vlgmr.msra.gmra.mrb[32].mxu0 %v5072_v40 }
 0x1f3   :  { %3754 = vmatprep.mubr.f32.mxu0 %v5074_v41 }
 0x1f6   :  { %3755 = vmatmul.mubr.f32.gmra.mrb[34].mxu0 %v5078_v42 }
 0x1f7   :  { %3757 = vmatprep.mubr.f32.mxu0 %v5080_v43 }
 0x1fa   :  { %3758 = vmatmul.mubr.f32.gmra.mrb[36].mxu0 %v5084_v44 }
 0x1fb   :  { %3760 = vmatprep.mubr.f32.mxu0 %v5086_v45 }
 0x1fe   :  { %3761 = vmatmul.mubr.f32.gmra.mrb[38].mxu0 %v5090_v46 }
 0x1ff   :  { %3763 = vmatprep.mubr.f32.mxu0 %v5093_v50 }
 0x202   :  { %3764 = vmatmul.mubr.f32.gmra.mrb[40].mxu0 %v5096_v51 }
 0x203   :  { %3766 = vmatprep.mubr.f32.mxu0 %v5102_v55 }
 0x206   :  { %3767 = vmatmul.mubr.f32.gmra.mrb[42].mxu0 %v5105_v56 }
 0x207   :  { %3769 = vmatprep.mubr.f32.mxu0 %v5108_v60 }
 0x20a   :  { %3770 = vmatmul.mubr.f32.gmra.mrb[44].mxu0 %v5111_v61 }
 0x20b   :  { %3772 = vmatprep.mubr.f32.mxu0 %v5114_v2 }
 0x20e   :  { %3773 = vmatmul.mubr.f32.gmra.mrb[46].mxu0 %v5117_v3 }
 0x20f   :  { %2132 = vmatprep.mubr.f32.mxu0 %v5466_v0 }
 0x285   :  { %v3553_v23 = vpop.f32.mrb[8].mxu0 }
 0x286   :  { %v905_v24 = vadd.f32 %v3553_v23, %v3227_v22  ;;  %v899_v25 = vpop.f32.mrb[9].mxu0 }
 0x287   :  { %v900_v26 = vadd.f32 %v3227_v22, %v899_v25 }
 0x288   :  { %v939_v32 = vmax.f32 %v905_v24, 0.0 }
 0x289   :  { %v938_v30 = vmax.f32 %v900_v26, 0.0  ;;  %v3556_v31 = vpop.f32.mrb[10].mxu0 }
 0x28a   :  { %v915_v33 = vadd.f32 %v3556_v31, %v3227_v22  ;;  %v909_v34 = vpop.f32.mrb[11].mxu0 }
 0x28b   :  { %v910_v36 = vadd.f32 %v3227_v22, %v909_v34  ;;  %3595 = vmatprep.mubr.f32.mxu1 %v938_v30 }
 0x28c   :  { %v941_v39 = vmax.f32 %v915_v33, 0.0  ;;  %3596 = vmatmul.mubr.f32.vlgmr.msra.gmra.mrb[8].mxu1 %v939_v32 }
 0x28d   :  { %v940_v47 = vmax.f32 %v910_v36, 0.0  ;;  %3909 = vmatpush3.bf16.msra.mxu1 %v5099_v54  ;;  %v3559_v48 = vpop.f32.mrb[12].mxu0  ;;  %v1352_v54 = vld [vmem:[#allocation11 + $0xc0] sm:$0xff] }
 0x28e   :  { %v925_v49 = vadd.f32 %v3559_v48, %v3227_v22  ;;  %v919_v52 = vpop.f32.mrb[13].mxu0  ;;  %3911 = vmatprep.subr.bf16.mxu1 %v3910_v35  ;;  %v3922_v11 = vpack.c.bf16 %v1353_v8, %v1352_v54 }
 0x28f   :  { %v920_v57 = vadd.f32 %v3227_v22, %v919_v52  ;;  %3598 = vmatprep.mubr.f32.mxu1 %v940_v47 }
 0x290   :  { %v943_v62 = vmax.f32 %v925_v49, 0.0  ;;  %3599 = vmatmul.mubr.f32.gmra.mrb[10].mxu1 %v941_v39 }
 0x291   :  { %v942_v63 = vmax.f32 %v920_v57, 0.0  ;;  %3913 = vmatpush3.bf16.msra.mxu1 %v3910_v35  ;;  %v3562_v1 = vpop.f32.mrb[14].mxu0 }
 0x292   :  { %v935_v4 = vadd.f32 %v3562_v1, %v3227_v22  ;;  %v929_v5 = vpop.f32.mrb[15].mxu0  ;;  %3915 = vmatprep.subr.bf16.mxu1 %v3914_v53 }
 0x293   :  { %v930_v7 = vadd.f32 %v3227_v22, %v929_v5  ;;  %3601 = vmatprep.mubr.f32.mxu1 %v942_v63 }
 0x294   :  { %v945_v9 = vmax.f32 %v935_v4, 0.0  ;;  %3602 = vmatmul.mubr.f32.gmra.mrb[12].mxu1 %v943_v62 }
 0x295   :  { %v944_v10 = vmax.f32 %v930_v7, 0.0  ;;  %3917 = vmatpush3.bf16.msra.mxu1 %v3914_v53 }
 0x296   :  { %3919 = vmatprep.subr.bf16.mxu1 %v3918_v6 }
 0x297   :  { %3604 = vmatprep.mubr.f32.mxu1 %v944_v10 }
 0x298   :  { %3605 = vmatmul.mubr.f32.gmra.mrb[14].mxu1 %v945_v9 }
 0x299   :  { %3921 = vmatpush3.bf16.msra.mxu1 %v3918_v6  ;;  %3695 = vmatprep.mubr.f32.mxu1 %v5069_v28 }
 0x29a   :  { %3923 = vmatprep.subr.bf16.mxu1 %v3922_v11 }
 0x29d   :  { %3925 = vmatpush3.bf16.msra.mxu1 %v3922_v11 }
 0x29e   :  { %3927 = vmatprep.subr.bf16.mxu1 %v3926_v14 }
 0x2a1   :  { %3929 = vmatpush3.bf16.msra.mxu1 %v3926_v14 }
 0x2a2   :  { %3931 = vmatprep.subr.bf16.mxu1 %v3930_v17 }
 0x2a5   :  { %3933 = vmatpush3.bf16.msra.mxu1 %v3930_v17  ;;  %v3641_v21 = vpop.f32.mrb[16].mxu0 }
 0x2a6   :  { %3935 = vmatprep.subr.bf16.mxu1 %v3934_v20  ;;  %v1229_v22 = vpop.f32.mrb[17].mxu0 }
 0x2a9   :  { %3937 = vmatpush3.bf16.msra.mxu1 %v3934_v20  ;;  %v3644_v23 = vpop.f32.mrb[18].mxu0  ;;  %v1911_v20 = vld [vmem:[#allocation14 + $0x8] sm:$0xff] }
 0x2aa   :  { %v1239_v24 = vpop.f32.mrb[19].mxu0 }
 0x2ac   :  { %3696 = vmatmul.mubr.f32.vlgmr.msra.gmra.mrb[16].mxu1 %v5072_v40 }
 0x2ad   :  { %3698 = vmatprep.mubr.f32.mxu1 %v5074_v41  ;;  %v3647_v28 = vpop.f32.mrb[20].mxu0 }
 0x2ae   :  { %v1249_v40 = vpop.f32.mrb[21].mxu0  ;;  %v1313_v32 = vrot.slane %v3647_v28, 6 }
 0x2af   :  { %v1312_v31 = vrot.slane %v1249_v40, 6  ;;  %v1910_v40 = vld [vmem:[#allocation14] sm:$0xff] }
 0x2b0   :  { %3699 = vmatmul.mubr.f32.gmra.mrb[18].mxu1 %v5078_v42 }
 0x2b1   :  { %3701 = vmatprep.mubr.f32.mxu1 %v5080_v43  ;;  %v3650_v41 = vpop.f32.mrb[22].mxu0 }
 0x2b2   :  { %v1259_v42 = vpop.f32.mrb[23].mxu0  ;;  %v1315_v37 = vrot.slane %v3650_v41, 6  ;;  %v1914_v41 = vld [vmem:[#allocation14 + $0x20] sm:$0xff] }
 0x2b3   :  { %v1314_v35 = vrot.slane %v1259_v42, 6  ;;  %v1912_v42 = vld [vmem:[#allocation14 + $0x10] sm:$0xff] }
 0x2b4   :  { %3702 = vmatmul.mubr.f32.gmra.mrb[20].mxu1 %v5084_v44 }
 0x2b5   :  { %3704 = vmatprep.mubr.f32.mxu1 %v5086_v45  ;;  %v3653_v43 = vpop.f32.mrb[24].mxu0 }
 0x2b6   :  { %v1269_v44 = vpop.f32.mrb[25].mxu0  ;;  %v1317_v47 = vrot.slane %v3653_v43, 6 }
 0x2b7   :  { %v1316_v38 = vrot.slane %v1269_v44, 6  ;;  %v3972_v44 = vpack.c.bf16 %v1914_v41, %v1910_v40  ;;  %v1935_v40 = vld [vmem:[#allocation14 + $0xc8] sm:$0xff] }
 0x2b8   :  { %3705 = vmatmul.mubr.f32.gmra.mrb[22].mxu1 %v5090_v46  ;;  %v1939_v41 = vld [vmem:[#allocation14 + $0xe8] sm:$0xff] }
 0x2b9   :  { %3707 = vmatprep.mubr.f32.mxu1 %v5093_v50  ;;  %v3656_v45 = vpop.f32.mrb[26].mxu0 }
 0x2ba   :  { %v1279_v46 = vpop.f32.mrb[27].mxu0  ;;  %v1319_v57 = vrot.slane %v3656_v45, 6  ;;  %v1916_v45 = vld [vmem:[#allocation14 + $0x30] sm:$0xff] }
 0x2bb   :  { %v1318_v52 = vrot.slane %v1279_v46, 6  ;;  %v4004_v46 = vpack.c.bf16 %v1916_v45, %v1912_v42  ;;  %v1937_v42 = vld [vmem:[#allocation14 + $0xd8] sm:$0xff] }
 0x2bc   :  { %3708 = vmatmul.mubr.f32.gmra.mrb[24].mxu1 %v5096_v51  ;;  %v1324_v51 = vlaneseq  ;;  %v1941_v45 = vld [vmem:[#allocation14 + $0xf8] sm:$0xff] }
 0x2bd   :  { %3710 = vmatprep.mubr.f32.mxu1 %v5102_v55  ;;  %v3659_v50 = vpop.f32.mrb[28].mxu0  ;;  %v1309_v55 = vrot.slane %v3641_v21, 6  ;;  %v1915_v21 = vld [vmem:[#allocation14 + $0x28] sm:$0xff] }
 0x2be   :  { %v1289_v25 = vpop.f32.mrb[29].mxu0  ;;  %v5158_v26 = vshrl.u32 %v1324_v51, 7  ;;  %v1321_v1 = vrot.slane %v3659_v50, 6  ;;  %v1919_v51 = vld [vmem:[#allocation14 + $0x48] sm:$0xff] }
 0x2bf   :  { %v1320_v59 = vrot.slane %v1289_v25, 6  ;;  %v1925_v25 = vld [vmem:[#allocation14 + $0x78] sm:$0xff] }
 0x2c0   :  { %3711 = vmatmul.mubr.f32.gmra.mrb[26].mxu1 %v5105_v56  ;;  %v1308_v56 = vrot.slane %v1229_v22, 6  ;;  %vm1326_vm2 = vcmp.lt.s32.totalorder %v5158_v26, 2  ;;  %v1913_v22 = vld [vmem:[#allocation14 + $0x18] sm:$0xff]  ;;  %vm1521_vm10 = vcmp.lt.s32.totalorder %v5158_v26, 1  ;;  %vm1772_vm11 = vcmp.ge.s32.totalorder %v5158_v26, 2 }
 0x2c1   :  { %3713 = vmatprep.mubr.f32.mxu1 %v5108_v60  ;;  %v1310_v60 = vrot.slane %v1239_v24, 6  ;;  %v5183_v36 = vsel %vm1326_vm2, %v1312_v31, %v1313_v32  ;;  %v5187_v39 = vsel %vm1326_vm2, %v1313_v32, %v1314_v35  ;;  %v5191_v48 = vsel %vm1326_vm2, %v1314_v35, %v1315_v37  ;;  %v1917_v24 = vld [vmem:[#allocation14 + $0x38] sm:$0xff]  ;;  %v1920_v32 = vld [vmem:[#allocation14 + $0x50] sm:$0xff] }
 0x2c2   :  { %v5167_v29 = vsel %vm1326_vm2, %v1308_v56, %v1309_v55  ;;  %v5195_v49 = vsel %vm1326_vm2, %v1315_v37, %v1316_v38  ;;  %v5199_v53 = vsel %vm1326_vm2, %v1316_v38, %v1317_v47  ;;  %v5203_v58 = vsel %vm1326_vm2, %v1317_v47, %v1318_v52  ;;  %v1924_v37 = vld [vmem:[#allocation14 + $0x70] sm:$0xff] }
 0x2c3   :  { %v5171_v30 = vsel %vm1326_vm2, %v1309_v55, %v1310_v60  ;;  %v5207_v63 = vsel %vm1326_vm2, %v1318_v52, %v1319_v57  ;;  %v5211_v4 = vsel %vm1326_vm2, %v1319_v57, %v1320_v59  ;;  %v5219_v54 = vsel %vm1326_vm2, %v1320_v59, %v1321_v1  ;;  %v1923_v55 = vld [vmem:[#allocation14 + $0x68] sm:$0xff]  ;;  %v1929_v59 = vld [vmem:[#allocation14 + $0x98] sm:$0xff] }
 0x2c4   :  { %3714 = vmatmul.mubr.f32.gmra.mrb[28].mxu1 %v5111_v61  ;;  %v3662_v61 = vpop.f32.mrb[30].mxu0  ;;  %v4002_v28 = vpack.c.bf16 %v1917_v24, %v1913_v22  ;;  %v4008_v38 = vpack.c.bf16 %v1924_v37, %v1920_v32  ;;  %v1927_v52 = vld [vmem:[#allocation14 + $0x88] sm:$0xff]  ;;  %v1932_v24 = vld [vmem:[#allocation14 + $0xb0] sm:$0xff]  ;;  %v1945_v32 = vld [vmem:[#allocation14 + $0x118] sm:$0xff] }
 0x2c5   :  { %3716 = vmatprep.mubr.f32.mxu1 %v5114_v2  ;;  %v1323_v2 = vrot.slane %v3662_v61, 6  ;;  %v1299_v62 = vpop.f32.mrb[31].mxu0  ;;  %v1931_v57 = vld [vmem:[#allocation14 + $0xa8] sm:$0xff]  ;;  %v1949_v37 = vld [vmem:[#allocation14 + $0x138] sm:$0xff] }
 0x2c6   :  { %v1322_v5 = vrot.slane %v1299_v62, 6  ;;  %v5213_v6 = vpop.f32.mrb[32].mxu0  ;;  %4003 = vmatprep.subr.bf16.mxu0 %v4002_v28  ;;  %v3978_v62 = vpack.c.bf16 %v1931_v57, %v1927_v52  ;;  %v1946_v52 = vld [vmem:[#allocation14 + $0x120] sm:$0xff]  ;;  %v4018_v57 = vpack.c.bf16 %v1949_v37, %v1945_v32  ;;  %v1964_v37 = vld [vmem:[#allocation14 + $0x1b0] sm:$0xff] }
 0x2c7   :  { %v5163_v27 = vsel %vm1326_vm2, %v1323_v2, %v1308_v56  ;;  %v5215_v7 = vpop.f32.mrb[33].mxu0  ;;  %v1921_v56 = vld [vmem:[#allocation14 + $0x58] sm:$0xff]  ;;  %4005 = vmatpush1.bf16.msra.mxu0 %v4004_v46  ;;  %v1934_v46 = vld [vmem:[#allocation14 + $0xc0] sm:$0xff] }
 0x2c8   :  { %3717 = vmatmul.mubr.f32.gmra.mrb[30].mxu1 %v5117_v3  ;;  %v1311_v3 = vrot.slane %v3644_v23, 6  ;;  %v5225_v9 = vsel %vm1326_vm2, %v1321_v1, %v1322_v5  ;;  %v5233_v12 = vsel %vm1326_vm2, %v1322_v5, %v1323_v2  ;;  %v3970_v23 = vpack.c.bf16 %v1915_v21, %v1911_v20  ;;  %v1933_v1 = vld [vmem:[#allocation14 + $0xb8] sm:$0xff]  ;;  %v1926_v5 = vld [vmem:[#allocation14 + $0x80] sm:$0xff] }
 0x2c9   :  { %2061 = vmatprep.mubr.f32.mxu1 %v5466_v0  ;;  %v5221_v8 = vpop.f32.mrb[34].mxu0  ;;  %5475 = vst [vmem:[#allocation28_spill] sm:$0xff] %v5225_v9  ;;  %v4006_v61 = vpack.c.bf16 %v1925_v25, %v1921_v56  ;;  %v1930_v20 = vld [vmem:[#allocation14 + $0xa0] sm:$0xff]  ;;  %v4010_v21 = vpack.c.bf16 %v1933_v1, %v1929_v59  ;;  %v1940_v25 = vld [vmem:[#allocation14 + $0xf0] sm:$0xff] }
 0x2ca   :  { %v5175_v33 = vsel %vm1326_vm2, %v1310_v60, %v1311_v3  ;;  %v5179_v34 = vsel %vm1326_vm2, %v1311_v3, %v1312_v31  ;;  %v5227_v10 = vpop.f32.mrb[35].mxu0  ;;  %3971 = vmatprep.subr.bf16.mxu1 %v3970_v23  ;;  %v3974_v60 = vpack.c.bf16 %v1923_v55, %v1919_v51  ;;  %v1918_v3 = vld [vmem:[#allocation14 + $0x40] sm:$0xff]  ;;  %v3980_v22 = vpack.c.bf16 %v1930_v20, %v1926_v5  ;;  %v1928_v23 = vld [vmem:[#allocation14 + $0x90] sm:$0xff]  ;;  %v1951_v20 = vld [vmem:[#allocation14 + $0x148] sm:$0xff] }
 0x2cb   :  { %3973 = vmatpush1.bf16.msra.mxu1 %v3972_v44  ;;  %v1922_v31 = vld [vmem:[#allocation14 + $0x60] sm:$0xff]  ;;  %4007 = vmatprep.subr.bf16.mxu0 %v4006_v61  ;;  %v4012_v28 = vpack.c.bf16 %v1932_v24, %v1928_v23  ;;  %v3982_v44 = vpack.c.bf16 %v1939_v41, %v1935_v40  ;;  %v4014_v55 = vpack.c.bf16 %v1941_v45, %v1937_v42  ;;  %v1948_v1 = vld [vmem:[#allocation14 + $0x130] sm:$0xff]  ;;  %v1957_v24 = vld [vmem:[#allocation14 + $0x178] sm:$0xff] }
 0x2cc   :  { %3975 = vmatprep.subr.bf16.mxu1 %v3974_v60  ;;  %v3976_v35 = vpack.c.bf16 %v1922_v31, %v1918_v3  ;;  %4009 = vmatpush1.bf16.msra.mxu0 %v4008_v38  ;;  %v1938_v51 = vld [vmem:[#allocation14 + $0xe0] sm:$0xff]  ;;  %v1936_v60 = vld [vmem:[#allocation14 + $0xd0] sm:$0xff]  ;;  %v1943_v3 = vld [vmem:[#allocation14 + $0x108] sm:$0xff] }
 0x2cd   :  { %v5229_v11 = vpop.f32.mrb[36].mxu0  ;;  %4011 = vmatprep.subr.bf16.mxu0 %v4010_v21  ;;  %v3984_v56 = vpack.c.bf16 %v1938_v51, %v1934_v46  ;;  %v4016_v61 = vpack.c.bf16 %v1940_v25, %v1936_v60  ;;  %v1947_v31 = vld [vmem:[#allocation14 + $0x128] sm:$0xff]  ;;  %v1942_v38 = vld [vmem:[#allocation14 + $0x100] sm:$0xff]  ;;  %v1956_v45 = vld [vmem:[#allocation14 + $0x170] sm:$0xff] }
 0x2ce   :  { %v5235_v13 = vpop.f32.mrb[37].mxu0  ;;  %v3988_v59 = vpack.c.bf16 %v1946_v52, %v1942_v38  ;;  %v1955_v21 = vld [vmem:[#allocation14 + $0x168] sm:$0xff]  ;;  %v1954_v40 = vld [vmem:[#allocation14 + $0x160] sm:$0xff]  ;;  %v1965_v25 = vld [vmem:[#allocation14 + $0x1b8] sm:$0xff] }
 0x2cf   :  { %3977 = vmatpush1.bf16.msra.mxu1 %v3976_v35  ;;  %v3986_v35 = vpack.c.bf16 %v1947_v31, %v1943_v3  ;;  %v3990_v23 = vpack.c.bf16 %v1955_v21, %v1951_v20  ;;  %v1959_v51 = vld [vmem:[#allocation14 + $0x188] sm:$0xff]  ;;  %v1962_v3 = vld [vmem:[#allocation14 + $0x1a0] sm:$0xff] }
 0x2d0   :  { %3979 = vmatprep.subr.bf16.mxu1 %v3978_v62  ;;  %4013 = vmatpush1.bf16.msra.mxu0 %v4012_v28  ;;  %v1944_v62 = vld [vmem:[#allocation14 + $0x110] sm:$0xff]  ;;  %v1950_v28 = vld [vmem:[#allocation14 + $0x140] sm:$0xff]  ;;  %v1967_v38 = vld [vmem:[#allocation14 + $0x1c8] sm:$0xff] }
 0x2d1   :  { %v5237_v14 = vpop.f32.mrb[38].mxu0  ;;  %4015 = vmatprep.subr.bf16.mxu0 %v4014_v55  ;;  %v4020_v5 = vpack.c.bf16 %v1948_v1, %v1944_v62  ;;  %v3992_v42 = vpack.c.bf16 %v1954_v40, %v1950_v28  ;;  %v1963_v55 = vld [vmem:[#allocation14 + $0x1a8] sm:$0xff]  ;;  %v1973_v62 = vld [vmem:[#allocation14 + $0x1f8] sm:$0xff]  ;;  %v1966_v20 = vld [vmem:[#allocation14 + $0x1c0] sm:$0xff] }
 0x2d2   :  { %v5239_v15 = vpop.f32.mrb[39].mxu0  ;;  %v3994_v60 = vpack.c.bf16 %v1963_v55, %v1959_v51  ;;  %v1970_v21 = vld [vmem:[#allocation14 + $0x1e0] sm:$0xff]  ;;  %v1847_v28 = vld [vmem:[#allocation13 + $0x8] sm:$0xff] }
 0x2d3   :  { %3981 = vmatpush1.bf16.msra.mxu1 %v3980_v22  ;;  %v1953_v22 = vld [vmem:[#allocation14 + $0x158] sm:$0xff]  ;;  %v1851_v40 = vld [vmem:[#allocation13 + $0x28] sm:$0xff]  ;;  %v3228_v51 = vld [vmem:[%s5448_s6] ss:$0 sm:$0xff] }
 0x2d4   :  { %3983 = vmatprep.subr.bf16.mxu1 %v3982_v44  ;;  %4017 = vmatpush1.bf16.msra.mxu0 %v4016_v61  ;;  %v4022_v41 = vpack.c.bf16 %v1957_v24, %v1953_v22  ;;  %v1952_v44 = vld [vmem:[#allocation14 + $0x150] sm:$0xff]  ;;  %v1958_v61 = vld [vmem:[#allocation14 + $0x180] sm:$0xff] }
 0x2d5   :  { %v5241_v16 = vpop.f32.mrb[40].mxu0  ;;  %4019 = vmatprep.subr.bf16.mxu0 %v4018_v57  ;;  %v4024_v46 = vpack.c.bf16 %v1956_v45, %v1952_v44  ;;  %v3996_v32 = vpack.c.bf16 %v1962_v3, %v1958_v61  ;;  %v1971_v57 = vld [vmem:[#allocation14 + $0x1e8] sm:$0xff]  ;;  %v1968_v22 = vld [vmem:[#allocation14 + $0x1d0] sm:$0xff]  ;;  %v1849_v44 = vld [vmem:[#allocation13 + $0x18] sm:$0xff] }
 0x2d6   :  { %v5243_v17 = vpop.f32.mrb[41].mxu0  ;;  %v3998_v1 = vpack.c.bf16 %v1971_v57, %v1967_v38  ;;  %v1972_v24 = vld [vmem:[#allocation14 + $0x1f0] sm:$0xff]  ;;  %v1853_v45 = vld [vmem:[#allocation13 + $0x38] sm:$0xff] }
 0x2d7   :  { %3985 = vmatpush1.bf16.msra.mxu1 %v3984_v56  ;;  %v1961_v56 = vld [vmem:[#allocation14 + $0x198] sm:$0xff] }
 0x2d8   :  { %3987 = vmatprep.subr.bf16.mxu1 %v3986_v35  ;;  %4021 = vmatpush1.bf16.msra.mxu0 %v4020_v5  ;;  %v4026_v31 = vpack.c.bf16 %v1965_v25, %v1961_v56  ;;  %v1960_v35 = vld [vmem:[#allocation14 + $0x190] sm:$0xff] }
 0x2d9   :  { %v5245_v18 = vpop.f32.mrb[42].mxu0  ;;  %4023 = vmatprep.subr.bf16.mxu0 %v4022_v41  ;;  %v4028_v52 = vpack.c.bf16 %v1964_v37, %v1960_v35  ;;  %v4032_v41 = vpack.c.bf16 %v1972_v24, %v1968_v22 }
 0x2da   :  { %v5247_v19 = vpop.f32.mrb[43].mxu0 }
 0x2db   :  { %3989 = vmatpush1.bf16.msra.mxu1 %v3988_v59  ;;  %v1969_v59 = vld [vmem:[#allocation14 + $0x1d8] sm:$0xff] }
 0x2dc   :  { %3991 = vmatprep.subr.bf16.mxu1 %v3990_v23  ;;  %4025 = vmatpush1.bf16.msra.mxu0 %v4024_v46  ;;  %v4030_v5 = vpack.c.bf16 %v1973_v62, %v1969_v59  ;;  %v4000_v23 = vpack.c.bf16 %v1970_v21, %v1966_v20  ;;  %v4066_v46 = vpack.c.bf16 %v1853_v45, %v1849_v44 }
 0x2dd   :  { %v5249_v43 = vpop.f32.mrb[44].mxu0  ;;  %4027 = vmatprep.subr.bf16.mxu0 %v4026_v31 }
 0x2de   :  { %v5251_v50 = vpop.f32.mrb[45].mxu0 }
 0x2df   :  { %3993 = vmatpush1.bf16.msra.mxu1 %v3992_v42  ;;  %v4034_v42 = vpack.c.bf16 %v1851_v40, %v1847_v28 }
 0x2e0   :  { %3995 = vmatprep.subr.bf16.mxu1 %v3994_v60  ;;  %4029 = vmatpush1.bf16.msra.mxu0 %v4028_v52 }
 0x2e1   :  { %v5253_v2 = vpop.f32.mrb[46].mxu0  ;;  %4031 = vmatprep.subr.bf16.mxu0 %v4030_v5 }
 0x2e2   :  { %5476 = vst [vmem:[#allocation29_spill] sm:$0xff] %v5253_v2  ;;  %v5255_v47 = vpop.f32.mrb[47].mxu0 }
 0x2e3   :  { %5477 = vst [vmem:[#allocation30_spill] sm:$0xff] %v5255_v47  ;;  %3997 = vmatpush1.bf16.msra.mxu1 %v3996_v32 }
 0x2e4   :  { %3999 = vmatprep.subr.bf16.mxu1 %v3998_v1  ;;  %4033 = vmatpush1.bf16.msra.mxu0 %v4032_v41 }
 0x2e5   :  { %4067 = vmatprep.subr.bf16.mxu0 %v4066_v46 }
 0x2e7   :  { %4001 = vmatpush1.bf16.msra.mxu1 %v4000_v23 }
 0x2e8   :  { %4035 = vmatprep.subr.bf16.mxu1 %v4034_v42 }
 0x35f   :  { %v3597_v55 = vpop.f32.mrb[8].mxu1 }
 0x360   :  { %v1041_v56 = vadd.f32 %v3597_v55, %v3228_v51  ;;  %v1035_v60 = vpop.f32.mrb[9].mxu1 }
 0x361   :  { %v1036_v25 = vadd.f32 %v3228_v51, %v1035_v60 }
 0x362   :  { %v1080_v61 = vrot.slane %v1041_v56, 4 }
 0x363   :  { %v1074_v3 = vrot.slane %v1036_v25, 4  ;;  %v3600_v31 = vpop.f32.mrb[10].mxu1 }
 0x364   :  { %v1081_v32 = vadd.f32 %v1080_v61, %v1041_v56  ;;  %v1051_v35 = vadd.f32 %v3600_v31, %v3228_v51  ;;  %v1045_v37 = vpop.f32.mrb[11].mxu1 }
 0x365   :  { %v1075_v38 = vadd.f32 %v1074_v3, %v1036_v25  ;;  %v1046_v52 = vadd.f32 %v3228_v51, %v1045_v37 }
 0x366   :  { %v1082_v57 = vrot.slane %v1081_v32, 2  ;;  %v1092_v59 = vrot.slane %v1051_v35, 4 }
 0x367   :  { %v1076_v62 = vrot.slane %v1075_v38, 2  ;;  %v1086_v1 = vrot.slane %v1046_v52, 4  ;;  %v3603_v5 = vpop.f32.mrb[12].mxu1 }
 0x368   :  { %v1083_v20 = vadd.f32 %v1082_v57, %v1081_v32  ;;  %v1093_v21 = vadd.f32 %v1092_v59, %v1051_v35  ;;  %v1061_v22 = vadd.f32 %v3603_v5, %v3228_v51  ;;  %v1055_v23 = vpop.f32.mrb[13].mxu1 }
 0x369   :  { %v1077_v24 = vadd.f32 %v1076_v62, %v1075_v38  ;;  %v1087_v28 = vadd.f32 %v1086_v1, %v1046_v52  ;;  %v1056_v40 = vadd.f32 %v3228_v51, %v1055_v23 }
 0x36a   :  { %v1084_v41 = vrot.slane %v1083_v20, 1  ;;  %v1094_v42 = vrot.slane %v1093_v21, 2  ;;  %v1104_v44 = vrot.slane %v1061_v22, 4 }
 0x36b   :  { %v1078_v45 = vrot.slane %v1077_v24, 1  ;;  %v1088_v46 = vrot.slane %v1087_v28, 2  ;;  %v1098_v55 = vrot.slane %v1056_v40, 4  ;;  %v3606_v56 = vpop.f32.mrb[14].mxu1 }
 0x36c   :  { %v1085_v60 = vadd.f32 %v1084_v41, %v1083_v20  ;;  %v1095_v25 = vadd.f32 %v1094_v42, %v1093_v21  ;;  %v1105_v61 = vadd.f32 %v1104_v44, %v1061_v22  ;;  %v1071_v3 = vadd.f32 %v3606_v56, %v3228_v51  ;;  %v1065_v31 = vpop.f32.mrb[15].mxu1 }
 0x36d   :  { %v1079_v32 = vadd.f32 %v1078_v45, %v1077_v24  ;;  %v1089_v35 = vadd.f32 %v1088_v46, %v1087_v28  ;;  %v1099_v37 = vadd.f32 %v1098_v55, %v1056_v40  ;;  %v1066_v57 = vadd.f32 %v3228_v51, %v1065_v31 }
 0x36e   :  { %v1124_v38 = vmul.f32 0.125, %v1085_v60  ;;  %v1096_v52 = vrot.slane %v1095_v25, 1  ;;  %v1106_v59 = vrot.slane %v1105_v61, 2  ;;  %v1116_v62 = vrot.slane %v1071_v3, 4 }
 0x36f   :  { %v1123_v1 = vmul.f32 0.125, %v1079_v32  ;;  %v1090_v5 = vrot.slane %v1089_v35, 1  ;;  %v1100_v23 = vrot.slane %v1099_v37, 2  ;;  %v1110_v0 = vrot.slane %v1066_v57, 4 }
 0x370   :  { %v1097_v47 = vadd.f32 %v1096_v52, %v1095_v25  ;;  %v1107_v9 = vadd.f32 %v1106_v59, %v1105_v61  ;;  %v1117_v2 = vadd.f32 %v1116_v62, %v1071_v3 }
 0x371   :  { %v2147_v20 = vsel %vm1982_vm3, %v1124_v38, %v1123_v1  ;;  %v1091_v21 = vadd.f32 %v1090_v5, %v1089_v35  ;;  %v1101_v22 = vadd.f32 %v1100_v23, %v1099_v37  ;;  %v1111_v41 = vadd.f32 %v1110_v0, %v1066_v57 }
 0x372   :  { %v1126_v24 = vmul.f32 0.125, %v1097_v47  ;;  %v1108_v28 = vrot.slane %v1107_v9, 1  ;;  %v1118_v51 = vrot.slane %v1117_v2, 2 }
 0x373   :  { %v1125_v40 = vmul.f32 0.125, %v1091_v21  ;;  %v1102_v42 = vrot.slane %v1101_v22, 1  ;;  %v1112_v44 = vrot.slane %v1111_v41, 2 }
 0x374   :  { %v1109_v45 = vadd.f32 %v1108_v28, %v1107_v9  ;;  %v1119_v46 = vadd.f32 %v1118_v51, %v1117_v2 }
 0x375   :  { %v2148_v55 = vsel %vm1984_vm4, %v1125_v40, %v2147_v20  ;;  %v1103_v56 = vadd.f32 %v1102_v42, %v1101_v22  ;;  %v1113_v60 = vadd.f32 %v1112_v44, %v1111_v41 }
 0x376   :  { %v1128_v25 = vmul.f32 0.125, %v1109_v45  ;;  %v1120_v61 = vrot.slane %v1119_v46, 1  ;;  %v2149_v3 = vsel %vm1986_vm5, %v1126_v24, %v2148_v55 }
 0x377   :  { %v1127_v0 = vmul.f32 0.125, %v1103_v56  ;;  %v1114_v47 = vrot.slane %v1113_v60, 1 }
 0x378   :  { %v1121_v31 = vadd.f32 %v1120_v61, %v1119_v46 }
 0x379   :  { %v1115_v32 = vadd.f32 %v1114_v47, %v1113_v60  ;;  %v2150_v35 = vsel %vm1988_vm6, %v1127_v0, %v2149_v3 }
 0x37a   :  { %v1130_v37 = vmul.f32 0.125, %v1121_v31  ;;  %v2151_v9 = vsel %vm1990_vm7, %v1128_v25, %v2150_v35 }
 0x37b   :  { %v1129_v2 = vmul.f32 0.125, %v1115_v32 }
 0x37d   :  { %v2152_v57 = vsel %vm1992_vm8, %v1129_v2, %v2151_v9 }
 0x37e   :  { %v5267_v38 = vsel %vm1994_vm9, %v1130_v37, %v2152_v57 }
 0x37f   :  { %v3697_v52 = vpop.f32.mrb[16].mxu1 }
 0x380   :  { %v1506_v59 = vrot.slane %v3697_v52, 7  ;;  %v5269_v62 = vpop.f32.mrb[17].mxu1 }
 0x381   :  { %v1505_v1 = vrot.slane %v5269_v62, 7 }
 0x383   :  { %v3700_v5 = vpop.f32.mrb[18].mxu1  ;;  %v1536_v23 = vsel %vm1521_vm10, %v1505_v1, %v1506_v59 }
 0x384   :  { %v1508_v20 = vrot.slane %v3700_v5, 7  ;;  %v1436_v21 = vpop.f32.mrb[19].mxu1  ;;  %v1539_v22 = vadd.f32 %v1536_v23, %v5167_v29 }
 0x385   :  { %v1507_v41 = vrot.slane %v1436_v21, 7 }
 0x386   :  { %v5279_v24 = vadd.f32 %v5213_v6, %v1539_v22  ;;  %v5292_v6 = vld [vmem:[%s5450_s8] ss:$0 sm:$0xff] }
 0x387   :  { %v3703_v28 = vpop.f32.mrb[20].mxu1  ;;  %v1534_v51 = vsel %vm1521_vm10, %v1507_v41, %v1508_v20  ;;  %v1535_v40 = vsel %vm1521_vm10, %v1506_v59, %v1507_v41 }
 0x388   :  { %v1510_v42 = vrot.slane %v3703_v28, 7  ;;  %v1446_v44 = vpop.f32.mrb[21].mxu1  ;;  %v1541_v45 = vadd.f32 %v1534_v51, %v5175_v33  ;;  %v1540_v46 = vadd.f32 %v1535_v40, %v5171_v30 }
 0x389   :  { %v1509_v55 = vrot.slane %v1446_v44, 7 }
 0x38a   :  { %v1719_v29 = vadd.f32 %v5221_v8, %v1541_v45  ;;  %v1718_v56 = vadd.f32 %v5227_v10, %v1540_v46 }
 0x38b   :  { %v3706_v60 = vpop.f32.mrb[22].mxu1  ;;  %v1532_v25 = vsel %vm1521_vm10, %v1509_v55, %v1510_v42  ;;  %v1533_v61 = vsel %vm1521_vm10, %v1508_v20, %v1509_v55 }
 0x38c   :  { %v1742_v33 = vadd.f32 %v5292_v6, %v1719_v29  ;;  %v1741_v30 = vadd.f32 %v5292_v6, %v1718_v56  ;;  %v1512_v3 = vrot.slane %v3706_v60, 7  ;;  %v1456_v8 = vpop.f32.mrb[23].mxu1  ;;  %v1543_v10 = vadd.f32 %v1532_v25, %v5183_v36 }
 0x38d   :  { %v1511_v0 = vrot.slane %v1456_v8, 7  ;;  %v1542_v47 = vadd.f32 %v1533_v61, %v5179_v34 }
 0x38e   :  { %v1758_v31 = vmax.f32 %v1742_v33, 0.0  ;;  %v1757_v32 = vmax.f32 %v1741_v30, 0.0  ;;  %v1721_v35 = vadd.f32 %v5229_v11, %v1543_v10 }
 0x38f   :  { %v1720_v37 = vadd.f32 %v5235_v13, %v1542_v47  ;;  %v3709_v9 = vpop.f32.mrb[24].mxu1  ;;  %v1530_v2 = vsel %vm1521_vm10, %v1511_v0, %v1512_v3  ;;  %v1531_v57 = vsel %vm1521_vm10, %v1510_v42, %v1511_v0 }
 0x390   :  { %v1776_v36 = vsel %vm1772_vm11, %v1757_v32, -inf  ;;  %v1744_v52 = vadd.f32 %v5292_v6, %v1721_v35  ;;  %v1514_v59 = vrot.slane %v3709_v9, 7  ;;  %v1466_v34 = vpop.f32.mrb[25].mxu1  ;;  %v1545_v5 = vadd.f32 %v1530_v2, %v5191_v48 }
 0x391   :  { %v1797_v23 = vmax.f32 %v1776_v36, %v1758_v31  ;;  %v1743_v11 = vadd.f32 %v5292_v6, %v1720_v37  ;;  %v1513_v13 = vrot.slane %v1466_v34, 7  ;;  %v1544_v20 = vadd.f32 %v1531_v57, %v5187_v39 }
 0x392   :  { %v1760_v21 = vmax.f32 %v1744_v52, 0.0  ;;  %v1723_v22 = vadd.f32 %v5237_v14, %v1545_v5  ;;  %v1740_v34 = vadd.f32 %v5292_v6, %v5279_v24 }
 0x393   :  { %v1759_v41 = vmax.f32 %v1743_v11, 0.0  ;;  %v1722_v28 = vadd.f32 %v5239_v15, %v1544_v20  ;;  %v3712_v51 = vpop.f32.mrb[26].mxu1  ;;  %v1528_v40 = vsel %vm1521_vm10, %v1513_v13, %v1514_v59  ;;  %v1529_v46 = vsel %vm1521_vm10, %v1512_v3, %v1513_v13 }
 0x394   :  { %v1746_v42 = vadd.f32 %v5292_v6, %v1723_v22  ;;  %v1516_v44 = vrot.slane %v3712_v51, 7  ;;  %v1476_v48 = vpop.f32.mrb[27].mxu1  ;;  %v1547_v45 = vadd.f32 %v1528_v40, %v5199_v53  ;;  %v1546_v60 = vadd.f32 %v1529_v46, %v5195_v49 }
 0x395   :  { %v1778_v39 = vsel %vm1772_vm11, %v1759_v41, -inf  ;;  %v1745_v14 = vadd.f32 %v5292_v6, %v1722_v28  ;;  %v1515_v55 = vrot.slane %v1476_v48, 7  ;;  %v1798_v2 = vrot.slane %v1797_v23, 4 }
 0x396   :  { %v1804_v15 = vmax.f32 %v1778_v39, %v1760_v21  ;;  %v1762_v29 = vmax.f32 %v1746_v42, 0.0  ;;  %v1725_v56 = vadd.f32 %v5241_v16, %v1547_v45  ;;  %v1724_v3 = vadd.f32 %v5243_v17, %v1546_v60 }
 0x397   :  { %v1761_v25 = vmax.f32 %v1745_v14, 0.0  ;;  %v3715_v61 = vpop.f32.mrb[28].mxu1  ;;  %v1526_v53 = vsel %vm1521_vm10, %v1515_v55, %v1516_v44  ;;  %v1527_v33 = vsel %vm1521_vm10, %v1514_v59, %v1515_v55  ;;  %v1799_v21 = vmax.f32 %v1797_v23, %v1798_v2 }
 0x398   :  { %v1748_v30 = vadd.f32 %v5292_v6, %v1725_v56  ;;  %v1518_v8 = vrot.slane %v3715_v61, 7  ;;  %v1486_v10 = vpop.f32.mrb[29].mxu1  ;;  %v1549_v49 = vadd.f32 %v1526_v53, %v5207_v63  ;;  %v1747_v31 = vadd.f32 %v5292_v6, %v1724_v3 }
 0x399   :  { %v1780_v0 = vsel %vm1772_vm11, %v1761_v25, -inf  ;;  %v1517_v16 = vrot.slane %v1486_v10, 7  ;;  %v1548_v37 = vadd.f32 %v1527_v33, %v5203_v58  ;;  %v1805_v41 = vrot.slane %v1804_v15, 4  ;;  %v5478_v25 = vld [vmem:[#allocation29_spill] sm:$0xff] }
 0x39a   :  { %v1811_v47 = vmax.f32 %v1780_v0, %v1762_v29  ;;  %v1764_v32 = vmax.f32 %v1748_v30, 0.0  ;;  %v1727_v35 = vadd.f32 %v5245_v18, %v1549_v49  ;;  %v1763_v57 = vmax.f32 %v1747_v31, 0.0  ;;  %v5479_v30 = vld [vmem:[#allocation28_spill] sm:$0xff] }
 0x39b   :  { %v3718_v9 = vpop.f32.mrb[30].mxu1  ;;  %v1524_v17 = vsel %vm1521_vm10, %v1517_v16, %v1518_v8  ;;  %v1726_v63 = vadd.f32 %v5247_v19, %v1548_v37  ;;  %v1525_v24 = vsel %vm1521_vm10, %v1516_v44, %v1517_v16  ;;  %v1800_v45 = vrot.slane %v1799_v21, 2  ;;  %v5480_v16 = vld [vmem:[#allocation30_spill] sm:$0xff] }
 0x39c   :  { %v1520_v36 = vrot.slane %v3718_v9, 7  ;;  %v1496_v52 = vpop.f32.mrb[31].mxu1  ;;  %v1750_v59 = vadd.f32 %v5292_v6, %v1727_v35  ;;  %v1782_v18 = vsel %vm1772_vm11, %v1763_v57, -inf  ;;  %v1551_v19 = vadd.f32 %v1524_v17, %v5219_v54 }
 0x39d   :  { %v1519_v5 = vrot.slane %v1496_v52, 7  ;;  %v1818_v11 = vmax.f32 %v1782_v18, %v1764_v32  ;;  %v1749_v13 = vadd.f32 %v5292_v6, %v1726_v63  ;;  %v1550_v51 = vadd.f32 %v1525_v24, %v5211_v4 }
 0x39e   :  { %v1537_v58 = vsel %vm1521_vm10, %v1520_v36, %v1505_v1  ;;  %v1766_v22 = vmax.f32 %v1750_v59, 0.0  ;;  %v1756_v1 = vmax.f32 %v1740_v34, 0.0  ;;  %v1812_v40 = vrot.slane %v1811_v47, 4 }
 0x39f   :  { %v1538_v20 = vadd.f32 %v1537_v58, %v5163_v27  ;;  %v1765_v28 = vmax.f32 %v1749_v13, 0.0  ;;  %v1729_v42 = vadd.f32 %v5249_v43, %v1551_v19  ;;  %v1522_v27 = vsel %vm1521_vm10, %v1519_v5, %v1520_v36 }
 0x3a0   :  { %v1819_v23 = vrot.slane %v1818_v11, 4  ;;  %v1728_v44 = vadd.f32 %v5251_v50, %v1550_v51  ;;  %v1553_v4 = vadd.f32 %v1522_v27, %v5233_v12  ;;  %v1806_v39 = vmax.f32 %v1804_v15, %v1805_v41 }
 0x3a1   :  { %v1716_v62 = vadd.f32 %v5215_v7, %v1538_v20  ;;  %v1784_v54 = vsel %vm1772_vm11, %v1765_v28, -inf  ;;  %v1752_v7 = vadd.f32 %v5292_v6, %v1729_v42  ;;  %v1523_v55 = vsel %vm1521_vm10, %v1518_v8, %v1519_v5 }
 0x3a2   :  { %v1825_v46 = vmax.f32 %v1784_v54, %v1766_v22  ;;  %v1751_v43 = vadd.f32 %v5292_v6, %v1728_v44  ;;  %v1813_v29 = vmax.f32 %v1811_v47, %v1812_v40  ;;  %v1731_v61 = vadd.f32 %v5478_v25, %v1553_v4  ;;  %v1855_v25 = vld [vmem:[#allocation13 + $0x48] sm:$0xff] }
 0x3a3   :  { %v1739_v48 = vadd.f32 %v5292_v6, %v1716_v62  ;;  %v1768_v60 = vmax.f32 %v1752_v7, 0.0  ;;  %v1820_v53 = vmax.f32 %v1818_v11, %v1819_v23  ;;  %v1552_v3 = vadd.f32 %v1523_v55, %v5479_v30  ;;  %v1861_v30 = vld [vmem:[#allocation13 + $0x78] sm:$0xff] }
 0x3a4   :  { %v1826_v56 = vrot.slane %v1825_v46, 4  ;;  %v1767_v33 = vmax.f32 %v1751_v43, 0.0  ;;  %v1754_v10 = vadd.f32 %v5292_v6, %v1731_v61  ;;  %v1807_v0 = vrot.slane %v1806_v39, 2  ;;  %v1850_v43 = vld [vmem:[#allocation13 + $0x20] sm:$0xff] }
 0x3a5   :  { %v1755_v14 = vmax.f32 %v1739_v48, 0.0  ;;  %v1730_v49 = vadd.f32 %v5480_v16, %v1552_v3  ;;  %v1814_v47 = vrot.slane %v1813_v29, 2  ;;  %v1801_v35 = vmax.f32 %v1799_v21, %v1800_v45 }
 0x3a6   :  { %v1827_v12 = vmax.f32 %v1825_v46, %v1826_v56  ;;  %v1786_v8 = vsel %vm1772_vm11, %v1767_v33, -inf  ;;  %v1821_v37 = vrot.slane %v1820_v53, 2  ;;  %v1770_v36 = vmax.f32 %v1754_v10, 0.0  ;;  %v1848_v56 = vld [vmem:[#allocation13 + $0x10] sm:$0xff]  ;;  %v1857_v33 = vld [vmem:[#allocation13 + $0x58] sm:$0xff] }
 0x3a7   :  { %v1774_v50 = vsel %vm1772_vm11, %v1755_v14, -inf  ;;  %v1832_v32 = vmax.f32 %v1786_v8, %v1768_v60  ;;  %v1753_v9 = vadd.f32 %v5292_v6, %v1730_v49  ;;  %v1808_v52 = vmax.f32 %v1806_v39, %v1807_v0  ;;  %v1846_v14 = vld [vmem:[#allocation13] sm:$0xff]  ;;  %v1852_v60 = vld [vmem:[#allocation13 + $0x30] sm:$0xff] }
 0x3a8   :  { %v1790_v15 = vmax.f32 %v1774_v50, %v1756_v1  ;;  %v1828_v17 = vrot.slane %v1827_v12, 2  ;;  %v1815_v63 = vmax.f32 %v1813_v29, %v1814_v47  ;;  %v1802_v58 = vrot.slane %v1801_v35, 1  ;;  %v1859_v50 = vld [vmem:[#allocation13 + $0x68] sm:$0xff]  ;;  %v1854_v0 = vld [vmem:[#allocation13 + $0x40] sm:$0xff]  ;;  %v1856_v47 = vld [vmem:[#allocation13 + $0x50] sm:$0xff] }
 0x3a9   :  { %v1833_v57 = vrot.slane %v1832_v32, 4  ;;  %v1769_v59 = vmax.f32 %v1753_v9, 0.0  ;;  %v1822_v5 = vmax.f32 %v1820_v53, %v1821_v37  ;;  %v1809_v19 = vrot.slane %v1808_v52, 1  ;;  %v1858_v8 = vld [vmem:[#allocation13 + $0x60] sm:$0xff]  ;;  %v1867_v37 = vld [vmem:[#allocation13 + $0xa8] sm:$0xff]  ;;  %v1865_v9 = vld [vmem:[#allocation13 + $0x98] sm:$0xff] }
 0x3aa   :  { %v1791_v31 = vrot.slane %v1790_v15, 4  ;;  %v1829_v13 = vmax.f32 %v1827_v12, %v1828_v17  ;;  %v1816_v6 = vrot.slane %v1815_v63, 1  ;;  %v1803_v51 = vmax.f32 %v1801_v35, %v1802_v58  ;;  %v1869_v17 = vld [vmem:[#allocation13 + $0xb8] sm:$0xff]  ;;  %v1871_v58 = vld [vmem:[#allocation13 + $0xc8] sm:$0xff] }
 0x3ab   :  { %v1834_v18 = vmax.f32 %v1832_v32, %v1833_v57  ;;  %v1788_v11 = vsel %vm1772_vm11, %v1769_v59, -inf  ;;  %v1823_v62 = vrot.slane %v1822_v5, 1  ;;  %v1810_v27 = vmax.f32 %v1808_v52, %v1809_v19  ;;  %v1863_v32 = vld [vmem:[#allocation13 + $0x88] sm:$0xff]  ;;  %v1866_v52 = vld [vmem:[#allocation13 + $0xa0] sm:$0xff] }
 0x3ac   :  { %v1792_v2 = vmax.f32 %v1790_v15, %v1791_v31  ;;  %v1839_v22 = vmax.f32 %v1788_v11, %v1770_v36  ;;  %v1830_v1 = vrot.slane %v1829_v13, 1  ;;  %v1817_v54 = vmax.f32 %v1815_v63, %v1816_v6  ;;  %v1860_v31 = vld [vmem:[#allocation13 + $0x70] sm:$0xff]  ;;  %v1862_v36 = vld [vmem:[#allocation13 + $0x80] sm:$0xff]  ;;  %v1873_v11 = vld [vmem:[#allocation13 + $0xd8] sm:$0xff] }
 0x3ad   :  { %v1835_v21 = vrot.slane %v1834_v18, 2  ;;  %v1824_v45 = vmax.f32 %v1822_v5, %v1823_v62  ;;  %v4036_v15 = vpack.c.bf16 %v1850_v43, %v1846_v14  ;;  %v4068_v10 = vpack.c.bf16 %v1852_v60, %v1848_v56  ;;  %v1875_v5 = vld [vmem:[#allocation13 + $0xe8] sm:$0xff]  ;;  %v1870_v19 = vld [vmem:[#allocation13 + $0xc0] sm:$0xff]  ;;  %v1876_v62 = vld [vmem:[#allocation13 + $0xf0] sm:$0xff] }
 0x3ae   :  { %v1793_v34 = vrot.slane %v1792_v2, 2  ;;  %v1840_v28 = vrot.slane %v1839_v22, 4  ;;  %v1831_v7 = vmax.f32 %v1829_v13, %v1830_v1  ;;  %v4038_v16 = vpack.c.bf16 %v1859_v50, %v1855_v25  ;;  %v1877_v13 = vld [vmem:[#allocation13 + $0xf8] sm:$0xff]  ;;  %v1874_v6 = vld [vmem:[#allocation13 + $0xe0] sm:$0xff]  ;;  %v1883_v1 = vld [vmem:[#allocation13 + $0x128] sm:$0xff] }
 0x3af   :  { %v1836_v41 = vmax.f32 %v1834_v18, %v1835_v21  ;;  %v4070_v49 = vpack.c.bf16 %v1861_v30, %v1857_v33  ;;  %v4072_v57 = vpack.c.bf16 %v1860_v31, %v1856_v47  ;;  %v4042_v59 = vpack.c.bf16 %v1867_v37, %v1863_v32  ;;  %v1868_v18 = vld [vmem:[#allocation13 + $0xb0] sm:$0xff]  ;;  %v1889_v14 = vld [vmem:[#allocation13 + $0x158] sm:$0xff]  ;;  %v1886_v56 = vld [vmem:[#allocation13 + $0x140] sm:$0xff] }
 0x3b0   :  { %v1794_v20 = vmax.f32 %v1792_v2, %v1793_v34  ;;  %v1841_v42 = vmax.f32 %v1839_v22, %v1840_v28  ;;  %v4040_v2 = vpack.c.bf16 %v1858_v8, %v1854_v0  ;;  %v4074_v63 = vpack.c.bf16 %v1869_v17, %v1865_v9  ;;  %v1864_v34 = vld [vmem:[#allocation13 + $0x90] sm:$0xff]  ;;  %v1893_v43 = vld [vmem:[#allocation13 + $0x178] sm:$0xff]  ;;  %v1890_v60 = vld [vmem:[#allocation13 + $0x160] sm:$0xff] }
 0x3b1   :  { %v1837_v23 = vrot.slane %v1836_v41, 1  ;;  %v4044_v21 = vpack.c.bf16 %v1866_v52, %v1862_v36  ;;  %v4076_v22 = vpack.c.bf16 %v1868_v18, %v1864_v34  ;;  %v1872_v28 = vld [vmem:[#allocation13 + $0xd0] sm:$0xff]  ;;  %v1895_v33 = vld [vmem:[#allocation13 + $0x188] sm:$0xff]  ;;  %v1894_v0 = vld [vmem:[#allocation13 + $0x180] sm:$0xff] }
 0x3b2   :  { %v1795_v24 = vrot.slane %v1794_v20, 1  ;;  %v1842_v48 = vrot.slane %v1841_v42, 2  ;;  %v1892_v50 = vld [vmem:[#allocation13 + $0x170] sm:$0xff]  ;;  %v1899_v30 = vld [vmem:[#allocation13 + $0x1a8] sm:$0xff]  ;;  %v1898_v8 = vld [vmem:[#allocation13 + $0x1a0] sm:$0xff] }
 0x3b3   :  { %v1838_v55 = vmax.f32 %v1836_v41, %v1837_v23  ;;  %v4078_v41 = vpack.c.bf16 %v1877_v13, %v1873_v11  ;;  %v4080_v23 = vpack.c.bf16 %v1876_v62, %v1872_v28  ;;  %v1896_v47 = vld [vmem:[#allocation13 + $0x190] sm:$0xff]  ;;  %v1903_v32 = vld [vmem:[#allocation13 + $0x1c8] sm:$0xff]  ;;  %v1905_v37 = vld [vmem:[#allocation13 + $0x1d8] sm:$0xff]  ;;  %v4060_v17 = vpack.c.bf16 %v1898_v8, %v1894_v0 }
 0x3b4   :  { %v1796_v40 = vmax.f32 %v1794_v20, %v1795_v24  ;;  %v1843_v4 = vmax.f32 %v1841_v42, %v1842_v48  ;;  %v5481_v20 = vmov 0.0   ;;  %v4046_v24 = vpack.c.bf16 %v1875_v5, %v1871_v58  ;;  %v1885_v42 = vld [vmem:[#allocation13 + $0x138] sm:$0xff]  ;;  %v1882_v48 = vld [vmem:[#allocation13 + $0x120] sm:$0xff]  ;;  %v1900_v31 = vld [vmem:[#allocation13 + $0x1b0] sm:$0xff] }
 0x3b5   :  { %v1909_v9 = vld [vmem:[#allocation13 + $0x1f8] sm:$0xff]  ;;  %v1906_v36 = vld [vmem:[#allocation13 + $0x1e0] sm:$0xff]  ;;  %v1908_v34 = vld [vmem:[#allocation13 + $0x1f0] sm:$0xff] }
 0x3b6   :  { %v1983_v44 = vsel %vm1982_vm3, %v1803_v51, %v1796_v40  ;;  %v1844_v61 = vrot.slane %v1843_v4, 1  ;;  %v1879_v51 = vld [vmem:[#allocation13 + $0x108] sm:$0xff]  ;;  %v1881_v40 = vld [vmem:[#allocation13 + $0x118] sm:$0xff]  ;;  %v2333_v28 = vld [vmem:[#allocation16 + $0x30] sm:$0xff] }
 0x3b7   :  { %v1985_v46 = vsel %vm1984_vm4, %v1810_v27, %v1983_v44  ;;  %v4048_v27 = vpack.c.bf16 %v1874_v6, %v1870_v19  ;;  %v4050_v44 = vpack.c.bf16 %v1883_v1, %v1879_v51  ;;  %v2328_v18 = vld [vmem:[#allocation16 + $0x8] sm:$0xff]  ;;  %v2330_v5 = vld [vmem:[#allocation16 + $0x18] sm:$0xff]  ;;  %v2331_v19 = vld [vmem:[#allocation16 + $0x20] sm:$0xff] }
 0x3b8   :  { %v1987_v39 = vsel %vm1986_vm5, %v1817_v54, %v1985_v46  ;;  %v1845_v12 = vmax.f32 %v1843_v4, %v1844_v61  ;;  %v1878_v54 = vld [vmem:[#allocation13 + $0x100] sm:$0xff]  ;;  %v1880_v46 = vld [vmem:[#allocation13 + $0x110] sm:$0xff]  ;;  %v1887_v4 = vld [vmem:[#allocation13 + $0x148] sm:$0xff]  ;;  %v4086_v61 = vpack.c.bf16 %v1893_v43, %v1889_v14 }
 0x3b9   :  { %v1989_v29 = vsel %vm1988_vm6, %v1824_v45, %v1987_v39  ;;  %v4082_v45 = vpack.c.bf16 %v1885_v42, %v1881_v40  ;;  %v1891_v39 = vld [vmem:[#allocation13 + $0x168] sm:$0xff]  ;;  %v2334_v11 = vld [vmem:[#allocation16 + $0x38] sm:$0xff] }
 0x3ba   :  { %v1991_v53 = vsel %vm1990_vm7, %v1831_v7, %v1989_v29  ;;  %v1884_v7 = vld [vmem:[#allocation13 + $0x130] sm:$0xff]  ;;  %v4054_v25 = vpack.c.bf16 %v1891_v39, %v1887_v4  ;;  %v2332_v58 = vld [vmem:[#allocation16 + $0x28] sm:$0xff]  ;;  %v2338_v1 = vld [vmem:[#allocation16 + $0x58] sm:$0xff] }
 0x3bb   :  { %v1993_v3 = vsel %vm1992_vm8, %v1838_v55, %v1991_v53  ;;  %v4052_v55 = vpack.c.bf16 %v1882_v48, %v1878_v54  ;;  %v4084_v29 = vpack.c.bf16 %v1884_v7, %v1880_v46  ;;  %v1888_v53 = vld [vmem:[#allocation13 + $0x150] sm:$0xff]  ;;  %v4098_v6 = vpack.c.bf16 %v2332_v58, %v2328_v18  ;;  %v2336_v62 = vld [vmem:[#allocation16 + $0x48] sm:$0xff]  ;;  %v2342_v40 = vld [vmem:[#allocation16 + $0x78] sm:$0xff] }
 0x3bc   :  { %v1995_v35 = vsel %vm1994_vm9, %v1845_v12, %v1993_v3  ;;  %v1897_v3 = vld [vmem:[#allocation13 + $0x198] sm:$0xff]  ;;  %v2340_v51 = vld [vmem:[#allocation16 + $0x68] sm:$0xff]  ;;  %v2339_v54 = vld [vmem:[#allocation16 + $0x60] sm:$0xff] }
 0x3bd   :  { %2062 = vmatmul.mubr.f32.vlgmr.msra.gmra.mrb[32].mxu1 %v1995_v35  ;;  %2133 = vmatmul.mubr.f32.vlgmr.msra.gmra.mrb[48].mxu0 %v1995_v35  ;;  %v1901_v12 = vld [vmem:[#allocation13 + $0x1b8] sm:$0xff]  ;;  %v1907_v35 = vld [vmem:[#allocation13 + $0x1e8] sm:$0xff]  ;;  %v4102_v48 = vpack.c.bf16 %v2340_v51, %v2336_v62  ;;  %v2341_v46 = vld [vmem:[#allocation16 + $0x70] sm:$0xff] }
 0x3be   :  { %4037 = vmatpush1.bf16.msra.mxu1 %v4036_v15  ;;  %4069 = vmatpush1.bf16.msra.mxu0 %v4068_v10  ;;  %v4056_v15 = vpack.c.bf16 %v1890_v60, %v1886_v56  ;;  %v4088_v10 = vpack.c.bf16 %v1892_v50, %v1888_v53  ;;  %v4062_v52 = vpack.c.bf16 %v1907_v35, %v1903_v32  ;;  %v2344_v7 = vld [vmem:[#allocation16 + $0x88] sm:$0xff]  ;;  %v2346_v39 = vld [vmem:[#allocation16 + $0x98] sm:$0xff]  ;;  %v2347_v56 = vld [vmem:[#allocation16 + $0xa0] sm:$0xff] }
 0x3bf   :  { %4039 = vmatprep.subr.bf16.mxu1 %v4038_v16  ;;  %4071 = vmatprep.subr.bf16.mxu0 %v4070_v49  ;;  %v4058_v16 = vpack.c.bf16 %v1899_v30, %v1895_v33  ;;  %v4090_v49 = vpack.c.bf16 %v1901_v12, %v1897_v3  ;;  %v2348_v4 = vld [vmem:[#allocation16 + $0xa8] sm:$0xff]  ;;  %v2350_v14 = vld [vmem:[#allocation16 + $0xb8] sm:$0xff]  ;;  %v2349_v53 = vld [vmem:[#allocation16 + $0xb0] sm:$0xff] }
 0x3c0   :  { %2219 = vmatprep.mubr.f32.mxu1 %v5481_v20  ;;  %2290 = vmatprep.mubr.f32.mxu0 %v5481_v20  ;;  %v4106_v60 = vpack.c.bf16 %v2348_v4, %v2344_v7  ;;  %v2352_v50 = vld [vmem:[#allocation16 + $0xc8] sm:$0xff]  ;;  %v2354_v30 = vld [vmem:[#allocation16 + $0xd8] sm:$0xff] }
 0x3c1   :  { %v2356_v33 = vld [vmem:[#allocation16 + $0xe8] sm:$0xff]  ;;  %v2358_v3 = vld [vmem:[#allocation16 + $0xf8] sm:$0xff] }
 0x3c2   :  { %4041 = vmatpush1.bf16.msra.mxu1 %v4040_v2  ;;  %4073 = vmatpush1.bf16.msra.mxu0 %v4072_v57  ;;  %v4092_v2 = vpack.c.bf16 %v1900_v31, %v1896_v47  ;;  %v1902_v57 = vld [vmem:[#allocation13 + $0x1c0] sm:$0xff]  ;;  %v4110_v0 = vpack.c.bf16 %v2356_v33, %v2352_v50  ;;  %v4238_v8 = vpack.c.bf16 %v2358_v3, %v2354_v30  ;;  %v2360_v47 = vld [vmem:[#allocation16 + $0x108] sm:$0xff]  ;;  %v2362_v32 = vld [vmem:[#allocation16 + $0x118] sm:$0xff] }
 0x3c3   :  { %4043 = vmatprep.subr.bf16.mxu1 %v4042_v59  ;;  %4075 = vmatprep.subr.bf16.mxu0 %v4074_v63  ;;  %v4094_v59 = vpack.c.bf16 %v1909_v9, %v1905_v37  ;;  %v1904_v63 = vld [vmem:[#allocation13 + $0x1d0] sm:$0xff]  ;;  %v4064_v13 = vpack.c.bf16 %v1906_v36, %v1902_v57  ;;  %v2364_v31 = vld [vmem:[#allocation16 + $0x128] sm:$0xff]  ;;  %v2366_v35 = vld [vmem:[#allocation16 + $0x138] sm:$0xff] }
 0x3c4   :  { %v4114_v57 = vpack.c.bf16 %v2364_v31, %v2360_v47  ;;  %v4242_v36 = vpack.c.bf16 %v2366_v35, %v2362_v32  ;;  %v2370_v18 = vld [vmem:[#allocation16 + $0x158] sm:$0xff] }
 0x3c5   :  { %v2374_v58 = vld [vmem:[#allocation16 + $0x178] sm:$0xff] }
 0x3c6   :  { %4045 = vmatpush1.bf16.msra.mxu1 %v4044_v21  ;;  %4077 = vmatpush1.bf16.msra.mxu0 %v4076_v22  ;;  %v4096_v21 = vpack.c.bf16 %v1908_v34, %v1904_v63  ;;  %v2327_v22 = vld [vmem:[#allocation16] sm:$0xff]  ;;  %v2368_v63 = vld [vmem:[#allocation16 + $0x148] sm:$0xff]  ;;  %v2378_v62 = vld [vmem:[#allocation16 + $0x198] sm:$0xff] }
 0x3c7   :  { %4047 = vmatprep.subr.bf16.mxu1 %v4046_v24  ;;  %4079 = vmatprep.subr.bf16.mxu0 %v4078_v41  ;;  %v4226_v24 = vpack.c.bf16 %v2334_v11, %v2330_v5  ;;  %v2329_v41 = vld [vmem:[#allocation16 + $0x10] sm:$0xff]  ;;  %v4100_v42 = vpack.c.bf16 %v2331_v19, %v2327_v22  ;;  %v2372_v34 = vld [vmem:[#allocation16 + $0x168] sm:$0xff]  ;;  %v4246_v19 = vpack.c.bf16 %v2374_v58, %v2370_v18  ;;  %v2382_v51 = vld [vmem:[#allocation16 + $0x1b8] sm:$0xff] }
 0x3c8   :  { %v4118_v22 = vpack.c.bf16 %v2372_v34, %v2368_v63  ;;  %v2386_v7 = vld [vmem:[#allocation16 + $0x1d8] sm:$0xff] }
 0x3c9   :  { %v2390_v4 = vld [vmem:[#allocation16 + $0x1f8] sm:$0xff] }
 0x3ca   :  { %4049 = vmatpush1.bf16.msra.mxu1 %v4048_v27  ;;  %4081 = vmatpush1.bf16.msra.mxu0 %v4080_v23  ;;  %v4228_v27 = vpack.c.bf16 %v2333_v28, %v2329_v41  ;;  %v2335_v23 = vld [vmem:[#allocation16 + $0x40] sm:$0xff]  ;;  %v2376_v41 = vld [vmem:[#allocation16 + $0x188] sm:$0xff]  ;;  %v2394_v50 = vld [vmem:[#allocation16 + $0x218] sm:$0xff] }
 0x3cb   :  { %4051 = vmatprep.subr.bf16.mxu1 %v4050_v44  ;;  %4083 = vmatprep.subr.bf16.mxu0 %v4082_v45  ;;  %v4230_v44 = vpack.c.bf16 %v2342_v40, %v2338_v1  ;;  %v2337_v45 = vld [vmem:[#allocation16 + $0x50] sm:$0xff]  ;;  %v4104_v43 = vpack.c.bf16 %v2339_v54, %v2335_v23  ;;  %v2380_v28 = vld [vmem:[#allocation16 + $0x1a8] sm:$0xff]  ;;  %v4250_v54 = vpack.c.bf16 %v2382_v51, %v2378_v62  ;;  %v2398_v33 = vld [vmem:[#allocation16 + $0x238] sm:$0xff] }
 0x3cc   :  { %v4122_v23 = vpack.c.bf16 %v2380_v28, %v2376_v41  ;;  %v2402_v47 = vld [vmem:[#allocation16 + $0x258] sm:$0xff] }
 0x3cd   :  { %v2406_v31 = vld [vmem:[#allocation16 + $0x278] sm:$0xff] }
 0x3ce   :  { %4053 = vmatpush1.bf16.msra.mxu1 %v4052_v55  ;;  %4085 = vmatpush1.bf16.msra.mxu0 %v4084_v29  ;;  %v4232_v55 = vpack.c.bf16 %v2341_v46, %v2337_v45  ;;  %v2343_v29 = vld [vmem:[#allocation16 + $0x80] sm:$0xff]  ;;  %v2384_v45 = vld [vmem:[#allocation16 + $0x1c8] sm:$0xff]  ;;  %v2410_v63 = vld [vmem:[#allocation16 + $0x298] sm:$0xff] }
 0x3cf   :  { %4055 = vmatprep.subr.bf16.mxu1 %v4054_v25  ;;  %4087 = vmatprep.subr.bf16.mxu0 %v4086_v61  ;;  %v4234_v25 = vpack.c.bf16 %v2350_v14, %v2346_v39  ;;  %v2345_v61 = vld [vmem:[#allocation16 + $0x90] sm:$0xff]  ;;  %v4108_v12 = vpack.c.bf16 %v2347_v56, %v2343_v29  ;;  %v2388_v46 = vld [vmem:[#allocation16 + $0x1e8] sm:$0xff]  ;;  %v4254_v56 = vpack.c.bf16 %v2390_v4, %v2386_v7  ;;  %v2414_v34 = vld [vmem:[#allocation16 + $0x2b8] sm:$0xff] }
 0x3d0   :  { %v4126_v29 = vpack.c.bf16 %v2388_v46, %v2384_v45  ;;  %v2418_v41 = vld [vmem:[#allocation16 + $0x2d8] sm:$0xff] }
 0x3d1   :  { %v2422_v28 = vld [vmem:[#allocation16 + $0x2f8] sm:$0xff] }
 0x3d2   :  { %4057 = vmatpush1.bf16.msra.mxu1 %v4056_v15  ;;  %4089 = vmatpush1.bf16.msra.mxu0 %v4088_v10  ;;  %v2351_v15 = vld [vmem:[#allocation16 + $0xc0] sm:$0xff]  ;;  %v2426_v45 = vld [vmem:[#allocation16 + $0x318] sm:$0xff] }
 0x3d3   :  { %4059 = vmatprep.subr.bf16.mxu1 %v4058_v16  ;;  %4091 = vmatprep.subr.bf16.mxu0 %v4090_v49  ;;  %v2355_v10 = vld [vmem:[#allocation16 + $0xe0] sm:$0xff]  ;;  %v2353_v16 = vld [vmem:[#allocation16 + $0xd0] sm:$0xff]  ;;  %v2430_v46 = vld [vmem:[#allocation16 + $0x338] sm:$0xff] }
 0x3d4   :  { %v2357_v49 = vld [vmem:[#allocation16 + $0xf0] sm:$0xff]  ;;  %v4112_v37 = vpack.c.bf16 %v2355_v10, %v2351_v15  ;;  %v4258_v10 = vpack.c.bf16 %v2398_v33, %v2394_v50 }
 0x3d5   :  { %v4240_v9 = vpack.c.bf16 %v2357_v49, %v2353_v16  ;;  %v2400_v16 = vld [vmem:[#allocation16 + $0x248] sm:$0xff] }
 0x3d6   :  { %4061 = vmatpush1.bf16.msra.mxu1 %v4060_v17  ;;  %4093 = vmatpush1.bf16.msra.mxu0 %v4092_v2  ;;  %v2359_v17 = vld [vmem:[#allocation16 + $0x100] sm:$0xff]  ;;  %v2404_v49 = vld [vmem:[#allocation16 + $0x268] sm:$0xff] }
 0x3d7   :  { %4063 = vmatprep.subr.bf16.mxu1 %v4062_v52  ;;  %4095 = vmatprep.subr.bf16.mxu0 %v4094_v59  ;;  %v2363_v2 = vld [vmem:[#allocation16 + $0x120] sm:$0xff]  ;;  %v2361_v52 = vld [vmem:[#allocation16 + $0x110] sm:$0xff] }
 0x3d8   :  { %v2365_v59 = vld [vmem:[#allocation16 + $0x130] sm:$0xff]  ;;  %v4116_v5 = vpack.c.bf16 %v2363_v2, %v2359_v17  ;;  %v4134_v17 = vpack.c.bf16 %v2404_v49, %v2400_v16  ;;  %v4262_v2 = vpack.c.bf16 %v2406_v31, %v2402_v47  ;;  %v2442_v16 = vld [vmem:[#allocation16 + $0x398] sm:$0xff] }
 0x3d9   :  { %v4244_v11 = vpack.c.bf16 %v2365_v59, %v2361_v52  ;;  %v2408_v52 = vld [vmem:[#allocation16 + $0x288] sm:$0xff]  ;;  %v2446_v49 = vld [vmem:[#allocation16 + $0x3b8] sm:$0xff] }
 0x3da   :  { %4065 = vmatpush1.bf16.msra.mxu1 %v4064_v13  ;;  %4097 = vmatpush1.bf16.msra.mxu0 %v4096_v21  ;;  %v2367_v13 = vld [vmem:[#allocation16 + $0x140] sm:$0xff]  ;;  %v2412_v59 = vld [vmem:[#allocation16 + $0x2a8] sm:$0xff] }
 0x3db   :  { %4099 = vmatprep.subr.bf16.mxu1 %v4098_v6  ;;  %4227 = vmatprep.subr.bf16.mxu0 %v4226_v24  ;;  %v2371_v21 = vld [vmem:[#allocation16 + $0x160] sm:$0xff]  ;;  %v2369_v6 = vld [vmem:[#allocation16 + $0x150] sm:$0xff] }
 0x3dc   :  { %v2373_v24 = vld [vmem:[#allocation16 + $0x170] sm:$0xff]  ;;  %v4120_v1 = vpack.c.bf16 %v2371_v21, %v2367_v13  ;;  %v4138_v13 = vpack.c.bf16 %v2412_v59, %v2408_v52  ;;  %v4266_v21 = vpack.c.bf16 %v2414_v34, %v2410_v63  ;;  %v2448_v52 = vld [vmem:[#allocation16 + $0x3c8] sm:$0xff]  ;;  %v2450_v63 = vld [vmem:[#allocation16 + $0x3d8] sm:$0xff] }
 0x3dd   :  { %2220 = vmatmul.mubr.f32.vlgmr.msra.gmra.mrb[32].mxu1 %v5267_v38  ;;  %2291 = vmatmul.mubr.f32.vlgmr.msra.gmra.mrb[48].mxu0 %v5267_v38  ;;  %v4236_v38 = vpack.c.bf16 %v2349_v53, %v2345_v61  ;;  %v4248_v40 = vpack.c.bf16 %v2373_v24, %v2369_v6  ;;  %v2392_v61 = vld [vmem:[#allocation16 + $0x208] sm:$0xff] }
 0x3de   :  { %4101 = vmatpush1.bf16.msra.mxu1 %v4100_v42  ;;  %4229 = vmatpush1.bf16.msra.mxu0 %v4228_v27  ;;  %v2375_v42 = vld [vmem:[#allocation16 + $0x180] sm:$0xff]  ;;  %v2396_v53 = vld [vmem:[#allocation16 + $0x228] sm:$0xff] }
 0x3df   :  { %4103 = vmatprep.subr.bf16.mxu1 %v4102_v48  ;;  %4231 = vmatprep.subr.bf16.mxu0 %v4230_v44  ;;  %v2379_v27 = vld [vmem:[#allocation16 + $0x1a0] sm:$0xff]  ;;  %v2377_v48 = vld [vmem:[#allocation16 + $0x190] sm:$0xff]  ;;  %v4130_v15 = vpack.c.bf16 %v2396_v53, %v2392_v61  ;;  %v2416_v6 = vld [vmem:[#allocation16 + $0x2c8] sm:$0xff] }
 0x3e0   :  { %v2381_v44 = vld [vmem:[#allocation16 + $0x1b0] sm:$0xff]  ;;  %v4124_v39 = vpack.c.bf16 %v2379_v27, %v2375_v42  ;;  %v2420_v24 = vld [vmem:[#allocation16 + $0x2e8] sm:$0xff]  ;;  %v4270_v27 = vpack.c.bf16 %v2422_v28, %v2418_v41  ;;  %v2434_v61 = vld [vmem:[#allocation16 + $0x358] sm:$0xff] }
 0x3e1   :  { %v4252_v14 = vpack.c.bf16 %v2381_v44, %v2377_v48  ;;  %v4142_v42 = vpack.c.bf16 %v2420_v24, %v2416_v6  ;;  %v2424_v48 = vld [vmem:[#allocation16 + $0x308] sm:$0xff]  ;;  %v2438_v53 = vld [vmem:[#allocation16 + $0x378] sm:$0xff] }
 0x3e2   :  { %4105 = vmatpush1.bf16.msra.mxu1 %v4104_v43  ;;  %4233 = vmatpush1.bf16.msra.mxu0 %v4232_v55  ;;  %v2383_v43 = vld [vmem:[#allocation16 + $0x1c0] sm:$0xff]  ;;  %v2428_v44 = vld [vmem:[#allocation16 + $0x328] sm:$0xff]  ;;  %v2458_v41 = vld [vmem:[#allocation16 + $0x418] sm:$0xff] }
 0x3e3   :  { %4107 = vmatprep.subr.bf16.mxu1 %v4106_v60  ;;  %4235 = vmatprep.subr.bf16.mxu0 %v4234_v25  ;;  %v2387_v55 = vld [vmem:[#allocation16 + $0x1e0] sm:$0xff]  ;;  %v2385_v60 = vld [vmem:[#allocation16 + $0x1d0] sm:$0xff]  ;;  %v2452_v59 = vld [vmem:[#allocation16 + $0x3e8] sm:$0xff] }
 0x3e4   :  { %v2389_v25 = vld [vmem:[#allocation16 + $0x1f0] sm:$0xff]  ;;  %v4128_v30 = vpack.c.bf16 %v2387_v55, %v2383_v43  ;;  %v4146_v43 = vpack.c.bf16 %v2428_v44, %v2424_v48  ;;  %v4274_v55 = vpack.c.bf16 %v2430_v46, %v2426_v45  ;;  %v4158_v34 = vpack.c.bf16 %v2452_v59, %v2448_v52  ;;  %v2456_v6 = vld [vmem:[#allocation16 + $0x408] sm:$0xff] }
 0x3e5   :  { %v4256_v3 = vpack.c.bf16 %v2389_v25, %v2385_v60  ;;  %v2432_v60 = vld [vmem:[#allocation16 + $0x348] sm:$0xff] }
 0x3e6   :  { %4109 = vmatpush1.bf16.msra.mxu1 %v4108_v12  ;;  %4237 = vmatpush1.bf16.msra.mxu0 %v4236_v38  ;;  %v2391_v12 = vld [vmem:[#allocation16 + $0x200] sm:$0xff]  ;;  %v2436_v25 = vld [vmem:[#allocation16 + $0x368] sm:$0xff] }
 0x3e7   :  { %4111 = vmatprep.subr.bf16.mxu1 %v4110_v0  ;;  %4239 = vmatprep.subr.bf16.mxu0 %v4238_v8  ;;  %v2395_v38 = vld [vmem:[#allocation16 + $0x220] sm:$0xff]  ;;  %v2393_v0 = vld [vmem:[#allocation16 + $0x210] sm:$0xff]  ;;  %v2460_v24 = vld [vmem:[#allocation16 + $0x428] sm:$0xff] }
 0x3e8   :  { %v2397_v8 = vld [vmem:[#allocation16 + $0x230] sm:$0xff]  ;;  %v4132_v32 = vpack.c.bf16 %v2395_v38, %v2391_v12  ;;  %v4150_v12 = vpack.c.bf16 %v2436_v25, %v2432_v60  ;;  %v4278_v38 = vpack.c.bf16 %v2438_v53, %v2434_v61  ;;  %v4162_v28 = vpack.c.bf16 %v2460_v24, %v2456_v6  ;;  %v2464_v61 = vld [vmem:[#allocation16 + $0x448] sm:$0xff] }
 0x3e9   :  { %v4260_v35 = vpack.c.bf16 %v2397_v8, %v2393_v0  ;;  %v2440_v0 = vld [vmem:[#allocation16 + $0x388] sm:$0xff]  ;;  %v2461_v60 = vld [vmem:[#allocation16 + $0x430] sm:$0xff] }
 0x3ea   :  { %4113 = vmatpush1.bf16.msra.mxu1 %v4112_v37  ;;  %4241 = vmatpush1.bf16.msra.mxu0 %v4240_v9  ;;  %v2399_v37 = vld [vmem:[#allocation16 + $0x240] sm:$0xff]  ;;  %v2444_v8 = vld [vmem:[#allocation16 + $0x3a8] sm:$0xff] }
 0x3eb   :  { %4115 = vmatprep.subr.bf16.mxu1 %v4114_v57  ;;  %4243 = vmatprep.subr.bf16.mxu0 %v4242_v36  ;;  %v2403_v9 = vld [vmem:[#allocation16 + $0x260] sm:$0xff]  ;;  %v2401_v57 = vld [vmem:[#allocation16 + $0x250] sm:$0xff] }
 0x3ec   :  { %v2405_v36 = vld [vmem:[#allocation16 + $0x270] sm:$0xff]  ;;  %v4136_v18 = vpack.c.bf16 %v2403_v9, %v2399_v37  ;;  %v4282_v37 = vpack.c.bf16 %v2446_v49, %v2442_v16  ;;  %v2443_v9 = vld [vmem:[#allocation16 + $0x3a0] sm:$0xff]  ;;  %v2472_v49 = vld [vmem:[#allocation16 + $0x488] sm:$0xff] }
 0x3ed   :  { %v4264_v58 = vpack.c.bf16 %v2405_v36, %v2401_v57  ;;  %v2469_v16 = vld [vmem:[#allocation16 + $0x470] sm:$0xff] }
 0x3ee   :  { %4117 = vmatpush1.bf16.msra.mxu1 %v4116_v5  ;;  %4245 = vmatpush1.bf16.msra.mxu0 %v4244_v11  ;;  %v2407_v5 = vld [vmem:[#allocation16 + $0x280] sm:$0xff] }
 0x3ef   :  { %4119 = vmatprep.subr.bf16.mxu1 %v4118_v22  ;;  %4247 = vmatprep.subr.bf16.mxu0 %v4246_v19  ;;  %v2411_v11 = vld [vmem:[#allocation16 + $0x2a0] sm:$0xff]  ;;  %v2409_v22 = vld [vmem:[#allocation16 + $0x290] sm:$0xff] }
 0x3f0   :  { %v2413_v19 = vld [vmem:[#allocation16 + $0x2b0] sm:$0xff]  ;;  %v4140_v62 = vpack.c.bf16 %v2411_v11, %v2407_v5  ;;  %v2451_v5 = vld [vmem:[#allocation16 + $0x3e0] sm:$0xff] }
 0x3f1   :  { %v4268_v51 = vpack.c.bf16 %v2413_v19, %v2409_v22  ;;  %v2453_v22 = vld [vmem:[#allocation16 + $0x3f0] sm:$0xff] }
 0x3f2   :  { %4121 = vmatpush1.bf16.msra.mxu1 %v4120_v1  ;;  %4249 = vmatpush1.bf16.msra.mxu0 %v4248_v40  ;;  %v2415_v1 = vld [vmem:[#allocation16 + $0x2c0] sm:$0xff] }
 0x3f3   :  { %4123 = vmatprep.subr.bf16.mxu1 %v4122_v23  ;;  %4251 = vmatprep.subr.bf16.mxu0 %v4250_v54  ;;  %v2419_v40 = vld [vmem:[#allocation16 + $0x2e0] sm:$0xff]  ;;  %v2417_v23 = vld [vmem:[#allocation16 + $0x2d0] sm:$0xff] }
 0x3f4   :  { %v2421_v54 = vld [vmem:[#allocation16 + $0x2f0] sm:$0xff]  ;;  %v4144_v7 = vpack.c.bf16 %v2419_v40, %v2415_v1  ;;  %v2301_v1 = vsub.s32 0, %v5158_v26  ;;  %v2309_v40 = vsub.s32 2, %v5158_v26 }
 0x3f5   :  { %v4272_v4 = vpack.c.bf16 %v2421_v54, %v2417_v23  ;;  %v2313_v23 = vsub.s32 3, %v5158_v26 }
 0x3f6   :  { %4125 = vmatpush1.bf16.msra.mxu1 %v4124_v39  ;;  %4253 = vmatpush1.bf16.msra.mxu0 %v4252_v14  ;;  %v2423_v39 = vld [vmem:[#allocation16 + $0x300] sm:$0xff] }
 0x3f7   :  { %4127 = vmatprep.subr.bf16.mxu1 %v4126_v29  ;;  %4255 = vmatprep.subr.bf16.mxu0 %v4254_v56  ;;  %v2427_v14 = vld [vmem:[#allocation16 + $0x320] sm:$0xff]  ;;  %v2425_v29 = vld [vmem:[#allocation16 + $0x310] sm:$0xff] }
 0x3f8   :  { %v2429_v56 = vld [vmem:[#allocation16 + $0x330] sm:$0xff]  ;;  %v4148_v50 = vpack.c.bf16 %v2427_v14, %v2423_v39 }
 0x3f9   :  { %v4276_v33 = vpack.c.bf16 %v2429_v56, %v2425_v29  ;;  %v2459_v29 = vld [vmem:[#allocation16 + $0x420] sm:$0xff]  ;;  %v2457_v56 = vld [vmem:[#allocation16 + $0x410] sm:$0xff] }
 0x3fa   :  { %4129 = vmatpush1.bf16.msra.mxu1 %v4128_v30  ;;  %4257 = vmatpush1.bf16.msra.mxu0 %v4256_v3  ;;  %v2431_v30 = vld [vmem:[#allocation16 + $0x340] sm:$0xff] }
 0x3fb   :  { %4131 = vmatprep.subr.bf16.mxu1 %v4130_v15  ;;  %4259 = vmatprep.subr.bf16.mxu0 %v4258_v10  ;;  %v2435_v3 = vld [vmem:[#allocation16 + $0x360] sm:$0xff]  ;;  %v2433_v15 = vld [vmem:[#allocation16 + $0x350] sm:$0xff] }
 0x3fc   :  { %v2437_v10 = vld [vmem:[#allocation16 + $0x370] sm:$0xff]  ;;  %v4152_v47 = vpack.c.bf16 %v2435_v3, %v2431_v30  ;;  %v2470_v30 = vld [vmem:[#allocation16 + $0x478] sm:$0xff] }
 0x3fd   :  { %v4280_v31 = vpack.c.bf16 %v2437_v10, %v2433_v15  ;;  %v2463_v15 = vld [vmem:[#allocation16 + $0x440] sm:$0xff] }
 0x3fe   :  { %4133 = vmatpush1.bf16.msra.mxu1 %v4132_v32  ;;  %4261 = vmatpush1.bf16.msra.mxu0 %v4260_v35  ;;  %v2439_v32 = vld [vmem:[#allocation16 + $0x380] sm:$0xff]  ;;  %v4154_v35 = vpack.c.bf16 %v2444_v8, %v2440_v0  ;;  %v2465_v8 = vld [vmem:[#allocation16 + $0x450] sm:$0xff] }
 0x3ff   :  { %4135 = vmatprep.subr.bf16.mxu1 %v4134_v17  ;;  %4263 = vmatprep.subr.bf16.mxu0 %v4262_v2  ;;  %v2441_v17 = vld [vmem:[#allocation16 + $0x390] sm:$0xff]  ;;  %v4156_v57 = vpack.c.bf16 %v2443_v9, %v2439_v32  ;;  %v2467_v10 = vld [vmem:[#allocation16 + $0x460] sm:$0xff]  ;;  %v2476_v32 = vld [vmem:[#allocation16 + $0x4a8] sm:$0xff] }
 0x400   :  { %v2445_v2 = vld [vmem:[#allocation16 + $0x3b0] sm:$0xff]  ;;  %v4170_v52 = vpack.c.bf16 %v2476_v32, %v2472_v49  ;;  %v2503_v49 = vld [vmem:[#allocation16 + $0x580] sm:$0xff] }
 0x401   :  { %v4284_v36 = vpack.c.bf16 %v2445_v2, %v2441_v17  ;;  %v4168_v17 = vpack.c.bf16 %v2467_v10, %v2463_v15  ;;  %v4296_v2 = vpack.c.bf16 %v2469_v16, %v2465_v8  ;;  %v2508_v15 = vld [vmem:[#allocation16 + $0x5a8] sm:$0xff]  ;;  %v2506_v10 = vld [vmem:[#allocation16 + $0x598] sm:$0xff] }
 0x402   :  { %4137 = vmatpush1.bf16.msra.mxu1 %v4136_v18  ;;  %4265 = vmatpush1.bf16.msra.mxu0 %v4264_v58  ;;  %v2454_v18 = vld [vmem:[#allocation16 + $0x3f8] sm:$0xff]  ;;  %v2447_v58 = vld [vmem:[#allocation16 + $0x3c0] sm:$0xff] }
 0x403   :  { %4139 = vmatprep.subr.bf16.mxu1 %v4138_v13  ;;  %4267 = vmatprep.subr.bf16.mxu0 %v4266_v21  ;;  %v4286_v11 = vpack.c.bf16 %v2454_v18, %v2450_v63  ;;  %v4160_v13 = vpack.c.bf16 %v2451_v5, %v2447_v58  ;;  %v2449_v21 = vld [vmem:[#allocation16 + $0x3d0] sm:$0xff]  ;;  %v2480_v18 = vld [vmem:[#allocation16 + $0x4c8] sm:$0xff]  ;;  %v2482_v5 = vld [vmem:[#allocation16 + $0x4d8] sm:$0xff] }
 0x404   :  { %v4288_v19 = vpack.c.bf16 %v2453_v22, %v2449_v21  ;;  %v2473_v63 = vld [vmem:[#allocation16 + $0x490] sm:$0xff]  ;;  %v2484_v58 = vld [vmem:[#allocation16 + $0x4e8] sm:$0xff]  ;;  %v2479_v22 = vld [vmem:[#allocation16 + $0x4c0] sm:$0xff] }
 0x405   :  { %v4174_v6 = vpack.c.bf16 %v2484_v58, %v2480_v18  ;;  %v2513_v58 = vld [vmem:[#allocation16 + $0x5d0] sm:$0xff] }
 0x406   :  { %4141 = vmatpush1.bf16.msra.mxu1 %v4140_v62  ;;  %4269 = vmatpush1.bf16.msra.mxu0 %v4268_v51  ;;  %v2462_v62 = vld [vmem:[#allocation16 + $0x438] sm:$0xff] }
 0x407   :  { %4143 = vmatprep.subr.bf16.mxu1 %v4142_v42  ;;  %4271 = vmatprep.subr.bf16.mxu0 %v4270_v27  ;;  %v4290_v51 = vpack.c.bf16 %v2462_v62, %v2458_v41  ;;  %v2297_v42 = vld [vmem:[%s5453_s11] sm:$0xf]  ;;  %v2305_v27 = vsub.s32 1, %v5158_v26  ;;  %v2481_v41 = vld [vmem:[#allocation16 + $0x4d0] sm:$0xff]  ;;  %v2488_v62 = vld [vmem:[#allocation16 + $0x508] sm:$0xff] }
 0x408   :  { %v2302_v54 = vrot.slane %v2297_v42, %v2301_v1  ;;  %v2310_v48 = vrot.slane %v2297_v42, %v2309_v40  ;;  %v2314_v45 = vrot.slane %v2297_v42, %v2313_v23 }
 0x409   :  { %v2306_v44 = vrot.slane %v2297_v42, %v2305_v27  ;;  %v2490_v42 = vld [vmem:[#allocation16 + $0x518] sm:$0xff] }
 0x40a   :  { %4145 = vmatpush1.bf16.msra.mxu1 %v4144_v7  ;;  %4273 = vmatpush1.bf16.msra.mxu0 %v4272_v4  ;;  %v2455_v4 = vld [vmem:[#allocation16 + $0x400] sm:$0xff] }
 0x40b   :  { %4147 = vmatprep.subr.bf16.mxu1 %v4146_v43  ;;  %4275 = vmatprep.subr.bf16.mxu0 %v4274_v55 }
 0x40e   :  { %4149 = vmatpush1.bf16.msra.mxu1 %v4148_v50  ;;  %4277 = vmatpush1.bf16.msra.mxu0 %v4276_v33  ;;  %v2468_v50 = vld [vmem:[#allocation16 + $0x468] sm:$0xff]  ;;  %v2466_v33 = vld [vmem:[#allocation16 + $0x458] sm:$0xff] }
 0x40f   :  { %4151 = vmatprep.subr.bf16.mxu1 %v4150_v12  ;;  %4279 = vmatprep.subr.bf16.mxu0 %v4278_v38  ;;  %v4164_v12 = vpack.c.bf16 %v2459_v29, %v2455_v4  ;;  %v4292_v38 = vpack.c.bf16 %v2461_v60, %v2457_v56  ;;  %v2500_v29 = vld [vmem:[#allocation16 + $0x568] sm:$0xff]  ;;  %v2498_v56 = vld [vmem:[#allocation16 + $0x558] sm:$0xff] }
 0x410   :  { %v2502_v60 = vld [vmem:[#allocation16 + $0x578] sm:$0xff] }
 0x412   :  { %4153 = vmatpush1.bf16.msra.mxu1 %v4152_v47  ;;  %4281 = vmatpush1.bf16.msra.mxu0 %v4280_v31  ;;  %v4166_v47 = vpack.c.bf16 %v2468_v50, %v2464_v61  ;;  %v4294_v31 = vpack.c.bf16 %v2470_v30, %v2466_v33  ;;  %v2499_v50 = vld [vmem:[#allocation16 + $0x560] sm:$0xff]  ;;  %v4310_v30 = vpack.c.bf16 %v2502_v60, %v2498_v56  ;;  %v2533_v56 = vld [vmem:[#allocation16 + $0x670] sm:$0xff]  ;;  %v2536_v60 = vld [vmem:[#allocation16 + $0x688] sm:$0xff] }
 0x413   :  { %4155 = vmatprep.subr.bf16.mxu1 %v4154_v35  ;;  %4283 = vmatprep.subr.bf16.mxu0 %v4282_v37  ;;  %v2474_v35 = vld [vmem:[#allocation16 + $0x498] sm:$0xff] }
 0x414   :  { %v2478_v37 = vld [vmem:[#allocation16 + $0x4b8] sm:$0xff] }
 0x415   :  { %v4298_v59 = vpack.c.bf16 %v2478_v37, %v2474_v35  ;;  %v2505_v35 = vld [vmem:[#allocation16 + $0x590] sm:$0xff] }
 0x416   :  { %4157 = vmatpush1.bf16.msra.mxu1 %v4156_v57  ;;  %4285 = vmatpush1.bf16.msra.mxu0 %v4284_v36  ;;  %v2471_v57 = vld [vmem:[#allocation16 + $0x480] sm:$0xff]  ;;  %v2509_v37 = vld [vmem:[#allocation16 + $0x5b0] sm:$0xff] }
 0x417   :  { %4159 = vmatprep.subr.bf16.mxu1 %v4158_v34  ;;  %4287 = vmatprep.subr.bf16.mxu0 %v4286_v11  ;;  %v2475_v36 = vld [vmem:[#allocation16 + $0x4a0] sm:$0xff]  ;;  %v2477_v34 = vld [vmem:[#allocation16 + $0x4b0] sm:$0xff]  ;;  %v2486_v11 = vld [vmem:[#allocation16 + $0x4f8] sm:$0xff] }
 0x418   :  { %v4300_v21 = vpack.c.bf16 %v2477_v34, %v2473_v63  ;;  %v4302_v24 = vpack.c.bf16 %v2486_v11, %v2482_v5  ;;  %v2515_v63 = vld [vmem:[#allocation16 + $0x5e0] sm:$0xff]  ;;  %v2517_v5 = vld [vmem:[#allocation16 + $0x5f0] sm:$0xff]  ;;  %v2520_v11 = vld [vmem:[#allocation16 + $0x608] sm:$0xff] }
 0x41a   :  { %4161 = vmatpush1.bf16.msra.mxu1 %v4160_v13  ;;  %4289 = vmatpush1.bf16.msra.mxu0 %v4288_v19  ;;  %v4172_v13 = vpack.c.bf16 %v2475_v36, %v2471_v57  ;;  %v2483_v19 = vld [vmem:[#allocation16 + $0x4e0] sm:$0xff]  ;;  %v2518_v57 = vld [vmem:[#allocation16 + $0x5f8] sm:$0xff] }
 0x41b   :  { %4163 = vmatprep.subr.bf16.mxu1 %v4162_v28  ;;  %4291 = vmatprep.subr.bf16.mxu0 %v4290_v51  ;;  %v2485_v28 = vld [vmem:[#allocation16 + $0x4f0] sm:$0xff]  ;;  %v2492_v51 = vld [vmem:[#allocation16 + $0x528] sm:$0xff] }
 0x4b0   :  { %v2221_v46 = vpop.f32.mrb[32].mxu1  ;;  %v2292_v7 = vpop.f32.mrb[48].mxu0 }
 0x4b1   :  { %v2319_v39 = vadd.f32 %v2302_v54, %v2221_v46  ;;  %v5408_v14 = vadd.f32 %v2310_v48, %v2292_v7  ;;  %v2223_v43 = vpop.f32.mrb[33].mxu1  ;;  %v2294_v55 = vpop.f32.mrb[49].mxu0  ;;  %v2494_v54 = vld [vmem:[#allocation16 + $0x538] sm:$0xff]  ;;  %v4176_v48 = vpack.c.bf16 %v2483_v19, %v2479_v22  ;;  %v2491_v46 = vld [vmem:[#allocation16 + $0x520] sm:$0xff]  ;;  %v4178_v7 = vpack.c.bf16 %v2492_v51, %v2488_v62  ;;  %v2521_v51 = vld [vmem:[#allocation16 + $0x610] sm:$0xff] }
 0x4b2   :  { %v2320_v25 = vadd.f32 %v2306_v44, %v2223_v43  ;;  %v2322_v53 = vadd.f32 %v2314_v45, %v2294_v55  ;;  %v4304_v44 = vpack.c.bf16 %v2485_v28, %v2481_v41  ;;  %v2487_v45 = vld [vmem:[#allocation16 + $0x500] sm:$0xff]  ;;  %v4306_v4 = vpack.c.bf16 %v2494_v54, %v2490_v42  ;;  %v2493_v43 = vld [vmem:[#allocation16 + $0x530] sm:$0xff]  ;;  %v2496_v55 = vld [vmem:[#allocation16 + $0x548] sm:$0xff] }
 0x4b3   :  { %v2323_v0 = vmax.f32 %v2319_v39, 0.0  ;;  %v2489_v39 = vld [vmem:[#allocation16 + $0x510] sm:$0xff]  ;;  %v4182_v33 = vpack.c.bf16 %v2500_v29, %v2496_v55  ;;  %v2526_v22 = vld [vmem:[#allocation16 + $0x638] sm:$0xff]  ;;  %v2523_v41 = vld [vmem:[#allocation16 + $0x620] sm:$0xff] }
 0x4b4   :  { %v2324_v3 = vmax.f32 %v2320_v25, 0.0  ;;  %v2326_v9 = vmax.f32 %v2322_v53, 0.0  ;;  %v4180_v25 = vpack.c.bf16 %v2491_v46, %v2487_v45  ;;  %v4308_v61 = vpack.c.bf16 %v2493_v43, %v2489_v39  ;;  %v2495_v53 = vld [vmem:[#allocation16 + $0x540] sm:$0xff]  ;;  %v2525_v42 = vld [vmem:[#allocation16 + $0x630] sm:$0xff]  ;;  %v2528_v54 = vld [vmem:[#allocation16 + $0x648] sm:$0xff] }
 0x4b5   :  { %v4184_v8 = vpack.c.bf16 %v2499_v50, %v2495_v53  ;;  %v2534_v45 = vld [vmem:[#allocation16 + $0x678] sm:$0xff]  ;;  %v2531_v39 = vld [vmem:[#allocation16 + $0x660] sm:$0xff]  ;;  %v2529_v29 = vld [vmem:[#allocation16 + $0x650] sm:$0xff] }
 0x4b6   :  { %2669 = vmatprep.mubr.f32.mxu1 %v2324_v3  ;;  %2811 = vmatprep.mubr.f32.mxu0 %v2324_v3  ;;  %v2497_v3 = vld [vmem:[#allocation16 + $0x550] sm:$0xff]  ;;  %v2542_v53 = vld [vmem:[#allocation16 + $0x6b8] sm:$0xff] }
 0x4b7   :  { %2670 = vmatmul.mubr.f32.vlgmr.msra.gmra.mrb[34].mxu1 %v2323_v0  ;;  %2812 = vmatmul.mubr.f32.vlgmr.msra.gmra.mrb[50].mxu0 %v2323_v0  ;;  %v2510_v0 = vld [vmem:[#allocation16 + $0x5b8] sm:$0xff] }
 0x4b8   :  { %4165 = vmatpush1.bf16.msra.mxu1 %v4164_v12  ;;  %4293 = vmatpush1.bf16.msra.mxu0 %v4292_v38  ;;  %v2501_v12 = vld [vmem:[#allocation16 + $0x570] sm:$0xff]  ;;  %v2504_v38 = vld [vmem:[#allocation16 + $0x588] sm:$0xff]  ;;  %v4314_v32 = vpack.c.bf16 %v2510_v0, %v2506_v10 }
 0x4b9   :  { %2740 = vmatprep.mubr.f32.mxu1 %v2326_v9  ;;  %2882 = vmatprep.mubr.f32.mxu0 %v2326_v9  ;;  %v4312_v16 = vpack.c.bf16 %v2501_v12, %v2497_v3  ;;  %v2512_v9 = vld [vmem:[#allocation16 + $0x5c8] sm:$0xff]  ;;  %v2539_v3 = vld [vmem:[#allocation16 + $0x6a0] sm:$0xff]  ;;  %v2541_v10 = vld [vmem:[#allocation16 + $0x6b0] sm:$0xff] }
 0x4ba   :  { %4167 = vmatprep.subr.bf16.mxu1 %v4166_v47  ;;  %4295 = vmatprep.subr.bf16.mxu0 %v4294_v31  ;;  %v2507_v47 = vld [vmem:[#allocation16 + $0x5a0] sm:$0xff]  ;;  %v4186_v31 = vpack.c.bf16 %v2508_v15, %v2504_v38  ;;  %v2537_v15 = vld [vmem:[#allocation16 + $0x690] sm:$0xff]  ;;  %v2544_v0 = vld [vmem:[#allocation16 + $0x6c8] sm:$0xff] }
 0x4bb   :  { %v4188_v36 = vpack.c.bf16 %v2507_v47, %v2503_v49  ;;  %v2550_v49 = vld [vmem:[#allocation16 + $0x6f8] sm:$0xff] }
 0x4bc   :  { %4169 = vmatpush1.bf16.msra.mxu1 %v4168_v17  ;;  %4297 = vmatpush1.bf16.msra.mxu0 %v4296_v2  ;;  %v2516_v17 = vld [vmem:[#allocation16 + $0x5e8] sm:$0xff]  ;;  %v2514_v2 = vld [vmem:[#allocation16 + $0x5d8] sm:$0xff] }
 0x4bd   :  { %4171 = vmatprep.subr.bf16.mxu1 %v4170_v52  ;;  %4299 = vmatprep.subr.bf16.mxu0 %v4298_v59  ;;  %v4316_v52 = vpack.c.bf16 %v2509_v37, %v2505_v35  ;;  %v2511_v59 = vld [vmem:[#allocation16 + $0x5c0] sm:$0xff]  ;;  %v4190_v34 = vpack.c.bf16 %v2516_v17, %v2512_v9  ;;  %v4318_v18 = vpack.c.bf16 %v2518_v57, %v2514_v2  ;;  %v2545_v17 = vld [vmem:[#allocation16 + $0x6d0] sm:$0xff]  ;;  %v2552_v57 = vld [vmem:[#allocation16 + $0x708] sm:$0xff] }
 0x4be   :  { %v4192_v19 = vpack.c.bf16 %v2515_v63, %v2511_v59  ;;  %v2547_v35 = vld [vmem:[#allocation16 + $0x6e0] sm:$0xff]  ;;  %v2549_v2 = vld [vmem:[#allocation16 + $0x6f0] sm:$0xff]  ;;  %v2558_v59 = vld [vmem:[#allocation16 + $0x738] sm:$0xff] }
 0x4c0   :  { %4173 = vmatpush1.bf16.msra.mxu1 %v4172_v13  ;;  %4301 = vmatpush1.bf16.msra.mxu0 %v4300_v21  ;;  %v2524_v13 = vld [vmem:[#allocation16 + $0x628] sm:$0xff]  ;;  %v2522_v21 = vld [vmem:[#allocation16 + $0x618] sm:$0xff] }
 0x4c1   :  { %4175 = vmatprep.subr.bf16.mxu1 %v4174_v6  ;;  %4303 = vmatprep.subr.bf16.mxu0 %v4302_v24  ;;  %v4320_v6 = vpack.c.bf16 %v2517_v5, %v2513_v58  ;;  %v2519_v24 = vld [vmem:[#allocation16 + $0x600] sm:$0xff]  ;;  %v4194_v28 = vpack.c.bf16 %v2524_v13, %v2520_v11  ;;  %v4322_v62 = vpack.c.bf16 %v2526_v22, %v2522_v21  ;;  %v2553_v13 = vld [vmem:[#allocation16 + $0x710] sm:$0xff]  ;;  %v2560_v22 = vld [vmem:[#allocation16 + $0x748] sm:$0xff] }
 0x4c2   :  { %v4196_v46 = vpack.c.bf16 %v2523_v41, %v2519_v24  ;;  %v2555_v58 = vld [vmem:[#allocation16 + $0x720] sm:$0xff]  ;;  %v2557_v21 = vld [vmem:[#allocation16 + $0x730] sm:$0xff]  ;;  %v2566_v24 = vld [vmem:[#allocation16 + $0x778] sm:$0xff] }
 0x4c4   :  { %4177 = vmatpush1.bf16.msra.mxu1 %v4176_v48  ;;  %4305 = vmatpush1.bf16.msra.mxu0 %v4304_v44  ;;  %v2532_v48 = vld [vmem:[#allocation16 + $0x668] sm:$0xff]  ;;  %v2530_v44 = vld [vmem:[#allocation16 + $0x658] sm:$0xff] }
 0x4c5   :  { %4179 = vmatprep.subr.bf16.mxu1 %v4178_v7  ;;  %4307 = vmatprep.subr.bf16.mxu0 %v4306_v4  ;;  %v4324_v7 = vpack.c.bf16 %v2525_v42, %v2521_v51  ;;  %v2527_v4 = vld [vmem:[#allocation16 + $0x640] sm:$0xff]  ;;  %v4198_v43 = vpack.c.bf16 %v2532_v48, %v2528_v54  ;;  %v4326_v55 = vpack.c.bf16 %v2534_v45, %v2530_v44  ;;  %v2561_v48 = vld [vmem:[#allocation16 + $0x750] sm:$0xff]  ;;  %v2568_v45 = vld [vmem:[#allocation16 + $0x788] sm:$0xff] }
 0x4c6   :  { %v4200_v50 = vpack.c.bf16 %v2531_v39, %v2527_v4  ;;  %v2563_v51 = vld [vmem:[#allocation16 + $0x760] sm:$0xff]  ;;  %v2565_v44 = vld [vmem:[#allocation16 + $0x770] sm:$0xff]  ;;  %v2574_v4 = vld [vmem:[#allocation16 + $0x7b8] sm:$0xff] }
 0x4c8   :  { %4181 = vmatpush1.bf16.msra.mxu1 %v4180_v25  ;;  %4309 = vmatpush1.bf16.msra.mxu0 %v4308_v61  ;;  %v2540_v25 = vld [vmem:[#allocation16 + $0x6a8] sm:$0xff]  ;;  %v2538_v61 = vld [vmem:[#allocation16 + $0x698] sm:$0xff] }
 0x4c9   :  { %4183 = vmatprep.subr.bf16.mxu1 %v4182_v33  ;;  %4311 = vmatprep.subr.bf16.mxu0 %v4310_v30  ;;  %v4328_v33 = vpack.c.bf16 %v2533_v56, %v2529_v29  ;;  %v2535_v30 = vld [vmem:[#allocation16 + $0x680] sm:$0xff]  ;;  %v4202_v12 = vpack.c.bf16 %v2540_v25, %v2536_v60  ;;  %v4330_v38 = vpack.c.bf16 %v2542_v53, %v2538_v61  ;;  %v2569_v25 = vld [vmem:[#allocation16 + $0x790] sm:$0xff]  ;;  %v2576_v53 = vld [vmem:[#allocation16 + $0x7c8] sm:$0xff] }
 0x4ca   :  { %v4204_v47 = vpack.c.bf16 %v2539_v3, %v2535_v30  ;;  %v2571_v29 = vld [vmem:[#allocation16 + $0x7a0] sm:$0xff]  ;;  %v2573_v61 = vld [vmem:[#allocation16 + $0x7b0] sm:$0xff]  ;;  %v2582_v30 = vld [vmem:[#allocation16 + $0x7f8] sm:$0xff] }
 0x4cc   :  { %4185 = vmatpush1.bf16.msra.mxu1 %v4184_v8  ;;  %4313 = vmatpush1.bf16.msra.mxu0 %v4312_v16  ;;  %v2548_v8 = vld [vmem:[#allocation16 + $0x6e8] sm:$0xff]  ;;  %v2546_v16 = vld [vmem:[#allocation16 + $0x6d8] sm:$0xff] }
 0x4cd   :  { %4187 = vmatprep.subr.bf16.mxu1 %v4186_v31  ;;  %4315 = vmatprep.subr.bf16.mxu0 %v4314_v32  ;;  %v4332_v31 = vpack.c.bf16 %v2541_v10, %v2537_v15  ;;  %v2543_v32 = vld [vmem:[#allocation16 + $0x6c0] sm:$0xff]  ;;  %v4206_v37 = vpack.c.bf16 %v2548_v8, %v2544_v0  ;;  %v4334_v9 = vpack.c.bf16 %v2550_v49, %v2546_v16  ;;  %v2577_v8 = vld [vmem:[#allocation16 + $0x7d0] sm:$0xff] }
 0x4ce   :  { %v4208_v63 = vpack.c.bf16 %v2547_v35, %v2543_v32  ;;  %v2579_v15 = vld [vmem:[#allocation16 + $0x7e0] sm:$0xff]  ;;  %v2581_v16 = vld [vmem:[#allocation16 + $0x7f0] sm:$0xff]  ;;  %v2942_v32 = vld [vmem:[#allocation17 + $0x188] sm:$0xff] }
 0x4cf   :  { %v2909_v49 = vld [vmem:[#allocation17 + $0x80] sm:$0xff] }
 0x4d0   :  { %4189 = vmatpush1.bf16.msra.mxu1 %v4188_v36  ;;  %4317 = vmatpush1.bf16.msra.mxu0 %v4316_v52  ;;  %v2556_v36 = vld [vmem:[#allocation16 + $0x728] sm:$0xff]  ;;  %v2554_v52 = vld [vmem:[#allocation16 + $0x718] sm:$0xff] }
 0x4d1   :  { %4191 = vmatprep.subr.bf16.mxu1 %v4190_v34  ;;  %4319 = vmatprep.subr.bf16.mxu0 %v4318_v18  ;;  %v4336_v34 = vpack.c.bf16 %v2549_v2, %v2545_v17  ;;  %v2551_v18 = vld [vmem:[#allocation16 + $0x700] sm:$0xff]  ;;  %v4210_v5 = vpack.c.bf16 %v2556_v36, %v2552_v57  ;;  %v4338_v11 = vpack.c.bf16 %v2558_v59, %v2554_v52  ;;  %v2894_v17 = vld [vmem:[#allocation17 + $0x8] sm:$0xff]  ;;  %v2911_v59 = vld [vmem:[#allocation17 + $0x90] sm:$0xff] }
 0x4d2   :  { %v4212_v41 = vpack.c.bf16 %v2555_v58, %v2551_v18  ;;  %v2925_v36 = vld [vmem:[#allocation17 + $0x100] sm:$0xff]  ;;  %v2926_v52 = vld [vmem:[#allocation17 + $0x108] sm:$0xff]  ;;  %v2944_v18 = vld [vmem:[#allocation17 + $0x198] sm:$0xff] }
 0x4d4   :  { %4193 = vmatpush1.bf16.msra.mxu1 %v4192_v19  ;;  %4321 = vmatpush1.bf16.msra.mxu0 %v4320_v6  ;;  %v2564_v19 = vld [vmem:[#allocation16 + $0x768] sm:$0xff]  ;;  %v2562_v6 = vld [vmem:[#allocation16 + $0x758] sm:$0xff] }
 0x4d5   :  { %4195 = vmatprep.subr.bf16.mxu1 %v4194_v28  ;;  %4323 = vmatprep.subr.bf16.mxu0 %v4322_v62  ;;  %v4340_v28 = vpack.c.bf16 %v2557_v21, %v2553_v13  ;;  %v2559_v62 = vld [vmem:[#allocation16 + $0x740] sm:$0xff]  ;;  %v4214_v42 = vpack.c.bf16 %v2564_v19, %v2560_v22  ;;  %v4342_v54 = vpack.c.bf16 %v2566_v24, %v2562_v6  ;;  %v2896_v13 = vld [vmem:[#allocation17 + $0x18] sm:$0xff]  ;;  %v2325_v21 = vmax.f32 %v5408_v14, 0.0  ;;  %v2927_v6 = vld [vmem:[#allocation17 + $0x110] sm:$0xff] }
 0x4d6   :  { %v4216_v39 = vpack.c.bf16 %v2563_v51, %v2559_v62  ;;  %v2928_v24 = vld [vmem:[#allocation17 + $0x118] sm:$0xff]  ;;  %v2945_v62 = vld [vmem:[#allocation17 + $0x1a0] sm:$0xff]  ;;  %v2946_v51 = vld [vmem:[#allocation17 + $0x1a8] sm:$0xff] }
 0x4d8   :  { %4197 = vmatpush1.bf16.msra.mxu1 %v4196_v46  ;;  %4325 = vmatpush1.bf16.msra.mxu0 %v4324_v7  ;;  %v2572_v46 = vld [vmem:[#allocation16 + $0x7a8] sm:$0xff]  ;;  %v2570_v7 = vld [vmem:[#allocation16 + $0x798] sm:$0xff] }
 0x4d9   :  { %4199 = vmatprep.subr.bf16.mxu1 %v4198_v43  ;;  %4327 = vmatprep.subr.bf16.mxu0 %v4326_v55  ;;  %v4344_v43 = vpack.c.bf16 %v2565_v44, %v2561_v48  ;;  %v2567_v55 = vld [vmem:[#allocation16 + $0x780] sm:$0xff]  ;;  %v4218_v56 = vpack.c.bf16 %v2572_v46, %v2568_v45  ;;  %v4346_v60 = vpack.c.bf16 %v2574_v4, %v2570_v7  ;;  %v2898_v44 = vld [vmem:[#allocation17 + $0x28] sm:$0xff]  ;;  %v2915_v4 = vld [vmem:[#allocation17 + $0xb0] sm:$0xff] }
 0x4da   :  { %v4220_v3 = vpack.c.bf16 %v2571_v29, %v2567_v55  ;;  %v2897_v48 = vld [vmem:[#allocation17 + $0x20] sm:$0xff]  ;;  %v4394_v45 = vpack.c.bf16 %v2946_v51, %v2945_v62  ;;  %v2930_v7 = vld [vmem:[#allocation17 + $0x128] sm:$0xff]  ;;  %v2948_v55 = vld [vmem:[#allocation17 + $0x1b8] sm:$0xff] }
 0x4db   :  { %v2929_v46 = vld [vmem:[#allocation17 + $0x120] sm:$0xff]  ;;  %v4364_v29 = vpack.c.bf16 %v2898_v44, %v2897_v48  ;;  %v2938_v62 = vld [vmem:[#allocation17 + $0x168] sm:$0xff]  ;;  %v2955_v48 = vld [vmem:[#allocation17 + $0x1f0] sm:$0xff] }
 0x4dc   :  { %4201 = vmatpush1.bf16.msra.mxu1 %v4200_v50  ;;  %4329 = vmatpush1.bf16.msra.mxu0 %v4328_v33  ;;  %v2580_v50 = vld [vmem:[#allocation16 + $0x7e8] sm:$0xff]  ;;  %v2578_v33 = vld [vmem:[#allocation16 + $0x7d8] sm:$0xff] }
 0x4dd   :  { %4203 = vmatprep.subr.bf16.mxu1 %v4202_v12  ;;  %4331 = vmatprep.subr.bf16.mxu0 %v4330_v38  ;;  %v4348_v12 = vpack.c.bf16 %v2573_v61, %v2569_v25  ;;  %v2575_v38 = vld [vmem:[#allocation16 + $0x7c0] sm:$0xff]  ;;  %v4222_v10 = vpack.c.bf16 %v2580_v50, %v2576_v53  ;;  %v4350_v0 = vpack.c.bf16 %v2582_v30, %v2578_v33  ;;  %v2900_v25 = vld [vmem:[#allocation17 + $0x38] sm:$0xff]  ;;  %v2931_v50 = vld [vmem:[#allocation17 + $0x130] sm:$0xff] }
 0x4de   :  { %v4224_v35 = vpack.c.bf16 %v2579_v15, %v2575_v38  ;;  %v2932_v33 = vld [vmem:[#allocation17 + $0x138] sm:$0xff]  ;;  %v2917_v30 = vld [vmem:[#allocation17 + $0xc0] sm:$0xff]  ;;  %v2950_v38 = vld [vmem:[#allocation17 + $0x1c8] sm:$0xff] }
 0x4e0   :  { %4205 = vmatpush1.bf16.msra.mxu1 %v4204_v47  ;;  %4333 = vmatpush1.bf16.msra.mxu0 %v4332_v31  ;;  %v2910_v47 = vld [vmem:[#allocation17 + $0x88] sm:$0xff]  ;;  %v2941_v31 = vld [vmem:[#allocation17 + $0x180] sm:$0xff] }
 0x4e1   :  { %4207 = vmatprep.subr.bf16.mxu1 %v4206_v37  ;;  %4335 = vmatprep.subr.bf16.mxu0 %v4334_v9  ;;  %v4352_v37 = vpack.c.bf16 %v2581_v16, %v2577_v8  ;;  %v2893_v9 = vld [vmem:[#allocation17] sm:$0xff]  ;;  %v4354_v2 = vpack.c.bf16 %v2910_v47, %v2909_v49  ;;  %v4386_v57 = vpack.c.bf16 %v2942_v32, %v2941_v31  ;;  %v2902_v8 = vld [vmem:[#allocation17 + $0x48] sm:$0xff]  ;;  %v2919_v32 = vld [vmem:[#allocation17 + $0xd0] sm:$0xff] }
 0x4e2   :  { %v4356_v58 = vpack.c.bf16 %v2894_v17, %v2893_v9  ;;  %v2933_v47 = vld [vmem:[#allocation17 + $0x140] sm:$0xff]  ;;  %v2934_v31 = vld [vmem:[#allocation17 + $0x148] sm:$0xff]  ;;  %v2952_v9 = vld [vmem:[#allocation17 + $0x1d8] sm:$0xff] }
 0x4e4   :  { %4209 = vmatpush1.bf16.msra.mxu1 %v4208_v63  ;;  %4337 = vmatpush1.bf16.msra.mxu0 %v4336_v34  ;;  %v2912_v63 = vld [vmem:[#allocation17 + $0x98] sm:$0xff]  ;;  %v2943_v34 = vld [vmem:[#allocation17 + $0x190] sm:$0xff] }
 0x4e5   :  { %4211 = vmatprep.subr.bf16.mxu1 %v4210_v5  ;;  %4339 = vmatprep.subr.bf16.mxu0 %v4338_v11  ;;  %v4388_v5 = vpack.c.bf16 %v2926_v52, %v2925_v36  ;;  %v2895_v11 = vld [vmem:[#allocation17 + $0x10] sm:$0xff]  ;;  %v4358_v22 = vpack.c.bf16 %v2912_v63, %v2911_v59  ;;  %v4390_v19 = vpack.c.bf16 %v2944_v18, %v2943_v34  ;;  %v2904_v36 = vld [vmem:[#allocation17 + $0x58] sm:$0xff]  ;;  %v2921_v18 = vld [vmem:[#allocation17 + $0xe0] sm:$0xff] }
 0x4e6   :  { %v2935_v63 = vld [vmem:[#allocation17 + $0x150] sm:$0xff]  ;;  %v2936_v34 = vld [vmem:[#allocation17 + $0x158] sm:$0xff] }
 0x4e8   :  { %4213 = vmatpush1.bf16.msra.mxu1 %v4212_v41  ;;  %4341 = vmatpush1.bf16.msra.mxu0 %v4340_v28  ;;  %v2913_v41 = vld [vmem:[#allocation17 + $0xa0] sm:$0xff]  ;;  %v2914_v28 = vld [vmem:[#allocation17 + $0xa8] sm:$0xff] }
 0x4e9   :  { %4215 = vmatprep.subr.bf16.mxu1 %v4214_v42  ;;  %4343 = vmatprep.subr.bf16.mxu0 %v4342_v54  ;;  %v4360_v42 = vpack.c.bf16 %v2896_v13, %v2895_v11  ;;  %v4392_v54 = vpack.c.bf16 %v2928_v24, %v2927_v6  ;;  %v4362_v14 = vpack.c.bf16 %v2914_v28, %v2913_v41  ;;  %v2954_v11 = vld [vmem:[#allocation17 + $0x1e8] sm:$0xff]  ;;  %v2905_v6 = vld [vmem:[#allocation17 + $0x60] sm:$0xff] }
 0x4ea   :  { %v2906_v24 = vld [vmem:[#allocation17 + $0x68] sm:$0xff]  ;;  %v2937_v41 = vld [vmem:[#allocation17 + $0x160] sm:$0xff] }
 0x4eb   :  { %v4380_v28 = vpack.c.bf16 %v2906_v24, %v2905_v6  ;;  %v4412_v51 = vpack.c.bf16 %v2938_v62, %v2937_v41 }
 0x4ec   :  { %4217 = vmatpush1.bf16.msra.mxu1 %v4216_v39  ;;  %4345 = vmatpush1.bf16.msra.mxu0 %v4344_v43  ;;  %v2916_v39 = vld [vmem:[#allocation17 + $0xb8] sm:$0xff]  ;;  %v2947_v43 = vld [vmem:[#allocation17 + $0x1b0] sm:$0xff] }
 0x4ed   :  { %4219 = vmatprep.subr.bf16.mxu1 %v4218_v56  ;;  %4347 = vmatprep.subr.bf16.mxu0 %v4346_v60  ;;  %v4396_v56 = vpack.c.bf16 %v2930_v7, %v2929_v46  ;;  %v2899_v60 = vld [vmem:[#allocation17 + $0x30] sm:$0xff]  ;;  %v4366_v61 = vpack.c.bf16 %v2916_v39, %v2915_v4  ;;  %v4398_v53 = vpack.c.bf16 %v2948_v55, %v2947_v43  ;;  %v2908_v46 = vld [vmem:[#allocation17 + $0x78] sm:$0xff] }
 0x4ee   :  { %v4368_v15 = vpack.c.bf16 %v2900_v25, %v2899_v60  ;;  %v2939_v39 = vld [vmem:[#allocation17 + $0x170] sm:$0xff]  ;;  %v2940_v43 = vld [vmem:[#allocation17 + $0x178] sm:$0xff] }
 0x4ef   :  { %v4416_v55 = vpack.c.bf16 %v2940_v43, %v2939_v39 }
 0x4f0   :  { %4221 = vmatpush1.bf16.msra.mxu1 %v4220_v3  ;;  %4349 = vmatpush1.bf16.msra.mxu0 %v4348_v12  ;;  %v2918_v3 = vld [vmem:[#allocation17 + $0xc8] sm:$0xff]  ;;  %v2949_v12 = vld [vmem:[#allocation17 + $0x1c0] sm:$0xff] }
 0x4f1   :  { %4223 = vmatprep.subr.bf16.mxu1 %v4222_v10  ;;  %4351 = vmatprep.subr.bf16.mxu0 %v4350_v0  ;;  %v4400_v10 = vpack.c.bf16 %v2932_v33, %v2931_v50  ;;  %v2901_v0 = vld [vmem:[#allocation17 + $0x40] sm:$0xff]  ;;  %v4370_v16 = vpack.c.bf16 %v2918_v3, %v2917_v30  ;;  %v4402_v49 = vpack.c.bf16 %v2950_v38, %v2949_v12 }
 0x4f2   :  { %v4372_v17 = vpack.c.bf16 %v2902_v8, %v2901_v0 }
 0x4f4   :  { %4225 = vmatpush1.bf16.msra.mxu1 %v4224_v35  ;;  %4353 = vmatpush1.bf16.msra.mxu0 %v4352_v37  ;;  %v2920_v35 = vld [vmem:[#allocation17 + $0xd8] sm:$0xff]  ;;  %v2951_v37 = vld [vmem:[#allocation17 + $0x1d0] sm:$0xff] }
 0x4f5   :  { %4355 = vmatprep.subr.bf16.mxu1 %v4354_v2  ;;  %4387 = vmatprep.subr.bf16.mxu0 %v4386_v57  ;;  %v4404_v2 = vpack.c.bf16 %v2934_v31, %v2933_v47  ;;  %v2903_v57 = vld [vmem:[#allocation17 + $0x50] sm:$0xff]  ;;  %v4374_v52 = vpack.c.bf16 %v2920_v35, %v2919_v32  ;;  %v4406_v59 = vpack.c.bf16 %v2952_v9, %v2951_v37  ;;  %v3110_v32 = vld [vmem:[#allocation19 + $0x28] sm:$0xff]  ;;  %v3112_v9 = vld [vmem:[#allocation19 + $0x38] sm:$0xff] }
 0x4f6   :  { %v4376_v13 = vpack.c.bf16 %v2904_v36, %v2903_v57  ;;  %v3107_v31 = vld [vmem:[#allocation19 + $0x10] sm:$0xff]  ;;  %v3114_v57 = vld [vmem:[#allocation19 + $0x48] sm:$0xff] }
 0x4f7   :  { %2741 = vmatmul.mubr.f32.vlgmr.msra.gmra.mrb[34].mxu1 %v2325_v21  ;;  %2883 = vmatmul.mubr.f32.vlgmr.msra.gmra.mrb[50].mxu0 %v2325_v21  ;;  %v4408_v21 = vpack.c.bf16 %v2936_v34, %v2935_v63  ;;  %v3111_v37 = vld [vmem:[#allocation19 + $0x30] sm:$0xff]  ;;  %v3117_v63 = vld [vmem:[#allocation19 + $0x60] sm:$0xff]  ;;  %v3118_v34 = vld [vmem:[#allocation19 + $0x68] sm:$0xff] }
 0x4f8   :  { %4357 = vmatpush3.bf16.msra.mxu1 %v4356_v58  ;;  %4389 = vmatpush3.bf16.msra.mxu0 %v4388_v5  ;;  %v2922_v58 = vld [vmem:[#allocation17 + $0xe8] sm:$0xff]  ;;  %v2953_v5 = vld [vmem:[#allocation17 + $0x1e0] sm:$0xff] }
 0x4f9   :  { %4359 = vmatprep.subr.bf16.mxu1 %v4358_v22  ;;  %4391 = vmatprep.subr.bf16.mxu0 %v4390_v19  ;;  %v4378_v22 = vpack.c.bf16 %v2922_v58, %v2921_v18  ;;  %v4410_v19 = vpack.c.bf16 %v2954_v11, %v2953_v5  ;;  %v4437_v18 = vpack.c.bf16 %v3118_v34, %v3117_v63  ;;  %v3119_v58 = vld [vmem:[#allocation19 + $0x70] sm:$0xff]  ;;  %v3120_v5 = vld [vmem:[#allocation19 + $0x78] sm:$0xff] }
 0x4fa   :  { %v4440_v11 = vpack.c.bf16 %v3120_v5, %v3119_v58 }
 0x4fc   :  { %4361 = vmatpush3.bf16.msra.mxu1 %v4360_v42  ;;  %4393 = vmatpush3.bf16.msra.mxu0 %v4392_v54  ;;  %v2923_v42 = vld [vmem:[#allocation17 + $0xf0] sm:$0xff]  ;;  %v2924_v54 = vld [vmem:[#allocation17 + $0xf8] sm:$0xff] }
 0x4fd   :  { %4363 = vmatprep.subr.bf16.mxu1 %v4362_v14  ;;  %4395 = vmatprep.subr.bf16.mxu0 %v4394_v45  ;;  %v4382_v44 = vpack.c.bf16 %v2924_v54, %v2923_v42  ;;  %v2956_v14 = vld [vmem:[#allocation17 + $0x1f8] sm:$0xff]  ;;  %v2907_v45 = vld [vmem:[#allocation17 + $0x70] sm:$0xff]  ;;  %v3231_v42 = vld [vmem:[%s5459_s17] ss:$0 sm:$0xff] }
 0x4fe   :  { %v4414_v7 = vpack.c.bf16 %v2956_v14, %v2955_v48  ;;  %v4384_v4 = vpack.c.bf16 %v2908_v46, %v2907_v45 }
 0x500   :  { %4365 = vmatpush3.bf16.msra.mxu1 %v4364_v29  ;;  %4397 = vmatpush3.bf16.msra.mxu0 %v4396_v56  ;;  %v4768_v29 = vmov 0.0|0.0   ;;  %v2583_v56 = vld [vmem:[%s5455_s13] sm:$0xf] }
 0x501   :  { %4367 = vmatprep.subr.bf16.mxu1 %v4366_v61  ;;  %4399 = vmatprep.subr.bf16.mxu0 %v4398_v53  ;;  %v2588_v60 = vrot.slane %v2583_v56, %v2301_v1  ;;  %v2596_v25 = vrot.slane %v2583_v56, %v2309_v40  ;;  %v2592_v61 = vrot.slane %v2583_v56, %v2305_v27  ;;  %v3108_v27 = vld [vmem:[#allocation19 + $0x18] sm:$0xff] }
 0x502   :  { %v2600_v53 = vrot.slane %v2583_v56, %v2313_v23  ;;  %v4422_v26 = vpack.c.bf16 %v3108_v27, %v3107_v31  ;;  %v3109_v23 = vld [vmem:[#allocation19 + $0x20] sm:$0xff] }
 0x503   :  { %v4425_v35 = vpack.c.bf16 %v3110_v32, %v3109_v23 }
 0x504   :  { %4369 = vmatpush3.bf16.msra.mxu1 %v4368_v15  ;;  %4401 = vmatpush3.bf16.msra.mxu0 %v4400_v10  ;;  %v3105_v15 = vld [vmem:[#allocation19] sm:$0xff]  ;;  %v3106_v10 = vld [vmem:[#allocation19 + $0x8] sm:$0xff] }
 0x505   :  { %4371 = vmatprep.subr.bf16.mxu1 %v4370_v16  ;;  %4403 = vmatprep.subr.bf16.mxu0 %v4402_v49  ;;  %v4419_v49 = vpack.c.bf16 %v3106_v10, %v3105_v15 }
 0x508   :  { %4373 = vmatpush3.bf16.msra.mxu1 %v4372_v17  ;;  %4405 = vmatpush3.bf16.msra.mxu0 %v4404_v2  ;;  %v4428_v17 = vpack.c.bf16 %v3112_v9, %v3111_v37  ;;  %v3113_v2 = vld [vmem:[#allocation19 + $0x40] sm:$0xff] }
 0x509   :  { %4375 = vmatprep.subr.bf16.mxu1 %v4374_v52  ;;  %4407 = vmatprep.subr.bf16.mxu0 %v4406_v59  ;;  %v4431_v36 = vpack.c.bf16 %v3114_v57, %v3113_v2  ;;  %v3115_v52 = vld [vmem:[#allocation19 + $0x50] sm:$0xff]  ;;  %v3116_v59 = vld [vmem:[#allocation19 + $0x58] sm:$0xff] }
 0x50c   :  { %4377 = vmatpush3.bf16.msra.mxu1 %v4376_v13  ;;  %4409 = vmatpush3.bf16.msra.mxu0 %v4408_v21 }
 0x50d   :  { %4379 = vmatprep.subr.bf16.mxu1 %v4378_v22  ;;  %4411 = vmatprep.subr.bf16.mxu0 %v4410_v19  ;;  %v3230_v22 = vld [vmem:[%s5457_s15] ss:$0 sm:$0xff]  ;;  %s4715_s15 = scalar_lea.vmem %s3206_s9, 128 }
 0x50e   :  { %p4716_p4 = scmp.ne.s32.totalorder %s3206_s9, %s4715_s15  ;;  %p4721_p6 = scmp.lt.s32.totalorder %s4715_s15, %s4715_s15 }
 0x510   :  { %4381 = vmatpush3.bf16.msra.mxu1 %v4380_v28  ;;  %4413 = vmatpush3.bf16.msra.mxu0 %v4412_v51  ;;  %p4722_p7 = por %p4721_p6, %p4720_p5 }
 0x511   :  { %4383 = vmatprep.subr.bf16.mxu1 %v4382_v44  ;;  %4415 = vmatprep.subr.bf16.mxu0 %v4414_v7 }
 0x512   :  { %p4723_p8 = pnand %p4722_p7, %p4716_p4 }
 0x514   :  { %4385 = vmatpush3.bf16.msra.mxu1 %v4384_v4  ;;  %4417 = vmatpush3.bf16.msra.mxu0 %v4416_v55 }
 0x515   :  { %4418 = vmatprep.subr.bf16.mxu1 %v4768_v29 }
 0x5ca   :  { %v2742_v50 = vpop.f32.mrb[34].mxu1  ;;  %v2884_v33 = vpop.f32.mrb[50].mxu0 }
 0x5cb   :  { %v4442_v30 = vadd.f32 %v2742_v50, %v2588_v60  ;;  %v4444_v3 = vadd.f32 %v2884_v33, %v2596_v25  ;;  %v2744_v12 = vpop.f32.mrb[35].mxu1  ;;  %v2886_v38 = vpop.f32.mrb[51].mxu0 }
 0x5cc   :  { %v4443_v0 = vadd.f32 %v2744_v12, %v2592_v61  ;;  %v4445_v8 = vadd.f32 %v2886_v38, %v2600_v53 }
 0x5cd   :  { %v2889_v40 = vmax.f32 %v4442_v30, 0.0  ;;  %v2891_v47 = vmax.f32 %v4444_v3, 0.0 }
 0x5ce   :  { %v2890_v1 = vmax.f32 %v4443_v0, 0.0  ;;  %v2892_v16 = vmax.f32 %v4445_v8, 0.0 }
 0x5d0   :  { %3028 = vmatprep.mubr.f32.mxu1 %v2890_v1  ;;  %3098 = vmatprep.mubr.f32.mxu0 %v2892_v16 }
 0x5d1   :  { %3029 = vmatmul.mubr.f32.vlgmr.msra.gmra.mrb[36].mxu1 %v2889_v40  ;;  %3099 = vmatmul.mubr.f32.vlgmr.msra.gmra.mrb[52].mxu0 %v2891_v47 }
 0x5d2   :  { %4420 = vmatpush3.bf16.msra.mxu1 %v4419_v49  ;;  %3807 = vmatprep.mubr.msk.f32.mxu1 %vm4767_vm0, %v5481_v20  ;;  %v4434_v20 = vpack.c.bf16 %v3116_v59, %v3115_v52 }
 0x5d3   :  { %4421 = vmatprep.subr.bf16.mxu1 %v4768_v29 }
 0x5d6   :  { %4423 = vmatpush3.bf16.msra.mxu1 %v4422_v26 }
 0x5d7   :  { %4424 = vmatprep.subr.bf16.mxu1 %v4768_v29 }
 0x5da   :  { %4426 = vmatpush3.bf16.msra.mxu1 %v4425_v35 }
 0x5db   :  { %4427 = vmatprep.subr.bf16.mxu1 %v4768_v29 }
 0x5de   :  { %4429 = vmatpush3.bf16.msra.mxu1 %v4428_v17 }
 0x5df   :  { %4430 = vmatprep.subr.bf16.mxu1 %v4768_v29 }
 0x5e2   :  { %4432 = vmatpush3.bf16.msra.mxu1 %v4431_v36 }
 0x5e3   :  { %4433 = vmatprep.subr.bf16.mxu1 %v4768_v29 }
 0x5e6   :  { %4435 = vmatpush3.bf16.msra.mxu1 %v4434_v20 }
 0x5e7   :  { %4436 = vmatprep.subr.bf16.mxu1 %v4768_v29 }
 0x5ea   :  { %4438 = vmatpush3.bf16.msra.mxu1 %v4437_v18 }
 0x5eb   :  { %4439 = vmatprep.subr.bf16.mxu1 %v4768_v29 }
 0x5ee   :  { %4441 = vmatpush3.bf16.msra.mxu1 %v4440_v11 }
 0x6a4   :  { %v3424_v13 = vpop.f32.mrb[36].mxu1  ;;  %v3459_v21 = vpop.f32.mrb[52].mxu0 }
 0x6a5   :  { %v3425_v19 = vpop.f32.mrb[37].mxu1  ;;  %v3460_v6 = vpop.f32.mrb[53].mxu0 }
 0x6a6   :  { %v3426_v24 = vadd.f32 %v3425_v19, %v3424_v13  ;;  %v3461_v41 = vadd.f32 %v3460_v6, %v3459_v21 }
 0x6a8   :  { %v3031_v28 = vadd.f32 %v3426_v24, %v3230_v22 }
 0x6aa   :  { %v3101_v62 = vadd.f32 %v3461_v41, %v3031_v28 }
 0x6ac   :  { %v3104_v51 = vmax.f32 %v3101_v62, 0.0 }
 0x6ae   :  { %3808 = vmatmul.mubr.f32.vlgmr.msra.gmra.mrb[38].mxu1 %v3104_v51 }
 0x781   :  { %v3194_v54 = vpop.f32.mrb[38].mxu1 }
 0x782   :  { %v3195_v48 = vadd.f32 %v3231_v42, %v3194_v54  ;;  %v3809_v44 = vpop.f32.mrb[39].mxu1 }
 0x784   :  { %3198 = vst [vmem:[#allocation20] sm:$0xff] %v3195_v48 }
 0x785   :  { %4726 = shalt.err (!%p4723_p8)
}
 0x786   :  { %s4727_s19 = scalar_lea.hbm %s5460_s18, 128 }
 0x787   :  { %p4728_p9 = scmp.ne.s32.totalorder %s5460_s18, %s4727_s19  ;;  %p4731_p10 = scmp.lt.u32.totalorder %s4727_s19, %s5460_s18 }
 0x789   :  { %p4733_p11 = pnand %p4731_p10, %p4728_p9 }
 0x78b   :  { %4736 = shalt.err (!%p4733_p11)
}
 0x78c   :  { %3208 = dma.vmem_to_hbm [thread:$0]  %s3206_s9, 128, %s5460_s18, [#allocation4]  }
 0x78d   :  { %4749 = dma.done.wait [#allocation4], 128  }
 0x78e   :  { %4750 = vsyncadd [#allocation4], 4294967168 }
 0x78f   :  { %3212 = vsyncpa [#allocation3], 1 }
 0x790   :  { %3213 = vsyncpa [#allocation6], 1 }
 0x791   :  { %3214 = vsyncpa [#allocation9], 1 }
 0x792   :  { %3215 = vsyncpa [#allocation12], 1 }
 0x793   :  { %3216 = vsyncpa [#allocation15], 1 }
 0x794   :  { %3217 = vsyncpa [#allocation18], 1 }
 0x795   :  { %3218 = vsyncpa [#allocation4], 1 }

// kernel: tpu_custom_call.1
= control target key start
LH: loop header
LB: loop body
LE: loop exit
PB: predicated region body
PF: predicated region fallthrough
CT: control target
= control target key end

     0   :  { %s5442_s0 = inlined_call_operand.hbm [shape: f32[8,8,8], index: 0, kind: input, shape index: {}]   ;;  %s5443_s1 = inlined_call_operand.hbm [shape: f32[8,8,128], index: 1, kind: input, shape index: {}]   ;;  %s5444_s2 = inlined_call_operand.hbm [shape: f32[8,16,128], index: 2, kind: input, shape index: {}]   ;;  %s5445_s3 = inlined_call_operand.hbm [shape: f32[128,128], index: 3, kind: input, shape index: {}]   ;;  %s5446_s4 = inlined_call_operand.vmem [shape: f32[1,128], index: 4, kind: input, shape index: {}]   ;;  %s5447_s5 = inlined_call_operand.hbm [shape: f32[128,128], index: 5, kind: input, shape index: {}]   ;;  %s5448_s6 = inlined_call_operand.vmem [shape: f32[1,128], index: 6, kind: input, shape index: {}]   ;;  %s5449_s7 = inlined_call_operand.hbm [shape: f32[3,128,128], index: 7, kind: input, shape index: {}]   ;;  %s5450_s8 = inlined_call_operand.vmem [shape: f32[1,128], index: 8, kind: input, shape index: {}]   ;;  %s5451_s9 = inlined_call_operand.hbm [shape: f32[128,512], index: 9, kind: input, shape index: {}]   ;;  %s5452_s10 = inlined_call_operand.hbm [shape: f32[128,512], index: 10, kind: input, shape index: {}]   ;;  %s5453_s11 = inlined_call_operand.vmem [shape: f32[1,512], index: 11, kind: input, shape index: {}]   ;;  %s5454_s12 = inlined_call_operand.hbm [shape: f32[512,512], index: 12, kind: input, shape index: {}]   ;;  %s5455_s13 = inlined_call_operand.vmem [shape: f32[1,512], index: 13, kind: input, shape index: {}]   ;;  %s5456_s14 = inlined_call_operand.hbm [shape: f32[512,128], index: 14, kind: input, shape index: {}]   ;;  %s5457_s15 = inlined_call_operand.vmem [shape: f32[1,128], index: 15, kind: input, shape index: {}]   ;;  %s5458_s16 = inlined_call_operand.hbm [shape: f32[128,128], index: 16, kind: input, shape index: {}]   ;;  %s5459_s17 = inlined_call_operand.vmem [shape: f32[1,128], index: 17, kind: input, shape index: {}]   ;;  %s5460_s18 = inlined_call_operand.hbm [shape: f32[8,128], index: 18, kind: output, shape index: {}]  }
   0x1   :  { %5468 = sst [smem:[#allocation31_spill]] %s5442_s0 }
   0x2   :  { %5469 = sst [smem:[#allocation32_spill]] %s5443_s1 }
   0x3   :  { %5470 = sst [smem:[#allocation33_spill]] %s5444_s2 }
   0x4   :  { %23 = vsyncpa [#allocation3], 0 }
   0x5   :  { %24 = vsyncpa [#allocation6], 0 }
   0x6   :  { %25 = vsyncpa [#allocation9], 0 }
   0x7   :  { %26 = vsyncpa [#allocation12], 0 }
   0x8   :  { %27 = vsyncpa [#allocation15], 0 }
   0x9   :  { %28 = vsyncpa [#allocation18], 0 }
   0xa   :  { %29 = vsyncpa [#allocation4], 0  ;;  %s4751_s27 = smov [#allocation5]   ;;  %s4752_s29 = smov [#allocation8]  }
   0xb   :  { %s47_s28 = sshll.u32 %s4751_s27, 4  ;;  %s71_s30 = sshll.u32 %s4752_s29, 4  ;;  %s48_s28 = int_to_ptr.vmem [resolvable:$true] %s47_s28  ;;  %s4865_s30 = int_to_ptr.vmem [resolvable:$true] %s71_s30 }
   0xc   :  { %s5471_s1 = sld [smem:[#allocation32_spill]] }
  0x12   :  { %s4473_s20 = scalar_lea.hbm %s5471_s1, 1024 }
  0x13   :  { %p4474_p0 = scmp.ne.s32.totalorder %s5471_s1, %s4473_s20  ;;  %p4477_p1 = scmp.lt.u32.totalorder %s4473_s20, %s5471_s1 }
  0x15   :  { %p4479_p2 = pnand %p4477_p1, %p4474_p0 }
  0x17   :  { %4482 = shalt.err (!%p4479_p2)
}
  0x18   :  { %s4483_s24 = scalar_lea.vmem %s48_s28, 1024  ;;  %p4488_p4 = scmp.lt.s32.totalorder %s48_s28, %s48_s28 }
  0x19   :  { %p4484_p3 = scmp.ne.s32.totalorder %s48_s28, %s4483_s24  ;;  %p4489_p5 = scmp.lt.s32.totalorder %s4483_s24, %s4483_s24 }
  0x1b   :  { %p4490_p6 = por %p4489_p5, %p4488_p4 }
  0x1d   :  { %p4491_p7 = pnand %p4490_p6, %p4484_p3 }
  0x1f   :  { %4494 = shalt.err (!%p4491_p7)
}
  0x20   :  { %s4753_s25 = smov 128   ;;  %s4754_s26 = smov 8  }
  0x21   :  { %53 = dma.hbm_to_vmem [thread:$0]  %s5471_s1, 1024, %s48_s28, [#allocation6], %s4753_s25, %s4753_s25, %s4754_s26  }
  0x22   :  { %s4495_s20 = scalar_lea.hbm %s5445_s3, 2048 }
  0x23   :  { %p4496_p8 = scmp.ne.s32.totalorder %s5445_s3, %s4495_s20  ;;  %p4499_p9 = scmp.lt.u32.totalorder %s4495_s20, %s5445_s3 }
  0x25   :  { %p4501_p10 = pnand %p4499_p9, %p4496_p8 }
  0x27   :  { %4504 = shalt.err (!%p4501_p10)
}
  0x28   :  { %s4505_s24 = scalar_lea.vmem %s4865_s30, 2048  ;;  %p4510_p12 = scmp.lt.s32.totalorder %s4865_s30, %s4865_s30 }
  0x29   :  { %p4506_p11 = scmp.ne.s32.totalorder %s4865_s30, %s4505_s24  ;;  %p4511_p13 = scmp.lt.s32.totalorder %s4505_s24, %s4505_s24 }
  0x2b   :  { %p4512_p0 = por %p4511_p13, %p4510_p12 }
  0x2d   :  { %p4513_p1 = pnand %p4512_p0, %p4506_p11 }
  0x2f   :  { %4516 = shalt.err (!%p4513_p1)
}
  0x30   :  { %77 = dma.hbm_to_vmem [thread:$0]  %s5445_s3, 2048, %s4865_s30, [#allocation9], %s4753_s25, %s4753_s25, %s4754_s26  }
  0x31   :  { %s4755_s27 = smov [#allocation11]   ;;  %s4517_s20 = scalar_lea.hbm %s5449_s7, 6144 }
  0x32   :  { %s99_s29 = sshll.u32 %s4755_s27, 4  ;;  %p4518_p2 = scmp.ne.s32.totalorder %s5449_s7, %s4517_s20  ;;  %s100_s29 = int_to_ptr.vmem [resolvable:$true] %s99_s29 }
  0x33   :  { %p4521_p3 = scmp.lt.u32.totalorder %s4517_s20, %s5449_s7 }
  0x35   :  { %p4523_p4 = pnand %p4521_p3, %p4518_p2 }
  0x37   :  { %4526 = shalt.err (!%p4523_p4)
}
  0x38   :  { %s4527_s24 = scalar_lea.vmem %s100_s29, 6144  ;;  %p4532_p6 = scmp.lt.s32.totalorder %s100_s29, %s100_s29 }
  0x39   :  { %p4528_p5 = scmp.ne.s32.totalorder %s100_s29, %s4527_s24  ;;  %p4533_p7 = scmp.lt.s32.totalorder %s4527_s24, %s4527_s24 }
  0x3b   :  { %p4534_p8 = por %p4533_p7, %p4532_p6 }
  0x3d   :  { %p4535_p9 = pnand %p4534_p8, %p4528_p5 }
  0x3f   :  { %4538 = shalt.err (!%p4535_p9)
}
  0x40   :  { %105 = dma.hbm_to_vmem [thread:$0]  %s5449_s7, 6144, %s100_s29, [#allocation12], %s4753_s25, %s4753_s25, %s4754_s26  }
  0x41   :  { %s4756_s28 = smov [#allocation14]   ;;  %s4757_s27 = smov [#allocation17]  }
  0x42   :  { %s125_s1 = sshll.u32 %s4756_s28, 4  ;;  %s153_s0 = sshll.u32 %s4757_s27, 4  ;;  %s126_s1 = int_to_ptr.vmem [resolvable:$true] %s125_s1  ;;  %s154_s0 = int_to_ptr.vmem [resolvable:$true] %s153_s0 }
  0x43   :  { %s4539_s21 = scalar_lea.hbm %s5452_s10, 8192 }
  0x44   :  { %p4540_p10 = scmp.ne.s32.totalorder %s5452_s10, %s4539_s21  ;;  %p4543_p11 = scmp.lt.u32.totalorder %s4539_s21, %s5452_s10 }
  0x46   :  { %p4545_p12 = pnand %p4543_p11, %p4540_p10 }
  0x48   :  { %4548 = shalt.err (!%p4545_p12)
}
  0x49   :  { %s4549_s7 = scalar_lea.vmem %s126_s1, 8192  ;;  %p4554_p0 = scmp.lt.s32.totalorder %s126_s1, %s126_s1 }
  0x4a   :  { %p4550_p13 = scmp.ne.s32.totalorder %s126_s1, %s4549_s7  ;;  %p4555_p1 = scmp.lt.s32.totalorder %s4549_s7, %s4549_s7 }
  0x4c   :  { %p4556_p2 = por %p4555_p1, %p4554_p0 }
  0x4e   :  { %p4557_p3 = pnand %p4556_p2, %p4550_p13 }
  0x50   :  { %4560 = shalt.err (!%p4557_p3)
}
  0x51   :  { %s5464_s29 = smov 512   ;;  %s4759_s3 = smov 32  }
  0x52   :  { %131 = dma.hbm_to_vmem [thread:$0]  %s5452_s10, 8192, %s126_s1, [#allocation15], %s5464_s29, %s5464_s29, %s4759_s3  }
  0x53   :  { %s4561_s20 = scalar_lea.hbm %s5456_s14, 8192 }
  0x54   :  { %p4562_p4 = scmp.ne.s32.totalorder %s5456_s14, %s4561_s20  ;;  %p4565_p5 = scmp.lt.u32.totalorder %s4561_s20, %s5456_s14 }
  0x56   :  { %p4567_p6 = pnand %p4565_p5, %p4562_p4 }
  0x58   :  { %4570 = shalt.err (!%p4567_p6)
}
  0x59   :  { %s4571_s24 = scalar_lea.vmem %s154_s0, 8192  ;;  %p4576_p8 = scmp.lt.s32.totalorder %s154_s0, %s154_s0 }
  0x5a   :  { %p4572_p7 = scmp.ne.s32.totalorder %s154_s0, %s4571_s24  ;;  %p4577_p9 = scmp.lt.s32.totalorder %s4571_s24, %s4571_s24 }
  0x5c   :  { %p4578_p10 = por %p4577_p9, %p4576_p8 }
  0x5e   :  { %p4579_p11 = pnand %p4578_p10, %p4572_p7 }
  0x60   :  { %4582 = shalt.err (!%p4579_p11)
}
  0x61   :  { %159 = dma.hbm_to_vmem [thread:$0]  %s5456_s14, 8192, %s154_s0, [#allocation18], %s4753_s25, %s4753_s25, %s4754_s26  }
  0x62   :  { %s4760_s7 = smov [#allocation2]   ;;  %s4761_s28 = smov [#allocation7]  }
  0x63   :  { %s35_s30 = sshll.u32 %s4760_s7, 4  ;;  %s59_s27 = sshll.u32 %s4761_s28, 4  ;;  %s36_s30 = int_to_ptr.vmem [resolvable:$true] %s35_s30  ;;  %s60_s27 = int_to_ptr.vmem [resolvable:$true] %s59_s27 }
  0x64   :  { %s5472_s21 = sld [smem:[#allocation31_spill]] }
  0x6a   :  { %s4583_s22 = scalar_lea.hbm %s5472_s21, 1024 }
  0x6b   :  { %p4584_p12 = scmp.ne.s32.totalorder %s5472_s21, %s4583_s22  ;;  %p4587_p13 = scmp.lt.u32.totalorder %s4583_s22, %s5472_s21 }
  0x6d   :  { %p4589_p0 = pnand %p4587_p13, %p4584_p12 }
  0x6f   :  { %4592 = shalt.err (!%p4589_p0)
}
  0x70   :  { %s4593_s14 = scalar_lea.vmem %s36_s30, 1024  ;;  %p4598_p2 = scmp.lt.s32.totalorder %s36_s30, %s36_s30 }
  0x71   :  { %p4594_p1 = scmp.ne.s32.totalorder %s36_s30, %s4593_s14  ;;  %p4599_p3 = scmp.lt.s32.totalorder %s4593_s14, %s4593_s14 }
  0x73   :  { %p4600_p4 = por %p4599_p3, %p4598_p2 }
  0x75   :  { %p4601_p5 = pnand %p4600_p4, %p4594_p1 }
  0x77   :  { %4604 = shalt.err (!%p4601_p5)
}
  0x78   :  { %41 = dma.hbm_to_vmem [thread:$0]  %s5472_s21, 1024, %s36_s30, [#allocation3], %s4753_s25, %s4753_s25, %s4754_s26  }
  0x79   :  { %s5473_s7 = sld [smem:[#allocation33_spill]] }
  0x7f   :  { %s4605_s28 = scalar_lea.hbm %s5473_s7, 2048 }
  0x80   :  { %p4606_p6 = scmp.ne.s32.totalorder %s5473_s7, %s4605_s28  ;;  %p4609_p7 = scmp.lt.u32.totalorder %s4605_s28, %s5473_s7 }
  0x82   :  { %p4611_p8 = pnand %p4609_p7, %p4606_p6 }
  0x84   :  { %4614 = shalt.err (!%p4611_p8)
}
  0x85   :  { %s4615_s23 = scalar_lea.vmem %s60_s27, 2048  ;;  %p4620_p10 = scmp.lt.s32.totalorder %s60_s27, %s60_s27 }
  0x86   :  { %p4616_p9 = scmp.ne.s32.totalorder %s60_s27, %s4615_s23  ;;  %p4621_p11 = scmp.lt.s32.totalorder %s4615_s23, %s4615_s23 }
  0x88   :  { %p4622_p12 = por %p4621_p11, %p4620_p10 }
  0x8a   :  { %p4623_p13 = pnand %p4622_p12, %p4616_p9 }
  0x8c   :  { %4626 = shalt.err (!%p4623_p13)
}
  0x8d   :  { %65 = dma.hbm_to_vmem [thread:$0]  %s5473_s7, 2048, %s60_s27, [#allocation6], %s4753_s25, %s4753_s25, %s4754_s26  }
  0x8e   :  { %s4762_s24 = smov [#allocation10]   ;;  %s4763_s0 = smov [#allocation13]  }
  0x8f   :  { %s85_s14 = sshll.u32 %s4762_s24, 4  ;;  %s113_s10 = sshll.u32 %s4763_s0, 4  ;;  %s86_s14 = int_to_ptr.vmem [resolvable:$true] %s85_s14  ;;  %s114_s10 = int_to_ptr.vmem [resolvable:$true] %s113_s10 }
  0x90   :  { %s4627_s28 = scalar_lea.hbm %s5447_s5, 2048 }
  0x91   :  { %p4628_p0 = scmp.ne.s32.totalorder %s5447_s5, %s4627_s28  ;;  %p4631_p1 = scmp.lt.u32.totalorder %s4627_s28, %s5447_s5 }
  0x93   :  { %p4633_p2 = pnand %p4631_p1, %p4628_p0 }
  0x95   :  { %4636 = shalt.err (!%p4633_p2)
}
  0x96   :  { %s4637_s27 = scalar_lea.vmem %s86_s14, 2048  ;;  %p4642_p4 = scmp.lt.s32.totalorder %s86_s14, %s86_s14 }
  0x97   :  { %p4638_p3 = scmp.ne.s32.totalorder %s86_s14, %s4637_s27  ;;  %p4643_p5 = scmp.lt.s32.totalorder %s4637_s27, %s4637_s27 }
  0x99   :  { %p4644_p6 = por %p4643_p5, %p4642_p4 }
  0x9b   :  { %p4645_p7 = pnand %p4644_p6, %p4638_p3 }
  0x9d   :  { %4648 = shalt.err (!%p4645_p7)
}
  0x9e   :  { %91 = dma.hbm_to_vmem [thread:$0]  %s5447_s5, 2048, %s86_s14, [#allocation9], %s4753_s25, %s4753_s25, %s4754_s26  }
  0x9f   :  { %s4649_s24 = scalar_lea.hbm %s5451_s9, 8192 }
  0xa0   :  { %p4650_p8 = scmp.ne.s32.totalorder %s5451_s9, %s4649_s24  ;;  %p4653_p9 = scmp.lt.u32.totalorder %s4649_s24, %s5451_s9 }
  0xa2   :  { %p4655_p10 = pnand %p4653_p9, %p4650_p8 }
  0xa4   :  { %4658 = shalt.err (!%p4655_p10)
}
  0xa5   :  { %s4659_s19 = scalar_lea.vmem %s114_s10, 8192  ;;  %p4664_p12 = scmp.lt.s32.totalorder %s114_s10, %s114_s10 }
  0xa6   :  { %p4660_p11 = scmp.ne.s32.totalorder %s114_s10, %s4659_s19  ;;  %p4665_p13 = scmp.lt.s32.totalorder %s4659_s19, %s4659_s19 }
  0xa8   :  { %p4666_p0 = por %p4665_p13, %p4664_p12 }
  0xaa   :  { %p4667_p1 = pnand %p4666_p0, %p4660_p11 }
  0xac   :  { %4670 = shalt.err (!%p4667_p1)
}
  0xad   :  { %s5474_s5 = smov 512   ;;  %s4764_s22 = smov [#allocation16]  }
  0xae   :  { %119 = dma.hbm_to_vmem [thread:$0]  %s5451_s9, 8192, %s114_s10, [#allocation12], %s5474_s5, %s5474_s5, %s4759_s3  }
  0xaf   :  { %s139_s2 = sshll.u32 %s4764_s22, 4  ;;  %s4765_s27 = smov [#allocation19]   ;;  %s140_s2 = int_to_ptr.vmem [resolvable:$true] %s139_s2 }
  0xb0   :  { %s167_s7 = sshll.u32 %s4765_s27, 4  ;;  %s4671_s21 = scalar_lea.hbm %s5454_s12, 32768  ;;  %s168_s7 = int_to_ptr.vmem [resolvable:$true] %s167_s7 }
  0xb1   :  { %p4672_p2 = scmp.ne.s32.totalorder %s5454_s12, %s4671_s21  ;;  %p4675_p3 = scmp.lt.u32.totalorder %s4671_s21, %s5454_s12 }
  0xb3   :  { %p4677_p4 = pnand %p4675_p3, %p4672_p2 }
  0xb5   :  { %4680 = shalt.err (!%p4677_p4)
}
  0xb6   :  { %s4681_s9 = scalar_lea.vmem %s140_s2, 32768  ;;  %p4686_p6 = scmp.lt.s32.totalorder %s140_s2, %s140_s2 }
  0xb7   :  { %p4682_p5 = scmp.ne.s32.totalorder %s140_s2, %s4681_s9  ;;  %p4687_p7 = scmp.lt.s32.totalorder %s4681_s9, %s4681_s9 }
  0xb9   :  { %p4688_p8 = por %p4687_p7, %p4686_p6 }
  0xbb   :  { %p4689_p9 = pnand %p4688_p8, %p4682_p5 }
  0xbd   :  { %4692 = shalt.err (!%p4689_p9)
}
  0xbe   :  { %145 = dma.hbm_to_vmem [thread:$0]  %s5454_s12, 32768, %s140_s2, [#allocation15], %s5474_s5, %s5474_s5, %s4759_s3  }
  0xbf   :  { %s4693_s20 = scalar_lea.hbm %s5458_s16, 2048 }
  0xc0   :  { %p4694_p10 = scmp.ne.s32.totalorder %s5458_s16, %s4693_s20  ;;  %p4697_p11 = scmp.lt.u32.totalorder %s4693_s20, %s5458_s16 }
  0xc2   :  { %p4699_p12 = pnand %p4697_p11, %p4694_p10 }
  0xc4   :  { %4702 = shalt.err (!%p4699_p12)
}
  0xc5   :  { %s4703_s21 = scalar_lea.vmem %s168_s7, 2048  ;;  %p4708_p0 = scmp.lt.s32.totalorder %s168_s7, %s168_s7 }
  0xc6   :  { %p4704_p13 = scmp.ne.s32.totalorder %s168_s7, %s4703_s21  ;;  %p4709_p1 = scmp.lt.s32.totalorder %s4703_s21, %s4703_s21 }
  0xc8   :  { %p4710_p2 = por %p4709_p1, %p4708_p0 }
  0xca   :  { %p4711_p3 = pnand %p4710_p2, %p4704_p13 }
  0xcc   :  { %4714 = shalt.err (!%p4711_p3)
}
  0xcd   :  { %173 = dma.hbm_to_vmem [thread:$0]  %s5458_s16, 2048, %s168_s7, [#allocation18], %s4753_s25, %s4753_s25, %s4754_s26  }
  0xce   :  { %4737 = dma.done.wait [#allocation3], 1024  }
  0xcf   :  { %4738 = vsyncadd [#allocation3], 4294966272 }
  0xd0   :  { %4739 = dma.done.wait [#allocation6], 3072  }
  0xd1   :  { %4740 = vsyncadd [#allocation6], 4294964224 }
  0xd2   :  { %4741 = dma.done.wait [#allocation9], 4096  }
  0xd3   :  { %4742 = vsyncadd [#allocation9], 4294963200 }
  0xd4   :  { %4743 = dma.done.wait [#allocation12], 14336  }
  0xd5   :  { %4744 = vsyncadd [#allocation12], 4294952960 }
  0xd6   :  { %4745 = dma.done.wait [#allocation15], 40960  }
  0xd7   :  { %4746 = vsyncadd [#allocation15], 4294926336 }
  0xd8   :  { %4747 = dma.done.wait [#allocation18], 10240  }
  0xd9   :  { %4748 = vsyncadd [#allocation18], 4294957056  ;;  %v5466_v0 = vmov 0.0   ;;  %vm4767_vm0 = vmmov 0   ;;  %vm225_vm1 = vcmask 64512   ;;  %v217_v1 = vld [vmem:[#allocation5] sm:$0xff] }
  0xda   :  { %3479 = vmatprep.subr.mxu0 %v5466_v0  ;;  %3484 = vmatprep.subr.mxu1 %v5466_v0  ;;  %v218_v2 = vld [vmem:[#allocation5 + $0x8] sm:$0xff]  ;;  %v209_v3 = vld [vmem:[#allocation2] sm:$0xff]  ;;  %v219_v5 = vld [vmem:[#allocation5 + $0x10] sm:$0xff]  ;;  %vm1982_vm3 = vcmask 1041409   ;;  %vm1984_vm4 = vcmask 1042434   ;;  %vm1986_vm5 = vcmask 1043459  }
  0xdb   :  { %3481 = vmatprep.mubr.msk.f32.mxu0 %vm4767_vm0, %v5466_v0  ;;  %3486 = vmatprep.mubr.msk.f32.mxu1 %vm4767_vm0, %v5466_v0  ;;  %v210_v4 = vld [vmem:[#allocation2 + $0x8] sm:$0xff]  ;;  %v220_v6 = vld [vmem:[#allocation5 + $0x18] sm:$0xff]  ;;  %v211_v7 = vld [vmem:[#allocation2 + $0x10] sm:$0xff]  ;;  %vm1988_vm6 = vcmask 1044484   ;;  %vm1990_vm7 = vcmask 1045509   ;;  %vm1992_vm8 = vcmask 1046534  }
  0xdc   :  { %3480 = vmatpush3.msra.mxu0 %v217_v1  ;;  %3485 = vmatpush3.msra.mxu1 %v218_v2  ;;  %v212_v8 = vld [vmem:[#allocation2 + $0x18] sm:$0xff]  ;;  %v221_v9 = vld [vmem:[#allocation5 + $0x20] sm:$0xff]  ;;  %v222_v10 = vld [vmem:[#allocation5 + $0x28] sm:$0xff]  ;;  %vm1994_vm9 = vcmask 1047559   ;;  %s4769_s29 = smov [#allocation20]  }
  0xdd   :  { %3482 = vmatmul.mubr.msk.f32.vlgmr.msra.gmra.mrb[0].mxu0 %vm225_vm1, %v209_v3  ;;  %3487 = vmatmul.mubr.msk.f32.vlgmr.msra.gmra.mrb[0].mxu1 %vm225_vm1, %v210_v4  ;;  %v213_v11 = vld [vmem:[#allocation2 + $0x20] sm:$0xff]  ;;  %v214_v12 = vld [vmem:[#allocation2 + $0x28] sm:$0xff]  ;;  %v223_v15 = vld [vmem:[#allocation5 + $0x30] sm:$0xff]  ;;  %s3205_s9 = sshll.u32 %s4769_s29, 4  ;;  %s3206_s9 = int_to_ptr.vmem [resolvable:$true] %s3205_s9 }
  0xde   :  { %3489 = vmatprep.subr.mxu0 %v5466_v0  ;;  %3491 = vmatprep.mubr.msk.f32.mxu0 %vm4767_vm0, %v5466_v0  ;;  %v810_v13 = vld [vmem:[#allocation8] sm:$0xff]  ;;  %v811_v14 = vld [vmem:[#allocation8 + $0x8] sm:$0xff]  ;;  %v224_v16 = vld [vmem:[#allocation5 + $0x38] sm:$0xff]  ;;  %p4720_p5 = scmp.lt.s32.totalorder %s3206_s9, %s3206_s9 }
  0xdf   :  { %3490 = vmatpush3.msra.mxu0 %v219_v5  ;;  %3494 = vmatprep.subr.mxu1 %v5466_v0  ;;  %v812_v17 = vld [vmem:[#allocation8 + $0x10] sm:$0xff]  ;;  %v813_v18 = vld [vmem:[#allocation8 + $0x18] sm:$0xff]  ;;  %v3810_v21 = vpack.c.bf16 %v811_v14, %v810_v13  ;;  %v814_v23 = vld [vmem:[#allocation8 + $0x20] sm:$0xff] }
  0xe0   :  { %3495 = vmatpush3.msra.mxu1 %v220_v6  ;;  %3496 = vmatprep.mubr.msk.f32.mxu1 %vm4767_vm0, %v5466_v0  ;;  %v215_v19 = vld [vmem:[#allocation2 + $0x30] sm:$0xff]  ;;  %v216_v20 = vld [vmem:[#allocation2 + $0x38] sm:$0xff]  ;;  %v3814_v22 = vpack.c.bf16 %v813_v18, %v812_v17  ;;  %v815_v24 = vld [vmem:[#allocation8 + $0x28] sm:$0xff] }
  0xe1   :  { %3492 = vmatmul.mubr.msk.f32.vlgmr.msra.gmra.mrb[2].mxu0 %vm225_vm1, %v211_v7  ;;  %3497 = vmatmul.mubr.msk.f32.vlgmr.msra.gmra.mrb[2].mxu1 %vm225_vm1, %v212_v8  ;;  %v3818_v25 = vpack.c.bf16 %v815_v24, %v814_v23  ;;  %v816_v26 = vld [vmem:[#allocation8 + $0x30] sm:$0xff]  ;;  %v817_v27 = vld [vmem:[#allocation8 + $0x38] sm:$0xff]  ;;  %v818_v29 = vld [vmem:[#allocation8 + $0x40] sm:$0xff] }
  0xe2   :  { %3499 = vmatprep.subr.mxu0 %v5466_v0  ;;  %3501 = vmatprep.mubr.msk.f32.mxu0 %vm4767_vm0, %v5466_v0  ;;  %v3822_v28 = vpack.c.bf16 %v817_v27, %v816_v26  ;;  %v819_v30 = vld [vmem:[#allocation8 + $0x48] sm:$0xff]  ;;  %v820_v32 = vld [vmem:[#allocation8 + $0x50] sm:$0xff]  ;;  %v821_v33 = vld [vmem:[#allocation8 + $0x58] sm:$0xff] }
  0xe3   :  { %3500 = vmatpush3.msra.mxu0 %v221_v9  ;;  %3504 = vmatprep.subr.mxu1 %v5466_v0  ;;  %v3826_v31 = vpack.c.bf16 %v819_v30, %v818_v29  ;;  %v3830_v34 = vpack.c.bf16 %v821_v33, %v820_v32  ;;  %v822_v35 = vld [vmem:[#allocation8 + $0x60] sm:$0xff]  ;;  %v823_v36 = vld [vmem:[#allocation8 + $0x68] sm:$0xff]  ;;  %v824_v38 = vld [vmem:[#allocation8 + $0x70] sm:$0xff] }
  0xe4   :  { %3505 = vmatpush3.msra.mxu1 %v222_v10  ;;  %3506 = vmatprep.mubr.msk.f32.mxu1 %vm4767_vm0, %v5466_v0  ;;  %v3834_v37 = vpack.c.bf16 %v823_v36, %v822_v35  ;;  %v825_v39 = vld [vmem:[#allocation8 + $0x78] sm:$0xff]  ;;  %v1147_v41 = vld [vmem:[#allocation11] sm:$0xff]  ;;  %v1148_v42 = vld [vmem:[#allocation11 + $0x8] sm:$0xff] }
  0xe5   :  { %3502 = vmatmul.mubr.msk.f32.vlgmr.msra.gmra.mrb[4].mxu0 %vm225_vm1, %v213_v11  ;;  %3507 = vmatmul.mubr.msk.f32.vlgmr.msra.gmra.mrb[4].mxu1 %vm225_vm1, %v214_v12  ;;  %v3838_v40 = vpack.c.bf16 %v825_v39, %v824_v38  ;;  %v3874_v43 = vpack.c.bf16 %v1148_v42, %v1147_v41  ;;  %v946_v44 = vld [vmem:[#allocation10] sm:$0xff]  ;;  %v947_v45 = vld [vmem:[#allocation10 + $0x8] sm:$0xff]  ;;  %v948_v47 = vld [vmem:[#allocation10 + $0x10] sm:$0xff] }
  0xe6   :  { %3509 = vmatprep.subr.mxu0 %v5466_v0  ;;  %3511 = vmatprep.mubr.msk.f32.mxu0 %vm4767_vm0, %v5466_v0  ;;  %v3842_v46 = vpack.c.bf16 %v947_v45, %v946_v44  ;;  %v949_v48 = vld [vmem:[#allocation10 + $0x18] sm:$0xff]  ;;  %v950_v50 = vld [vmem:[#allocation10 + $0x20] sm:$0xff]  ;;  %v951_v51 = vld [vmem:[#allocation10 + $0x28] sm:$0xff] }
  0xe7   :  { %3510 = vmatpush3.msra.mxu0 %v223_v15  ;;  %3514 = vmatprep.subr.mxu1 %v5466_v0  ;;  %v3846_v49 = vpack.c.bf16 %v949_v48, %v948_v47  ;;  %v3850_v52 = vpack.c.bf16 %v951_v51, %v950_v50  ;;  %v952_v53 = vld [vmem:[#allocation10 + $0x30] sm:$0xff]  ;;  %v953_v54 = vld [vmem:[#allocation10 + $0x38] sm:$0xff]  ;;  %v954_v56 = vld [vmem:[#allocation10 + $0x40] sm:$0xff] }
  0xe8   :  { %3515 = vmatpush3.msra.mxu1 %v224_v16  ;;  %3516 = vmatprep.mubr.msk.f32.mxu1 %vm4767_vm0, %v5466_v0  ;;  %v3854_v55 = vpack.c.bf16 %v953_v54, %v952_v53  ;;  %v955_v57 = vld [vmem:[#allocation10 + $0x48] sm:$0xff]  ;;  %v956_v59 = vld [vmem:[#allocation10 + $0x50] sm:$0xff]  ;;  %v957_v60 = vld [vmem:[#allocation10 + $0x58] sm:$0xff] }
  0xe9   :  { %3512 = vmatmul.mubr.msk.f32.vlgmr.msra.gmra.mrb[6].mxu0 %vm225_vm1, %v215_v19  ;;  %3517 = vmatmul.mubr.msk.f32.vlgmr.msra.gmra.mrb[6].mxu1 %vm225_vm1, %v216_v20  ;;  %v3858_v58 = vpack.c.bf16 %v955_v57, %v954_v56  ;;  %v3862_v61 = vpack.c.bf16 %v957_v60, %v956_v59  ;;  %v958_v62 = vld [vmem:[#allocation10 + $0x60] sm:$0xff]  ;;  %v959_v63 = vld [vmem:[#allocation10 + $0x68] sm:$0xff]  ;;  %v1149_v2 = vld [vmem:[#allocation11 + $0x10] sm:$0xff] }
  0xea   :  { %3811 = vmatprep.subr.bf16.mxu0 %v3810_v21  ;;  %3843 = vmatprep.subr.bf16.mxu1 %v3842_v46  ;;  %v3866_v1 = vpack.c.bf16 %v959_v63, %v958_v62  ;;  %v1150_v3 = vld [vmem:[#allocation11 + $0x18] sm:$0xff]  ;;  %v1151_v9 = vld [vmem:[#allocation11 + $0x20] sm:$0xff]  ;;  %v1152_v10 = vld [vmem:[#allocation11 + $0x28] sm:$0xff] }
  0xeb   :  { %3813 = vmatpush3.bf16.msra.mxu0 %v3810_v21  ;;  %3845 = vmatpush3.bf16.msra.mxu1 %v3842_v46  ;;  %v3878_v6 = vpack.c.bf16 %v1150_v3, %v1149_v2  ;;  %v3882_v13 = vpack.c.bf16 %v1152_v10, %v1151_v9  ;;  %v1153_v16 = vld [vmem:[#allocation11 + $0x30] sm:$0xff]  ;;  %v1154_v17 = vld [vmem:[#allocation11 + $0x38] sm:$0xff]  ;;  %v1155_v23 = vld [vmem:[#allocation11 + $0x40] sm:$0xff] }
  0xec   :  { %3815 = vmatprep.subr.bf16.mxu0 %v3814_v22  ;;  %3847 = vmatprep.subr.bf16.mxu1 %v3846_v49  ;;  %v3886_v20 = vpack.c.bf16 %v1154_v17, %v1153_v16  ;;  %v1156_v24 = vld [vmem:[#allocation11 + $0x48] sm:$0xff]  ;;  %v1158_v32 = vld [vmem:[#allocation11 + $0x58] sm:$0xff]  ;;  %v5074_v41 = vld [vmem:[#allocation7 + $0x10] sm:$0xff] }
  0xed   :  { %v3890_v27 = vpack.c.bf16 %v1156_v24, %v1155_v23  ;;  %v1160_v35 = vld [vmem:[#allocation11 + $0x68] sm:$0xff]  ;;  %v1162_v38 = vld [vmem:[#allocation11 + $0x78] sm:$0xff]  ;;  %v5086_v45 = vld [vmem:[#allocation7 + $0x30] sm:$0xff] }
  0xee   :  { %v5078_v42 = vld [vmem:[#allocation7 + $0x18] sm:$0xff]  ;;  %v5084_v44 = vld [vmem:[#allocation7 + $0x28] sm:$0xff]  ;;  %v960_v47 = vld [vmem:[#allocation10 + $0x70] sm:$0xff] }
  0xef   :  { %3817 = vmatpush3.bf16.msra.mxu0 %v3814_v22  ;;  %3849 = vmatpush3.bf16.msra.mxu1 %v3846_v49  ;;  %v5090_v46 = vld [vmem:[#allocation7 + $0x38] sm:$0xff]  ;;  %v5093_v50 = vld [vmem:[#allocation7 + $0x40] sm:$0xff]  ;;  %v5096_v51 = vld [vmem:[#allocation7 + $0x48] sm:$0xff] }
  0xf0   :  { %3819 = vmatprep.subr.bf16.mxu0 %v3818_v25  ;;  %3851 = vmatprep.subr.bf16.mxu1 %v3850_v52  ;;  %v961_v48 = vld [vmem:[#allocation10 + $0x78] sm:$0xff]  ;;  %v1345_v53 = vld [vmem:[#allocation11 + $0x88] sm:$0xff]  ;;  %v1555_v57 = vld [vmem:[#allocation11 + $0x100] sm:$0xff] }
  0xf1   :  { %v3870_v49 = vpack.c.bf16 %v961_v48, %v960_v47  ;;  %v5105_v56 = vld [vmem:[#allocation7 + $0x58] sm:$0xff]  ;;  %v5108_v60 = vld [vmem:[#allocation7 + $0x60] sm:$0xff]  ;;  %v1557_v62 = vld [vmem:[#allocation11 + $0x110] sm:$0xff] }
  0xf2   :  { %v1558_v63 = vld [vmem:[#allocation11 + $0x118] sm:$0xff]  ;;  %v5114_v2 = vld [vmem:[#allocation7 + $0x70] sm:$0xff]  ;;  %v1563_v10 = vld [vmem:[#allocation11 + $0x140] sm:$0xff] }
  0xf3   :  { %3821 = vmatpush3.bf16.msra.mxu0 %v3818_v25  ;;  %3853 = vmatpush3.bf16.msra.mxu1 %v3850_v52  ;;  %v1344_v52 = vld [vmem:[#allocation11 + $0x80] sm:$0xff]  ;;  %v5117_v3 = vld [vmem:[#allocation7 + $0x78] sm:$0xff]  ;;  %v1568_v17 = vld [vmem:[#allocation11 + $0x168] sm:$0xff] }
  0xf4   :  { %3823 = vmatprep.subr.bf16.mxu0 %v3822_v28  ;;  %3855 = vmatprep.subr.bf16.mxu1 %v3854_v55  ;;  %v5099_v54 = vpack.c.bf16 %v1345_v53, %v1344_v52  ;;  %v1567_v16 = vld [vmem:[#allocation11 + $0x160] sm:$0xff] }
  0xf7   :  { %3825 = vmatpush3.bf16.msra.mxu0 %v3822_v28  ;;  %3857 = vmatpush3.bf16.msra.mxu1 %v3854_v55  ;;  %v5069_v28 = vld [vmem:[#allocation7] sm:$0xff]  ;;  %v5102_v55 = vld [vmem:[#allocation7 + $0x50] sm:$0xff] }
  0xf8   :  { %3827 = vmatprep.subr.bf16.mxu0 %v3826_v31  ;;  %3859 = vmatprep.subr.bf16.mxu1 %v3858_v58 }
  0xfb   :  { %3829 = vmatpush3.bf16.msra.mxu0 %v3826_v31  ;;  %3861 = vmatpush3.bf16.msra.mxu1 %v3858_v58  ;;  %v1157_v31 = vld [vmem:[#allocation11 + $0x50] sm:$0xff]  ;;  %v1556_v58 = vld [vmem:[#allocation11 + $0x108] sm:$0xff] }
  0xfc   :  { %3831 = vmatprep.subr.bf16.mxu0 %v3830_v34  ;;  %3863 = vmatprep.subr.bf16.mxu1 %v3862_v61  ;;  %v3894_v33 = vpack.c.bf16 %v1158_v32, %v1157_v31  ;;  %v3938_v59 = vpack.c.bf16 %v1556_v58, %v1555_v57  ;;  %v1350_v58 = vld [vmem:[#allocation11 + $0xb0] sm:$0xff] }
  0xff   :  { %3833 = vmatpush3.bf16.msra.mxu0 %v3830_v34  ;;  %3865 = vmatpush3.bf16.msra.mxu1 %v3862_v61  ;;  %v1159_v34 = vld [vmem:[#allocation11 + $0x60] sm:$0xff]  ;;  %v5111_v61 = vld [vmem:[#allocation7 + $0x68] sm:$0xff] }
 0x100   :  { %3835 = vmatprep.subr.bf16.mxu0 %v3834_v37  ;;  %3867 = vmatprep.subr.bf16.mxu1 %v3866_v1  ;;  %v3898_v36 = vpack.c.bf16 %v1160_v35, %v1159_v34 }
 0x103   :  { %3837 = vmatpush3.bf16.msra.mxu0 %v3834_v37  ;;  %3869 = vmatpush3.bf16.msra.mxu1 %v3866_v1  ;;  %v1161_v37 = vld [vmem:[#allocation11 + $0x70] sm:$0xff]  ;;  %v3942_v1 = vpack.c.bf16 %v1558_v63, %v1557_v62 }
 0x104   :  { %3839 = vmatprep.subr.bf16.mxu0 %v3838_v40  ;;  %v3902_v39 = vpack.c.bf16 %v1162_v38, %v1161_v37  ;;  %3871 = vmatprep.subr.bf16.mxu1 %v3870_v49  ;;  %v1348_v37 = vld [vmem:[#allocation11 + $0xa0] sm:$0xff]  ;;  %v1349_v38 = vld [vmem:[#allocation11 + $0xa8] sm:$0xff] }
 0x105   :  { %v3914_v53 = vpack.c.bf16 %v1349_v38, %v1348_v37 }
 0x107   :  { %3841 = vmatpush3.bf16.msra.mxu0 %v3838_v40  ;;  %v5072_v40 = vld [vmem:[#allocation7 + $0x8] sm:$0xff]  ;;  %3873 = vmatpush3.bf16.msra.mxu1 %v3870_v49 }
 0x108   :  { %3875 = vmatprep.subr.bf16.mxu0 %v3874_v43  ;;  %3907 = vmatprep.subr.bf16.mxu1 %v5099_v54 }
 0x1b0   :  { %v295_v4 = vpop.f32.mrb[0].mxu0  ;;  %v368_v5 = vpop.f32.mrb[0].mxu1 }
 0x1b1   :  { %v3483_v7 = vpop.f32.mrb[1].mxu0  ;;  %v3488_v8 = vpop.f32.mrb[1].mxu1  ;;  %3551 = vmatprep.mubr.f32.mxu0 %v295_v4  ;;  %v1559_v4 = vld [vmem:[#allocation11 + $0x120] sm:$0xff] }
 0x1b2   :  { %3552 = vmatmul.mubr.f32.vlgmr.msra.gmra.mrb[8].mxu0 %v368_v5  ;;  %v1560_v5 = vld [vmem:[#allocation11 + $0x128] sm:$0xff]  ;;  %v1561_v7 = vld [vmem:[#allocation11 + $0x130] sm:$0xff]  ;;  %v1562_v8 = vld [vmem:[#allocation11 + $0x138] sm:$0xff] }
 0x1b3   :  { %3877 = vmatpush3.bf16.msra.mxu0 %v3874_v43  ;;  %v5080_v43 = vld [vmem:[#allocation7 + $0x20] sm:$0xff]  ;;  %v3950_v9 = vpack.c.bf16 %v1562_v8, %v1561_v7  ;;  %v1353_v8 = vld [vmem:[#allocation11 + $0xc8] sm:$0xff] }
 0x1b4   :  { %v441_v11 = vpop.f32.mrb[2].mxu0  ;;  %v514_v12 = vpop.f32.mrb[2].mxu1  ;;  %3879 = vmatprep.subr.bf16.mxu0 %v3878_v6 }
 0x1b5   :  { %3554 = vmatprep.mubr.f32.mxu0 %v441_v11  ;;  %v3493_v14 = vpop.f32.mrb[3].mxu0  ;;  %v3498_v15 = vpop.f32.mrb[3].mxu1  ;;  %v1564_v11 = vld [vmem:[#allocation11 + $0x148] sm:$0xff] }
 0x1b6   :  { %3555 = vmatmul.mubr.f32.gmra.mrb[10].mxu0 %v514_v12  ;;  %v3954_v12 = vpack.c.bf16 %v1564_v11, %v1563_v10  ;;  %v1566_v14 = vld [vmem:[#allocation11 + $0x158] sm:$0xff] }
 0x1b7   :  { %3881 = vmatpush3.bf16.msra.mxu0 %v3878_v6  ;;  %v3946_v6 = vpack.c.bf16 %v1560_v5, %v1559_v4 }
 0x1b8   :  { %v587_v18 = vpop.f32.mrb[4].mxu0  ;;  %v660_v19 = vpop.f32.mrb[4].mxu1  ;;  %3883 = vmatprep.subr.bf16.mxu0 %v3882_v13 }
 0x1b9   :  { %3557 = vmatprep.mubr.f32.mxu0 %v587_v18  ;;  %v3503_v21 = vpop.f32.mrb[5].mxu0  ;;  %v3508_v22 = vpop.f32.mrb[5].mxu1  ;;  %v3962_v18 = vpack.c.bf16 %v1568_v17, %v1567_v16  ;;  %v1357_v16 = vld [vmem:[#allocation11 + $0xe8] sm:$0xff] }
 0x1ba   :  { %3558 = vmatmul.mubr.f32.gmra.mrb[12].mxu0 %v660_v19  ;;  %v1569_v19 = vld [vmem:[#allocation11 + $0x170] sm:$0xff]  ;;  %v3227_v22 = vld [vmem:[%s5446_s4] ss:$0 sm:$0xff] }
 0x1bb   :  { %3885 = vmatpush3.bf16.msra.mxu0 %v3882_v13  ;;  %v1565_v13 = vld [vmem:[#allocation11 + $0x150] sm:$0xff] }
 0x1bc   :  { %v733_v25 = vpop.f32.mrb[6].mxu0  ;;  %v806_v26 = vpop.f32.mrb[6].mxu1  ;;  %3887 = vmatprep.subr.bf16.mxu0 %v3886_v20  ;;  %v3958_v15 = vpack.c.bf16 %v1566_v14, %v1565_v13  ;;  %v1355_v13 = vld [vmem:[#allocation11 + $0xd8] sm:$0xff] }
 0x1bd   :  { %3560 = vmatprep.mubr.f32.mxu0 %v733_v25  ;;  %v3513_v29 = vpop.f32.mrb[7].mxu0  ;;  %v3518_v30 = vpop.f32.mrb[7].mxu1 }
 0x1be   :  { %3561 = vmatmul.mubr.f32.gmra.mrb[14].mxu0 %v806_v26  ;;  %v1347_v29 = vld [vmem:[#allocation11 + $0x98] sm:$0xff] }
 0x1bf   :  { %3889 = vmatpush3.bf16.msra.mxu0 %v3886_v20  ;;  %3639 = vmatprep.mubr.f32.mxu0 %v5069_v28  ;;  %v1570_v20 = vld [vmem:[#allocation11 + $0x178] sm:$0xff] }
 0x1c0   :  { %3891 = vmatprep.subr.bf16.mxu0 %v3890_v27  ;;  %v3966_v21 = vpack.c.bf16 %v1570_v20, %v1569_v19  ;;  %v1359_v19 = vld [vmem:[#allocation11 + $0xf8] sm:$0xff] }
 0x1c3   :  { %3893 = vmatpush3.bf16.msra.mxu0 %v3890_v27  ;;  %v1346_v27 = vld [vmem:[#allocation11 + $0x90] sm:$0xff] }
 0x1c4   :  { %3895 = vmatprep.subr.bf16.mxu0 %v3894_v33  ;;  %v3910_v35 = vpack.c.bf16 %v1347_v29, %v1346_v27 }
 0x1c7   :  { %3897 = vmatpush3.bf16.msra.mxu0 %v3894_v33 }
 0x1c8   :  { %3899 = vmatprep.subr.bf16.mxu0 %v3898_v36 }
 0x1cb   :  { %3901 = vmatpush3.bf16.msra.mxu0 %v3898_v36 }
 0x1cc   :  { %3903 = vmatprep.subr.bf16.mxu0 %v3902_v39 }
 0x1cf   :  { %3905 = vmatpush3.bf16.msra.mxu0 %v3902_v39 }
 0x1d0   :  { %3939 = vmatprep.subr.bf16.mxu0 %v3938_v59 }
 0x1d2   :  { %3640 = vmatmul.mubr.f32.vlgmr.msra.gmra.mrb[16].mxu0 %v5072_v40 }
 0x1d3   :  { %3642 = vmatprep.mubr.f32.mxu0 %v5074_v41  ;;  %3941 = vmatpush3.bf16.msra.mxu0 %v3938_v59  ;;  %v1351_v59 = vld [vmem:[#allocation11 + $0xb8] sm:$0xff] }
 0x1d4   :  { %3943 = vmatprep.subr.bf16.mxu0 %v3942_v1 }
 0x1d6   :  { %3643 = vmatmul.mubr.f32.gmra.mrb[18].mxu0 %v5078_v42 }
 0x1d7   :  { %3645 = vmatprep.mubr.f32.mxu0 %v5080_v43  ;;  %3945 = vmatpush3.bf16.msra.mxu0 %v3942_v1 }
 0x1d8   :  { %3947 = vmatprep.subr.bf16.mxu0 %v3946_v6 }
 0x1da   :  { %3646 = vmatmul.mubr.f32.gmra.mrb[20].mxu0 %v5084_v44 }
 0x1db   :  { %3648 = vmatprep.mubr.f32.mxu0 %v5086_v45  ;;  %3949 = vmatpush3.bf16.msra.mxu0 %v3946_v6  ;;  %v3918_v6 = vpack.c.bf16 %v1351_v59, %v1350_v58 }
 0x1dc   :  { %3951 = vmatprep.subr.bf16.mxu0 %v3950_v9 }
 0x1de   :  { %3649 = vmatmul.mubr.f32.gmra.mrb[22].mxu0 %v5090_v46 }
 0x1df   :  { %3651 = vmatprep.mubr.f32.mxu0 %v5093_v50  ;;  %3953 = vmatpush3.bf16.msra.mxu0 %v3950_v9 }
 0x1e0   :  { %3955 = vmatprep.subr.bf16.mxu0 %v3954_v12 }
 0x1e2   :  { %3652 = vmatmul.mubr.f32.gmra.mrb[24].mxu0 %v5096_v51 }
 0x1e3   :  { %3654 = vmatprep.mubr.f32.mxu0 %v5102_v55  ;;  %3957 = vmatpush3.bf16.msra.mxu0 %v3954_v12  ;;  %v1354_v12 = vld [vmem:[#allocation11 + $0xd0] sm:$0xff] }
 0x1e4   :  { %3959 = vmatprep.subr.bf16.mxu0 %v3958_v15  ;;  %v3926_v14 = vpack.c.bf16 %v1355_v13, %v1354_v12 }
 0x1e6   :  { %3655 = vmatmul.mubr.f32.gmra.mrb[26].mxu0 %v5105_v56 }
 0x1e7   :  { %3657 = vmatprep.mubr.f32.mxu0 %v5108_v60  ;;  %3961 = vmatpush3.bf16.msra.mxu0 %v3958_v15  ;;  %v1356_v15 = vld [vmem:[#allocation11 + $0xe0] sm:$0xff] }
 0x1e8   :  { %3963 = vmatprep.subr.bf16.mxu0 %v3962_v18  ;;  %v3930_v17 = vpack.c.bf16 %v1357_v16, %v1356_v15 }
 0x1ea   :  { %3658 = vmatmul.mubr.f32.gmra.mrb[28].mxu0 %v5111_v61 }
 0x1eb   :  { %3660 = vmatprep.mubr.f32.mxu0 %v5114_v2  ;;  %3965 = vmatpush3.bf16.msra.mxu0 %v3962_v18  ;;  %v1358_v18 = vld [vmem:[#allocation11 + $0xf0] sm:$0xff] }
 0x1ec   :  { %3967 = vmatprep.subr.bf16.mxu0 %v3966_v21  ;;  %v3934_v20 = vpack.c.bf16 %v1359_v19, %v1358_v18 }
 0x1ee   :  { %3661 = vmatmul.mubr.f32.gmra.mrb[30].mxu0 %v5117_v3 }
 0x1ef   :  { %3751 = vmatprep.mubr.f32.mxu0 %v5069_v28  ;;  %3969 = vmatpush3.bf16.msra.mxu0 %v3966_v21 }
 0x1f2   :  { %3752 = vmatmul.mubr.f32.vlgmr.msra.gmra.mrb[32].mxu0 %v5072_v40 }
 0x1f3   :  { %3754 = vmatprep.mubr.f32.mxu0 %v5074_v41 }
 0x1f6   :  { %3755 = vmatmul.mubr.f32.gmra.mrb[34].mxu0 %v5078_v42 }
 0x1f7   :  { %3757 = vmatprep.mubr.f32.mxu0 %v5080_v43 }
 0x1fa   :  { %3758 = vmatmul.mubr.f32.gmra.mrb[36].mxu0 %v5084_v44 }
 0x1fb   :  { %3760 = vmatprep.mubr.f32.mxu0 %v5086_v45 }
 0x1fe   :  { %3761 = vmatmul.mubr.f32.gmra.mrb[38].mxu0 %v5090_v46 }
 0x1ff   :  { %3763 = vmatprep.mubr.f32.mxu0 %v5093_v50 }
 0x202   :  { %3764 = vmatmul.mubr.f32.gmra.mrb[40].mxu0 %v5096_v51 }
 0x203   :  { %3766 = vmatprep.mubr.f32.mxu0 %v5102_v55 }
 0x206   :  { %3767 = vmatmul.mubr.f32.gmra.mrb[42].mxu0 %v5105_v56 }
 0x207   :  { %3769 = vmatprep.mubr.f32.mxu0 %v5108_v60 }
 0x20a   :  { %3770 = vmatmul.mubr.f32.gmra.mrb[44].mxu0 %v5111_v61 }
 0x20b   :  { %3772 = vmatprep.mubr.f32.mxu0 %v5114_v2 }
 0x20e   :  { %3773 = vmatmul.mubr.f32.gmra.mrb[46].mxu0 %v5117_v3 }
 0x20f   :  { %2132 = vmatprep.mubr.f32.mxu0 %v5466_v0 }
 0x285   :  { %v3553_v23 = vpop.f32.mrb[8].mxu0 }
 0x286   :  { %v905_v24 = vadd.f32 %v3553_v23, %v3227_v22  ;;  %v899_v25 = vpop.f32.mrb[9].mxu0 }
 0x287   :  { %v900_v26 = vadd.f32 %v3227_v22, %v899_v25 }
 0x288   :  { %v939_v32 = vmax.f32 %v905_v24, 0.0 }
 0x289   :  { %v938_v30 = vmax.f32 %v900_v26, 0.0  ;;  %v3556_v31 = vpop.f32.mrb[10].mxu0 }
 0x28a   :  { %v915_v33 = vadd.f32 %v3556_v31, %v3227_v22  ;;  %v909_v34 = vpop.f32.mrb[11].mxu0 }
 0x28b   :  { %v910_v36 = vadd.f32 %v3227_v22, %v909_v34  ;;  %3595 = vmatprep.mubr.f32.mxu1 %v938_v30 }
 0x28c   :  { %v941_v39 = vmax.f32 %v915_v33, 0.0  ;;  %3596 = vmatmul.mubr.f32.vlgmr.msra.gmra.mrb[8].mxu1 %v939_v32 }
 0x28d   :  { %v940_v47 = vmax.f32 %v910_v36, 0.0  ;;  %3909 = vmatpush3.bf16.msra.mxu1 %v5099_v54  ;;  %v3559_v48 = vpop.f32.mrb[12].mxu0  ;;  %v1352_v54 = vld [vmem:[#allocation11 + $0xc0] sm:$0xff] }
 0x28e   :  { %v925_v49 = vadd.f32 %v3559_v48, %v3227_v22  ;;  %v919_v52 = vpop.f32.mrb[13].mxu0  ;;  %3911 = vmatprep.subr.bf16.mxu1 %v3910_v35  ;;  %v3922_v11 = vpack.c.bf16 %v1353_v8, %v1352_v54 }
 0x28f   :  { %v920_v57 = vadd.f32 %v3227_v22, %v919_v52  ;;  %3598 = vmatprep.mubr.f32.mxu1 %v940_v47 }
 0x290   :  { %v943_v62 = vmax.f32 %v925_v49, 0.0  ;;  %3599 = vmatmul.mubr.f32.gmra.mrb[10].mxu1 %v941_v39 }
 0x291   :  { %v942_v63 = vmax.f32 %v920_v57, 0.0  ;;  %3913 = vmatpush3.bf16.msra.mxu1 %v3910_v35  ;;  %v3562_v1 = vpop.f32.mrb[14].mxu0 }
 0x292   :  { %v935_v4 = vadd.f32 %v3562_v1, %v3227_v22  ;;  %v929_v5 = vpop.f32.mrb[15].mxu0  ;;  %3915 = vmatprep.subr.bf16.mxu1 %v3914_v53 }
 0x293   :  { %v930_v7 = vadd.f32 %v3227_v22, %v929_v5  ;;  %3601 = vmatprep.mubr.f32.mxu1 %v942_v63 }
 0x294   :  { %v945_v9 = vmax.f32 %v935_v4, 0.0  ;;  %3602 = vmatmul.mubr.f32.gmra.mrb[12].mxu1 %v943_v62 }
 0x295   :  { %v944_v10 = vmax.f32 %v930_v7, 0.0  ;;  %3917 = vmatpush3.bf16.msra.mxu1 %v3914_v53 }
 0x296   :  { %3919 = vmatprep.subr.bf16.mxu1 %v3918_v6 }
 0x297   :  { %3604 = vmatprep.mubr.f32.mxu1 %v944_v10 }
 0x298   :  { %3605 = vmatmul.mubr.f32.gmra.mrb[14].mxu1 %v945_v9 }
 0x299   :  { %3921 = vmatpush3.bf16.msra.mxu1 %v3918_v6  ;;  %3695 = vmatprep.mubr.f32.mxu1 %v5069_v28 }
 0x29a   :  { %3923 = vmatprep.subr.bf16.mxu1 %v3922_v11 }
 0x29d   :  { %3925 = vmatpush3.bf16.msra.mxu1 %v3922_v11 }
 0x29e   :  { %3927 = vmatprep.subr.bf16.mxu1 %v3926_v14 }
 0x2a1   :  { %3929 = vmatpush3.bf16.msra.mxu1 %v3926_v14 }
 0x2a2   :  { %3931 = vmatprep.subr.bf16.mxu1 %v3930_v17 }
 0x2a5   :  { %3933 = vmatpush3.bf16.msra.mxu1 %v3930_v17  ;;  %v3641_v21 = vpop.f32.mrb[16].mxu0 }
 0x2a6   :  { %3935 = vmatprep.subr.bf16.mxu1 %v3934_v20  ;;  %v1229_v22 = vpop.f32.mrb[17].mxu0 }
 0x2a9   :  { %3937 = vmatpush3.bf16.msra.mxu1 %v3934_v20  ;;  %v3644_v23 = vpop.f32.mrb[18].mxu0  ;;  %v1911_v20 = vld [vmem:[#allocation14 + $0x8] sm:$0xff] }
 0x2aa   :  { %v1239_v24 = vpop.f32.mrb[19].mxu0 }
 0x2ac   :  { %3696 = vmatmul.mubr.f32.vlgmr.msra.gmra.mrb[16].mxu1 %v5072_v40 }
 0x2ad   :  { %3698 = vmatprep.mubr.f32.mxu1 %v5074_v41  ;;  %v3647_v28 = vpop.f32.mrb[20].mxu0 }
 0x2ae   :  { %v1249_v40 = vpop.f32.mrb[21].mxu0  ;;  %v1313_v32 = vrot.slane %v3647_v28, 6 }
 0x2af   :  { %v1312_v31 = vrot.slane %v1249_v40, 6  ;;  %v1910_v40 = vld [vmem:[#allocation14] sm:$0xff] }
 0x2b0   :  { %3699 = vmatmul.mubr.f32.gmra.mrb[18].mxu1 %v5078_v42 }
 0x2b1   :  { %3701 = vmatprep.mubr.f32.mxu1 %v5080_v43  ;;  %v3650_v41 = vpop.f32.mrb[22].mxu0 }
 0x2b2   :  { %v1259_v42 = vpop.f32.mrb[23].mxu0  ;;  %v1315_v37 = vrot.slane %v3650_v41, 6  ;;  %v1914_v41 = vld [vmem:[#allocation14 + $0x20] sm:$0xff] }
 0x2b3   :  { %v1314_v35 = vrot.slane %v1259_v42, 6  ;;  %v1912_v42 = vld [vmem:[#allocation14 + $0x10] sm:$0xff] }
 0x2b4   :  { %3702 = vmatmul.mubr.f32.gmra.mrb[20].mxu1 %v5084_v44 }
 0x2b5   :  { %3704 = vmatprep.mubr.f32.mxu1 %v5086_v45  ;;  %v3653_v43 = vpop.f32.mrb[24].mxu0 }
 0x2b6   :  { %v1269_v44 = vpop.f32.mrb[25].mxu0  ;;  %v1317_v47 = vrot.slane %v3653_v43, 6 }
 0x2b7   :  { %v1316_v38 = vrot.slane %v1269_v44, 6  ;;  %v3972_v44 = vpack.c.bf16 %v1914_v41, %v1910_v40  ;;  %v1935_v40 = vld [vmem:[#allocation14 + $0xc8] sm:$0xff] }
 0x2b8   :  { %3705 = vmatmul.mubr.f32.gmra.mrb[22].mxu1 %v5090_v46  ;;  %v1939_v41 = vld [vmem:[#allocation14 + $0xe8] sm:$0xff] }
 0x2b9   :  { %3707 = vmatprep.mubr.f32.mxu1 %v5093_v50  ;;  %v3656_v45 = vpop.f32.mrb[26].mxu0 }
 0x2ba   :  { %v1279_v46 = vpop.f32.mrb[27].mxu0  ;;  %v1319_v57 = vrot.slane %v3656_v45, 6  ;;  %v1916_v45 = vld [vmem:[#allocation14 + $0x30] sm:$0xff] }
 0x2bb   :  { %v1318_v52 = vrot.slane %v1279_v46, 6  ;;  %v4004_v46 = vpack.c.bf16 %v1916_v45, %v1912_v42  ;;  %v1937_v42 = vld [vmem:[#allocation14 + $0xd8] sm:$0xff] }
 0x2bc   :  { %3708 = vmatmul.mubr.f32.gmra.mrb[24].mxu1 %v5096_v51  ;;  %v1324_v51 = vlaneseq  ;;  %v1941_v45 = vld [vmem:[#allocation14 + $0xf8] sm:$0xff] }
 0x2bd   :  { %3710 = vmatprep.mubr.f32.mxu1 %v5102_v55  ;;  %v3659_v50 = vpop.f32.mrb[28].mxu0  ;;  %v1309_v55 = vrot.slane %v3641_v21, 6  ;;  %v1915_v21 = vld [vmem:[#allocation14 + $0x28] sm:$0xff] }
 0x2be   :  { %v1289_v25 = vpop.f32.mrb[29].mxu0  ;;  %v5158_v26 = vshrl.u32 %v1324_v51, 7  ;;  %v1321_v1 = vrot.slane %v3659_v50, 6  ;;  %v1919_v51 = vld [vmem:[#allocation14 + $0x48] sm:$0xff] }
 0x2bf   :  { %v1320_v59 = vrot.slane %v1289_v25, 6  ;;  %v1925_v25 = vld [vmem:[#allocation14 + $0x78] sm:$0xff] }
 0x2c0   :  { %3711 = vmatmul.mubr.f32.gmra.mrb[26].mxu1 %v5105_v56  ;;  %v1308_v56 = vrot.slane %v1229_v22, 6  ;;  %vm1326_vm2 = vcmp.lt.s32.totalorder %v5158_v26, 2  ;;  %v1913_v22 = vld [vmem:[#allocation14 + $0x18] sm:$0xff]  ;;  %vm1521_vm10 = vcmp.lt.s32.totalorder %v5158_v26, 1  ;;  %vm1772_vm11 = vcmp.ge.s32.totalorder %v5158_v26, 2 }
 0x2c1   :  { %3713 = vmatprep.mubr.f32.mxu1 %v5108_v60  ;;  %v1310_v60 = vrot.slane %v1239_v24, 6  ;;  %v5183_v36 = vsel %vm1326_vm2, %v1312_v31, %v1313_v32  ;;  %v5187_v39 = vsel %vm1326_vm2, %v1313_v32, %v1314_v35  ;;  %v5191_v48 = vsel %vm1326_vm2, %v1314_v35, %v1315_v37  ;;  %v1917_v24 = vld [vmem:[#allocation14 + $0x38] sm:$0xff]  ;;  %v1920_v32 = vld [vmem:[#allocation14 + $0x50] sm:$0xff] }
 0x2c2   :  { %v5167_v29 = vsel %vm1326_vm2, %v1308_v56, %v1309_v55  ;;  %v5195_v49 = vsel %vm1326_vm2, %v1315_v37, %v1316_v38  ;;  %v5199_v53 = vsel %vm1326_vm2, %v1316_v38, %v1317_v47  ;;  %v5203_v58 = vsel %vm1326_vm2, %v1317_v47, %v1318_v52  ;;  %v1924_v37 = vld [vmem:[#allocation14 + $0x70] sm:$0xff] }
 0x2c3   :  { %v5171_v30 = vsel %vm1326_vm2, %v1309_v55, %v1310_v60  ;;  %v5207_v63 = vsel %vm1326_vm2, %v1318_v52, %v1319_v57  ;;  %v5211_v4 = vsel %vm1326_vm2, %v1319_v57, %v1320_v59  ;;  %v5219_v54 = vsel %vm1326_vm2, %v1320_v59, %v1321_v1  ;;  %v1923_v55 = vld [vmem:[#allocation14 + $0x68] sm:$0xff]  ;;  %v1929_v59 = vld [vmem:[#allocation14 + $0x98] sm:$0xff] }
 0x2c4   :  { %3714 = vmatmul.mubr.f32.gmra.mrb[28].mxu1 %v5111_v61  ;;  %v3662_v61 = vpop.f32.mrb[30].mxu0  ;;  %v4002_v28 = vpack.c.bf16 %v1917_v24, %v1913_v22  ;;  %v4008_v38 = vpack.c.bf16 %v1924_v37, %v1920_v32  ;;  %v1927_v52 = vld [vmem:[#allocation14 + $0x88] sm:$0xff]  ;;  %v1932_v24 = vld [vmem:[#allocation14 + $0xb0] sm:$0xff]  ;;  %v1945_v32 = vld [vmem:[#allocation14 + $0x118] sm:$0xff] }
 0x2c5   :  { %3716 = vmatprep.mubr.f32.mxu1 %v5114_v2  ;;  %v1323_v2 = vrot.slane %v3662_v61, 6  ;;  %v1299_v62 = vpop.f32.mrb[31].mxu0  ;;  %v1931_v57 = vld [vmem:[#allocation14 + $0xa8] sm:$0xff]  ;;  %v1949_v37 = vld [vmem:[#allocation14 + $0x138] sm:$0xff] }
 0x2c6   :  { %v1322_v5 = vrot.slane %v1299_v62, 6  ;;  %v5213_v6 = vpop.f32.mrb[32].mxu0  ;;  %4003 = vmatprep.subr.bf16.mxu0 %v4002_v28  ;;  %v3978_v62 = vpack.c.bf16 %v1931_v57, %v1927_v52  ;;  %v1946_v52 = vld [vmem:[#allocation14 + $0x120] sm:$0xff]  ;;  %v4018_v57 = vpack.c.bf16 %v1949_v37, %v1945_v32  ;;  %v1964_v37 = vld [vmem:[#allocation14 + $0x1b0] sm:$0xff] }
 0x2c7   :  { %v5163_v27 = vsel %vm1326_vm2, %v1323_v2, %v1308_v56  ;;  %v5215_v7 = vpop.f32.mrb[33].mxu0  ;;  %v1921_v56 = vld [vmem:[#allocation14 + $0x58] sm:$0xff]  ;;  %4005 = vmatpush1.bf16.msra.mxu0 %v4004_v46  ;;  %v1934_v46 = vld [vmem:[#allocation14 + $0xc0] sm:$0xff] }
 0x2c8   :  { %3717 = vmatmul.mubr.f32.gmra.mrb[30].mxu1 %v5117_v3  ;;  %v1311_v3 = vrot.slane %v3644_v23, 6  ;;  %v5225_v9 = vsel %vm1326_vm2, %v1321_v1, %v1322_v5  ;;  %v5233_v12 = vsel %vm1326_vm2, %v1322_v5, %v1323_v2  ;;  %v3970_v23 = vpack.c.bf16 %v1915_v21, %v1911_v20  ;;  %v1933_v1 = vld [vmem:[#allocation14 + $0xb8] sm:$0xff]  ;;  %v1926_v5 = vld [vmem:[#allocation14 + $0x80] sm:$0xff] }
 0x2c9   :  { %2061 = vmatprep.mubr.f32.mxu1 %v5466_v0  ;;  %v5221_v8 = vpop.f32.mrb[34].mxu0  ;;  %5475 = vst [vmem:[#allocation28_spill] sm:$0xff] %v5225_v9  ;;  %v4006_v61 = vpack.c.bf16 %v1925_v25, %v1921_v56  ;;  %v1930_v20 = vld [vmem:[#allocation14 + $0xa0] sm:$0xff]  ;;  %v4010_v21 = vpack.c.bf16 %v1933_v1, %v1929_v59  ;;  %v1940_v25 = vld [vmem:[#allocation14 + $0xf0] sm:$0xff] }
 0x2ca   :  { %v5175_v33 = vsel %vm1326_vm2, %v1310_v60, %v1311_v3  ;;  %v5179_v34 = vsel %vm1326_vm2, %v1311_v3, %v1312_v31  ;;  %v5227_v10 = vpop.f32.mrb[35].mxu0  ;;  %3971 = vmatprep.subr.bf16.mxu1 %v3970_v23  ;;  %v3974_v60 = vpack.c.bf16 %v1923_v55, %v1919_v51  ;;  %v1918_v3 = vld [vmem:[#allocation14 + $0x40] sm:$0xff]  ;;  %v3980_v22 = vpack.c.bf16 %v1930_v20, %v1926_v5  ;;  %v1928_v23 = vld [vmem:[#allocation14 + $0x90] sm:$0xff]  ;;  %v1951_v20 = vld [vmem:[#allocation14 + $0x148] sm:$0xff] }
 0x2cb   :  { %3973 = vmatpush1.bf16.msra.mxu1 %v3972_v44  ;;  %v1922_v31 = vld [vmem:[#allocation14 + $0x60] sm:$0xff]  ;;  %4007 = vmatprep.subr.bf16.mxu0 %v4006_v61  ;;  %v4012_v28 = vpack.c.bf16 %v1932_v24, %v1928_v23  ;;  %v3982_v44 = vpack.c.bf16 %v1939_v41, %v1935_v40  ;;  %v4014_v55 = vpack.c.bf16 %v1941_v45, %v1937_v42  ;;  %v1948_v1 = vld [vmem:[#allocation14 + $0x130] sm:$0xff]  ;;  %v1957_v24 = vld [vmem:[#allocation14 + $0x178] sm:$0xff] }
 0x2cc   :  { %3975 = vmatprep.subr.bf16.mxu1 %v3974_v60  ;;  %v3976_v35 = vpack.c.bf16 %v1922_v31, %v1918_v3  ;;  %4009 = vmatpush1.bf16.msra.mxu0 %v4008_v38  ;;  %v1938_v51 = vld [vmem:[#allocation14 + $0xe0] sm:$0xff]  ;;  %v1936_v60 = vld [vmem:[#allocation14 + $0xd0] sm:$0xff]  ;;  %v1943_v3 = vld [vmem:[#allocation14 + $0x108] sm:$0xff] }
 0x2cd   :  { %v5229_v11 = vpop.f32.mrb[36].mxu0  ;;  %4011 = vmatprep.subr.bf16.mxu0 %v4010_v21  ;;  %v3984_v56 = vpack.c.bf16 %v1938_v51, %v1934_v46  ;;  %v4016_v61 = vpack.c.bf16 %v1940_v25, %v1936_v60  ;;  %v1947_v31 = vld [vmem:[#allocation14 + $0x128] sm:$0xff]  ;;  %v1942_v38 = vld [vmem:[#allocation14 + $0x100] sm:$0xff]  ;;  %v1956_v45 = vld [vmem:[#allocation14 + $0x170] sm:$0xff] }
 0x2ce   :  { %v5235_v13 = vpop.f32.mrb[37].mxu0  ;;  %v3988_v59 = vpack.c.bf16 %v1946_v52, %v1942_v38  ;;  %v1955_v21 = vld [vmem:[#allocation14 + $0x168] sm:$0xff]  ;;  %v1954_v40 = vld [vmem:[#allocation14 + $0x160] sm:$0xff]  ;;  %v1965_v25 = vld [vmem:[#allocation14 + $0x1b8] sm:$0xff] }
 0x2cf   :  { %3977 = vmatpush1.bf16.msra.mxu1 %v3976_v35  ;;  %v3986_v35 = vpack.c.bf16 %v1947_v31, %v1943_v3  ;;  %v3990_v23 = vpack.c.bf16 %v1955_v21, %v1951_v20  ;;  %v1959_v51 = vld [vmem:[#allocation14 + $0x188] sm:$0xff]  ;;  %v1962_v3 = vld [vmem:[#allocation14 + $0x1a0] sm:$0xff] }
 0x2d0   :  { %3979 = vmatprep.subr.bf16.mxu1 %v3978_v62  ;;  %4013 = vmatpush1.bf16.msra.mxu0 %v4012_v28  ;;  %v1944_v62 = vld [vmem:[#allocation14 + $0x110] sm:$0xff]  ;;  %v1950_v28 = vld [vmem:[#allocation14 + $0x140] sm:$0xff]  ;;  %v1967_v38 = vld [vmem:[#allocation14 + $0x1c8] sm:$0xff] }
 0x2d1   :  { %v5237_v14 = vpop.f32.mrb[38].mxu0  ;;  %4015 = vmatprep.subr.bf16.mxu0 %v4014_v55  ;;  %v4020_v5 = vpack.c.bf16 %v1948_v1, %v1944_v62  ;;  %v3992_v42 = vpack.c.bf16 %v1954_v40, %v1950_v28  ;;  %v1963_v55 = vld [vmem:[#allocation14 + $0x1a8] sm:$0xff]  ;;  %v1973_v62 = vld [vmem:[#allocation14 + $0x1f8] sm:$0xff]  ;;  %v1966_v20 = vld [vmem:[#allocation14 + $0x1c0] sm:$0xff] }
 0x2d2   :  { %v5239_v15 = vpop.f32.mrb[39].mxu0  ;;  %v3994_v60 = vpack.c.bf16 %v1963_v55, %v1959_v51  ;;  %v1970_v21 = vld [vmem:[#allocation14 + $0x1e0] sm:$0xff]  ;;  %v1847_v28 = vld [vmem:[#allocation13 + $0x8] sm:$0xff] }
 0x2d3   :  { %3981 = vmatpush1.bf16.msra.mxu1 %v3980_v22  ;;  %v1953_v22 = vld [vmem:[#allocation14 + $0x158] sm:$0xff]  ;;  %v1851_v40 = vld [vmem:[#allocation13 + $0x28] sm:$0xff]  ;;  %v3228_v51 = vld [vmem:[%s5448_s6] ss:$0 sm:$0xff] }
 0x2d4   :  { %3983 = vmatprep.subr.bf16.mxu1 %v3982_v44  ;;  %4017 = vmatpush1.bf16.msra.mxu0 %v4016_v61  ;;  %v4022_v41 = vpack.c.bf16 %v1957_v24, %v1953_v22  ;;  %v1952_v44 = vld [vmem:[#allocation14 + $0x150] sm:$0xff]  ;;  %v1958_v61 = vld [vmem:[#allocation14 + $0x180] sm:$0xff] }
 0x2d5   :  { %v5241_v16 = vpop.f32.mrb[40].mxu0  ;;  %4019 = vmatprep.subr.bf16.mxu0 %v4018_v57  ;;  %v4024_v46 = vpack.c.bf16 %v1956_v45, %v1952_v44  ;;  %v3996_v32 = vpack.c.bf16 %v1962_v3, %v1958_v61  ;;  %v1971_v57 = vld [vmem:[#allocation14 + $0x1e8] sm:$0xff]  ;;  %v1968_v22 = vld [vmem:[#allocation14 + $0x1d0] sm:$0xff]  ;;  %v1849_v44 = vld [vmem:[#allocation13 + $0x18] sm:$0xff] }
 0x2d6   :  { %v5243_v17 = vpop.f32.mrb[41].mxu0  ;;  %v3998_v1 = vpack.c.bf16 %v1971_v57, %v1967_v38  ;;  %v1972_v24 = vld [vmem:[#allocation14 + $0x1f0] sm:$0xff]  ;;  %v1853_v45 = vld [vmem:[#allocation13 + $0x38] sm:$0xff] }
 0x2d7   :  { %3985 = vmatpush1.bf16.msra.mxu1 %v3984_v56  ;;  %v1961_v56 = vld [vmem:[#allocation14 + $0x198] sm:$0xff] }
 0x2d8   :  { %3987 = vmatprep.subr.bf16.mxu1 %v3986_v35  ;;  %4021 = vmatpush1.bf16.msra.mxu0 %v4020_v5  ;;  %v4026_v31 = vpack.c.bf16 %v1965_v25, %v1961_v56  ;;  %v1960_v35 = vld [vmem:[#allocation14 + $0x190] sm:$0xff] }
 0x2d9   :  { %v5245_v18 = vpop.f32.mrb[42].mxu0  ;;  %4023 = vmatprep.subr.bf16.mxu0 %v4022_v41  ;;  %v4028_v52 = vpack.c.bf16 %v1964_v37, %v1960_v35  ;;  %v4032_v41 = vpack.c.bf16 %v1972_v24, %v1968_v22 }
 0x2da   :  { %v5247_v19 = vpop.f32.mrb[43].mxu0 }
 0x2db   :  { %3989 = vmatpush1.bf16.msra.mxu1 %v3988_v59  ;;  %v1969_v59 = vld [vmem:[#allocation14 + $0x1d8] sm:$0xff] }
 0x2dc   :  { %3991 = vmatprep.subr.bf16.mxu1 %v3990_v23  ;;  %4025 = vmatpush1.bf16.msra.mxu0 %v4024_v46  ;;  %v4030_v5 = vpack.c.bf16 %v1973_v62, %v1969_v59  ;;  %v4000_v23 = vpack.c.bf16 %v1970_v21, %v1966_v20  ;;  %v4066_v46 = vpack.c.bf16 %v1853_v45, %v1849_v44 }
 0x2dd   :  { %v5249_v43 = vpop.f32.mrb[44].mxu0  ;;  %4027 = vmatprep.subr.bf16.mxu0 %v4026_v31 }
 0x2de   :  { %v5251_v50 = vpop.f32.mrb[45].mxu0 }
 0x2df   :  { %3993 = vmatpush1.bf16.msra.mxu1 %v3992_v42  ;;  %v4034_v42 = vpack.c.bf16 %v1851_v40, %v1847_v28 }
 0x2e0   :  { %3995 = vmatprep.subr.bf16.mxu1 %v3994_v60  ;;  %4029 = vmatpush1.bf16.msra.mxu0 %v4028_v52 }
 0x2e1   :  { %v5253_v2 = vpop.f32.mrb[46].mxu0  ;;  %4031 = vmatprep.subr.bf16.mxu0 %v4030_v5 }
 0x2e2   :  { %5476 = vst [vmem:[#allocation29_spill] sm:$0xff] %v5253_v2  ;;  %v5255_v47 = vpop.f32.mrb[47].mxu0 }
 0x2e3   :  { %5477 = vst [vmem:[#allocation30_spill] sm:$0xff] %v5255_v47  ;;  %3997 = vmatpush1.bf16.msra.mxu1 %v3996_v32 }
 0x2e4   :  { %3999 = vmatprep.subr.bf16.mxu1 %v3998_v1  ;;  %4033 = vmatpush1.bf16.msra.mxu0 %v4032_v41 }
 0x2e5   :  { %4067 = vmatprep.subr.bf16.mxu0 %v4066_v46 }
 0x2e7   :  { %4001 = vmatpush1.bf16.msra.mxu1 %v4000_v23 }
 0x2e8   :  { %4035 = vmatprep.subr.bf16.mxu1 %v4034_v42 }
 0x35f   :  { %v3597_v55 = vpop.f32.mrb[8].mxu1 }
 0x360   :  { %v1041_v56 = vadd.f32 %v3597_v55, %v3228_v51  ;;  %v1035_v60 = vpop.f32.mrb[9].mxu1 }
 0x361   :  { %v1036_v25 = vadd.f32 %v3228_v51, %v1035_v60 }
 0x362   :  { %v1080_v61 = vrot.slane %v1041_v56, 4 }
 0x363   :  { %v1074_v3 = vrot.slane %v1036_v25, 4  ;;  %v3600_v31 = vpop.f32.mrb[10].mxu1 }
 0x364   :  { %v1081_v32 = vadd.f32 %v1080_v61, %v1041_v56  ;;  %v1051_v35 = vadd.f32 %v3600_v31, %v3228_v51  ;;  %v1045_v37 = vpop.f32.mrb[11].mxu1 }
 0x365   :  { %v1075_v38 = vadd.f32 %v1074_v3, %v1036_v25  ;;  %v1046_v52 = vadd.f32 %v3228_v51, %v1045_v37 }
 0x366   :  { %v1082_v57 = vrot.slane %v1081_v32, 2  ;;  %v1092_v59 = vrot.slane %v1051_v35, 4 }
 0x367   :  { %v1076_v62 = vrot.slane %v1075_v38, 2  ;;  %v1086_v1 = vrot.slane %v1046_v52, 4  ;;  %v3603_v5 = vpop.f32.mrb[12].mxu1 }
 0x368   :  { %v1083_v20 = vadd.f32 %v1082_v57, %v1081_v32  ;;  %v1093_v21 = vadd.f32 %v1092_v59, %v1051_v35  ;;  %v1061_v22 = vadd.f32 %v3603_v5, %v3228_v51  ;;  %v1055_v23 = vpop.f32.mrb[13].mxu1 }
 0x369   :  { %v1077_v24 = vadd.f32 %v1076_v62, %v1075_v38  ;;  %v1087_v28 = vadd.f32 %v1086_v1, %v1046_v52  ;;  %v1056_v40 = vadd.f32 %v3228_v51, %v1055_v23 }
 0x36a   :  { %v1084_v41 = vrot.slane %v1083_v20, 1  ;;  %v1094_v42 = vrot.slane %v1093_v21, 2  ;;  %v1104_v44 = vrot.slane %v1061_v22, 4 }
 0x36b   :  { %v1078_v45 = vrot.slane %v1077_v24, 1  ;;  %v1088_v46 = vrot.slane %v1087_v28, 2  ;;  %v1098_v55 = vrot.slane %v1056_v40, 4  ;;  %v3606_v56 = vpop.f32.mrb[14].mxu1 }
 0x36c   :  { %v1085_v60 = vadd.f32 %v1084_v41, %v1083_v20  ;;  %v1095_v25 = vadd.f32 %v1094_v42, %v1093_v21  ;;  %v1105_v61 = vadd.f32 %v1104_v44, %v1061_v22  ;;  %v1071_v3 = vadd.f32 %v3606_v56, %v3228_v51  ;;  %v1065_v31 = vpop.f32.mrb[15].mxu1 }
 0x36d   :  { %v1079_v32 = vadd.f32 %v1078_v45, %v1077_v24  ;;  %v1089_v35 = vadd.f32 %v1088_v46, %v1087_v28  ;;  %v1099_v37 = vadd.f32 %v1098_v55, %v1056_v40  ;;  %v1066_v57 = vadd.f32 %v3228_v51, %v1065_v31 }
 0x36e   :  { %v1124_v38 = vmul.f32 0.125, %v1085_v60  ;;  %v1096_v52 = vrot.slane %v1095_v25, 1  ;;  %v1106_v59 = vrot.slane %v1105_v61, 2  ;;  %v1116_v62 = vrot.slane %v1071_v3, 4 }
 0x36f   :  { %v1123_v1 = vmul.f32 0.125, %v1079_v32  ;;  %v1090_v5 = vrot.slane %v1089_v35, 1  ;;  %v1100_v23 = vrot.slane %v1099_v37, 2  ;;  %v1110_v0 = vrot.slane %v1066_v57, 4 }
 0x370   :  { %v1097_v47 = vadd.f32 %v1096_v52, %v1095_v25  ;;  %v1107_v9 = vadd.f32 %v1106_v59, %v1105_v61  ;;  %v1117_v2 = vadd.f32 %v1116_v62, %v1071_v3 }
 0x371   :  { %v2147_v20 = vsel %vm1982_vm3, %v1124_v38, %v1123_v1  ;;  %v1091_v21 = vadd.f32 %v1090_v5, %v1089_v35  ;;  %v1101_v22 = vadd.f32 %v1100_v23, %v1099_v37  ;;  %v1111_v41 = vadd.f32 %v1110_v0, %v1066_v57 }
 0x372   :  { %v1126_v24 = vmul.f32 0.125, %v1097_v47  ;;  %v1108_v28 = vrot.slane %v1107_v9, 1  ;;  %v1118_v51 = vrot.slane %v1117_v2, 2 }
 0x373   :  { %v1125_v40 = vmul.f32 0.125, %v1091_v21  ;;  %v1102_v42 = vrot.slane %v1101_v22, 1  ;;  %v1112_v44 = vrot.slane %v1111_v41, 2 }
 0x374   :  { %v1109_v45 = vadd.f32 %v1108_v28, %v1107_v9  ;;  %v1119_v46 = vadd.f32 %v1118_v51, %v1117_v2 }
 0x375   :  { %v2148_v55 = vsel %vm1984_vm4, %v1125_v40, %v2147_v20  ;;  %v1103_v56 = vadd.f32 %v1102_v42, %v1101_v22  ;;  %v1113_v60 = vadd.f32 %v1112_v44, %v1111_v41 }
 0x376   :  { %v1128_v25 = vmul.f32 0.125, %v1109_v45  ;;  %v1120_v61 = vrot.slane %v1119_v46, 1  ;;  %v2149_v3 = vsel %vm1986_vm5, %v1126_v24, %v2148_v55 }
 0x377   :  { %v1127_v0 = vmul.f32 0.125, %v1103_v56  ;;  %v1114_v47 = vrot.slane %v1113_v60, 1 }
 0x378   :  { %v1121_v31 = vadd.f32 %v1120_v61, %v1119_v46 }
 0x379   :  { %v1115_v32 = vadd.f32 %v1114_v47, %v1113_v60  ;;  %v2150_v35 = vsel %vm1988_vm6, %v1127_v0, %v2149_v3 }
 0x37a   :  { %v1130_v37 = vmul.f32 0.125, %v1121_v31  ;;  %v2151_v9 = vsel %vm1990_vm7, %v1128_v25, %v2150_v35 }
 0x37b   :  { %v1129_v2 = vmul.f32 0.125, %v1115_v32 }
 0x37d   :  { %v2152_v57 = vsel %vm1992_vm8, %v1129_v2, %v2151_v9 }
 0x37e   :  { %v5267_v38 = vsel %vm1994_vm9, %v1130_v37, %v2152_v57 }
 0x37f   :  { %v3697_v52 = vpop.f32.mrb[16].mxu1 }
 0x380   :  { %v1506_v59 = vrot.slane %v3697_v52, 7  ;;  %v5269_v62 = vpop.f32.mrb[17].mxu1 }
 0x381   :  { %v1505_v1 = vrot.slane %v5269_v62, 7 }
 0x383   :  { %v3700_v5 = vpop.f32.mrb[18].mxu1  ;;  %v1536_v23 = vsel %vm1521_vm10, %v1505_v1, %v1506_v59 }
 0x384   :  { %v1508_v20 = vrot.slane %v3700_v5, 7  ;;  %v1436_v21 = vpop.f32.mrb[19].mxu1  ;;  %v1539_v22 = vadd.f32 %v1536_v23, %v5167_v29 }
 0x385   :  { %v1507_v41 = vrot.slane %v1436_v21, 7 }
 0x386   :  { %v5279_v24 = vadd.f32 %v5213_v6, %v1539_v22  ;;  %v5292_v6 = vld [vmem:[%s5450_s8] ss:$0 sm:$0xff] }
 0x387   :  { %v3703_v28 = vpop.f32.mrb[20].mxu1  ;;  %v1534_v51 = vsel %vm1521_vm10, %v1507_v41, %v1508_v20  ;;  %v1535_v40 = vsel %vm1521_vm10, %v1506_v59, %v1507_v41 }
 0x388   :  { %v1510_v42 = vrot.slane %v3703_v28, 7  ;;  %v1446_v44 = vpop.f32.mrb[21].mxu1  ;;  %v1541_v45 = vadd.f32 %v1534_v51, %v5175_v33  ;;  %v1540_v46 = vadd.f32 %v1535_v40, %v5171_v30 }
 0x389   :  { %v1509_v55 = vrot.slane %v1446_v44, 7 }
 0x38a   :  { %v1719_v29 = vadd.f32 %v5221_v8, %v1541_v45  ;;  %v1718_v56 = vadd.f32 %v5227_v10, %v1540_v46 }
 0x38b   :  { %v3706_v60 = vpop.f32.mrb[22].mxu1  ;;  %v1532_v25 = vsel %vm1521_vm10, %v1509_v55, %v1510_v42  ;;  %v1533_v61 = vsel %vm1521_vm10, %v1508_v20, %v1509_v55 }
 0x38c   :  { %v1742_v33 = vadd.f32 %v5292_v6, %v1719_v29  ;;  %v1741_v30 = vadd.f32 %v5292_v6, %v1718_v56  ;;  %v1512_v3 = vrot.slane %v3706_v60, 7  ;;  %v1456_v8 = vpop.f32.mrb[23].mxu1  ;;  %v1543_v10 = vadd.f32 %v1532_v25, %v5183_v36 }
 0x38d   :  { %v1511_v0 = vrot.slane %v1456_v8, 7  ;;  %v1542_v47 = vadd.f32 %v1533_v61, %v5179_v34 }
 0x38e   :  { %v1758_v31 = vmax.f32 %v1742_v33, 0.0  ;;  %v1757_v32 = vmax.f32 %v1741_v30, 0.0  ;;  %v1721_v35 = vadd.f32 %v5229_v11, %v1543_v10 }
 0x38f   :  { %v1720_v37 = vadd.f32 %v5235_v13, %v1542_v47  ;;  %v3709_v9 = vpop.f32.mrb[24].mxu1  ;;  %v1530_v2 = vsel %vm1521_vm10, %v1511_v0, %v1512_v3  ;;  %v1531_v57 = vsel %vm1521_vm10, %v1510_v42, %v1511_v0 }
 0x390   :  { %v1776_v36 = vsel %vm1772_vm11, %v1757_v32, -inf  ;;  %v1744_v52 = vadd.f32 %v5292_v6, %v1721_v35  ;;  %v1514_v59 = vrot.slane %v3709_v9, 7  ;;  %v1466_v34 = vpop.f32.mrb[25].mxu1  ;;  %v1545_v5 = vadd.f32 %v1530_v2, %v5191_v48 }
 0x391   :  { %v1797_v23 = vmax.f32 %v1776_v36, %v1758_v31  ;;  %v1743_v11 = vadd.f32 %v5292_v6, %v1720_v37  ;;  %v1513_v13 = vrot.slane %v1466_v34, 7  ;;  %v1544_v20 = vadd.f32 %v1531_v57, %v5187_v39 }
 0x392   :  { %v1760_v21 = vmax.f32 %v1744_v52, 0.0  ;;  %v1723_v22 = vadd.f32 %v5237_v14, %v1545_v5  ;;  %v1740_v34 = vadd.f32 %v5292_v6, %v5279_v24 }
 0x393   :  { %v1759_v41 = vmax.f32 %v1743_v11, 0.0  ;;  %v1722_v28 = vadd.f32 %v5239_v15, %v1544_v20  ;;  %v3712_v51 = vpop.f32.mrb[26].mxu1  ;;  %v1528_v40 = vsel %vm1521_vm10, %v1513_v13, %v1514_v59  ;;  %v1529_v46 = vsel %vm1521_vm10, %v1512_v3, %v1513_v13 }
 0x394   :  { %v1746_v42 = vadd.f32 %v5292_v6, %v1723_v22  ;;  %v1516_v44 = vrot.slane %v3712_v51, 7  ;;  %v1476_v48 = vpop.f32.mrb[27].mxu1  ;;  %v1547_v45 = vadd.f32 %v1528_v40, %v5199_v53  ;;  %v1546_v60 = vadd.f32 %v1529_v46, %v5195_v49 }
 0x395   :  { %v1778_v39 = vsel %vm1772_vm11, %v1759_v41, -inf  ;;  %v1745_v14 = vadd.f32 %v5292_v6, %v1722_v28  ;;  %v1515_v55 = vrot.slane %v1476_v48, 7  ;;  %v1798_v2 = vrot.slane %v1797_v23, 4 }
 0x396   :  { %v1804_v15 = vmax.f32 %v1778_v39, %v1760_v21  ;;  %v1762_v29 = vmax.f32 %v1746_v42, 0.0  ;;  %v1725_v56 = vadd.f32 %v5241_v16, %v1547_v45  ;;  %v1724_v3 = vadd.f32 %v5243_v17, %v1546_v60 }
 0x397   :  { %v1761_v25 = vmax.f32 %v1745_v14, 0.0  ;;  %v3715_v61 = vpop.f32.mrb[28].mxu1  ;;  %v1526_v53 = vsel %vm1521_vm10, %v1515_v55, %v1516_v44  ;;  %v1527_v33 = vsel %vm1521_vm10, %v1514_v59, %v1515_v55  ;;  %v1799_v21 = vmax.f32 %v1797_v23, %v1798_v2 }
 0x398   :  { %v1748_v30 = vadd.f32 %v5292_v6, %v1725_v56  ;;  %v1518_v8 = vrot.slane %v3715_v61, 7  ;;  %v1486_v10 = vpop.f32.mrb[29].mxu1  ;;  %v1549_v49 = vadd.f32 %v1526_v53, %v5207_v63  ;;  %v1747_v31 = vadd.f32 %v5292_v6, %v1724_v3 }
 0x399   :  { %v1780_v0 = vsel %vm1772_vm11, %v1761_v25, -inf  ;;  %v1517_v16 = vrot.slane %v1486_v10, 7  ;;  %v1548_v37 = vadd.f32 %v1527_v33, %v5203_v58  ;;  %v1805_v41 = vrot.slane %v1804_v15, 4  ;;  %v5478_v25 = vld [vmem:[#allocation29_spill] sm:$0xff] }
 0x39a   :  { %v1811_v47 = vmax.f32 %v1780_v0, %v1762_v29  ;;  %v1764_v32 = vmax.f32 %v1748_v30, 0.0  ;;  %v1727_v35 = vadd.f32 %v5245_v18, %v1549_v49  ;;  %v1763_v57 = vmax.f32 %v1747_v31, 0.0  ;;  %v5479_v30 = vld [vmem:[#allocation28_spill] sm:$0xff] }
 0x39b   :  { %v3718_v9 = vpop.f32.mrb[30].mxu1  ;;  %v1524_v17 = vsel %vm1521_vm10, %v1517_v16, %v1518_v8  ;;  %v1726_v63 = vadd.f32 %v5247_v19, %v1548_v37  ;;  %v1525_v24 = vsel %vm1521_vm10, %v1516_v44, %v1517_v16  ;;  %v1800_v45 = vrot.slane %v1799_v21, 2  ;;  %v5480_v16 = vld [vmem:[#allocation30_spill] sm:$0xff] }
 0x39c   :  { %v1520_v36 = vrot.slane %v3718_v9, 7  ;;  %v1496_v52 = vpop.f32.mrb[31].mxu1  ;;  %v1750_v59 = vadd.f32 %v5292_v6, %v1727_v35  ;;  %v1782_v18 = vsel %vm1772_vm11, %v1763_v57, -inf  ;;  %v1551_v19 = vadd.f32 %v1524_v17, %v5219_v54 }
 0x39d   :  { %v1519_v5 = vrot.slane %v1496_v52, 7  ;;  %v1818_v11 = vmax.f32 %v1782_v18, %v1764_v32  ;;  %v1749_v13 = vadd.f32 %v5292_v6, %v1726_v63  ;;  %v1550_v51 = vadd.f32 %v1525_v24, %v5211_v4 }
 0x39e   :  { %v1537_v58 = vsel %vm1521_vm10, %v1520_v36, %v1505_v1  ;;  %v1766_v22 = vmax.f32 %v1750_v59, 0.0  ;;  %v1756_v1 = vmax.f32 %v1740_v34, 0.0  ;;  %v1812_v40 = vrot.slane %v1811_v47, 4 }
 0x39f   :  { %v1538_v20 = vadd.f32 %v1537_v58, %v5163_v27  ;;  %v1765_v28 = vmax.f32 %v1749_v13, 0.0  ;;  %v1729_v42 = vadd.f32 %v5249_v43, %v1551_v19  ;;  %v1522_v27 = vsel %vm1521_vm10, %v1519_v5, %v1520_v36 }
 0x3a0   :  { %v1819_v23 = vrot.slane %v1818_v11, 4  ;;  %v1728_v44 = vadd.f32 %v5251_v50, %v1550_v51  ;;  %v1553_v4 = vadd.f32 %v1522_v27, %v5233_v12  ;;  %v1806_v39 = vmax.f32 %v1804_v15, %v1805_v41 }
 0x3a1   :  { %v1716_v62 = vadd.f32 %v5215_v7, %v1538_v20  ;;  %v1784_v54 = vsel %vm1772_vm11, %v1765_v28, -inf  ;;  %v1752_v7 = vadd.f32 %v5292_v6, %v1729_v42  ;;  %v1523_v55 = vsel %vm1521_vm10, %v1518_v8, %v1519_v5 }
 0x3a2   :  { %v1825_v46 = vmax.f32 %v1784_v54, %v1766_v22  ;;  %v1751_v43 = vadd.f32 %v5292_v6, %v1728_v44  ;;  %v1813_v29 = vmax.f32 %v1811_v47, %v1812_v40  ;;  %v1731_v61 = vadd.f32 %v5478_v25, %v1553_v4  ;;  %v1855_v25 = vld [vmem:[#allocation13 + $0x48] sm:$0xff] }
 0x3a3   :  { %v1739_v48 = vadd.f32 %v5292_v6, %v1716_v62  ;;  %v1768_v60 = vmax.f32 %v1752_v7, 0.0  ;;  %v1820_v53 = vmax.f32 %v1818_v11, %v1819_v23  ;;  %v1552_v3 = vadd.f32 %v1523_v55, %v5479_v30  ;;  %v1861_v30 = vld [vmem:[#allocation13 + $0x78] sm:$0xff] }
 0x3a4   :  { %v1826_v56 = vrot.slane %v1825_v46, 4  ;;  %v1767_v33 = vmax.f32 %v1751_v43, 0.0  ;;  %v1754_v10 = vadd.f32 %v5292_v6, %v1731_v61  ;;  %v1807_v0 = vrot.slane %v1806_v39, 2  ;;  %v1850_v43 = vld [vmem:[#allocation13 + $0x20] sm:$0xff] }
 0x3a5   :  { %v1755_v14 = vmax.f32 %v1739_v48, 0.0  ;;  %v1730_v49 = vadd.f32 %v5480_v16, %v1552_v3  ;;  %v1814_v47 = vrot.slane %v1813_v29, 2  ;;  %v1801_v35 = vmax.f32 %v1799_v21, %v1800_v45 }
 0x3a6   :  { %v1827_v12 = vmax.f32 %v1825_v46, %v1826_v56  ;;  %v1786_v8 = vsel %vm1772_vm11, %v1767_v33, -inf  ;;  %v1821_v37 = vrot.slane %v1820_v53, 2  ;;  %v1770_v36 = vmax.f32 %v1754_v10, 0.0  ;;  %v1848_v56 = vld [vmem:[#allocation13 + $0x10] sm:$0xff]  ;;  %v1857_v33 = vld [vmem:[#allocation13 + $0x58] sm:$0xff] }
 0x3a7   :  { %v1774_v50 = vsel %vm1772_vm11, %v1755_v14, -inf  ;;  %v1832_v32 = vmax.f32 %v1786_v8, %v1768_v60  ;;  %v1753_v9 = vadd.f32 %v5292_v6, %v1730_v49  ;;  %v1808_v52 = vmax.f32 %v1806_v39, %v1807_v0  ;;  %v1846_v14 = vld [vmem:[#allocation13] sm:$0xff]  ;;  %v1852_v60 = vld [vmem:[#allocation13 + $0x30] sm:$0xff] }
 0x3a8   :  { %v1790_v15 = vmax.f32 %v1774_v50, %v1756_v1  ;;  %v1828_v17 = vrot.slane %v1827_v12, 2  ;;  %v1815_v63 = vmax.f32 %v1813_v29, %v1814_v47  ;;  %v1802_v58 = vrot.slane %v1801_v35, 1  ;;  %v1859_v50 = vld [vmem:[#allocation13 + $0x68] sm:$0xff]  ;;  %v1854_v0 = vld [vmem:[#allocation13 + $0x40] sm:$0xff]  ;;  %v1856_v47 = vld [vmem:[#allocation13 + $0x50] sm:$0xff] }
 0x3a9   :  { %v1833_v57 = vrot.slane %v1832_v32, 4  ;;  %v1769_v59 = vmax.f32 %v1753_v9, 0.0  ;;  %v1822_v5 = vmax.f32 %v1820_v53, %v1821_v37  ;;  %v1809_v19 = vrot.slane %v1808_v52, 1  ;;  %v1858_v8 = vld [vmem:[#allocation13 + $0x60] sm:$0xff]  ;;  %v1867_v37 = vld [vmem:[#allocation13 + $0xa8] sm:$0xff]  ;;  %v1865_v9 = vld [vmem:[#allocation13 + $0x98] sm:$0xff] }
 0x3aa   :  { %v1791_v31 = vrot.slane %v1790_v15, 4  ;;  %v1829_v13 = vmax.f32 %v1827_v12, %v1828_v17  ;;  %v1816_v6 = vrot.slane %v1815_v63, 1  ;;  %v1803_v51 = vmax.f32 %v1801_v35, %v1802_v58  ;;  %v1869_v17 = vld [vmem:[#allocation13 + $0xb8] sm:$0xff]  ;;  %v1871_v58 = vld [vmem:[#allocation13 + $0xc8] sm:$0xff] }
 0x3ab   :  { %v1834_v18 = vmax.f32 %v1832_v32, %v1833_v57  ;;  %v1788_v11 = vsel %vm1772_vm11, %v1769_v59, -inf  ;;  %v1823_v62 = vrot.slane %v1822_v5, 1  ;;  %v1810_v27 = vmax.f32 %v1808_v52, %v1809_v19  ;;  %v1863_v32 = vld [vmem:[#allocation13 + $0x88] sm:$0xff]  ;;  %v1866_v52 = vld [vmem:[#allocation13 + $0xa0] sm:$0xff] }
 0x3ac   :  { %v1792_v2 = vmax.f32 %v1790_v15, %v1791_v31  ;;  %v1839_v22 = vmax.f32 %v1788_v11, %v1770_v36  ;;  %v1830_v1 = vrot.slane %v1829_v13, 1  ;;  %v1817_v54 = vmax.f32 %v1815_v63, %v1816_v6  ;;  %v1860_v31 = vld [vmem:[#allocation13 + $0x70] sm:$0xff]  ;;  %v1862_v36 = vld [vmem:[#allocation13 + $0x80] sm:$0xff]  ;;  %v1873_v11 = vld [vmem:[#allocation13 + $0xd8] sm:$0xff] }
 0x3ad   :  { %v1835_v21 = vrot.slane %v1834_v18, 2  ;;  %v1824_v45 = vmax.f32 %v1822_v5, %v1823_v62  ;;  %v4036_v15 = vpack.c.bf16 %v1850_v43, %v1846_v14  ;;  %v4068_v10 = vpack.c.bf16 %v1852_v60, %v1848_v56  ;;  %v1875_v5 = vld [vmem:[#allocation13 + $0xe8] sm:$0xff]  ;;  %v1870_v19 = vld [vmem:[#allocation13 + $0xc0] sm:$0xff]  ;;  %v1876_v62 = vld [vmem:[#allocation13 + $0xf0] sm:$0xff] }
 0x3ae   :  { %v1793_v34 = vrot.slane %v1792_v2, 2  ;;  %v1840_v28 = vrot.slane %v1839_v22, 4  ;;  %v1831_v7 = vmax.f32 %v1829_v13, %v1830_v1  ;;  %v4038_v16 = vpack.c.bf16 %v1859_v50, %v1855_v25  ;;  %v1877_v13 = vld [vmem:[#allocation13 + $0xf8] sm:$0xff]  ;;  %v1874_v6 = vld [vmem:[#allocation13 + $0xe0] sm:$0xff]  ;;  %v1883_v1 = vld [vmem:[#allocation13 + $0x128] sm:$0xff] }
 0x3af   :  { %v1836_v41 = vmax.f32 %v1834_v18, %v1835_v21  ;;  %v4070_v49 = vpack.c.bf16 %v1861_v30, %v1857_v33  ;;  %v4072_v57 = vpack.c.bf16 %v1860_v31, %v1856_v47  ;;  %v4042_v59 = vpack.c.bf16 %v1867_v37, %v1863_v32  ;;  %v1868_v18 = vld [vmem:[#allocation13 + $0xb0] sm:$0xff]  ;;  %v1889_v14 = vld [vmem:[#allocation13 + $0x158] sm:$0xff]  ;;  %v1886_v56 = vld [vmem:[#allocation13 + $0x140] sm:$0xff] }
 0x3b0   :  { %v1794_v20 = vmax.f32 %v1792_v2, %v1793_v34  ;;  %v1841_v42 = vmax.f32 %v1839_v22, %v1840_v28  ;;  %v4040_v2 = vpack.c.bf16 %v1858_v8, %v1854_v0  ;;  %v4074_v63 = vpack.c.bf16 %v1869_v17, %v1865_v9  ;;  %v1864_v34 = vld [vmem:[#allocation13 + $0x90] sm:$0xff]  ;;  %v1893_v43 = vld [vmem:[#allocation13 + $0x178] sm:$0xff]  ;;  %v1890_v60 = vld [vmem:[#allocation13 + $0x160] sm:$0xff] }
 0x3b1   :  { %v1837_v23 = vrot.slane %v1836_v41, 1  ;;  %v4044_v21 = vpack.c.bf16 %v1866_v52, %v1862_v36  ;;  %v4076_v22 = vpack.c.bf16 %v1868_v18, %v1864_v34  ;;  %v1872_v28 = vld [vmem:[#allocation13 + $0xd0] sm:$0xff]  ;;  %v1895_v33 = vld [vmem:[#allocation13 + $0x188] sm:$0xff]  ;;  %v1894_v0 = vld [vmem:[#allocation13 + $0x180] sm:$0xff] }
 0x3b2   :  { %v1795_v24 = vrot.slane %v1794_v20, 1  ;;  %v1842_v48 = vrot.slane %v1841_v42, 2  ;;  %v1892_v50 = vld [vmem:[#allocation13 + $0x170] sm:$0xff]  ;;  %v1899_v30 = vld [vmem:[#allocation13 + $0x1a8] sm:$0xff]  ;;  %v1898_v8 = vld [vmem:[#allocation13 + $0x1a0] sm:$0xff] }
 0x3b3   :  { %v1838_v55 = vmax.f32 %v1836_v41, %v1837_v23  ;;  %v4078_v41 = vpack.c.bf16 %v1877_v13, %v1873_v11  ;;  %v4080_v23 = vpack.c.bf16 %v1876_v62, %v1872_v28  ;;  %v1896_v47 = vld [vmem:[#allocation13 + $0x190] sm:$0xff]  ;;  %v1903_v32 = vld [vmem:[#allocation13 + $0x1c8] sm:$0xff]  ;;  %v1905_v37 = vld [vmem:[#allocation13 + $0x1d8] sm:$0xff]  ;;  %v4060_v17 = vpack.c.bf16 %v1898_v8, %v1894_v0 }
 0x3b4   :  { %v1796_v40 = vmax.f32 %v1794_v20, %v1795_v24  ;;  %v1843_v4 = vmax.f32 %v1841_v42, %v1842_v48  ;;  %v5481_v20 = vmov 0.0   ;;  %v4046_v24 = vpack.c.bf16 %v1875_v5, %v1871_v58  ;;  %v1885_v42 = vld [vmem:[#allocation13 + $0x138] sm:$0xff]  ;;  %v1882_v48 = vld [vmem:[#allocation13 + $0x120] sm:$0xff]  ;;  %v1900_v31 = vld [vmem:[#allocation13 + $0x1b0] sm:$0xff] }
 0x3b5   :  { %v1909_v9 = vld [vmem:[#allocation13 + $0x1f8] sm:$0xff]  ;;  %v1906_v36 = vld [vmem:[#allocation13 + $0x1e0] sm:$0xff]  ;;  %v1908_v34 = vld [vmem:[#allocation13 + $0x1f0] sm:$0xff] }
 0x3b6   :  { %v1983_v44 = vsel %vm1982_vm3, %v1803_v51, %v1796_v40  ;;  %v1844_v61 = vrot.slane %v1843_v4, 1  ;;  %v1879_v51 = vld [vmem:[#allocation13 + $0x108] sm:$0xff]  ;;  %v1881_v40 = vld [vmem:[#allocation13 + $0x118] sm:$0xff]  ;;  %v2333_v28 = vld [vmem:[#allocation16 + $0x30] sm:$0xff] }
 0x3b7   :  { %v1985_v46 = vsel %vm1984_vm4, %v1810_v27, %v1983_v44  ;;  %v4048_v27 = vpack.c.bf16 %v1874_v6, %v1870_v19  ;;  %v4050_v44 = vpack.c.bf16 %v1883_v1, %v1879_v51  ;;  %v2328_v18 = vld [vmem:[#allocation16 + $0x8] sm:$0xff]  ;;  %v2330_v5 = vld [vmem:[#allocation16 + $0x18] sm:$0xff]  ;;  %v2331_v19 = vld [vmem:[#allocation16 + $0x20] sm:$0xff] }
 0x3b8   :  { %v1987_v39 = vsel %vm1986_vm5, %v1817_v54, %v1985_v46  ;;  %v1845_v12 = vmax.f32 %v1843_v4, %v1844_v61  ;;  %v1878_v54 = vld [vmem:[#allocation13 + $0x100] sm:$0xff]  ;;  %v1880_v46 = vld [vmem:[#allocation13 + $0x110] sm:$0xff]  ;;  %v1887_v4 = vld [vmem:[#allocation13 + $0x148] sm:$0xff]  ;;  %v4086_v61 = vpack.c.bf16 %v1893_v43, %v1889_v14 }
 0x3b9   :  { %v1989_v29 = vsel %vm1988_vm6, %v1824_v45, %v1987_v39  ;;  %v4082_v45 = vpack.c.bf16 %v1885_v42, %v1881_v40  ;;  %v1891_v39 = vld [vmem:[#allocation13 + $0x168] sm:$0xff]  ;;  %v2334_v11 = vld [vmem:[#allocation16 + $0x38] sm:$0xff] }
 0x3ba   :  { %v1991_v53 = vsel %vm1990_vm7, %v1831_v7, %v1989_v29  ;;  %v1884_v7 = vld [vmem:[#allocation13 + $0x130] sm:$0xff]  ;;  %v4054_v25 = vpack.c.bf16 %v1891_v39, %v1887_v4  ;;  %v2332_v58 = vld [vmem:[#allocation16 + $0x28] sm:$0xff]  ;;  %v2338_v1 = vld [vmem:[#allocation16 + $0x58] sm:$0xff] }
 0x3bb   :  { %v1993_v3 = vsel %vm1992_vm8, %v1838_v55, %v1991_v53  ;;  %v4052_v55 = vpack.c.bf16 %v1882_v48, %v1878_v54  ;;  %v4084_v29 = vpack.c.bf16 %v1884_v7, %v1880_v46  ;;  %v1888_v53 = vld [vmem:[#allocation13 + $0x150] sm:$0xff]  ;;  %v4098_v6 = vpack.c.bf16 %v2332_v58, %v2328_v18  ;;  %v2336_v62 = vld [vmem:[#allocation16 + $0x48] sm:$0xff]  ;;  %v2342_v40 = vld [vmem:[#allocation16 + $0x78] sm:$0xff] }
 0x3bc   :  { %v1995_v35 = vsel %vm1994_vm9, %v1845_v12, %v1993_v3  ;;  %v1897_v3 = vld [vmem:[#allocation13 + $0x198] sm:$0xff]  ;;  %v2340_v51 = vld [vmem:[#allocation16 + $0x68] sm:$0xff]  ;;  %v2339_v54 = vld [vmem:[#allocation16 + $0x60] sm:$0xff] }
 0x3bd   :  { %2062 = vmatmul.mubr.f32.vlgmr.msra.gmra.mrb[32].mxu1 %v1995_v35  ;;  %2133 = vmatmul.mubr.f32.vlgmr.msra.gmra.mrb[48].mxu0 %v1995_v35  ;;  %v1901_v12 = vld [vmem:[#allocation13 + $0x1b8] sm:$0xff]  ;;  %v1907_v35 = vld [vmem:[#allocation13 + $0x1e8] sm:$0xff]  ;;  %v4102_v48 = vpack.c.bf16 %v2340_v51, %v2336_v62  ;;  %v2341_v46 = vld [vmem:[#allocation16 + $0x70] sm:$0xff] }
 0x3be   :  { %4037 = vmatpush1.bf16.msra.mxu1 %v4036_v15  ;;  %4069 = vmatpush1.bf16.msra.mxu0 %v4068_v10  ;;  %v4056_v15 = vpack.c.bf16 %v1890_v60, %v1886_v56  ;;  %v4088_v10 = vpack.c.bf16 %v1892_v50, %v1888_v53  ;;  %v4062_v52 = vpack.c.bf16 %v1907_v35, %v1903_v32  ;;  %v2344_v7 = vld [vmem:[#allocation16 + $0x88] sm:$0xff]  ;;  %v2346_v39 = vld [vmem:[#allocation16 + $0x98] sm:$0xff]  ;;  %v2347_v56 = vld [vmem:[#allocation16 + $0xa0] sm:$0xff] }
 0x3bf   :  { %4039 = vmatprep.subr.bf16.mxu1 %v4038_v16  ;;  %4071 = vmatprep.subr.bf16.mxu0 %v4070_v49  ;;  %v4058_v16 = vpack.c.bf16 %v1899_v30, %v1895_v33  ;;  %v4090_v49 = vpack.c.bf16 %v1901_v12, %v1897_v3  ;;  %v2348_v4 = vld [vmem:[#allocation16 + $0xa8] sm:$0xff]  ;;  %v2350_v14 = vld [vmem:[#allocation16 + $0xb8] sm:$0xff]  ;;  %v2349_v53 = vld [vmem:[#allocation16 + $0xb0] sm:$0xff] }
 0x3c0   :  { %2219 = vmatprep.mubr.f32.mxu1 %v5481_v20  ;;  %2290 = vmatprep.mubr.f32.mxu0 %v5481_v20  ;;  %v4106_v60 = vpack.c.bf16 %v2348_v4, %v2344_v7  ;;  %v2352_v50 = vld [vmem:[#allocation16 + $0xc8] sm:$0xff]  ;;  %v2354_v30 = vld [vmem:[#allocation16 + $0xd8] sm:$0xff] }
 0x3c1   :  { %v2356_v33 = vld [vmem:[#allocation16 + $0xe8] sm:$0xff]  ;;  %v2358_v3 = vld [vmem:[#allocation16 + $0xf8] sm:$0xff] }
 0x3c2   :  { %4041 = vmatpush1.bf16.msra.mxu1 %v4040_v2  ;;  %4073 = vmatpush1.bf16.msra.mxu0 %v4072_v57  ;;  %v4092_v2 = vpack.c.bf16 %v1900_v31, %v1896_v47  ;;  %v1902_v57 = vld [vmem:[#allocation13 + $0x1c0] sm:$0xff]  ;;  %v4110_v0 = vpack.c.bf16 %v2356_v33, %v2352_v50  ;;  %v4238_v8 = vpack.c.bf16 %v2358_v3, %v2354_v30  ;;  %v2360_v47 = vld [vmem:[#allocation16 + $0x108] sm:$0xff]  ;;  %v2362_v32 = vld [vmem:[#allocation16 + $0x118] sm:$0xff] }
 0x3c3   :  { %4043 = vmatprep.subr.bf16.mxu1 %v4042_v59  ;;  %4075 = vmatprep.subr.bf16.mxu0 %v4074_v63  ;;  %v4094_v59 = vpack.c.bf16 %v1909_v9, %v1905_v37  ;;  %v1904_v63 = vld [vmem:[#allocation13 + $0x1d0] sm:$0xff]  ;;  %v4064_v13 = vpack.c.bf16 %v1906_v36, %v1902_v57  ;;  %v2364_v31 = vld [vmem:[#allocation16 + $0x128] sm:$0xff]  ;;  %v2366_v35 = vld [vmem:[#allocation16 + $0x138] sm:$0xff] }
 0x3c4   :  { %v4114_v57 = vpack.c.bf16 %v2364_v31, %v2360_v47  ;;  %v4242_v36 = vpack.c.bf16 %v2366_v35, %v2362_v32  ;;  %v2370_v18 = vld [vmem:[#allocation16 + $0x158] sm:$0xff] }
 0x3c5   :  { %v2374_v58 = vld [vmem:[#allocation16 + $0x178] sm:$0xff] }
 0x3c6   :  { %4045 = vmatpush1.bf16.msra.mxu1 %v4044_v21  ;;  %4077 = vmatpush1.bf16.msra.mxu0 %v4076_v22  ;;  %v4096_v21 = vpack.c.bf16 %v1908_v34, %v1904_v63  ;;  %v2327_v22 = vld [vmem:[#allocation16] sm:$0xff]  ;;  %v2368_v63 = vld [vmem:[#allocation16 + $0x148] sm:$0xff]  ;;  %v2378_v62 = vld [vmem:[#allocation16 + $0x198] sm:$0xff] }
 0x3c7   :  { %4047 = vmatprep.subr.bf16.mxu1 %v4046_v24  ;;  %4079 = vmatprep.subr.bf16.mxu0 %v4078_v41  ;;  %v4226_v24 = vpack.c.bf16 %v2334_v11, %v2330_v5  ;;  %v2329_v41 = vld [vmem:[#allocation16 + $0x10] sm:$0xff]  ;;  %v4100_v42 = vpack.c.bf16 %v2331_v19, %v2327_v22  ;;  %v2372_v34 = vld [vmem:[#allocation16 + $0x168] sm:$0xff]  ;;  %v4246_v19 = vpack.c.bf16 %v2374_v58, %v2370_v18  ;;  %v2382_v51 = vld [vmem:[#allocation16 + $0x1b8] sm:$0xff] }
 0x3c8   :  { %v4118_v22 = vpack.c.bf16 %v2372_v34, %v2368_v63  ;;  %v2386_v7 = vld [vmem:[#allocation16 + $0x1d8] sm:$0xff] }
 0x3c9   :  { %v2390_v4 = vld [vmem:[#allocation16 + $0x1f8] sm:$0xff] }
 0x3ca   :  { %4049 = vmatpush1.bf16.msra.mxu1 %v4048_v27  ;;  %4081 = vmatpush1.bf16.msra.mxu0 %v4080_v23  ;;  %v4228_v27 = vpack.c.bf16 %v2333_v28, %v2329_v41  ;;  %v2335_v23 = vld [vmem:[#allocation16 + $0x40] sm:$0xff]  ;;  %v2376_v41 = vld [vmem:[#allocation16 + $0x188] sm:$0xff]  ;;  %v2394_v50 = vld [vmem:[#allocation16 + $0x218] sm:$0xff] }
 0x3cb   :  { %4051 = vmatprep.subr.bf16.mxu1 %v4050_v44  ;;  %4083 = vmatprep.subr.bf16.mxu0 %v4082_v45  ;;  %v4230_v44 = vpack.c.bf16 %v2342_v40, %v2338_v1  ;;  %v2337_v45 = vld [vmem:[#allocation16 + $0x50] sm:$0xff]  ;;  %v4104_v43 = vpack.c.bf16 %v2339_v54, %v2335_v23  ;;  %v2380_v28 = vld [vmem:[#allocation16 + $0x1a8] sm:$0xff]  ;;  %v4250_v54 = vpack.c.bf16 %v2382_v51, %v2378_v62  ;;  %v2398_v33 = vld [vmem:[#allocation16 + $0x238] sm:$0xff] }
 0x3cc   :  { %v4122_v23 = vpack.c.bf16 %v2380_v28, %v2376_v41  ;;  %v2402_v47 = vld [vmem:[#allocation16 + $0x258] sm:$0xff] }
 0x3cd   :  { %v2406_v31 = vld [vmem:[#allocation16 + $0x278] sm:$0xff] }
 0x3ce   :  { %4053 = vmatpush1.bf16.msra.mxu1 %v4052_v55  ;;  %4085 = vmatpush1.bf16.msra.mxu0 %v4084_v29  ;;  %v4232_v55 = vpack.c.bf16 %v2341_v46, %v2337_v45  ;;  %v2343_v29 = vld [vmem:[#allocation16 + $0x80] sm:$0xff]  ;;  %v2384_v45 = vld [vmem:[#allocation16 + $0x1c8] sm:$0xff]  ;;  %v2410_v63 = vld [vmem:[#allocation16 + $0x298] sm:$0xff] }
 0x3cf   :  { %4055 = vmatprep.subr.bf16.mxu1 %v4054_v25  ;;  %4087 = vmatprep.subr.bf16.mxu0 %v4086_v61  ;;  %v4234_v25 = vpack.c.bf16 %v2350_v14, %v2346_v39  ;;  %v2345_v61 = vld [vmem:[#allocation16 + $0x90] sm:$0xff]  ;;  %v4108_v12 = vpack.c.bf16 %v2347_v56, %v2343_v29  ;;  %v2388_v46 = vld [vmem:[#allocation16 + $0x1e8] sm:$0xff]  ;;  %v4254_v56 = vpack.c.bf16 %v2390_v4, %v2386_v7  ;;  %v2414_v34 = vld [vmem:[#allocation16 + $0x2b8] sm:$0xff] }
 0x3d0   :  { %v4126_v29 = vpack.c.bf16 %v2388_v46, %v2384_v45  ;;  %v2418_v41 = vld [vmem:[#allocation16 + $0x2d8] sm:$0xff] }
 0x3d1   :  { %v2422_v28 = vld [vmem:[#allocation16 + $0x2f8] sm:$0xff] }
 0x3d2   :  { %4057 = vmatpush1.bf16.msra.mxu1 %v4056_v15  ;;  %4089 = vmatpush1.bf16.msra.mxu0 %v4088_v10  ;;  %v2351_v15 = vld [vmem:[#allocation16 + $0xc0] sm:$0xff]  ;;  %v2426_v45 = vld [vmem:[#allocation16 + $0x318] sm:$0xff] }
 0x3d3   :  { %4059 = vmatprep.subr.bf16.mxu1 %v4058_v16  ;;  %4091 = vmatprep.subr.bf16.mxu0 %v4090_v49  ;;  %v2355_v10 = vld [vmem:[#allocation16 + $0xe0] sm:$0xff]  ;;  %v2353_v16 = vld [vmem:[#allocation16 + $0xd0] sm:$0xff]  ;;  %v2430_v46 = vld [vmem:[#allocation16 + $0x338] sm:$0xff] }
 0x3d4   :  { %v2357_v49 = vld [vmem:[#allocation16 + $0xf0] sm:$0xff]  ;;  %v4112_v37 = vpack.c.bf16 %v2355_v10, %v2351_v15  ;;  %v4258_v10 = vpack.c.bf16 %v2398_v33, %v2394_v50 }
 0x3d5   :  { %v4240_v9 = vpack.c.bf16 %v2357_v49, %v2353_v16  ;;  %v2400_v16 = vld [vmem:[#allocation16 + $0x248] sm:$0xff] }
 0x3d6   :  { %4061 = vmatpush1.bf16.msra.mxu1 %v4060_v17  ;;  %4093 = vmatpush1.bf16.msra.mxu0 %v4092_v2  ;;  %v2359_v17 = vld [vmem:[#allocation16 + $0x100] sm:$0xff]  ;;  %v2404_v49 = vld [vmem:[#allocation16 + $0x268] sm:$0xff] }
 0x3d7   :  { %4063 = vmatprep.subr.bf16.mxu1 %v4062_v52  ;;  %4095 = vmatprep.subr.bf16.mxu0 %v4094_v59  ;;  %v2363_v2 = vld [vmem:[#allocation16 + $0x120] sm:$0xff]  ;;  %v2361_v52 = vld [vmem:[#allocation16 + $0x110] sm:$0xff] }
 0x3d8   :  { %v2365_v59 = vld [vmem:[#allocation16 + $0x130] sm:$0xff]  ;;  %v4116_v5 = vpack.c.bf16 %v2363_v2, %v2359_v17  ;;  %v4134_v17 = vpack.c.bf16 %v2404_v49, %v2400_v16  ;;  %v4262_v2 = vpack.c.bf16 %v2406_v31, %v2402_v47  ;;  %v2442_v16 = vld [vmem:[#allocation16 + $0x398] sm:$0xff] }
 0x3d9   :  { %v4244_v11 = vpack.c.bf16 %v2365_v59, %v2361_v52  ;;  %v2408_v52 = vld [vmem:[#allocation16 + $0x288] sm:$0xff]  ;;  %v2446_v49 = vld [vmem:[#allocation16 + $0x3b8] sm:$0xff] }
 0x3da   :  { %4065 = vmatpush1.bf16.msra.mxu1 %v4064_v13  ;;  %4097 = vmatpush1.bf16.msra.mxu0 %v4096_v21  ;;  %v2367_v13 = vld [vmem:[#allocation16 + $0x140] sm:$0xff]  ;;  %v2412_v59 = vld [vmem:[#allocation16 + $0x2a8] sm:$0xff] }
 0x3db   :  { %4099 = vmatprep.subr.bf16.mxu1 %v4098_v6  ;;  %4227 = vmatprep.subr.bf16.mxu0 %v4226_v24  ;;  %v2371_v21 = vld [vmem:[#allocation16 + $0x160] sm:$0xff]  ;;  %v2369_v6 = vld [vmem:[#allocation16 + $0x150] sm:$0xff] }
 0x3dc   :  { %v2373_v24 = vld [vmem:[#allocation16 + $0x170] sm:$0xff]  ;;  %v4120_v1 = vpack.c.bf16 %v2371_v21, %v2367_v13  ;;  %v4138_v13 = vpack.c.bf16 %v2412_v59, %v2408_v52  ;;  %v4266_v21 = vpack.c.bf16 %v2414_v34, %v2410_v63  ;;  %v2448_v52 = vld [vmem:[#allocation16 + $0x3c8] sm:$0xff]  ;;  %v2450_v63 = vld [vmem:[#allocation16 + $0x3d8] sm:$0xff] }
 0x3dd   :  { %2220 = vmatmul.mubr.f32.vlgmr.msra.gmra.mrb[32].mxu1 %v5267_v38  ;;  %2291 = vmatmul.mubr.f32.vlgmr.msra.gmra.mrb[48].mxu0 %v5267_v38  ;;  %v4236_v38 = vpack.c.bf16 %v2349_v53, %v2345_v61  ;;  %v4248_v40 = vpack.c.bf16 %v2373_v24, %v2369_v6  ;;  %v2392_v61 = vld [vmem:[#allocation16 + $0x208] sm:$0xff] }
 0x3de   :  { %4101 = vmatpush1.bf16.msra.mxu1 %v4100_v42  ;;  %4229 = vmatpush1.bf16.msra.mxu0 %v4228_v27  ;;  %v2375_v42 = vld [vmem:[#allocation16 + $0x180] sm:$0xff]  ;;  %v2396_v53 = vld [vmem:[#allocation16 + $0x228] sm:$0xff] }
 0x3df   :  { %4103 = vmatprep.subr.bf16.mxu1 %v4102_v48  ;;  %4231 = vmatprep.subr.bf16.mxu0 %v4230_v44  ;;  %v2379_v27 = vld [vmem:[#allocation16 + $0x1a0] sm:$0xff]  ;;  %v2377_v48 = vld [vmem:[#allocation16 + $0x190] sm:$0xff]  ;;  %v4130_v15 = vpack.c.bf16 %v2396_v53, %v2392_v61  ;;  %v2416_v6 = vld [vmem:[#allocation16 + $0x2c8] sm:$0xff] }
 0x3e0   :  { %v2381_v44 = vld [vmem:[#allocation16 + $0x1b0] sm:$0xff]  ;;  %v4124_v39 = vpack.c.bf16 %v2379_v27, %v2375_v42  ;;  %v2420_v24 = vld [vmem:[#allocation16 + $0x2e8] sm:$0xff]  ;;  %v4270_v27 = vpack.c.bf16 %v2422_v28, %v2418_v41  ;;  %v2434_v61 = vld [vmem:[#allocation16 + $0x358] sm:$0xff] }
 0x3e1   :  { %v4252_v14 = vpack.c.bf16 %v2381_v44, %v2377_v48  ;;  %v4142_v42 = vpack.c.bf16 %v2420_v24, %v2416_v6  ;;  %v2424_v48 = vld [vmem:[#allocation16 + $0x308] sm:$0xff]  ;;  %v2438_v53 = vld [vmem:[#allocation16 + $0x378] sm:$0xff] }
 0x3e2   :  { %4105 = vmatpush1.bf16.msra.mxu1 %v4104_v43  ;;  %4233 = vmatpush1.bf16.msra.mxu0 %v4232_v55  ;;  %v2383_v43 = vld [vmem:[#allocation16 + $0x1c0] sm:$0xff]  ;;  %v2428_v44 = vld [vmem:[#allocation16 + $0x328] sm:$0xff]  ;;  %v2458_v41 = vld [vmem:[#allocation16 + $0x418] sm:$0xff] }
 0x3e3   :  { %4107 = vmatprep.subr.bf16.mxu1 %v4106_v60  ;;  %4235 = vmatprep.subr.bf16.mxu0 %v4234_v25  ;;  %v2387_v55 = vld [vmem:[#allocation16 + $0x1e0] sm:$0xff]  ;;  %v2385_v60 = vld [vmem:[#allocation16 + $0x1d0] sm:$0xff]  ;;  %v2452_v59 = vld [vmem:[#allocation16 + $0x3e8] sm:$0xff] }
 0x3e4   :  { %v2389_v25 = vld [vmem:[#allocation16 + $0x1f0] sm:$0xff]  ;;  %v4128_v30 = vpack.c.bf16 %v2387_v55, %v2383_v43  ;;  %v4146_v43 = vpack.c.bf16 %v2428_v44, %v2424_v48  ;;  %v4274_v55 = vpack.c.bf16 %v2430_v46, %v2426_v45  ;;  %v4158_v34 = vpack.c.bf16 %v2452_v59, %v2448_v52  ;;  %v2456_v6 = vld [vmem:[#allocation16 + $0x408] sm:$0xff] }
 0x3e5   :  { %v4256_v3 = vpack.c.bf16 %v2389_v25, %v2385_v60  ;;  %v2432_v60 = vld [vmem:[#allocation16 + $0x348] sm:$0xff] }
 0x3e6   :  { %4109 = vmatpush1.bf16.msra.mxu1 %v4108_v12  ;;  %4237 = vmatpush1.bf16.msra.mxu0 %v4236_v38  ;;  %v2391_v12 = vld [vmem:[#allocation16 + $0x200] sm:$0xff]  ;;  %v2436_v25 = vld [vmem:[#allocation16 + $0x368] sm:$0xff] }
 0x3e7   :  { %4111 = vmatprep.subr.bf16.mxu1 %v4110_v0  ;;  %4239 = vmatprep.subr.bf16.mxu0 %v4238_v8  ;;  %v2395_v38 = vld [vmem:[#allocation16 + $0x220] sm:$0xff]  ;;  %v2393_v0 = vld [vmem:[#allocation16 + $0x210] sm:$0xff]  ;;  %v2460_v24 = vld [vmem:[#allocation16 + $0x428] sm:$0xff] }
 0x3e8   :  { %v2397_v8 = vld [vmem:[#allocation16 + $0x230] sm:$0xff]  ;;  %v4132_v32 = vpack.c.bf16 %v2395_v38, %v2391_v12  ;;  %v4150_v12 = vpack.c.bf16 %v2436_v25, %v2432_v60  ;;  %v4278_v38 = vpack.c.bf16 %v2438_v53, %v2434_v61  ;;  %v4162_v28 = vpack.c.bf16 %v2460_v24, %v2456_v6  ;;  %v2464_v61 = vld [vmem:[#allocation16 + $0x448] sm:$0xff] }
 0x3e9   :  { %v4260_v35 = vpack.c.bf16 %v2397_v8, %v2393_v0  ;;  %v2440_v0 = vld [vmem:[#allocation16 + $0x388] sm:$0xff]  ;;  %v2461_v60 = vld [vmem:[#allocation16 + $0x430] sm:$0xff] }
 0x3ea   :  { %4113 = vmatpush1.bf16.msra.mxu1 %v4112_v37  ;;  %4241 = vmatpush1.bf16.msra.mxu0 %v4240_v9  ;;  %v2399_v37 = vld [vmem:[#allocation16 + $0x240] sm:$0xff]  ;;  %v2444_v8 = vld [vmem:[#allocation16 + $0x3a8] sm:$0xff] }
 0x3eb   :  { %4115 = vmatprep.subr.bf16.mxu1 %v4114_v57  ;;  %4243 = vmatprep.subr.bf16.mxu0 %v4242_v36  ;;  %v2403_v9 = vld [vmem:[#allocation16 + $0x260] sm:$0xff]  ;;  %v2401_v57 = vld [vmem:[#allocation16 + $0x250] sm:$0xff] }
 0x3ec   :  { %v2405_v36 = vld [vmem:[#allocation16 + $0x270] sm:$0xff]  ;;  %v4136_v18 = vpack.c.bf16 %v2403_v9, %v2399_v37  ;;  %v4282_v37 = vpack.c.bf16 %v2446_v49, %v2442_v16  ;;  %v2443_v9 = vld [vmem:[#allocation16 + $0x3a0] sm:$0xff]  ;;  %v2472_v49 = vld [vmem:[#allocation16 + $0x488] sm:$0xff] }
 0x3ed   :  { %v4264_v58 = vpack.c.bf16 %v2405_v36, %v2401_v57  ;;  %v2469_v16 = vld [vmem:[#allocation16 + $0x470] sm:$0xff] }
 0x3ee   :  { %4117 = vmatpush1.bf16.msra.mxu1 %v4116_v5  ;;  %4245 = vmatpush1.bf16.msra.mxu0 %v4244_v11  ;;  %v2407_v5 = vld [vmem:[#allocation16 + $0x280] sm:$0xff] }
 0x3ef   :  { %4119 = vmatprep.subr.bf16.mxu1 %v4118_v22  ;;  %4247 = vmatprep.subr.bf16.mxu0 %v4246_v19  ;;  %v2411_v11 = vld [vmem:[#allocation16 + $0x2a0] sm:$0xff]  ;;  %v2409_v22 = vld [vmem:[#allocation16 + $0x290] sm:$0xff] }
 0x3f0   :  { %v2413_v19 = vld [vmem:[#allocation16 + $0x2b0] sm:$0xff]  ;;  %v4140_v62 = vpack.c.bf16 %v2411_v11, %v2407_v5  ;;  %v2451_v5 = vld [vmem:[#allocation16 + $0x3e0] sm:$0xff] }
 0x3f1   :  { %v4268_v51 = vpack.c.bf16 %v2413_v19, %v2409_v22  ;;  %v2453_v22 = vld [vmem:[#allocation16 + $0x3f0] sm:$0xff] }
 0x3f2   :  { %4121 = vmatpush1.bf16.msra.mxu1 %v4120_v1  ;;  %4249 = vmatpush1.bf16.msra.mxu0 %v4248_v40  ;;  %v2415_v1 = vld [vmem:[#allocation16 + $0x2c0] sm:$0xff] }
 0x3f3   :  { %4123 = vmatprep.subr.bf16.mxu1 %v4122_v23  ;;  %4251 = vmatprep.subr.bf16.mxu0 %v4250_v54  ;;  %v2419_v40 = vld [vmem:[#allocation16 + $0x2e0] sm:$0xff]  ;;  %v2417_v23 = vld [vmem:[#allocation16 + $0x2d0] sm:$0xff] }
 0x3f4   :  { %v2421_v54 = vld [vmem:[#allocation16 + $0x2f0] sm:$0xff]  ;;  %v4144_v7 = vpack.c.bf16 %v2419_v40, %v2415_v1  ;;  %v2301_v1 = vsub.s32 0, %v5158_v26  ;;  %v2309_v40 = vsub.s32 2, %v5158_v26 }
 0x3f5   :  { %v4272_v4 = vpack.c.bf16 %v2421_v54, %v2417_v23  ;;  %v2313_v23 = vsub.s32 3, %v5158_v26 }
 0x3f6   :  { %4125 = vmatpush1.bf16.msra.mxu1 %v4124_v39  ;;  %4253 = vmatpush1.bf16.msra.mxu0 %v4252_v14  ;;  %v2423_v39 = vld [vmem:[#allocation16 + $0x300] sm:$0xff] }
 0x3f7   :  { %4127 = vmatprep.subr.bf16.mxu1 %v4126_v29  ;;  %4255 = vmatprep.subr.bf16.mxu0 %v4254_v56  ;;  %v2427_v14 = vld [vmem:[#allocation16 + $0x320] sm:$0xff]  ;;  %v2425_v29 = vld [vmem:[#allocation16 + $0x310] sm:$0xff] }
 0x3f8   :  { %v2429_v56 = vld [vmem:[#allocation16 + $0x330] sm:$0xff]  ;;  %v4148_v50 = vpack.c.bf16 %v2427_v14, %v2423_v39 }
 0x3f9   :  { %v4276_v33 = vpack.c.bf16 %v2429_v56, %v2425_v29  ;;  %v2459_v29 = vld [vmem:[#allocation16 + $0x420] sm:$0xff]  ;;  %v2457_v56 = vld [vmem:[#allocation16 + $0x410] sm:$0xff] }
 0x3fa   :  { %4129 = vmatpush1.bf16.msra.mxu1 %v4128_v30  ;;  %4257 = vmatpush1.bf16.msra.mxu0 %v4256_v3  ;;  %v2431_v30 = vld [vmem:[#allocation16 + $0x340] sm:$0xff] }
 0x3fb   :  { %4131 = vmatprep.subr.bf16.mxu1 %v4130_v15  ;;  %4259 = vmatprep.subr.bf16.mxu0 %v4258_v10  ;;  %v2435_v3 = vld [vmem:[#allocation16 + $0x360] sm:$0xff]  ;;  %v2433_v15 = vld [vmem:[#allocation16 + $0x350] sm:$0xff] }
 0x3fc   :  { %v2437_v10 = vld [vmem:[#allocation16 + $0x370] sm:$0xff]  ;;  %v4152_v47 = vpack.c.bf16 %v2435_v3, %v2431_v30  ;;  %v2470_v30 = vld [vmem:[#allocation16 + $0x478] sm:$0xff] }
 0x3fd   :  { %v4280_v31 = vpack.c.bf16 %v2437_v10, %v2433_v15  ;;  %v2463_v15 = vld [vmem:[#allocation16 + $0x440] sm:$0xff] }
 0x3fe   :  { %4133 = vmatpush1.bf16.msra.mxu1 %v4132_v32  ;;  %4261 = vmatpush1.bf16.msra.mxu0 %v4260_v35  ;;  %v2439_v32 = vld [vmem:[#allocation16 + $0x380] sm:$0xff]  ;;  %v4154_v35 = vpack.c.bf16 %v2444_v8, %v2440_v0  ;;  %v2465_v8 = vld [vmem:[#allocation16 + $0x450] sm:$0xff] }
 0x3ff   :  { %4135 = vmatprep.subr.bf16.mxu1 %v4134_v17  ;;  %4263 = vmatprep.subr.bf16.mxu0 %v4262_v2  ;;  %v2441_v17 = vld [vmem:[#allocation16 + $0x390] sm:$0xff]  ;;  %v4156_v57 = vpack.c.bf16 %v2443_v9, %v2439_v32  ;;  %v2467_v10 = vld [vmem:[#allocation16 + $0x460] sm:$0xff]  ;;  %v2476_v32 = vld [vmem:[#allocation16 + $0x4a8] sm:$0xff] }
 0x400   :  { %v2445_v2 = vld [vmem:[#allocation16 + $0x3b0] sm:$0xff]  ;;  %v4170_v52 = vpack.c.bf16 %v2476_v32, %v2472_v49  ;;  %v2503_v49 = vld [vmem:[#allocation16 + $0x580] sm:$0xff] }
 0x401   :  { %v4284_v36 = vpack.c.bf16 %v2445_v2, %v2441_v17  ;;  %v4168_v17 = vpack.c.bf16 %v2467_v10, %v2463_v15  ;;  %v4296_v2 = vpack.c.bf16 %v2469_v16, %v2465_v8  ;;  %v2508_v15 = vld [vmem:[#allocation16 + $0x5a8] sm:$0xff]  ;;  %v2506_v10 = vld [vmem:[#allocation16 + $0x598] sm:$0xff] }
 0x402   :  { %4137 = vmatpush1.bf16.msra.mxu1 %v4136_v18  ;;  %4265 = vmatpush1.bf16.msra.mxu0 %v4264_v58  ;;  %v2454_v18 = vld [vmem:[#allocation16 + $0x3f8] sm:$0xff]  ;;  %v2447_v58 = vld [vmem:[#allocation16 + $0x3c0] sm:$0xff] }
 0x403   :  { %4139 = vmatprep.subr.bf16.mxu1 %v4138_v13  ;;  %4267 = vmatprep.subr.bf16.mxu0 %v4266_v21  ;;  %v4286_v11 = vpack.c.bf16 %v2454_v18, %v2450_v63  ;;  %v4160_v13 = vpack.c.bf16 %v2451_v5, %v2447_v58  ;;  %v2449_v21 = vld [vmem:[#allocation16 + $0x3d0] sm:$0xff]  ;;  %v2480_v18 = vld [vmem:[#allocation16 + $0x4c8] sm:$0xff]  ;;  %v2482_v5 = vld [vmem:[#allocation16 + $0x4d8] sm:$0xff] }
 0x404   :  { %v4288_v19 = vpack.c.bf16 %v2453_v22, %v2449_v21  ;;  %v2473_v63 = vld [vmem:[#allocation16 + $0x490] sm:$0xff]  ;;  %v2484_v58 = vld [vmem:[#allocation16 + $0x4e8] sm:$0xff]  ;;  %v2479_v22 = vld [vmem:[#allocation16 + $0x4c0] sm:$0xff] }
 0x405   :  { %v4174_v6 = vpack.c.bf16 %v2484_v58, %v2480_v18  ;;  %v2513_v58 = vld [vmem:[#allocation16 + $0x5d0] sm:$0xff] }
 0x406   :  { %4141 = vmatpush1.bf16.msra.mxu1 %v4140_v62  ;;  %4269 = vmatpush1.bf16.msra.mxu0 %v4268_v51  ;;  %v2462_v62 = vld [vmem:[#allocation16 + $0x438] sm:$0xff] }
 0x407   :  { %4143 = vmatprep.subr.bf16.mxu1 %v4142_v42  ;;  %4271 = vmatprep.subr.bf16.mxu0 %v4270_v27  ;;  %v4290_v51 = vpack.c.bf16 %v2462_v62, %v2458_v41  ;;  %v2297_v42 = vld [vmem:[%s5453_s11] sm:$0xf]  ;;  %v2305_v27 = vsub.s32 1, %v5158_v26  ;;  %v2481_v41 = vld [vmem:[#allocation16 + $0x4d0] sm:$0xff]  ;;  %v2488_v62 = vld [vmem:[#allocation16 + $0x508] sm:$0xff] }
 0x408   :  { %v2302_v54 = vrot.slane %v2297_v42, %v2301_v1  ;;  %v2310_v48 = vrot.slane %v2297_v42, %v2309_v40  ;;  %v2314_v45 = vrot.slane %v2297_v42, %v2313_v23 }
 0x409   :  { %v2306_v44 = vrot.slane %v2297_v42, %v2305_v27  ;;  %v2490_v42 = vld [vmem:[#allocation16 + $0x518] sm:$0xff] }
 0x40a   :  { %4145 = vmatpush1.bf16.msra.mxu1 %v4144_v7  ;;  %4273 = vmatpush1.bf16.msra.mxu0 %v4272_v4  ;;  %v2455_v4 = vld [vmem:[#allocation16 + $0x400] sm:$0xff] }
 0x40b   :  { %4147 = vmatprep.subr.bf16.mxu1 %v4146_v43  ;;  %4275 = vmatprep.subr.bf16.mxu0 %v4274_v55 }
 0x40e   :  { %4149 = vmatpush1.bf16.msra.mxu1 %v4148_v50  ;;  %4277 = vmatpush1.bf16.msra.mxu0 %v4276_v33  ;;  %v2468_v50 = vld [vmem:[#allocation16 + $0x468] sm:$0xff]  ;;  %v2466_v33 = vld [vmem:[#allocation16 + $0x458] sm:$0xff] }
 0x40f   :  { %4151 = vmatprep.subr.bf16.mxu1 %v4150_v12  ;;  %4279 = vmatprep.subr.bf16.mxu0 %v4278_v38  ;;  %v4164_v12 = vpack.c.bf16 %v2459_v29, %v2455_v4  ;;  %v4292_v38 = vpack.c.bf16 %v2461_v60, %v2457_v56  ;;  %v2500_v29 = vld [vmem:[#allocation16 + $0x568] sm:$0xff]  ;;  %v2498_v56 = vld [vmem:[#allocation16 + $0x558] sm:$0xff] }
 0x410   :  { %v2502_v60 = vld [vmem:[#allocation16 + $0x578] sm:$0xff] }
 0x412   :  { %4153 = vmatpush1.bf16.msra.mxu1 %v4152_v47  ;;  %4281 = vmatpush1.bf16.msra.mxu0 %v4280_v31  ;;  %v4166_v47 = vpack.c.bf16 %v2468_v50, %v2464_v61  ;;  %v4294_v31 = vpack.c.bf16 %v2470_v30, %v2466_v33  ;;  %v2499_v50 = vld [vmem:[#allocation16 + $0x560] sm:$0xff]  ;;  %v4310_v30 = vpack.c.bf16 %v2502_v60, %v2498_v56  ;;  %v2533_v56 = vld [vmem:[#allocation16 + $0x670] sm:$0xff]  ;;  %v2536_v60 = vld [vmem:[#allocation16 + $0x688] sm:$0xff] }
 0x413   :  { %4155 = vmatprep.subr.bf16.mxu1 %v4154_v35  ;;  %4283 = vmatprep.subr.bf16.mxu0 %v4282_v37  ;;  %v2474_v35 = vld [vmem:[#allocation16 + $0x498] sm:$0xff] }
 0x414   :  { %v2478_v37 = vld [vmem:[#allocation16 + $0x4b8] sm:$0xff] }
 0x415   :  { %v4298_v59 = vpack.c.bf16 %v2478_v37, %v2474_v35  ;;  %v2505_v35 = vld [vmem:[#allocation16 + $0x590] sm:$0xff] }
 0x416   :  { %4157 = vmatpush1.bf16.msra.mxu1 %v4156_v57  ;;  %4285 = vmatpush1.bf16.msra.mxu0 %v4284_v36  ;;  %v2471_v57 = vld [vmem:[#allocation16 + $0x480] sm:$0xff]  ;;  %v2509_v37 = vld [vmem:[#allocation16 + $0x5b0] sm:$0xff] }
 0x417   :  { %4159 = vmatprep.subr.bf16.mxu1 %v4158_v34  ;;  %4287 = vmatprep.subr.bf16.mxu0 %v4286_v11  ;;  %v2475_v36 = vld [vmem:[#allocation16 + $0x4a0] sm:$0xff]  ;;  %v2477_v34 = vld [vmem:[#allocation16 + $0x4b0] sm:$0xff]  ;;  %v2486_v11 = vld [vmem:[#allocation16 + $0x4f8] sm:$0xff] }
 0x418   :  { %v4300_v21 = vpack.c.bf16 %v2477_v34, %v2473_v63  ;;  %v4302_v24 = vpack.c.bf16 %v2486_v11, %v2482_v5  ;;  %v2515_v63 = vld [vmem:[#allocation16 + $0x5e0] sm:$0xff]  ;;  %v2517_v5 = vld [vmem:[#allocation16 + $0x5f0] sm:$0xff]  ;;  %v2520_v11 = vld [vmem:[#allocation16 + $0x608] sm:$0xff] }
 0x41a   :  { %4161 = vmatpush1.bf16.msra.mxu1 %v4160_v13  ;;  %4289 = vmatpush1.bf16.msra.mxu0 %v4288_v19  ;;  %v4172_v13 = vpack.c.bf16 %v2475_v36, %v2471_v57  ;;  %v2483_v19 = vld [vmem:[#allocation16 + $0x4e0] sm:$0xff]  ;;  %v2518_v57 = vld [vmem:[#allocation16 + $0x5f8] sm:$0xff] }
 0x41b   :  { %4163 = vmatprep.subr.bf16.mxu1 %v4162_v28  ;;  %4291 = vmatprep.subr.bf16.mxu0 %v4290_v51  ;;  %v2485_v28 = vld [vmem:[#allocation16 + $0x4f0] sm:$0xff]  ;;  %v2492_v51 = vld [vmem:[#allocation16 + $0x528] sm:$0xff] }
 0x4b0   :  { %v2221_v46 = vpop.f32.mrb[32].mxu1  ;;  %v2292_v7 = vpop.f32.mrb[48].mxu0 }
 0x4b1   :  { %v2319_v39 = vadd.f32 %v2302_v54, %v2221_v46  ;;  %v5408_v14 = vadd.f32 %v2310_v48, %v2292_v7  ;;  %v2223_v43 = vpop.f32.mrb[33].mxu1  ;;  %v2294_v55 = vpop.f32.mrb[49].mxu0  ;;  %v2494_v54 = vld [vmem:[#allocation16 + $0x538] sm:$0xff]  ;;  %v4176_v48 = vpack.c.bf16 %v2483_v19, %v2479_v22  ;;  %v2491_v46 = vld [vmem:[#allocation16 + $0x520] sm:$0xff]  ;;  %v4178_v7 = vpack.c.bf16 %v2492_v51, %v2488_v62  ;;  %v2521_v51 = vld [vmem:[#allocation16 + $0x610] sm:$0xff] }
 0x4b2   :  { %v2320_v25 = vadd.f32 %v2306_v44, %v2223_v43  ;;  %v2322_v53 = vadd.f32 %v2314_v45, %v2294_v55  ;;  %v4304_v44 = vpack.c.bf16 %v2485_v28, %v2481_v41  ;;  %v2487_v45 = vld [vmem:[#allocation16 + $0x500] sm:$0xff]  ;;  %v4306_v4 = vpack.c.bf16 %v2494_v54, %v2490_v42  ;;  %v2493_v43 = vld [vmem:[#allocation16 + $0x530] sm:$0xff]  ;;  %v2496_v55 = vld [vmem:[#allocation16 + $0x548] sm:$0xff] }
 0x4b3   :  { %v2323_v0 = vmax.f32 %v2319_v39, 0.0  ;;  %v2489_v39 = vld [vmem:[#allocation16 + $0x510] sm:$0xff]  ;;  %v4182_v33 = vpack.c.bf16 %v2500_v29, %v2496_v55  ;;  %v2526_v22 = vld [vmem:[#allocation16 + $0x638] sm:$0xff]  ;;  %v2523_v41 = vld [vmem:[#allocation16 + $0x620] sm:$0xff] }
 0x4b4   :  { %v2324_v3 = vmax.f32 %v2320_v25, 0.0  ;;  %v2326_v9 = vmax.f32 %v2322_v53, 0.0  ;;  %v4180_v25 = vpack.c.bf16 %v2491_v46, %v2487_v45  ;;  %v4308_v61 = vpack.c.bf16 %v2493_v43, %v2489_v39  ;;  %v2495_v53 = vld [vmem:[#allocation16 + $0x540] sm:$0xff]  ;;  %v2525_v42 = vld [vmem:[#allocation16 + $0x630] sm:$0xff]  ;;  %v2528_v54 = vld [vmem:[#allocation16 + $0x648] sm:$0xff] }
 0x4b5   :  { %v4184_v8 = vpack.c.bf16 %v2499_v50, %v2495_v53  ;;  %v2534_v45 = vld [vmem:[#allocation16 + $0x678] sm:$0xff]  ;;  %v2531_v39 = vld [vmem:[#allocation16 + $0x660] sm:$0xff]  ;;  %v2529_v29 = vld [vmem:[#allocation16 + $0x650] sm:$0xff] }
 0x4b6   :  { %2669 = vmatprep.mubr.f32.mxu1 %v2324_v3  ;;  %2811 = vmatprep.mubr.f32.mxu0 %v2324_v3  ;;  %v2497_v3 = vld [vmem:[#allocation16 + $0x550] sm:$0xff]  ;;  %v2542_v53 = vld [vmem:[#allocation16 + $0x6b8] sm:$0xff] }
 0x4b7   :  { %2670 = vmatmul.mubr.f32.vlgmr.msra.gmra.mrb[34].mxu1 %v2323_v0  ;;  %2812 = vmatmul.mubr.f32.vlgmr.msra.gmra.mrb[50].mxu0 %v2323_v0  ;;  %v2510_v0 = vld [vmem:[#allocation16 + $0x5b8] sm:$0xff] }
 0x4b8   :  { %4165 = vmatpush1.bf16.msra.mxu1 %v4164_v12  ;;  %4293 = vmatpush1.bf16.msra.mxu0 %v4292_v38  ;;  %v2501_v12 = vld [vmem:[#allocation16 + $0x570] sm:$0xff]  ;;  %v2504_v38 = vld [vmem:[#allocation16 + $0x588] sm:$0xff]  ;;  %v4314_v32 = vpack.c.bf16 %v2510_v0, %v2506_v10 }
 0x4b9   :  { %2740 = vmatprep.mubr.f32.mxu1 %v2326_v9  ;;  %2882 = vmatprep.mubr.f32.mxu0 %v2326_v9  ;;  %v4312_v16 = vpack.c.bf16 %v2501_v12, %v2497_v3  ;;  %v2512_v9 = vld [vmem:[#allocation16 + $0x5c8] sm:$0xff]  ;;  %v2539_v3 = vld [vmem:[#allocation16 + $0x6a0] sm:$0xff]  ;;  %v2541_v10 = vld [vmem:[#allocation16 + $0x6b0] sm:$0xff] }
 0x4ba   :  { %4167 = vmatprep.subr.bf16.mxu1 %v4166_v47  ;;  %4295 = vmatprep.subr.bf16.mxu0 %v4294_v31  ;;  %v2507_v47 = vld [vmem:[#allocation16 + $0x5a0] sm:$0xff]  ;;  %v4186_v31 = vpack.c.bf16 %v2508_v15, %v2504_v38  ;;  %v2537_v15 = vld [vmem:[#allocation16 + $0x690] sm:$0xff]  ;;  %v2544_v0 = vld [vmem:[#allocation16 + $0x6c8] sm:$0xff] }
 0x4bb   :  { %v4188_v36 = vpack.c.bf16 %v2507_v47, %v2503_v49  ;;  %v2550_v49 = vld [vmem:[#allocation16 + $0x6f8] sm:$0xff] }
 0x4bc   :  { %4169 = vmatpush1.bf16.msra.mxu1 %v4168_v17  ;;  %4297 = vmatpush1.bf16.msra.mxu0 %v4296_v2  ;;  %v2516_v17 = vld [vmem:[#allocation16 + $0x5e8] sm:$0xff]  ;;  %v2514_v2 = vld [vmem:[#allocation16 + $0x5d8] sm:$0xff] }
 0x4bd   :  { %4171 = vmatprep.subr.bf16.mxu1 %v4170_v52  ;;  %4299 = vmatprep.subr.bf16.mxu0 %v4298_v59  ;;  %v4316_v52 = vpack.c.bf16 %v2509_v37, %v2505_v35  ;;  %v2511_v59 = vld [vmem:[#allocation16 + $0x5c0] sm:$0xff]  ;;  %v4190_v34 = vpack.c.bf16 %v2516_v17, %v2512_v9  ;;  %v4318_v18 = vpack.c.bf16 %v2518_v57, %v2514_v2  ;;  %v2545_v17 = vld [vmem:[#allocation16 + $0x6d0] sm:$0xff]  ;;  %v2552_v57 = vld [vmem:[#allocation16 + $0x708] sm:$0xff] }
 0x4be   :  { %v4192_v19 = vpack.c.bf16 %v2515_v63, %v2511_v59  ;;  %v2547_v35 = vld [vmem:[#allocation16 + $0x6e0] sm:$0xff]  ;;  %v2549_v2 = vld [vmem:[#allocation16 + $0x6f0] sm:$0xff]  ;;  %v2558_v59 = vld [vmem:[#allocation16 + $0x738] sm:$0xff] }
 0x4c0   :  { %4173 = vmatpush1.bf16.msra.mxu1 %v4172_v13  ;;  %4301 = vmatpush1.bf16.msra.mxu0 %v4300_v21  ;;  %v2524_v13 = vld [vmem:[#allocation16 + $0x628] sm:$0xff]  ;;  %v2522_v21 = vld [vmem:[#allocation16 + $0x618] sm:$0xff] }
 0x4c1   :  { %4175 = vmatprep.subr.bf16.mxu1 %v4174_v6  ;;  %4303 = vmatprep.subr.bf16.mxu0 %v4302_v24  ;;  %v4320_v6 = vpack.c.bf16 %v2517_v5, %v2513_v58  ;;  %v2519_v24 = vld [vmem:[#allocation16 + $0x600] sm:$0xff]  ;;  %v4194_v28 = vpack.c.bf16 %v2524_v13, %v2520_v11  ;;  %v4322_v62 = vpack.c.bf16 %v2526_v22, %v2522_v21  ;;  %v2553_v13 = vld [vmem:[#allocation16 + $0x710] sm:$0xff]  ;;  %v2560_v22 = vld [vmem:[#allocation16 + $0x748] sm:$0xff] }
 0x4c2   :  { %v4196_v46 = vpack.c.bf16 %v2523_v41, %v2519_v24  ;;  %v2555_v58 = vld [vmem:[#allocation16 + $0x720] sm:$0xff]  ;;  %v2557_v21 = vld [vmem:[#allocation16 + $0x730] sm:$0xff]  ;;  %v2566_v24 = vld [vmem:[#allocation16 + $0x778] sm:$0xff] }
 0x4c4   :  { %4177 = vmatpush1.bf16.msra.mxu1 %v4176_v48  ;;  %4305 = vmatpush1.bf16.msra.mxu0 %v4304_v44  ;;  %v2532_v48 = vld [vmem:[#allocation16 + $0x668] sm:$0xff]  ;;  %v2530_v44 = vld [vmem:[#allocation16 + $0x658] sm:$0xff] }
 0x4c5   :  { %4179 = vmatprep.subr.bf16.mxu1 %v4178_v7  ;;  %4307 = vmatprep.subr.bf16.mxu0 %v4306_v4  ;;  %v4324_v7 = vpack.c.bf16 %v2525_v42, %v2521_v51  ;;  %v2527_v4 = vld [vmem:[#allocation16 + $0x640] sm:$0xff]  ;;  %v4198_v43 = vpack.c.bf16 %v2532_v48, %v2528_v54  ;;  %v4326_v55 = vpack.c.bf16 %v2534_v45, %v2530_v44  ;;  %v2561_v48 = vld [vmem:[#allocation16 + $0x750] sm:$0xff]  ;;  %v2568_v45 = vld [vmem:[#allocation16 + $0x788] sm:$0xff] }
 0x4c6   :  { %v4200_v50 = vpack.c.bf16 %v2531_v39, %v2527_v4  ;;  %v2563_v51 = vld [vmem:[#allocation16 + $0x760] sm:$0xff]  ;;  %v2565_v44 = vld [vmem:[#allocation16 + $0x770] sm:$0xff]  ;;  %v2574_v4 = vld [vmem:[#allocation16 + $0x7b8] sm:$0xff] }
 0x4c8   :  { %4181 = vmatpush1.bf16.msra.mxu1 %v4180_v25  ;;  %4309 = vmatpush1.bf16.msra.mxu0 %v4308_v61  ;;  %v2540_v25 = vld [vmem:[#allocation16 + $0x6a8] sm:$0xff]  ;;  %v2538_v61 = vld [vmem:[#allocation16 + $0x698] sm:$0xff] }
 0x4c9   :  { %4183 = vmatprep.subr.bf16.mxu1 %v4182_v33  ;;  %4311 = vmatprep.subr.bf16.mxu0 %v4310_v30  ;;  %v4328_v33 = vpack.c.bf16 %v2533_v56, %v2529_v29  ;;  %v2535_v30 = vld [vmem:[#allocation16 + $0x680] sm:$0xff]  ;;  %v4202_v12 = vpack.c.bf16 %v2540_v25, %v2536_v60  ;;  %v4330_v38 = vpack.c.bf16 %v2542_v53, %v2538_v61  ;;  %v2569_v25 = vld [vmem:[#allocation16 + $0x790] sm:$0xff]  ;;  %v2576_v53 = vld [vmem:[#allocation16 + $0x7c8] sm:$0xff] }
 0x4ca   :  { %v4204_v47 = vpack.c.bf16 %v2539_v3, %v2535_v30  ;;  %v2571_v29 = vld [vmem:[#allocation16 + $0x7a0] sm:$0xff]  ;;  %v2573_v61 = vld [vmem:[#allocation16 + $0x7b0] sm:$0xff]  ;;  %v2582_v30 = vld [vmem:[#allocation16 + $0x7f8] sm:$0xff] }
 0x4cc   :  { %4185 = vmatpush1.bf16.msra.mxu1 %v4184_v8  ;;  %4313 = vmatpush1.bf16.msra.mxu0 %v4312_v16  ;;  %v2548_v8 = vld [vmem:[#allocation16 + $0x6e8] sm:$0xff]  ;;  %v2546_v16 = vld [vmem:[#allocation16 + $0x6d8] sm:$0xff] }
 0x4cd   :  { %4187 = vmatprep.subr.bf16.mxu1 %v4186_v31  ;;  %4315 = vmatprep.subr.bf16.mxu0 %v4314_v32  ;;  %v4332_v31 = vpack.c.bf16 %v2541_v10, %v2537_v15  ;;  %v2543_v32 = vld [vmem:[#allocation16 + $0x6c0] sm:$0xff]  ;;  %v4206_v37 = vpack.c.bf16 %v2548_v8, %v2544_v0  ;;  %v4334_v9 = vpack.c.bf16 %v2550_v49, %v2546_v16  ;;  %v2577_v8 = vld [vmem:[#allocation16 + $0x7d0] sm:$0xff] }
 0x4ce   :  { %v4208_v63 = vpack.c.bf16 %v2547_v35, %v2543_v32  ;;  %v2579_v15 = vld [vmem:[#allocation16 + $0x7e0] sm:$0xff]  ;;  %v2581_v16 = vld [vmem:[#allocation16 + $0x7f0] sm:$0xff]  ;;  %v2942_v32 = vld [vmem:[#allocation17 + $0x188] sm:$0xff] }
 0x4cf   :  { %v2909_v49 = vld [vmem:[#allocation17 + $0x80] sm:$0xff] }
 0x4d0   :  { %4189 = vmatpush1.bf16.msra.mxu1 %v4188_v36  ;;  %4317 = vmatpush1.bf16.msra.mxu0 %v4316_v52  ;;  %v2556_v36 = vld [vmem:[#allocation16 + $0x728] sm:$0xff]  ;;  %v2554_v52 = vld [vmem:[#allocation16 + $0x718] sm:$0xff] }
 0x4d1   :  { %4191 = vmatprep.subr.bf16.mxu1 %v4190_v34  ;;  %4319 = vmatprep.subr.bf16.mxu0 %v4318_v18  ;;  %v4336_v34 = vpack.c.bf16 %v2549_v2, %v2545_v17  ;;  %v2551_v18 = vld [vmem:[#allocation16 + $0x700] sm:$0xff]  ;;  %v4210_v5 = vpack.c.bf16 %v2556_v36, %v2552_v57  ;;  %v4338_v11 = vpack.c.bf16 %v2558_v59, %v2554_v52  ;;  %v2894_v17 = vld [vmem:[#allocation17 + $0x8] sm:$0xff]  ;;  %v2911_v59 = vld [vmem:[#allocation17 + $0x90] sm:$0xff] }
 0x4d2   :  { %v4212_v41 = vpack.c.bf16 %v2555_v58, %v2551_v18  ;;  %v2925_v36 = vld [vmem:[#allocation17 + $0x100] sm:$0xff]  ;;  %v2926_v52 = vld [vmem:[#allocation17 + $0x108] sm:$0xff]  ;;  %v2944_v18 = vld [vmem:[#allocation17 + $0x198] sm:$0xff] }
 0x4d4   :  { %4193 = vmatpush1.bf16.msra.mxu1 %v4192_v19  ;;  %4321 = vmatpush1.bf16.msra.mxu0 %v4320_v6  ;;  %v2564_v19 = vld [vmem:[#allocation16 + $0x768] sm:$0xff]  ;;  %v2562_v6 = vld [vmem:[#allocation16 + $0x758] sm:$0xff] }
 0x4d5   :  { %4195 = vmatprep.subr.bf16.mxu1 %v4194_v28  ;;  %4323 = vmatprep.subr.bf16.mxu0 %v4322_v62  ;;  %v4340_v28 = vpack.c.bf16 %v2557_v21, %v2553_v13  ;;  %v2559_v62 = vld [vmem:[#allocation16 + $0x740] sm:$0xff]  ;;  %v4214_v42 = vpack.c.bf16 %v2564_v19, %v2560_v22  ;;  %v4342_v54 = vpack.c.bf16 %v2566_v24, %v2562_v6  ;;  %v2896_v13 = vld [vmem:[#allocation17 + $0x18] sm:$0xff]  ;;  %v2325_v21 = vmax.f32 %v5408_v14, 0.0  ;;  %v2927_v6 = vld [vmem:[#allocation17 + $0x110] sm:$0xff] }
 0x4d6   :  { %v4216_v39 = vpack.c.bf16 %v2563_v51, %v2559_v62  ;;  %v2928_v24 = vld [vmem:[#allocation17 + $0x118] sm:$0xff]  ;;  %v2945_v62 = vld [vmem:[#allocation17 + $0x1a0] sm:$0xff]  ;;  %v2946_v51 = vld [vmem:[#allocation17 + $0x1a8] sm:$0xff] }
 0x4d8   :  { %4197 = vmatpush1.bf16.msra.mxu1 %v4196_v46  ;;  %4325 = vmatpush1.bf16.msra.mxu0 %v4324_v7  ;;  %v2572_v46 = vld [vmem:[#allocation16 + $0x7a8] sm:$0xff]  ;;  %v2570_v7 = vld [vmem:[#allocation16 + $0x798] sm:$0xff] }
 0x4d9   :  { %4199 = vmatprep.subr.bf16.mxu1 %v4198_v43  ;;  %4327 = vmatprep.subr.bf16.mxu0 %v4326_v55  ;;  %v4344_v43 = vpack.c.bf16 %v2565_v44, %v2561_v48  ;;  %v2567_v55 = vld [vmem:[#allocation16 + $0x780] sm:$0xff]  ;;  %v4218_v56 = vpack.c.bf16 %v2572_v46, %v2568_v45  ;;  %v4346_v60 = vpack.c.bf16 %v2574_v4, %v2570_v7  ;;  %v2898_v44 = vld [vmem:[#allocation17 + $0x28] sm:$0xff]  ;;  %v2915_v4 = vld [vmem:[#allocation17 + $0xb0] sm:$0xff] }
 0x4da   :  { %v4220_v3 = vpack.c.bf16 %v2571_v29, %v2567_v55  ;;  %v2897_v48 = vld [vmem:[#allocation17 + $0x20] sm:$0xff]  ;;  %v4394_v45 = vpack.c.bf16 %v2946_v51, %v2945_v62  ;;  %v2930_v7 = vld [vmem:[#allocation17 + $0x128] sm:$0xff]  ;;  %v2948_v55 = vld [vmem:[#allocation17 + $0x1b8] sm:$0xff] }
 0x4db   :  { %v2929_v46 = vld [vmem:[#allocation17 + $0x120] sm:$0xff]  ;;  %v4364_v29 = vpack.c.bf16 %v2898_v44, %v2897_v48  ;;  %v2938_v62 = vld [vmem:[#allocation17 + $0x168] sm:$0xff]  ;;  %v2955_v48 = vld [vmem:[#allocation17 + $0x1f0] sm:$0xff] }
 0x4dc   :  { %4201 = vmatpush1.bf16.msra.mxu1 %v4200_v50  ;;  %4329 = vmatpush1.bf16.msra.mxu0 %v4328_v33  ;;  %v2580_v50 = vld [vmem:[#allocation16 + $0x7e8] sm:$0xff]  ;;  %v2578_v33 = vld [vmem:[#allocation16 + $0x7d8] sm:$0xff] }
 0x4dd   :  { %4203 = vmatprep.subr.bf16.mxu1 %v4202_v12  ;;  %4331 = vmatprep.subr.bf16.mxu0 %v4330_v38  ;;  %v4348_v12 = vpack.c.bf16 %v2573_v61, %v2569_v25  ;;  %v2575_v38 = vld [vmem:[#allocation16 + $0x7c0] sm:$0xff]  ;;  %v4222_v10 = vpack.c.bf16 %v2580_v50, %v2576_v53  ;;  %v4350_v0 = vpack.c.bf16 %v2582_v30, %v2578_v33  ;;  %v2900_v25 = vld [vmem:[#allocation17 + $0x38] sm:$0xff]  ;;  %v2931_v50 = vld [vmem:[#allocation17 + $0x130] sm:$0xff] }
 0x4de   :  { %v4224_v35 = vpack.c.bf16 %v2579_v15, %v2575_v38  ;;  %v2932_v33 = vld [vmem:[#allocation17 + $0x138] sm:$0xff]  ;;  %v2917_v30 = vld [vmem:[#allocation17 + $0xc0] sm:$0xff]  ;;  %v2950_v38 = vld [vmem:[#allocation17 + $0x1c8] sm:$0xff] }
 0x4e0   :  { %4205 = vmatpush1.bf16.msra.mxu1 %v4204_v47  ;;  %4333 = vmatpush1.bf16.msra.mxu0 %v4332_v31  ;;  %v2910_v47 = vld [vmem:[#allocation17 + $0x88] sm:$0xff]  ;;  %v2941_v31 = vld [vmem:[#allocation17 + $0x180] sm:$0xff] }
 0x4e1   :  { %4207 = vmatprep.subr.bf16.mxu1 %v4206_v37  ;;  %4335 = vmatprep.subr.bf16.mxu0 %v4334_v9  ;;  %v4352_v37 = vpack.c.bf16 %v2581_v16, %v2577_v8  ;;  %v2893_v9 = vld [vmem:[#allocation17] sm:$0xff]  ;;  %v4354_v2 = vpack.c.bf16 %v2910_v47, %v2909_v49  ;;  %v4386_v57 = vpack.c.bf16 %v2942_v32, %v2941_v31  ;;  %v2902_v8 = vld [vmem:[#allocation17 + $0x48] sm:$0xff]  ;;  %v2919_v32 = vld [vmem:[#allocation17 + $0xd0] sm:$0xff] }
 0x4e2   :  { %v4356_v58 = vpack.c.bf16 %v2894_v17, %v2893_v9  ;;  %v2933_v47 = vld [vmem:[#allocation17 + $0x140] sm:$0xff]  ;;  %v2934_v31 = vld [vmem:[#allocation17 + $0x148] sm:$0xff]  ;;  %v2952_v9 = vld [vmem:[#allocation17 + $0x1d8] sm:$0xff] }
 0x4e4   :  { %4209 = vmatpush1.bf16.msra.mxu1 %v4208_v63  ;;  %4337 = vmatpush1.bf16.msra.mxu0 %v4336_v34  ;;  %v2912_v63 = vld [vmem:[#allocation17 + $0x98] sm:$0xff]  ;;  %v2943_v34 = vld [vmem:[#allocation17 + $0x190] sm:$0xff] }
 0x4e5   :  { %4211 = vmatprep.subr.bf16.mxu1 %v4210_v5  ;;  %4339 = vmatprep.subr.bf16.mxu0 %v4338_v11  ;;  %v4388_v5 = vpack.c.bf16 %v2926_v52, %v2925_v36  ;;  %v2895_v11 = vld [vmem:[#allocation17 + $0x10] sm:$0xff]  ;;  %v4358_v22 = vpack.c.bf16 %v2912_v63, %v2911_v59  ;;  %v4390_v19 = vpack.c.bf16 %v2944_v18, %v2943_v34  ;;  %v2904_v36 = vld [vmem:[#allocation17 + $0x58] sm:$0xff]  ;;  %v2921_v18 = vld [vmem:[#allocation17 + $0xe0] sm:$0xff] }
 0x4e6   :  { %v2935_v63 = vld [vmem:[#allocation17 + $0x150] sm:$0xff]  ;;  %v2936_v34 = vld [vmem:[#allocation17 + $0x158] sm:$0xff] }
 0x4e8   :  { %4213 = vmatpush1.bf16.msra.mxu1 %v4212_v41  ;;  %4341 = vmatpush1.bf16.msra.mxu0 %v4340_v28  ;;  %v2913_v41 = vld [vmem:[#allocation17 + $0xa0] sm:$0xff]  ;;  %v2914_v28 = vld [vmem:[#allocation17 + $0xa8] sm:$0xff] }
 0x4e9   :  { %4215 = vmatprep.subr.bf16.mxu1 %v4214_v42  ;;  %4343 = vmatprep.subr.bf16.mxu0 %v4342_v54  ;;  %v4360_v42 = vpack.c.bf16 %v2896_v13, %v2895_v11  ;;  %v4392_v54 = vpack.c.bf16 %v2928_v24, %v2927_v6  ;;  %v4362_v14 = vpack.c.bf16 %v2914_v28, %v2913_v41  ;;  %v2954_v11 = vld [vmem:[#allocation17 + $0x1e8] sm:$0xff]  ;;  %v2905_v6 = vld [vmem:[#allocation17 + $0x60] sm:$0xff] }
 0x4ea   :  { %v2906_v24 = vld [vmem:[#allocation17 + $0x68] sm:$0xff]  ;;  %v2937_v41 = vld [vmem:[#allocation17 + $0x160] sm:$0xff] }
 0x4eb   :  { %v4380_v28 = vpack.c.bf16 %v2906_v24, %v2905_v6  ;;  %v4412_v51 = vpack.c.bf16 %v2938_v62, %v2937_v41 }
 0x4ec   :  { %4217 = vmatpush1.bf16.msra.mxu1 %v4216_v39  ;;  %4345 = vmatpush1.bf16.msra.mxu0 %v4344_v43  ;;  %v2916_v39 = vld [vmem:[#allocation17 + $0xb8] sm:$0xff]  ;;  %v2947_v43 = vld [vmem:[#allocation17 + $0x1b0] sm:$0xff] }
 0x4ed   :  { %4219 = vmatprep.subr.bf16.mxu1 %v4218_v56  ;;  %4347 = vmatprep.subr.bf16.mxu0 %v4346_v60  ;;  %v4396_v56 = vpack.c.bf16 %v2930_v7, %v2929_v46  ;;  %v2899_v60 = vld [vmem:[#allocation17 + $0x30] sm:$0xff]  ;;  %v4366_v61 = vpack.c.bf16 %v2916_v39, %v2915_v4  ;;  %v4398_v53 = vpack.c.bf16 %v2948_v55, %v2947_v43  ;;  %v2908_v46 = vld [vmem:[#allocation17 + $0x78] sm:$0xff] }
 0x4ee   :  { %v4368_v15 = vpack.c.bf16 %v2900_v25, %v2899_v60  ;;  %v2939_v39 = vld [vmem:[#allocation17 + $0x170] sm:$0xff]  ;;  %v2940_v43 = vld [vmem:[#allocation17 + $0x178] sm:$0xff] }
 0x4ef   :  { %v4416_v55 = vpack.c.bf16 %v2940_v43, %v2939_v39 }
 0x4f0   :  { %4221 = vmatpush1.bf16.msra.mxu1 %v4220_v3  ;;  %4349 = vmatpush1.bf16.msra.mxu0 %v4348_v12  ;;  %v2918_v3 = vld [vmem:[#allocation17 + $0xc8] sm:$0xff]  ;;  %v2949_v12 = vld [vmem:[#allocation17 + $0x1c0] sm:$0xff] }
 0x4f1   :  { %4223 = vmatprep.subr.bf16.mxu1 %v4222_v10  ;;  %4351 = vmatprep.subr.bf16.mxu0 %v4350_v0  ;;  %v4400_v10 = vpack.c.bf16 %v2932_v33, %v2931_v50  ;;  %v2901_v0 = vld [vmem:[#allocation17 + $0x40] sm:$0xff]  ;;  %v4370_v16 = vpack.c.bf16 %v2918_v3, %v2917_v30  ;;  %v4402_v49 = vpack.c.bf16 %v2950_v38, %v2949_v12 }
 0x4f2   :  { %v4372_v17 = vpack.c.bf16 %v2902_v8, %v2901_v0 }
 0x4f4   :  { %4225 = vmatpush1.bf16.msra.mxu1 %v4224_v35  ;;  %4353 = vmatpush1.bf16.msra.mxu0 %v4352_v37  ;;  %v2920_v35 = vld [vmem:[#allocation17 + $0xd8] sm:$0xff]  ;;  %v2951_v37 = vld [vmem:[#allocation17 + $0x1d0] sm:$0xff] }
 0x4f5   :  { %4355 = vmatprep.subr.bf16.mxu1 %v4354_v2  ;;  %4387 = vmatprep.subr.bf16.mxu0 %v4386_v57  ;;  %v4404_v2 = vpack.c.bf16 %v2934_v31, %v2933_v47  ;;  %v2903_v57 = vld [vmem:[#allocation17 + $0x50] sm:$0xff]  ;;  %v4374_v52 = vpack.c.bf16 %v2920_v35, %v2919_v32  ;;  %v4406_v59 = vpack.c.bf16 %v2952_v9, %v2951_v37  ;;  %v3110_v32 = vld [vmem:[#allocation19 + $0x28] sm:$0xff]  ;;  %v3112_v9 = vld [vmem:[#allocation19 + $0x38] sm:$0xff] }
 0x4f6   :  { %v4376_v13 = vpack.c.bf16 %v2904_v36, %v2903_v57  ;;  %v3107_v31 = vld [vmem:[#allocation19 + $0x10] sm:$0xff]  ;;  %v3114_v57 = vld [vmem:[#allocation19 + $0x48] sm:$0xff] }
 0x4f7   :  { %2741 = vmatmul.mubr.f32.vlgmr.msra.gmra.mrb[34].mxu1 %v2325_v21  ;;  %2883 = vmatmul.mubr.f32.vlgmr.msra.gmra.mrb[50].mxu0 %v2325_v21  ;;  %v4408_v21 = vpack.c.bf16 %v2936_v34, %v2935_v63  ;;  %v3111_v37 = vld [vmem:[#allocation19 + $0x30] sm:$0xff]  ;;  %v3117_v63 = vld [vmem:[#allocation19 + $0x60] sm:$0xff]  ;;  %v3118_v34 = vld [vmem:[#allocation19 + $0x68] sm:$0xff] }
 0x4f8   :  { %4357 = vmatpush3.bf16.msra.mxu1 %v4356_v58  ;;  %4389 = vmatpush3.bf16.msra.mxu0 %v4388_v5  ;;  %v2922_v58 = vld [vmem:[#allocation17 + $0xe8] sm:$0xff]  ;;  %v2953_v5 = vld [vmem:[#allocation17 + $0x1e0] sm:$0xff] }
 0x4f9   :  { %4359 = vmatprep.subr.bf16.mxu1 %v4358_v22  ;;  %4391 = vmatprep.subr.bf16.mxu0 %v4390_v19  ;;  %v4378_v22 = vpack.c.bf16 %v2922_v58, %v2921_v18  ;;  %v4410_v19 = vpack.c.bf16 %v2954_v11, %v2953_v5  ;;  %v4437_v18 = vpack.c.bf16 %v3118_v34, %v3117_v63  ;;  %v3119_v58 = vld [vmem:[#allocation19 + $0x70] sm:$0xff]  ;;  %v3120_v5 = vld [vmem:[#allocation19 + $0x78] sm:$0xff] }
 0x4fa   :  { %v4440_v11 = vpack.c.bf16 %v3120_v5, %v3119_v58 }
 0x4fc   :  { %4361 = vmatpush3.bf16.msra.mxu1 %v4360_v42  ;;  %4393 = vmatpush3.bf16.msra.mxu0 %v4392_v54  ;;  %v2923_v42 = vld [vmem:[#allocation17 + $0xf0] sm:$0xff]  ;;  %v2924_v54 = vld [vmem:[#allocation17 + $0xf8] sm:$0xff] }
 0x4fd   :  { %4363 = vmatprep.subr.bf16.mxu1 %v4362_v14  ;;  %4395 = vmatprep.subr.bf16.mxu0 %v4394_v45  ;;  %v4382_v44 = vpack.c.bf16 %v2924_v54, %v2923_v42  ;;  %v2956_v14 = vld [vmem:[#allocation17 + $0x1f8] sm:$0xff]  ;;  %v2907_v45 = vld [vmem:[#allocation17 + $0x70] sm:$0xff]  ;;  %v3231_v42 = vld [vmem:[%s5459_s17] ss:$0 sm:$0xff] }
 0x4fe   :  { %v4414_v7 = vpack.c.bf16 %v2956_v14, %v2955_v48  ;;  %v4384_v4 = vpack.c.bf16 %v2908_v46, %v2907_v45 }
 0x500   :  { %4365 = vmatpush3.bf16.msra.mxu1 %v4364_v29  ;;  %4397 = vmatpush3.bf16.msra.mxu0 %v4396_v56  ;;  %v4768_v29 = vmov 0.0|0.0   ;;  %v2583_v56 = vld [vmem:[%s5455_s13] sm:$0xf] }
 0x501   :  { %4367 = vmatprep.subr.bf16.mxu1 %v4366_v61  ;;  %4399 = vmatprep.subr.bf16.mxu0 %v4398_v53  ;;  %v2588_v60 = vrot.slane %v2583_v56, %v2301_v1  ;;  %v2596_v25 = vrot.slane %v2583_v56, %v2309_v40  ;;  %v2592_v61 = vrot.slane %v2583_v56, %v2305_v27  ;;  %v3108_v27 = vld [vmem:[#allocation19 + $0x18] sm:$0xff] }
 0x502   :  { %v2600_v53 = vrot.slane %v2583_v56, %v2313_v23  ;;  %v4422_v26 = vpack.c.bf16 %v3108_v27, %v3107_v31  ;;  %v3109_v23 = vld [vmem:[#allocation19 + $0x20] sm:$0xff] }
 0x503   :  { %v4425_v35 = vpack.c.bf16 %v3110_v32, %v3109_v23 }
 0x504   :  { %4369 = vmatpush3.bf16.msra.mxu1 %v4368_v15  ;;  %4401 = vmatpush3.bf16.msra.mxu0 %v4400_v10  ;;  %v3105_v15 = vld [vmem:[#allocation19] sm:$0xff]  ;;  %v3106_v10 = vld [vmem:[#allocation19 + $0x8] sm:$0xff] }
 0x505   :  { %4371 = vmatprep.subr.bf16.mxu1 %v4370_v16  ;;  %4403 = vmatprep.subr.bf16.mxu0 %v4402_v49  ;;  %v4419_v49 = vpack.c.bf16 %v3106_v10, %v3105_v15 }
 0x508   :  { %4373 = vmatpush3.bf16.msra.mxu1 %v4372_v17  ;;  %4405 = vmatpush3.bf16.msra.mxu0 %v4404_v2  ;;  %v4428_v17 = vpack.c.bf16 %v3112_v9, %v3111_v37  ;;  %v3113_v2 = vld [vmem:[#allocation19 + $0x40] sm:$0xff] }
 0x509   :  { %4375 = vmatprep.subr.bf16.mxu1 %v4374_v52  ;;  %4407 = vmatprep.subr.bf16.mxu0 %v4406_v59  ;;  %v4431_v36 = vpack.c.bf16 %v3114_v57, %v3113_v2  ;;  %v3115_v52 = vld [vmem:[#allocation19 + $0x50] sm:$0xff]  ;;  %v3116_v59 = vld [vmem:[#allocation19 + $0x58] sm:$0xff] }
 0x50c   :  { %4377 = vmatpush3.bf16.msra.mxu1 %v4376_v13  ;;  %4409 = vmatpush3.bf16.msra.mxu0 %v4408_v21 }
 0x50d   :  { %4379 = vmatprep.subr.bf16.mxu1 %v4378_v22  ;;  %4411 = vmatprep.subr.bf16.mxu0 %v4410_v19  ;;  %v3230_v22 = vld [vmem:[%s5457_s15] ss:$0 sm:$0xff]  ;;  %s4715_s15 = scalar_lea.vmem %s3206_s9, 128 }
 0x50e   :  { %p4716_p4 = scmp.ne.s32.totalorder %s3206_s9, %s4715_s15  ;;  %p4721_p6 = scmp.lt.s32.totalorder %s4715_s15, %s4715_s15 }
 0x510   :  { %4381 = vmatpush3.bf16.msra.mxu1 %v4380_v28  ;;  %4413 = vmatpush3.bf16.msra.mxu0 %v4412_v51  ;;  %p4722_p7 = por %p4721_p6, %p4720_p5 }
 0x511   :  { %4383 = vmatprep.subr.bf16.mxu1 %v4382_v44  ;;  %4415 = vmatprep.subr.bf16.mxu0 %v4414_v7 }
 0x512   :  { %p4723_p8 = pnand %p4722_p7, %p4716_p4 }
 0x514   :  { %4385 = vmatpush3.bf16.msra.mxu1 %v4384_v4  ;;  %4417 = vmatpush3.bf16.msra.mxu0 %v4416_v55 }
 0x515   :  { %4418 = vmatprep.subr.bf16.mxu1 %v4768_v29 }
 0x5ca   :  { %v2742_v50 = vpop.f32.mrb[34].mxu1  ;;  %v2884_v33 = vpop.f32.mrb[50].mxu0 }
 0x5cb   :  { %v4442_v30 = vadd.f32 %v2742_v50, %v2588_v60  ;;  %v4444_v3 = vadd.f32 %v2884_v33, %v2596_v25  ;;  %v2744_v12 = vpop.f32.mrb[35].mxu1  ;;  %v2886_v38 = vpop.f32.mrb[51].mxu0 }
 0x5cc   :  { %v4443_v0 = vadd.f32 %v2744_v12, %v2592_v61  ;;  %v4445_v8 = vadd.f32 %v2886_v38, %v2600_v53 }
 0x5cd   :  { %v2889_v40 = vmax.f32 %v4442_v30, 0.0  ;;  %v2891_v47 = vmax.f32 %v4444_v3, 0.0 }
 0x5ce   :  { %v2890_v1 = vmax.f32 %v4443_v0, 0.0  ;;  %v2892_v16 = vmax.f32 %v4445_v8, 0.0 }
 0x5d0   :  { %3028 = vmatprep.mubr.f32.mxu1 %v2890_v1  ;;  %3098 = vmatprep.mubr.f32.mxu0 %v2892_v16 }
 0x5d1   :  { %3029 = vmatmul.mubr.f32.vlgmr.msra.gmra.mrb[36].mxu1 %v2889_v40  ;;  %3099 = vmatmul.mubr.f32.vlgmr.msra.gmra.mrb[52].mxu0 %v2891_v47 }
 0x5d2   :  { %4420 = vmatpush3.bf16.msra.mxu1 %v4419_v49  ;;  %3807 = vmatprep.mubr.msk.f32.mxu1 %vm4767_vm0, %v5481_v20  ;;  %v4434_v20 = vpack.c.bf16 %v3116_v59, %v3115_v52 }
 0x5d3   :  { %4421 = vmatprep.subr.bf16.mxu1 %v4768_v29 }
 0x5d6   :  { %4423 = vmatpush3.bf16.msra.mxu1 %v4422_v26 }
 0x5d7   :  { %4424 = vmatprep.subr.bf16.mxu1 %v4768_v29 }
 0x5da   :  { %4426 = vmatpush3.bf16.msra.mxu1 %v4425_v35 }
 0x5db   :  { %4427 = vmatprep.subr.bf16.mxu1 %v4768_v29 }
 0x5de   :  { %4429 = vmatpush3.bf16.msra.mxu1 %v4428_v17 }
 0x5df   :  { %4430 = vmatprep.subr.bf16.mxu1 %v4768_v29 }
 0x5e2   :  { %4432 = vmatpush3.bf16.msra.mxu1 %v4431_v36 }
 0x5e3   :  { %4433 = vmatprep.subr.bf16.mxu1 %v4768_v29 }
 0x5e6   :  { %4435 = vmatpush3.bf16.msra.mxu1 %v4434_v20 }
 0x5e7   :  { %4436 = vmatprep.subr.bf16.mxu1 %v4768_v29 }
 0x5ea   :  { %4438 = vmatpush3.bf16.msra.mxu1 %v4437_v18 }
 0x5eb   :  { %4439 = vmatprep.subr.bf16.mxu1 %v4768_v29 }
 0x5ee   :  { %4441 = vmatpush3.bf16.msra.mxu1 %v4440_v11 }
 0x6a4   :  { %v3424_v13 = vpop.f32.mrb[36].mxu1  ;;  %v3459_v21 = vpop.f32.mrb[52].mxu0 }
 0x6a5   :  { %v3425_v19 = vpop.f32.mrb[37].mxu1  ;;  %v3460_v6 = vpop.f32.mrb[53].mxu0 }
 0x6a6   :  { %v3426_v24 = vadd.f32 %v3425_v19, %v3424_v13  ;;  %v3461_v41 = vadd.f32 %v3460_v6, %v3459_v21 }
 0x6a8   :  { %v3031_v28 = vadd.f32 %v3426_v24, %v3230_v22 }
 0x6aa   :  { %v3101_v62 = vadd.f32 %v3461_v41, %v3031_v28 }
 0x6ac   :  { %v3104_v51 = vmax.f32 %v3101_v62, 0.0 }
 0x6ae   :  { %3808 = vmatmul.mubr.f32.vlgmr.msra.gmra.mrb[38].mxu1 %v3104_v51 }
 0x781   :  { %v3194_v54 = vpop.f32.mrb[38].mxu1 }
 0x782   :  { %v3195_v48 = vadd.f32 %v3231_v42, %v3194_v54  ;;  %v3809_v44 = vpop.f32.mrb[39].mxu1 }
 0x784   :  { %3198 = vst [vmem:[#allocation20] sm:$0xff] %v3195_v48 }
 0x785   :  { %4726 = shalt.err (!%p4723_p8)
}
 0x786   :  { %s4727_s19 = scalar_lea.hbm %s5460_s18, 128 }
 0x787   :  { %p4728_p9 = scmp.ne.s32.totalorder %s5460_s18, %s4727_s19  ;;  %p4731_p10 = scmp.lt.u32.totalorder %s4727_s19, %s5460_s18 }
 0x789   :  { %p4733_p11 = pnand %p4731_p10, %p4728_p9 }
 0x78b   :  { %4736 = shalt.err (!%p4733_p11)
}
 0x78c   :  { %3208 = dma.vmem_to_hbm [thread:$0]  %s3206_s9, 128, %s5460_s18, [#allocation4]  }
 0x78d   :  { %4749 = dma.done.wait [#allocation4], 128  }
 0x78e   :  { %4750 = vsyncadd [#allocation4], 4294967168 }
 0x78f   :  { %3212 = vsyncpa [#allocation3], 1 }
 0x790   :  { %3213 = vsyncpa [#allocation6], 1 }
 0x791   :  { %3214 = vsyncpa [#allocation9], 1 }
 0x792   :  { %3215 = vsyncpa [#allocation12], 1 }
 0x793   :  { %3216 = vsyncpa [#allocation15], 1 }
 0x794   :  { %3217 = vsyncpa [#allocation18], 1 }
 0x795   :  { %3218 = vsyncpa [#allocation4], 1 }

</bundles_post_ra>
